<compile_context>
chip_gen: v6e
topology: v6e:2x2x1
jax: 0.10.0
libtpu: 0.0.40
codegen_flags: <defaults>
</compile_context>

<pallas_src>
import itertools
import functools

import jax
import jax.numpy as jnp
from jax import lax
from jax.experimental import pallas as pl
from jax.experimental.pallas import tpu as pltpu

# ----------------------------- configuration --------------------------------
DIM = 32          # input channels
KEY_DIM = 8
NUM_HEADS = 8
ATTN_RATIO = 2
RES = 7           # resolution (H == W == RES)
TOPK = 12
ALPHA = 0.75
B = 2

N = RES * RES                       # 49 tokens
D = ATTN_RATIO * KEY_DIM            # per-head value dim (16)
DH = D * NUM_HEADS                  # 128
NH_KD = KEY_DIM * NUM_HEADS         # 64
H_TOT = 2 * NH_KD + DH              # concatenated q/k/v channels (256)
SCALE = KEY_DIM ** (-0.5)
N_TOPK_HEADS = int(ALPHA * NUM_HEADS)   # 6 heads get the top-k sparsification


# ------------------------------- fused kernel --------------------------------
def fused_forward_kernel(x_ref, wqkv_ref, bqkv_ref, bias_ref, wdw_ref, bdw_ref,
                         wproj_ref, bproj_ref, o_ref, vpad_ref, acc_ref, *,
                         num_heads, key_dim, d, topk, n_topk_heads, scale, res):
    n = res * res
    dh = num_heads * d
    nh_kd = num_heads * key_dim
    neg = jnp.float32(-1e30)
    pos = jnp.float32(1e30)

    # ---- q / k / v projections (1x1 conv + folded BN): one fused matmul ------
    x = x_ref[0]                                                # (N, DIM)
    qkv = (jnp.dot(x, wqkv_ref[...], preferred_element_type=jnp.float32)
           + bqkv_ref[...])                                     # (N, H_TOT)
    q_all = qkv[:, :nh_kd]                                      # (N, 64)
    k_all = qkv[:, nh_kd:2 * nh_kd]                             # (N, 64)
    v_all = qkv[:, 2 * nh_kd:]                                  # (N, 128) lane-dense

    # ---- per-head attention, heads statically unrolled ------------------------
    for h in range(num_heads):
        q_h = q_all[:, h * key_dim:(h + 1) * key_dim]           # (N, key_dim)
        k_h = k_all[:, h * key_dim:(h + 1) * key_dim]           # (N, key_dim)
        v_h = v_all[:, h * d:(h + 1) * d]                       # (N, d)

        s = lax.dot_general(q_h, k_h, (((1,), (1,)), ((), ())),
                            preferred_element_type=jnp.float32)
        s = s * scale + bias_ref[h]                             # (N, N)

        if h < n_topk_heads and topk < n:
            # Threshold top-k: find the k-th largest value of each row by
            # iteratively peeling maxima (or minima, whichever side is cheaper),
            # then keep everything >= that per-row threshold.
            # TODO(synk): torch.topk breaks exact ties by index; rows with ties
            # straddling the k-th value keep a few extra entries here.
            work = s
            if topk - 1 <= n - topk:
                for _ in range(topk - 1):                       # unrolled (static)
                    m = jnp.max(work, axis=-1, keepdims=True)
                    work = jnp.where(work >= m, neg, work)
                thresh = jnp.max(work, axis=-1, keepdims=True)
            else:
                for _ in range(n - topk):
                    m = jnp.min(work, axis=-1, keepdims=True)
                    work = jnp.where(work <= m, pos, work)
                thresh = jnp.min(work, axis=-1, keepdims=True)
            s = jnp.where(s >= thresh, s, neg)

        m = jnp.max(s, axis=-1, keepdims=True)
        p = jnp.exp(s - m)
        p = p / jnp.sum(p, axis=-1, keepdims=True)
        out_h = jnp.dot(p, v_h, preferred_element_type=jnp.float32)   # (N, d)
        acc_ref[:, h * d:(h + 1) * d] = out_h                   # build (N, 128) slab

    # ---- v_local: depthwise 3x3 conv on v, padded inside VMEM -----------------
    vpad_ref[...] = jnp.zeros_like(vpad_ref)
    for i in range(res):                                        # scatter v rows into
        vpad_ref[1 + i, 1:res + 1, :] = v_all[i * res:(i + 1) * res, :]  # padded image

    acc_img = None
    for di in range(3):
        rows = vpad_ref[di:di + res, :, :]                      # (res, res+2, dh), once
        for dj in range(3):
            tap = rows[:, dj:dj + res, :] * wdw_ref[di * 3 + dj:di * 3 + dj + 1, :]
            acc_img = tap if acc_img is None else acc_img + tap

    for i in range(res):                                        # fuse "+ attn" residual
        acc_ref[i * res:(i + 1) * res, :] = (
            acc_ref[i * res:(i + 1) * res, :] + acc_img[i])

    # ---- residual + folded-BN bias, ReLU, 1x1 projection (+ folded BN) --------
    fused = acc_ref[...] + bdw_ref[...]                         # (N, dh)
    out = (jnp.dot(jnp.maximum(fused, 0.0), wproj_ref[...],
                   preferred_element_type=jnp.float32) + bproj_ref[...])
    o_ref[0] = out                                              # (N, DIM)


def attention4d_knn_pallas(x_tok, params):
    kern = functools.partial(
        fused_forward_kernel,
        num_heads=NUM_HEADS, key_dim=KEY_DIM, d=D, topk=TOPK,
        n_topk_heads=N_TOPK_HEADS, scale=SCALE, res=RES)
    return pl.pallas_call(
        kern,
        out_shape=jax.ShapeDtypeStruct((B, N, DIM), jnp.float32),
        grid=(B,),
        in_specs=[
            pl.BlockSpec((1, N, DIM), lambda b: (b, 0, 0)),
            pl.BlockSpec((DIM, H_TOT), lambda b: (0, 0)),
            pl.BlockSpec((1, H_TOT), lambda b: (0, 0)),
            pl.BlockSpec((NUM_HEADS, N, N), lambda b: (0, 0, 0)),
            pl.BlockSpec((9, DH), lambda b: (0, 0)),
            pl.BlockSpec((1, DH), lambda b: (0, 0)),
            pl.BlockSpec((DH, DIM), lambda b: (0, 0)),
            pl.BlockSpec((1, DIM), lambda b: (0, 0)),
        ],
        out_specs=pl.BlockSpec((1, N, DIM), lambda b: (b, 0, 0)),
        scratch_shapes=[
            pltpu.VMEM((RES + 2, RES + 2, DH), jnp.float32),    # padded v image
            pltpu.VMEM((N, DH), jnp.float32),                   # attn + dwconv slab
        ],
        compiler_params=pltpu.CompilerParams(
            dimension_semantics=("parallel",)),
    )(x_tok, params["w_qkv"], params["b_qkv"], params["bias_table"],
      params["w_dw9"], params["b_dw"], params["w_proj"], params["b_proj"])


# --------------------------- parameter construction -------------------------
def fold_conv_bn(key, cin, cout, eps=1e-5):
    """1x1 Conv(+bias) followed by BatchNorm, folded into (W[cin,cout], b[cout])."""
    kw, kb, kg, kbt, km, kv = jax.random.split(key, 6)
    w = 0.1 * jax.random.normal(kw, (cin, cout), jnp.float32)
    b = 0.05 * jax.random.normal(kb, (cout,), jnp.float32)
    gamma = 1.0 + 0.1 * jax.random.normal(kg, (cout,), jnp.float32)
    beta = 0.05 * jax.random.normal(kbt, (cout,), jnp.float32)
    mean = 0.05 * jax.random.normal(km, (cout,), jnp.float32)
    var = 1.0 + 0.1 * jnp.abs(jax.random.normal(kv, (cout,), jnp.float32))
    s = gamma / jnp.sqrt(var + eps)
    return w * s[None, :], beta + (b - mean) * s


def fold_dwconv_bn(key, c, eps=1e-5):
    """Depthwise 3x3 Conv(+bias) + BN folded into (W9[9, c], b[c])."""
    kw, kb, kg, kbt, km, kv = jax.random.split(key, 6)
    w = 0.1 * jax.random.normal(kw, (9, c), jnp.float32)     # [di*3+dj, channel]
    b = 0.05 * jax.random.normal(kb, (c,), jnp.float32)
    gamma = 1.0 + 0.1 * jax.random.normal(kg, (c,), jnp.float32)
    beta = 0.05 * jax.random.normal(kbt, (c,), jnp.float32)
    mean = 0.05 * jax.random.normal(km, (c,), jnp.float32)
    var = 1.0 + 0.1 * jnp.abs(jax.random.normal(kv, (c,), jnp.float32))
    s = gamma / jnp.sqrt(var + eps)
    return w * s[None, :], beta + (b - mean) * s


def make_attention_bias_table(key):
    """attention_biases[:, attention_bias_idxs] -> (num_heads, N, N)."""
    points = list(itertools.product(range(RES), range(RES)))
    attention_offsets = {}
    idxs = []
    for p1 in points:
        for p2 in points:
            off = (abs(p1[0] - p2[0]), abs(p1[1] - p2[1]))
            if off not in attention_offsets:
                attention_offsets[off] = len(attention_offsets)
            idxs.append(attention_offsets[off])
    idxs = jnp.asarray(idxs, jnp.int32).reshape(N, N)
    ab = 0.02 * jax.random.normal(
        key, (NUM_HEADS, len(attention_offsets)), jnp.float32)
    return ab[:, idxs]                                        # (num_heads, N, N)


def init_params(key):
    kq, kk, kv, kdw, kproj, kab = jax.random.split(key, 6)
    wq, bq = fold_conv_bn(kq, DIM, NH_KD)
    wk, bk = fold_conv_bn(kk, DIM, NH_KD)
    wv, bv = fold_conv_bn(kv, DIM, DH)
    w_dw9, b_dw = fold_dwconv_bn(kdw, DH)
    w_proj, b_proj = fold_conv_bn(kproj, DH, DIM)
    return dict(
        w_qkv=jnp.concatenate([wq, wk, wv], axis=1),          # (DIM, H_TOT)
        b_qkv=jnp.concatenate([bq, bk, bv], axis=0).reshape(1, H_TOT),
        w_dw9=w_dw9, b_dw=b_dw.reshape(1, DH),
        w_proj=w_proj, b_proj=b_proj.reshape(1, DIM),
        bias_table=make_attention_bias_table(kab),            # (num_heads, N, N)
    )


# ------------------------------ forward pass ---------------------------------
@jax.jit
def attention4d_knn_forward(x, params):
    """x: (B, DIM, RES, RES) NCHW  ->  (B, DIM, RES, RES) NCHW."""
    # single layout transform in, single out -- everything else is in-kernel
    x_tok = jnp.transpose(x, (0, 2, 3, 1)).reshape(B, N, DIM)
    out_tok = attention4d_knn_pallas(x_tok, params)            # (B, N, DIM)
    return out_tok.reshape(B, RES, RES, DIM).transpose(0, 3, 1, 2)

# TODO(synk): stride_conv / upsample branch (stride is not None) is not implemented.

# ---------------------------------- main --------------------------------------
if __name__ == "__main__":
    key = jax.random.PRNGKey(0)
    kx, kp = jax.random.split(key)
    x = jax.random.normal(kx, (B, DIM, RES, RES), jnp.float32)   # NCHW like torch
    params = init_params(kp)

    out = attention4d_knn_forward(x, params)
    out = jax.block_until_ready(out)
    assert out.shape == (B, DIM, RES, RES)
    assert bool(jnp.all(jnp.isfinite(out)))
    print("KERNEL_OK")
</pallas_src>

<mosaic_0001>
module attributes {stable_mosaic.version = 11 : i64} {
  func.func @fused_forward_kernel(%arg0: i32, %arg1: memref<1x49x32xf32, #tpu.memory_space<vmem>>, %arg2: memref<32x256xf32, #tpu.memory_space<vmem>>, %arg3: memref<1x256xf32, #tpu.memory_space<vmem>>, %arg4: memref<8x49x49xf32, #tpu.memory_space<vmem>>, %arg5: memref<9x128xf32, #tpu.memory_space<vmem>>, %arg6: memref<1x128xf32, #tpu.memory_space<vmem>>, %arg7: memref<128x32xf32, #tpu.memory_space<vmem>>, %arg8: memref<1x32xf32, #tpu.memory_space<vmem>>, %arg9: memref<1x49x32xf32, #tpu.memory_space<vmem>>, %arg10: memref<9x9x128xf32, #tpu.memory_space<vmem>>, %arg11: memref<49x128xf32, #tpu.memory_space<vmem>>) attributes {dimension_semantics = [#tpu.dimension_semantics<parallel>], iteration_bounds = array<i64: 2>, scalar_prefetch = 0 : i64, scratch_operands = 2 : i64, tpu.core_type = #tpu.core_type<tc>, window_params = [{transform_indices = @transform_0, window_bounds = array<i64: 1, 49, 32>}, {pipeline_mode = #tpu.pipeline_mode<synchronous>, transform_indices = @transform_1, window_bounds = array<i64: 32, 256>}, {pipeline_mode = #tpu.pipeline_mode<synchronous>, transform_indices = @transform_2, window_bounds = array<i64: 1, 256>}, {pipeline_mode = #tpu.pipeline_mode<synchronous>, transform_indices = @transform_3, window_bounds = array<i64: 8, 49, 49>}, {pipeline_mode = #tpu.pipeline_mode<synchronous>, transform_indices = @transform_4, window_bounds = array<i64: 9, 128>}, {pipeline_mode = #tpu.pipeline_mode<synchronous>, transform_indices = @transform_5, window_bounds = array<i64: 1, 128>}, {pipeline_mode = #tpu.pipeline_mode<synchronous>, transform_indices = @transform_6, window_bounds = array<i64: 128, 32>}, {pipeline_mode = #tpu.pipeline_mode<synchronous>, transform_indices = @transform_7, window_bounds = array<i64: 1, 32>}, {transform_indices = @transform_8, window_bounds = array<i64: 1, 49, 32>}]} {
    %c0 = arith.constant 0 : index
    %c0_0 = arith.constant 0 : index
    %c0_1 = arith.constant 0 : index
    %0 = vector.load %arg1[%c0, %c0_0, %c0_1] : memref<1x49x32xf32, #tpu.memory_space<vmem>>, vector<1x49x32xf32>
    %1 = vector.shape_cast %0 : vector<1x49x32xf32> to vector<49x32xf32>
    %c0_2 = arith.constant 0 : index
    %c0_3 = arith.constant 0 : index
    %2 = vector.load %arg2[%c0_2, %c0_3] : memref<32x256xf32, #tpu.memory_space<vmem>>, vector<32x256xf32>
    %cst = arith.constant dense<0.000000e+00> : vector<49x256xf32>
    %3 = tpu.matmul %1, %2, %cst {dimension_numbers = #tpu.dot_dimension_numbers<[1], [0], [0], [1], [0, 0, 1, 1], [], []>} : vector<49x32xf32>, vector<32x256xf32>, vector<49x256xf32> -> vector<49x256xf32>
    %c0_4 = arith.constant 0 : index
    %c0_5 = arith.constant 0 : index
    %4 = vector.load %arg3[%c0_4, %c0_5] : memref<1x256xf32, #tpu.memory_space<vmem>>, vector<1x256xf32>
    %5 = vector.broadcast %4 : vector<1x256xf32> to vector<49x256xf32>
    %6 = arith.addf %3, %5 : vector<49x256xf32>
    %7 = vector.extract_strided_slice %6 {offsets = [0, 0], sizes = [49, 64], strides = [1, 1]} : vector<49x256xf32> to vector<49x64xf32>
    %8 = vector.extract_strided_slice %6 {offsets = [0, 64], sizes = [49, 64], strides = [1, 1]} : vector<49x256xf32> to vector<49x64xf32>
    %9 = vector.extract_strided_slice %6 {offsets = [0, 128], sizes = [49, 128], strides = [1, 1]} : vector<49x256xf32> to vector<49x128xf32>
    %10 = vector.extract_strided_slice %7 {offsets = [0, 0], sizes = [49, 8], strides = [1, 1]} : vector<49x64xf32> to vector<49x8xf32>
    %11 = vector.extract_strided_slice %8 {offsets = [0, 0], sizes = [49, 8], strides = [1, 1]} : vector<49x64xf32> to vector<49x8xf32>
    %12 = vector.extract_strided_slice %9 {offsets = [0, 0], sizes = [49, 16], strides = [1, 1]} : vector<49x128xf32> to vector<49x16xf32>
    %cst_6 = arith.constant dense<0.000000e+00> : vector<49x49xf32>
    %13 = tpu.matmul %10, %11, %cst_6 {dimension_numbers = #tpu.dot_dimension_numbers<[1], [1], [0], [0], [0, 0, 1, 0], [], []>} : vector<49x8xf32>, vector<49x8xf32>, vector<49x49xf32> -> vector<49x49xf32>
    %cst_7 = arith.constant 0.353553385 : f32
    %14 = vector.broadcast %cst_7 : f32 to vector<49x49xf32>
    %15 = arith.mulf %13, %14 : vector<49x49xf32>
    %c0_8 = arith.constant 0 : index
    %c0_9 = arith.constant 0 : index
    %c0_10 = arith.constant 0 : index
    %16 = vector.load %arg4[%c0_8, %c0_9, %c0_10] : memref<8x49x49xf32, #tpu.memory_space<vmem>>, vector<1x49x49xf32>
    %17 = vector.shape_cast %16 : vector<1x49x49xf32> to vector<49x49xf32>
    %18 = arith.addf %15, %17 : vector<49x49xf32>
    %cst_11 = arith.constant dense<0xFF800000> : vector<49xf32>
    %19 = vector.multi_reduction <maximumf>, %18, %cst_11 [1] : vector<49x49xf32> to vector<49xf32>
    %20 = vector.shape_cast %19 : vector<49xf32> to vector<49x1xf32>
    %21 = vector.broadcast %20 : vector<49x1xf32> to vector<49x49xf32>
    %22 = arith.cmpf oge, %18, %21 : vector<49x49xf32>
    %cst_12 = arith.constant -1.000000e+30 : f32
    %23 = vector.broadcast %cst_12 : f32 to vector<49x49xf32>
    %24 = arith.select %22, %23, %18 : vector<49x49xi1>, vector<49x49xf32>
    %cst_13 = arith.constant dense<0xFF800000> : vector<49xf32>
    %25 = vector.multi_reduction <maximumf>, %24, %cst_13 [1] : vector<49x49xf32> to vector<49xf32>
    %26 = vector.shape_cast %25 : vector<49xf32> to vector<49x1xf32>
    %27 = vector.broadcast %26 : vector<49x1xf32> to vector<49x49xf32>
    %28 = arith.cmpf oge, %24, %27 : vector<49x49xf32>
    %cst_14 = arith.constant -1.000000e+30 : f32
    %29 = vector.broadcast %cst_14 : f32 to vector<49x49xf32>
    %30 = arith.select %28, %29, %24 : vector<49x49xi1>, vector<49x49xf32>
    %cst_15 = arith.constant dense<0xFF800000> : vector<49xf32>
    %31 = vector.multi_reduction <maximumf>, %30, %cst_15 [1] : vector<49x49xf32> to vector<49xf32>
    %32 = vector.shape_cast %31 : vector<49xf32> to vector<49x1xf32>
    %33 = vector.broadcast %32 : vector<49x1xf32> to vector<49x49xf32>
    %34 = arith.cmpf oge, %30, %33 : vector<49x49xf32>
    %cst_16 = arith.constant -1.000000e+30 : f32
    %35 = vector.broadcast %cst_16 : f32 to vector<49x49xf32>
    %36 = arith.select %34, %35, %30 : vector<49x49xi1>, vector<49x49xf32>
    %cst_17 = arith.constant dense<0xFF800000> : vector<49xf32>
    %37 = vector.multi_reduction <maximumf>, %36, %cst_17 [1] : vector<49x49xf32> to vector<49xf32>
    %38 = vector.shape_cast %37 : vector<49xf32> to vector<49x1xf32>
    %39 = vector.broadcast %38 : vector<49x1xf32> to vector<49x49xf32>
    %40 = arith.cmpf oge, %36, %39 : vector<49x49xf32>
    %cst_18 = arith.constant -1.000000e+30 : f32
    %41 = vector.broadcast %cst_18 : f32 to vector<49x49xf32>
    %42 = arith.select %40, %41, %36 : vector<49x49xi1>, vector<49x49xf32>
    %cst_19 = arith.constant dense<0xFF800000> : vector<49xf32>
    %43 = vector.multi_reduction <maximumf>, %42, %cst_19 [1] : vector<49x49xf32> to vector<49xf32>
    %44 = vector.shape_cast %43 : vector<49xf32> to vector<49x1xf32>
    %45 = vector.broadcast %44 : vector<49x1xf32> to vector<49x49xf32>
    %46 = arith.cmpf oge, %42, %45 : vector<49x49xf32>
    %cst_20 = arith.constant -1.000000e+30 : f32
    %47 = vector.broadcast %cst_20 : f32 to vector<49x49xf32>
    %48 = arith.select %46, %47, %42 : vector<49x49xi1>, vector<49x49xf32>
    %cst_21 = arith.constant dense<0xFF800000> : vector<49xf32>
    %49 = vector.multi_reduction <maximumf>, %48, %cst_21 [1] : vector<49x49xf32> to vector<49xf32>
    %50 = vector.shape_cast %49 : vector<49xf32> to vector<49x1xf32>
    %51 = vector.broadcast %50 : vector<49x1xf32> to vector<49x49xf32>
    %52 = arith.cmpf oge, %48, %51 : vector<49x49xf32>
    %cst_22 = arith.constant -1.000000e+30 : f32
    %53 = vector.broadcast %cst_22 : f32 to vector<49x49xf32>
    %54 = arith.select %52, %53, %48 : vector<49x49xi1>, vector<49x49xf32>
    %cst_23 = arith.constant dense<0xFF800000> : vector<49xf32>
    %55 = vector.multi_reduction <maximumf>, %54, %cst_23 [1] : vector<49x49xf32> to vector<49xf32>
    %56 = vector.shape_cast %55 : vector<49xf32> to vector<49x1xf32>
    %57 = vector.broadcast %56 : vector<49x1xf32> to vector<49x49xf32>
    %58 = arith.cmpf oge, %54, %57 : vector<49x49xf32>
    %cst_24 = arith.constant -1.000000e+30 : f32
    %59 = vector.broadcast %cst_24 : f32 to vector<49x49xf32>
    %60 = arith.select %58, %59, %54 : vector<49x49xi1>, vector<49x49xf32>
    %cst_25 = arith.constant dense<0xFF800000> : vector<49xf32>
    %61 = vector.multi_reduction <maximumf>, %60, %cst_25 [1] : vector<49x49xf32> to vector<49xf32>
    %62 = vector.shape_cast %61 : vector<49xf32> to vector<49x1xf32>
    %63 = vector.broadcast %62 : vector<49x1xf32> to vector<49x49xf32>
    %64 = arith.cmpf oge, %60, %63 : vector<49x49xf32>
    %cst_26 = arith.constant -1.000000e+30 : f32
    %65 = vector.broadcast %cst_26 : f32 to vector<49x49xf32>
    %66 = arith.select %64, %65, %60 : vector<49x49xi1>, vector<49x49xf32>
    %cst_27 = arith.constant dense<0xFF800000> : vector<49xf32>
    %67 = vector.multi_reduction <maximumf>, %66, %cst_27 [1] : vector<49x49xf32> to vector<49xf32>
    %68 = vector.shape_cast %67 : vector<49xf32> to vector<49x1xf32>
    %69 = vector.broadcast %68 : vector<49x1xf32> to vector<49x49xf32>
    %70 = arith.cmpf oge, %66, %69 : vector<49x49xf32>
    %cst_28 = arith.constant -1.000000e+30 : f32
    %71 = vector.broadcast %cst_28 : f32 to vector<49x49xf32>
    %72 = arith.select %70, %71, %66 : vector<49x49xi1>, vector<49x49xf32>
    %cst_29 = arith.constant dense<0xFF800000> : vector<49xf32>
    %73 = vector.multi_reduction <maximumf>, %72, %cst_29 [1] : vector<49x49xf32> to vector<49xf32>
    %74 = vector.shape_cast %73 : vector<49xf32> to vector<49x1xf32>
    %75 = vector.broadcast %74 : vector<49x1xf32> to vector<49x49xf32>
    %76 = arith.cmpf oge, %72, %75 : vector<49x49xf32>
    %cst_30 = arith.constant -1.000000e+30 : f32
    %77 = vector.broadcast %cst_30 : f32 to vector<49x49xf32>
    %78 = arith.select %76, %77, %72 : vector<49x49xi1>, vector<49x49xf32>
    %cst_31 = arith.constant dense<0xFF800000> : vector<49xf32>
    %79 = vector.multi_reduction <maximumf>, %78, %cst_31 [1] : vector<49x49xf32> to vector<49xf32>
    %80 = vector.shape_cast %79 : vector<49xf32> to vector<49x1xf32>
    %81 = vector.broadcast %80 : vector<49x1xf32> to vector<49x49xf32>
    %82 = arith.cmpf oge, %78, %81 : vector<49x49xf32>
    %cst_32 = arith.constant -1.000000e+30 : f32
    %83 = vector.broadcast %cst_32 : f32 to vector<49x49xf32>
    %84 = arith.select %82, %83, %78 : vector<49x49xi1>, vector<49x49xf32>
    %cst_33 = arith.constant dense<0xFF800000> : vector<49xf32>
    %85 = vector.multi_reduction <maximumf>, %84, %cst_33 [1] : vector<49x49xf32> to vector<49xf32>
    %86 = vector.shape_cast %85 : vector<49xf32> to vector<49x1xf32>
    %87 = vector.broadcast %86 : vector<49x1xf32> to vector<49x49xf32>
    %88 = arith.cmpf oge, %18, %87 : vector<49x49xf32>
    %cst_34 = arith.constant -1.000000e+30 : f32
    %89 = vector.broadcast %cst_34 : f32 to vector<49x49xf32>
    %90 = arith.select %88, %18, %89 : vector<49x49xi1>, vector<49x49xf32>
    %cst_35 = arith.constant dense<0xFF800000> : vector<49xf32>
    %91 = vector.multi_reduction <maximumf>, %90, %cst_35 [1] : vector<49x49xf32> to vector<49xf32>
    %92 = vector.shape_cast %91 : vector<49xf32> to vector<49x1xf32>
    %93 = vector.broadcast %92 : vector<49x1xf32> to vector<49x49xf32>
    %94 = arith.subf %90, %93 : vector<49x49xf32>
    %95 = math.exp %94 : vector<49x49xf32>
    %cst_36 = arith.constant dense<0.000000e+00> : vector<49xf32>
    %96 = vector.multi_reduction <add>, %95, %cst_36 [1] : vector<49x49xf32> to vector<49xf32>
    %97 = vector.shape_cast %96 : vector<49xf32> to vector<49x1xf32>
    %98 = vector.broadcast %97 : vector<49x1xf32> to vector<49x49xf32>
    %99 = arith.divf %95, %98 : vector<49x49xf32>
    %cst_37 = arith.constant dense<0.000000e+00> : vector<49x16xf32>
    %100 = tpu.matmul %99, %12, %cst_37 {dimension_numbers = #tpu.dot_dimension_numbers<[1], [0], [0], [1], [0, 0, 1, 1], [], []>} : vector<49x49xf32>, vector<49x16xf32>, vector<49x16xf32> -> vector<49x16xf32>
    %c0_38 = arith.constant 0 : index
    %c0_39 = arith.constant 0 : index
    %101 = vector.load %arg11[%c0_38, %c0_39] : memref<49x128xf32, #tpu.memory_space<vmem>>, vector<49x16xf32>
    tpu.vector_store %arg11[%c0_38, %c0_39], %100 {strides = array<i32>} : memref<49x128xf32, #tpu.memory_space<vmem>>, vector<49x16xf32>,
    %102 = vector.extract_strided_slice %7 {offsets = [0, 8], sizes = [49, 8], strides = [1, 1]} : vector<49x64xf32> to vector<49x8xf32>
    %103 = vector.extract_strided_slice %8 {offsets = [0, 8], sizes = [49, 8], strides = [1, 1]} : vector<49x64xf32> to vector<49x8xf32>
    %104 = vector.extract_strided_slice %9 {offsets = [0, 16], sizes = [49, 16], strides = [1, 1]} : vector<49x128xf32> to vector<49x16xf32>
    %cst_40 = arith.constant dense<0.000000e+00> : vector<49x49xf32>
    %105 = tpu.matmul %102, %103, %cst_40 {dimension_numbers = #tpu.dot_dimension_numbers<[1], [1], [0], [0], [0, 0, 1, 0], [], []>} : vector<49x8xf32>, vector<49x8xf32>, vector<49x49xf32> -> vector<49x49xf32>
    %cst_41 = arith.constant 0.353553385 : f32
    %106 = vector.broadcast %cst_41 : f32 to vector<49x49xf32>
    %107 = arith.mulf %105, %106 : vector<49x49xf32>
    %c1 = arith.constant 1 : index
    %c0_42 = arith.constant 0 : index
    %c0_43 = arith.constant 0 : index
    %108 = vector.load %arg4[%c1, %c0_42, %c0_43] : memref<8x49x49xf32, #tpu.memory_space<vmem>>, vector<1x49x49xf32>
    %109 = vector.shape_cast %108 : vector<1x49x49xf32> to vector<49x49xf32>
    %110 = arith.addf %107, %109 : vector<49x49xf32>
    %cst_44 = arith.constant dense<0xFF800000> : vector<49xf32>
    %111 = vector.multi_reduction <maximumf>, %110, %cst_44 [1] : vector<49x49xf32> to vector<49xf32>
    %112 = vector.shape_cast %111 : vector<49xf32> to vector<49x1xf32>
    %113 = vector.broadcast %112 : vector<49x1xf32> to vector<49x49xf32>
    %114 = arith.cmpf oge, %110, %113 : vector<49x49xf32>
    %cst_45 = arith.constant -1.000000e+30 : f32
    %115 = vector.broadcast %cst_45 : f32 to vector<49x49xf32>
    %116 = arith.select %114, %115, %110 : vector<49x49xi1>, vector<49x49xf32>
    %cst_46 = arith.constant dense<0xFF800000> : vector<49xf32>
    %117 = vector.multi_reduction <maximumf>, %116, %cst_46 [1] : vector<49x49xf32> to vector<49xf32>
    %118 = vector.shape_cast %117 : vector<49xf32> to vector<49x1xf32>
    %119 = vector.broadcast %118 : vector<49x1xf32> to vector<49x49xf32>
    %120 = arith.cmpf oge, %116, %119 : vector<49x49xf32>
    %cst_47 = arith.constant -1.000000e+30 : f32
    %121 = vector.broadcast %cst_47 : f32 to vector<49x49xf32>
    %122 = arith.select %120, %121, %116 : vector<49x49xi1>, vector<49x49xf32>
    %cst_48 = arith.constant dense<0xFF800000> : vector<49xf32>
    %123 = vector.multi_reduction <maximumf>, %122, %cst_48 [1] : vector<49x49xf32> to vector<49xf32>
    %124 = vector.shape_cast %123 : vector<49xf32> to vector<49x1xf32>
    %125 = vector.broadcast %124 : vector<49x1xf32> to vector<49x49xf32>
    %126 = arith.cmpf oge, %122, %125 : vector<49x49xf32>
    %cst_49 = arith.constant -1.000000e+30 : f32
    %127 = vector.broadcast %cst_49 : f32 to vector<49x49xf32>
    %128 = arith.select %126, %127, %122 : vector<49x49xi1>, vector<49x49xf32>
    %cst_50 = arith.constant dense<0xFF800000> : vector<49xf32>
    %129 = vector.multi_reduction <maximumf>, %128, %cst_50 [1] : vector<49x49xf32> to vector<49xf32>
    %130 = vector.shape_cast %129 : vector<49xf32> to vector<49x1xf32>
    %131 = vector.broadcast %130 : vector<49x1xf32> to vector<49x49xf32>
    %132 = arith.cmpf oge, %128, %131 : vector<49x49xf32>
    %cst_51 = arith.constant -1.000000e+30 : f32
    %133 = vector.broadcast %cst_51 : f32 to vector<49x49xf32>
    %134 = arith.select %132, %133, %128 : vector<49x49xi1>, vector<49x49xf32>
    %cst_52 = arith.constant dense<0xFF800000> : vector<49xf32>
    %135 = vector.multi_reduction <maximumf>, %134, %cst_52 [1] : vector<49x49xf32> to vector<49xf32>
    %136 = vector.shape_cast %135 : vector<49xf32> to vector<49x1xf32>
    %137 = vector.broadcast %136 : vector<49x1xf32> to vector<49x49xf32>
    %138 = arith.cmpf oge, %134, %137 : vector<49x49xf32>
    %cst_53 = arith.constant -1.000000e+30 : f32
    %139 = vector.broadcast %cst_53 : f32 to vector<49x49xf32>
    %140 = arith.select %138, %139, %134 : vector<49x49xi1>, vector<49x49xf32>
    %cst_54 = arith.constant dense<0xFF800000> : vector<49xf32>
    %141 = vector.multi_reduction <maximumf>, %140, %cst_54 [1] : vector<49x49xf32> to vector<49xf32>
    %142 = vector.shape_cast %141 : vector<49xf32> to vector<49x1xf32>
    %143 = vector.broadcast %142 : vector<49x1xf32> to vector<49x49xf32>
    %144 = arith.cmpf oge, %140, %143 : vector<49x49xf32>
    %cst_55 = arith.constant -1.000000e+30 : f32
    %145 = vector.broadcast %cst_55 : f32 to vector<49x49xf32>
    %146 = arith.select %144, %145, %140 : vector<49x49xi1>, vector<49x49xf32>
    %cst_56 = arith.constant dense<0xFF800000> : vector<49xf32>
    %147 = vector.multi_reduction <maximumf>, %146, %cst_56 [1] : vector<49x49xf32> to vector<49xf32>
    %148 = vector.shape_cast %147 : vector<49xf32> to vector<49x1xf32>
    %149 = vector.broadcast %148 : vector<49x1xf32> to vector<49x49xf32>
    %150 = arith.cmpf oge, %146, %149 : vector<49x49xf32>
    %cst_57 = arith.constant -1.000000e+30 : f32
    %151 = vector.broadcast %cst_57 : f32 to vector<49x49xf32>
    %152 = arith.select %150, %151, %146 : vector<49x49xi1>, vector<49x49xf32>
    %cst_58 = arith.constant dense<0xFF800000> : vector<49xf32>
    %153 = vector.multi_reduction <maximumf>, %152, %cst_58 [1] : vector<49x49xf32> to vector<49xf32>
    %154 = vector.shape_cast %153 : vector<49xf32> to vector<49x1xf32>
    %155 = vector.broadcast %154 : vector<49x1xf32> to vector<49x49xf32>
    %156 = arith.cmpf oge, %152, %155 : vector<49x49xf32>
    %cst_59 = arith.constant -1.000000e+30 : f32
    %157 = vector.broadcast %cst_59 : f32 to vector<49x49xf32>
    %158 = arith.select %156, %157, %152 : vector<49x49xi1>, vector<49x49xf32>
    %cst_60 = arith.constant dense<0xFF800000> : vector<49xf32>
    %159 = vector.multi_reduction <maximumf>, %158, %cst_60 [1] : vector<49x49xf32> to vector<49xf32>
    %160 = vector.shape_cast %159 : vector<49xf32> to vector<49x1xf32>
    %161 = vector.broadcast %160 : vector<49x1xf32> to vector<49x49xf32>
    %162 = arith.cmpf oge, %158, %161 : vector<49x49xf32>
    %cst_61 = arith.constant -1.000000e+30 : f32
    %163 = vector.broadcast %cst_61 : f32 to vector<49x49xf32>
    %164 = arith.select %162, %163, %158 : vector<49x49xi1>, vector<49x49xf32>
    %cst_62 = arith.constant dense<0xFF800000> : vector<49xf32>
    %165 = vector.multi_reduction <maximumf>, %164, %cst_62 [1] : vector<49x49xf32> to vector<49xf32>
    %166 = vector.shape_cast %165 : vector<49xf32> to vector<49x1xf32>
    %167 = vector.broadcast %166 : vector<49x1xf32> to vector<49x49xf32>
    %168 = arith.cmpf oge, %164, %167 : vector<49x49xf32>
    %cst_63 = arith.constant -1.000000e+30 : f32
    %169 = vector.broadcast %cst_63 : f32 to vector<49x49xf32>
    %170 = arith.select %168, %169, %164 : vector<49x49xi1>, vector<49x49xf32>
    %cst_64 = arith.constant dense<0xFF800000> : vector<49xf32>
    %171 = vector.multi_reduction <maximumf>, %170, %cst_64 [1] : vector<49x49xf32> to vector<49xf32>
    %172 = vector.shape_cast %171 : vector<49xf32> to vector<49x1xf32>
    %173 = vector.broadcast %172 : vector<49x1xf32> to vector<49x49xf32>
    %174 = arith.cmpf oge, %170, %173 : vector<49x49xf32>
    %cst_65 = arith.constant -1.000000e+30 : f32
    %175 = vector.broadcast %cst_65 : f32 to vector<49x49xf32>
    %176 = arith.select %174, %175, %170 : vector<49x49xi1>, vector<49x49xf32>
    %cst_66 = arith.constant dense<0xFF800000> : vector<49xf32>
    %177 = vector.multi_reduction <maximumf>, %176, %cst_66 [1] : vector<49x49xf32> to vector<49xf32>
    %178 = vector.shape_cast %177 : vector<49xf32> to vector<49x1xf32>
    %179 = vector.broadcast %178 : vector<49x1xf32> to vector<49x49xf32>
    %180 = arith.cmpf oge, %110, %179 : vector<49x49xf32>
    %cst_67 = arith.constant -1.000000e+30 : f32
    %181 = vector.broadcast %cst_67 : f32 to vector<49x49xf32>
    %182 = arith.select %180, %110, %181 : vector<49x49xi1>, vector<49x49xf32>
    %cst_68 = arith.constant dense<0xFF800000> : vector<49xf32>
    %183 = vector.multi_reduction <maximumf>, %182, %cst_68 [1] : vector<49x49xf32> to vector<49xf32>
    %184 = vector.shape_cast %183 : vector<49xf32> to vector<49x1xf32>
    %185 = vector.broadcast %184 : vector<49x1xf32> to vector<49x49xf32>
    %186 = arith.subf %182, %185 : vector<49x49xf32>
    %187 = math.exp %186 : vector<49x49xf32>
    %cst_69 = arith.constant dense<0.000000e+00> : vector<49xf32>
    %188 = vector.multi_reduction <add>, %187, %cst_69 [1] : vector<49x49xf32> to vector<49xf32>
    %189 = vector.shape_cast %188 : vector<49xf32> to vector<49x1xf32>
    %190 = vector.broadcast %189 : vector<49x1xf32> to vector<49x49xf32>
    %191 = arith.divf %187, %190 : vector<49x49xf32>
    %cst_70 = arith.constant dense<0.000000e+00> : vector<49x16xf32>
    %192 = tpu.matmul %191, %104, %cst_70 {dimension_numbers = #tpu.dot_dimension_numbers<[1], [0], [0], [1], [0, 0, 1, 1], [], []>} : vector<49x49xf32>, vector<49x16xf32>, vector<49x16xf32> -> vector<49x16xf32>
    %c0_71 = arith.constant 0 : index
    %c16 = arith.constant 16 : index
    %193 = vector.load %arg11[%c0_71, %c16] : memref<49x128xf32, #tpu.memory_space<vmem>>, vector<49x16xf32>
    tpu.vector_store %arg11[%c0_71, %c16], %192 {strides = array<i32>} : memref<49x128xf32, #tpu.memory_space<vmem>>, vector<49x16xf32>,
    %194 = vector.extract_strided_slice %7 {offsets = [0, 16], sizes = [49, 8], strides = [1, 1]} : vector<49x64xf32> to vector<49x8xf32>
    %195 = vector.extract_strided_slice %8 {offsets = [0, 16], sizes = [49, 8], strides = [1, 1]} : vector<49x64xf32> to vector<49x8xf32>
    %196 = vector.extract_strided_slice %9 {offsets = [0, 32], sizes = [49, 16], strides = [1, 1]} : vector<49x128xf32> to vector<49x16xf32>
    %cst_72 = arith.constant dense<0.000000e+00> : vector<49x49xf32>
    %197 = tpu.matmul %194, %195, %cst_72 {dimension_numbers = #tpu.dot_dimension_numbers<[1], [1], [0], [0], [0, 0, 1, 0], [], []>} : vector<49x8xf32>, vector<49x8xf32>, vector<49x49xf32> -> vector<49x49xf32>
    %cst_73 = arith.constant 0.353553385 : f32
    %198 = vector.broadcast %cst_73 : f32 to vector<49x49xf32>
    %199 = arith.mulf %197, %198 : vector<49x49xf32>
    %c2 = arith.constant 2 : index
    %c0_74 = arith.constant 0 : index
    %c0_75 = arith.constant 0 : index
    %200 = vector.load %arg4[%c2, %c0_74, %c0_75] : memref<8x49x49xf32, #tpu.memory_space<vmem>>, vector<1x49x49xf32>
    %201 = vector.shape_cast %200 : vector<1x49x49xf32> to vector<49x49xf32>
    %202 = arith.addf %199, %201 : vector<49x49xf32>
    %cst_76 = arith.constant dense<0xFF800000> : vector<49xf32>
    %203 = vector.multi_reduction <maximumf>, %202, %cst_76 [1] : vector<49x49xf32> to vector<49xf32>
    %204 = vector.shape_cast %203 : vector<49xf32> to vector<49x1xf32>
    %205 = vector.broadcast %204 : vector<49x1xf32> to vector<49x49xf32>
    %206 = arith.cmpf oge, %202, %205 : vector<49x49xf32>
    %cst_77 = arith.constant -1.000000e+30 : f32
    %207 = vector.broadcast %cst_77 : f32 to vector<49x49xf32>
    %208 = arith.select %206, %207, %202 : vector<49x49xi1>, vector<49x49xf32>
    %cst_78 = arith.constant dense<0xFF800000> : vector<49xf32>
    %209 = vector.multi_reduction <maximumf>, %208, %cst_78 [1] : vector<49x49xf32> to vector<49xf32>
    %210 = vector.shape_cast %209 : vector<49xf32> to vector<49x1xf32>
    %211 = vector.broadcast %210 : vector<49x1xf32> to vector<49x49xf32>
    %212 = arith.cmpf oge, %208, %211 : vector<49x49xf32>
    %cst_79 = arith.constant -1.000000e+30 : f32
    %213 = vector.broadcast %cst_79 : f32 to vector<49x49xf32>
    %214 = arith.select %212, %213, %208 : vector<49x49xi1>, vector<49x49xf32>
    %cst_80 = arith.constant dense<0xFF800000> : vector<49xf32>
    %215 = vector.multi_reduction <maximumf>, %214, %cst_80 [1] : vector<49x49xf32> to vector<49xf32>
    %216 = vector.shape_cast %215 : vector<49xf32> to vector<49x1xf32>
    %217 = vector.broadcast %216 : vector<49x1xf32> to vector<49x49xf32>
    %218 = arith.cmpf oge, %214, %217 : vector<49x49xf32>
    %cst_81 = arith.constant -1.000000e+30 : f32
    %219 = vector.broadcast %cst_81 : f32 to vector<49x49xf32>
    %220 = arith.select %218, %219, %214 : vector<49x49xi1>, vector<49x49xf32>
    %cst_82 = arith.constant dense<0xFF800000> : vector<49xf32>
    %221 = vector.multi_reduction <maximumf>, %220, %cst_82 [1] : vector<49x49xf32> to vector<49xf32>
    %222 = vector.shape_cast %221 : vector<49xf32> to vector<49x1xf32>
    %223 = vector.broadcast %222 : vector<49x1xf32> to vector<49x49xf32>
    %224 = arith.cmpf oge, %220, %223 : vector<49x49xf32>
    %cst_83 = arith.constant -1.000000e+30 : f32
    %225 = vector.broadcast %cst_83 : f32 to vector<49x49xf32>
    %226 = arith.select %224, %225, %220 : vector<49x49xi1>, vector<49x49xf32>
    %cst_84 = arith.constant dense<0xFF800000> : vector<49xf32>
    %227 = vector.multi_reduction <maximumf>, %226, %cst_84 [1] : vector<49x49xf32> to vector<49xf32>
    %228 = vector.shape_cast %227 : vector<49xf32> to vector<49x1xf32>
    %229 = vector.broadcast %228 : vector<49x1xf32> to vector<49x49xf32>
    %230 = arith.cmpf oge, %226, %229 : vector<49x49xf32>
    %cst_85 = arith.constant -1.000000e+30 : f32
    %231 = vector.broadcast %cst_85 : f32 to vector<49x49xf32>
    %232 = arith.select %230, %231, %226 : vector<49x49xi1>, vector<49x49xf32>
    %cst_86 = arith.constant dense<0xFF800000> : vector<49xf32>
    %233 = vector.multi_reduction <maximumf>, %232, %cst_86 [1] : vector<49x49xf32> to vector<49xf32>
    %234 = vector.shape_cast %233 : vector<49xf32> to vector<49x1xf32>
    %235 = vector.broadcast %234 : vector<49x1xf32> to vector<49x49xf32>
    %236 = arith.cmpf oge, %232, %235 : vector<49x49xf32>
    %cst_87 = arith.constant -1.000000e+30 : f32
    %237 = vector.broadcast %cst_87 : f32 to vector<49x49xf32>
    %238 = arith.select %236, %237, %232 : vector<49x49xi1>, vector<49x49xf32>
    %cst_88 = arith.constant dense<0xFF800000> : vector<49xf32>
    %239 = vector.multi_reduction <maximumf>, %238, %cst_88 [1] : vector<49x49xf32> to vector<49xf32>
    %240 = vector.shape_cast %239 : vector<49xf32> to vector<49x1xf32>
    %241 = vector.broadcast %240 : vector<49x1xf32> to vector<49x49xf32>
    %242 = arith.cmpf oge, %238, %241 : vector<49x49xf32>
    %cst_89 = arith.constant -1.000000e+30 : f32
    %243 = vector.broadcast %cst_89 : f32 to vector<49x49xf32>
    %244 = arith.select %242, %243, %238 : vector<49x49xi1>, vector<49x49xf32>
    %cst_90 = arith.constant dense<0xFF800000> : vector<49xf32>
    %245 = vector.multi_reduction <maximumf>, %244, %cst_90 [1] : vector<49x49xf32> to vector<49xf32>
    %246 = vector.shape_cast %245 : vector<49xf32> to vector<49x1xf32>
    %247 = vector.broadcast %246 : vector<49x1xf32> to vector<49x49xf32>
    %248 = arith.cmpf oge, %244, %247 : vector<49x49xf32>
    %cst_91 = arith.constant -1.000000e+30 : f32
    %249 = vector.broadcast %cst_91 : f32 to vector<49x49xf32>
    %250 = arith.select %248, %249, %244 : vector<49x49xi1>, vector<49x49xf32>
    %cst_92 = arith.constant dense<0xFF800000> : vector<49xf32>
    %251 = vector.multi_reduction <maximumf>, %250, %cst_92 [1] : vector<49x49xf32> to vector<49xf32>
    %252 = vector.shape_cast %251 : vector<49xf32> to vector<49x1xf32>
    %253 = vector.broadcast %252 : vector<49x1xf32> to vector<49x49xf32>
    %254 = arith.cmpf oge, %250, %253 : vector<49x49xf32>
    %cst_93 = arith.constant -1.000000e+30 : f32
    %255 = vector.broadcast %cst_93 : f32 to vector<49x49xf32>
    %256 = arith.select %254, %255, %250 : vector<49x49xi1>, vector<49x49xf32>
    %cst_94 = arith.constant dense<0xFF800000> : vector<49xf32>
    %257 = vector.multi_reduction <maximumf>, %256, %cst_94 [1] : vector<49x49xf32> to vector<49xf32>
    %258 = vector.shape_cast %257 : vector<49xf32> to vector<49x1xf32>
    %259 = vector.broadcast %258 : vector<49x1xf32> to vector<49x49xf32>
    %260 = arith.cmpf oge, %256, %259 : vector<49x49xf32>
    %cst_95 = arith.constant -1.000000e+30 : f32
    %261 = vector.broadcast %cst_95 : f32 to vector<49x49xf32>
    %262 = arith.select %260, %261, %256 : vector<49x49xi1>, vector<49x49xf32>
    %cst_96 = arith.constant dense<0xFF800000> : vector<49xf32>
    %263 = vector.multi_reduction <maximumf>, %262, %cst_96 [1] : vector<49x49xf32> to vector<49xf32>
    %264 = vector.shape_cast %263 : vector<49xf32> to vector<49x1xf32>
    %265 = vector.broadcast %264 : vector<49x1xf32> to vector<49x49xf32>
    %266 = arith.cmpf oge, %262, %265 : vector<49x49xf32>
    %cst_97 = arith.constant -1.000000e+30 : f32
    %267 = vector.broadcast %cst_97 : f32 to vector<49x49xf32>
    %268 = arith.select %266, %267, %262 : vector<49x49xi1>, vector<49x49xf32>
    %cst_98 = arith.constant dense<0xFF800000> : vector<49xf32>
    %269 = vector.multi_reduction <maximumf>, %268, %cst_98 [1] : vector<49x49xf32> to vector<49xf32>
    %270 = vector.shape_cast %269 : vector<49xf32> to vector<49x1xf32>
    %271 = vector.broadcast %270 : vector<49x1xf32> to vector<49x49xf32>
    %272 = arith.cmpf oge, %202, %271 : vector<49x49xf32>
    %cst_99 = arith.constant -1.000000e+30 : f32
    %273 = vector.broadcast %cst_99 : f32 to vector<49x49xf32>
    %274 = arith.select %272, %202, %273 : vector<49x49xi1>, vector<49x49xf32>
    %cst_100 = arith.constant dense<0xFF800000> : vector<49xf32>
    %275 = vector.multi_reduction <maximumf>, %274, %cst_100 [1] : vector<49x49xf32> to vector<49xf32>
    %276 = vector.shape_cast %275 : vector<49xf32> to vector<49x1xf32>
    %277 = vector.broadcast %276 : vector<49x1xf32> to vector<49x49xf32>
    %278 = arith.subf %274, %277 : vector<49x49xf32>
    %279 = math.exp %278 : vector<49x49xf32>
    %cst_101 = arith.constant dense<0.000000e+00> : vector<49xf32>
    %280 = vector.multi_reduction <add>, %279, %cst_101 [1] : vector<49x49xf32> to vector<49xf32>
    %281 = vector.shape_cast %280 : vector<49xf32> to vector<49x1xf32>
    %282 = vector.broadcast %281 : vector<49x1xf32> to vector<49x49xf32>
    %283 = arith.divf %279, %282 : vector<49x49xf32>
    %cst_102 = arith.constant dense<0.000000e+00> : vector<49x16xf32>
    %284 = tpu.matmul %283, %196, %cst_102 {dimension_numbers = #tpu.dot_dimension_numbers<[1], [0], [0], [1], [0, 0, 1, 1], [], []>} : vector<49x49xf32>, vector<49x16xf32>, vector<49x16xf32> -> vector<49x16xf32>
    %c0_103 = arith.constant 0 : index
    %c32 = arith.constant 32 : index
    %285 = vector.load %arg11[%c0_103, %c32] : memref<49x128xf32, #tpu.memory_space<vmem>>, vector<49x16xf32>
    tpu.vector_store %arg11[%c0_103, %c32], %284 {strides = array<i32>} : memref<49x128xf32, #tpu.memory_space<vmem>>, vector<49x16xf32>,
    %286 = vector.extract_strided_slice %7 {offsets = [0, 24], sizes = [49, 8], strides = [1, 1]} : vector<49x64xf32> to vector<49x8xf32>
    %287 = vector.extract_strided_slice %8 {offsets = [0, 24], sizes = [49, 8], strides = [1, 1]} : vector<49x64xf32> to vector<49x8xf32>
    %288 = vector.extract_strided_slice %9 {offsets = [0, 48], sizes = [49, 16], strides = [1, 1]} : vector<49x128xf32> to vector<49x16xf32>
    %cst_104 = arith.constant dense<0.000000e+00> : vector<49x49xf32>
    %289 = tpu.matmul %286, %287, %cst_104 {dimension_numbers = #tpu.dot_dimension_numbers<[1], [1], [0], [0], [0, 0, 1, 0], [], []>} : vector<49x8xf32>, vector<49x8xf32>, vector<49x49xf32> -> vector<49x49xf32>
    %cst_105 = arith.constant 0.353553385 : f32
    %290 = vector.broadcast %cst_105 : f32 to vector<49x49xf32>
    %291 = arith.mulf %289, %290 : vector<49x49xf32>
    %c3 = arith.constant 3 : index
    %c0_106 = arith.constant 0 : index
    %c0_107 = arith.constant 0 : index
    %292 = vector.load %arg4[%c3, %c0_106, %c0_107] : memref<8x49x49xf32, #tpu.memory_space<vmem>>, vector<1x49x49xf32>
    %293 = vector.shape_cast %292 : vector<1x49x49xf32> to vector<49x49xf32>
    %294 = arith.addf %291, %293 : vector<49x49xf32>
    %cst_108 = arith.constant dense<0xFF800000> : vector<49xf32>
    %295 = vector.multi_reduction <maximumf>, %294, %cst_108 [1] : vector<49x49xf32> to vector<49xf32>
    %296 = vector.shape_cast %295 : vector<49xf32> to vector<49x1xf32>
    %297 = vector.broadcast %296 : vector<49x1xf32> to vector<49x49xf32>
    %298 = arith.cmpf oge, %294, %297 : vector<49x49xf32>
    %cst_109 = arith.constant -1.000000e+30 : f32
    %299 = vector.broadcast %cst_109 : f32 to vector<49x49xf32>
    %300 = arith.select %298, %299, %294 : vector<49x49xi1>, vector<49x49xf32>
    %cst_110 = arith.constant dense<0xFF800000> : vector<49xf32>
    %301 = vector.multi_reduction <maximumf>, %300, %cst_110 [1] : vector<49x49xf32> to vector<49xf32>
    %302 = vector.shape_cast %301 : vector<49xf32> to vector<49x1xf32>
    %303 = vector.broadcast %302 : vector<49x1xf32> to vector<49x49xf32>
    %304 = arith.cmpf oge, %300, %303 : vector<49x49xf32>
    %cst_111 = arith.constant -1.000000e+30 : f32
    %305 = vector.broadcast %cst_111 : f32 to vector<49x49xf32>
    %306 = arith.select %304, %305, %300 : vector<49x49xi1>, vector<49x49xf32>
    %cst_112 = arith.constant dense<0xFF800000> : vector<49xf32>
    %307 = vector.multi_reduction <maximumf>, %306, %cst_112 [1] : vector<49x49xf32> to vector<49xf32>
    %308 = vector.shape_cast %307 : vector<49xf32> to vector<49x1xf32>
    %309 = vector.broadcast %308 : vector<49x1xf32> to vector<49x49xf32>
    %310 = arith.cmpf oge, %306, %309 : vector<49x49xf32>
    %cst_113 = arith.constant -1.000000e+30 : f32
    %311 = vector.broadcast %cst_113 : f32 to vector<49x49xf32>
    %312 = arith.select %310, %311, %306 : vector<49x49xi1>, vector<49x49xf32>
    %cst_114 = arith.constant dense<0xFF800000> : vector<49xf32>
    %313 = vector.multi_reduction <maximumf>, %312, %cst_114 [1] : vector<49x49xf32> to vector<49xf32>
    %314 = vector.shape_cast %313 : vector<49xf32> to vector<49x1xf32>
    %315 = vector.broadcast %314 : vector<49x1xf32> to vector<49x49xf32>
    %316 = arith.cmpf oge, %312, %315 : vector<49x49xf32>
    %cst_115 = arith.constant -1.000000e+30 : f32
    %317 = vector.broadcast %cst_115 : f32 to vector<49x49xf32>
    %318 = arith.select %316, %317, %312 : vector<49x49xi1>, vector<49x49xf32>
    %cst_116 = arith.constant dense<0xFF800000> : vector<49xf32>
    %319 = vector.multi_reduction <maximumf>, %318, %cst_116 [1] : vector<49x49xf32> to vector<49xf32>
    %320 = vector.shape_cast %319 : vector<49xf32> to vector<49x1xf32>
    %321 = vector.broadcast %320 : vector<49x1xf32> to vector<49x49xf32>
    %322 = arith.cmpf oge, %318, %321 : vector<49x49xf32>
    %cst_117 = arith.constant -1.000000e+30 : f32
    %323 = vector.broadcast %cst_117 : f32 to vector<49x49xf32>
    %324 = arith.select %322, %323, %318 : vector<49x49xi1>, vector<49x49xf32>
    %cst_118 = arith.constant dense<0xFF800000> : vector<49xf32>
    %325 = vector.multi_reduction <maximumf>, %324, %cst_118 [1] : vector<49x49xf32> to vector<49xf32>
    %326 = vector.shape_cast %325 : vector<49xf32> to vector<49x1xf32>
    %327 = vector.broadcast %326 : vector<49x1xf32> to vector<49x49xf32>
    %328 = arith.cmpf oge, %324, %327 : vector<49x49xf32>
    %cst_119 = arith.constant -1.000000e+30 : f32
    %329 = vector.broadcast %cst_119 : f32 to vector<49x49xf32>
    %330 = arith.select %328, %329, %324 : vector<49x49xi1>, vector<49x49xf32>
    %cst_120 = arith.constant dense<0xFF800000> : vector<49xf32>
    %331 = vector.multi_reduction <maximumf>, %330, %cst_120 [1] : vector<49x49xf32> to vector<49xf32>
    %332 = vector.shape_cast %331 : vector<49xf32> to vector<49x1xf32>
    %333 = vector.broadcast %332 : vector<49x1xf32> to vector<49x49xf32>
    %334 = arith.cmpf oge, %330, %333 : vector<49x49xf32>
    %cst_121 = arith.constant -1.000000e+30 : f32
    %335 = vector.broadcast %cst_121 : f32 to vector<49x49xf32>
    %336 = arith.select %334, %335, %330 : vector<49x49xi1>, vector<49x49xf32>
    %cst_122 = arith.constant dense<0xFF800000> : vector<49xf32>
    %337 = vector.multi_reduction <maximumf>, %336, %cst_122 [1] : vector<49x49xf32> to vector<49xf32>
    %338 = vector.shape_cast %337 : vector<49xf32> to vector<49x1xf32>
    %339 = vector.broadcast %338 : vector<49x1xf32> to vector<49x49xf32>
    %340 = arith.cmpf oge, %336, %339 : vector<49x49xf32>
    %cst_123 = arith.constant -1.000000e+30 : f32
    %341 = vector.broadcast %cst_123 : f32 to vector<49x49xf32>
    %342 = arith.select %340, %341, %336 : vector<49x49xi1>, vector<49x49xf32>
    %cst_124 = arith.constant dense<0xFF800000> : vector<49xf32>
    %343 = vector.multi_reduction <maximumf>, %342, %cst_124 [1] : vector<49x49xf32> to vector<49xf32>
    %344 = vector.shape_cast %343 : vector<49xf32> to vector<49x1xf32>
    %345 = vector.broadcast %344 : vector<49x1xf32> to vector<49x49xf32>
    %346 = arith.cmpf oge, %342, %345 : vector<49x49xf32>
    %cst_125 = arith.constant -1.000000e+30 : f32
    %347 = vector.broadcast %cst_125 : f32 to vector<49x49xf32>
    %348 = arith.select %346, %347, %342 : vector<49x49xi1>, vector<49x49xf32>
    %cst_126 = arith.constant dense<0xFF800000> : vector<49xf32>
    %349 = vector.multi_reduction <maximumf>, %348, %cst_126 [1] : vector<49x49xf32> to vector<49xf32>
    %350 = vector.shape_cast %349 : vector<49xf32> to vector<49x1xf32>
    %351 = vector.broadcast %350 : vector<49x1xf32> to vector<49x49xf32>
    %352 = arith.cmpf oge, %348, %351 : vector<49x49xf32>
    %cst_127 = arith.constant -1.000000e+30 : f32
    %353 = vector.broadcast %cst_127 : f32 to vector<49x49xf32>
    %354 = arith.select %352, %353, %348 : vector<49x49xi1>, vector<49x49xf32>
    %cst_128 = arith.constant dense<0xFF800000> : vector<49xf32>
    %355 = vector.multi_reduction <maximumf>, %354, %cst_128 [1] : vector<49x49xf32> to vector<49xf32>
    %356 = vector.shape_cast %355 : vector<49xf32> to vector<49x1xf32>
    %357 = vector.broadcast %356 : vector<49x1xf32> to vector<49x49xf32>
    %358 = arith.cmpf oge, %354, %357 : vector<49x49xf32>
    %cst_129 = arith.constant -1.000000e+30 : f32
    %359 = vector.broadcast %cst_129 : f32 to vector<49x49xf32>
    %360 = arith.select %358, %359, %354 : vector<49x49xi1>, vector<49x49xf32>
    %cst_130 = arith.constant dense<0xFF800000> : vector<49xf32>
    %361 = vector.multi_reduction <maximumf>, %360, %cst_130 [1] : vector<49x49xf32> to vector<49xf32>
    %362 = vector.shape_cast %361 : vector<49xf32> to vector<49x1xf32>
    %363 = vector.broadcast %362 : vector<49x1xf32> to vector<49x49xf32>
    %364 = arith.cmpf oge, %294, %363 : vector<49x49xf32>
    %cst_131 = arith.constant -1.000000e+30 : f32
    %365 = vector.broadcast %cst_131 : f32 to vector<49x49xf32>
    %366 = arith.select %364, %294, %365 : vector<49x49xi1>, vector<49x49xf32>
    %cst_132 = arith.constant dense<0xFF800000> : vector<49xf32>
    %367 = vector.multi_reduction <maximumf>, %366, %cst_132 [1] : vector<49x49xf32> to vector<49xf32>
    %368 = vector.shape_cast %367 : vector<49xf32> to vector<49x1xf32>
    %369 = vector.broadcast %368 : vector<49x1xf32> to vector<49x49xf32>
    %370 = arith.subf %366, %369 : vector<49x49xf32>
    %371 = math.exp %370 : vector<49x49xf32>
    %cst_133 = arith.constant dense<0.000000e+00> : vector<49xf32>
    %372 = vector.multi_reduction <add>, %371, %cst_133 [1] : vector<49x49xf32> to vector<49xf32>
    %373 = vector.shape_cast %372 : vector<49xf32> to vector<49x1xf32>
    %374 = vector.broadcast %373 : vector<49x1xf32> to vector<49x49xf32>
    %375 = arith.divf %371, %374 : vector<49x49xf32>
    %cst_134 = arith.constant dense<0.000000e+00> : vector<49x16xf32>
    %376 = tpu.matmul %375, %288, %cst_134 {dimension_numbers = #tpu.dot_dimension_numbers<[1], [0], [0], [1], [0, 0, 1, 1], [], []>} : vector<49x49xf32>, vector<49x16xf32>, vector<49x16xf32> -> vector<49x16xf32>
    %c0_135 = arith.constant 0 : index
    %c48 = arith.constant 48 : index
    %377 = vector.load %arg11[%c0_135, %c48] : memref<49x128xf32, #tpu.memory_space<vmem>>, vector<49x16xf32>
    tpu.vector_store %arg11[%c0_135, %c48], %376 {strides = array<i32>} : memref<49x128xf32, #tpu.memory_space<vmem>>, vector<49x16xf32>,
    %378 = vector.extract_strided_slice %7 {offsets = [0, 32], sizes = [49, 8], strides = [1, 1]} : vector<49x64xf32> to vector<49x8xf32>
    %379 = vector.extract_strided_slice %8 {offsets = [0, 32], sizes = [49, 8], strides = [1, 1]} : vector<49x64xf32> to vector<49x8xf32>
    %380 = vector.extract_strided_slice %9 {offsets = [0, 64], sizes = [49, 16], strides = [1, 1]} : vector<49x128xf32> to vector<49x16xf32>
    %cst_136 = arith.constant dense<0.000000e+00> : vector<49x49xf32>
    %381 = tpu.matmul %378, %379, %cst_136 {dimension_numbers = #tpu.dot_dimension_numbers<[1], [1], [0], [0], [0, 0, 1, 0], [], []>} : vector<49x8xf32>, vector<49x8xf32>, vector<49x49xf32> -> vector<49x49xf32>
    %cst_137 = arith.constant 0.353553385 : f32
    %382 = vector.broadcast %cst_137 : f32 to vector<49x49xf32>
    %383 = arith.mulf %381, %382 : vector<49x49xf32>
    %c4 = arith.constant 4 : index
    %c0_138 = arith.constant 0 : index
    %c0_139 = arith.constant 0 : index
    %384 = vector.load %arg4[%c4, %c0_138, %c0_139] : memref<8x49x49xf32, #tpu.memory_space<vmem>>, vector<1x49x49xf32>
    %385 = vector.shape_cast %384 : vector<1x49x49xf32> to vector<49x49xf32>
    %386 = arith.addf %383, %385 : vector<49x49xf32>
    %cst_140 = arith.constant dense<0xFF800000> : vector<49xf32>
    %387 = vector.multi_reduction <maximumf>, %386, %cst_140 [1] : vector<49x49xf32> to vector<49xf32>
    %388 = vector.shape_cast %387 : vector<49xf32> to vector<49x1xf32>
    %389 = vector.broadcast %388 : vector<49x1xf32> to vector<49x49xf32>
    %390 = arith.cmpf oge, %386, %389 : vector<49x49xf32>
    %cst_141 = arith.constant -1.000000e+30 : f32
    %391 = vector.broadcast %cst_141 : f32 to vector<49x49xf32>
    %392 = arith.select %390, %391, %386 : vector<49x49xi1>, vector<49x49xf32>
    %cst_142 = arith.constant dense<0xFF800000> : vector<49xf32>
    %393 = vector.multi_reduction <maximumf>, %392, %cst_142 [1] : vector<49x49xf32> to vector<49xf32>
    %394 = vector.shape_cast %393 : vector<49xf32> to vector<49x1xf32>
    %395 = vector.broadcast %394 : vector<49x1xf32> to vector<49x49xf32>
    %396 = arith.cmpf oge, %392, %395 : vector<49x49xf32>
    %cst_143 = arith.constant -1.000000e+30 : f32
    %397 = vector.broadcast %cst_143 : f32 to vector<49x49xf32>
    %398 = arith.select %396, %397, %392 : vector<49x49xi1>, vector<49x49xf32>
    %cst_144 = arith.constant dense<0xFF800000> : vector<49xf32>
    %399 = vector.multi_reduction <maximumf>, %398, %cst_144 [1] : vector<49x49xf32> to vector<49xf32>
    %400 = vector.shape_cast %399 : vector<49xf32> to vector<49x1xf32>
    %401 = vector.broadcast %400 : vector<49x1xf32> to vector<49x49xf32>
    %402 = arith.cmpf oge, %398, %401 : vector<49x49xf32>
    %cst_145 = arith.constant -1.000000e+30 : f32
    %403 = vector.broadcast %cst_145 : f32 to vector<49x49xf32>
    %404 = arith.select %402, %403, %398 : vector<49x49xi1>, vector<49x49xf32>
    %cst_146 = arith.constant dense<0xFF800000> : vector<49xf32>
    %405 = vector.multi_reduction <maximumf>, %404, %cst_146 [1] : vector<49x49xf32> to vector<49xf32>
    %406 = vector.shape_cast %405 : vector<49xf32> to vector<49x1xf32>
    %407 = vector.broadcast %406 : vector<49x1xf32> to vector<49x49xf32>
    %408 = arith.cmpf oge, %404, %407 : vector<49x49xf32>
    %cst_147 = arith.constant -1.000000e+30 : f32
    %409 = vector.broadcast %cst_147 : f32 to vector<49x49xf32>
    %410 = arith.select %408, %409, %404 : vector<49x49xi1>, vector<49x49xf32>
    %cst_148 = arith.constant dense<0xFF800000> : vector<49xf32>
    %411 = vector.multi_reduction <maximumf>, %410, %cst_148 [1] : vector<49x49xf32> to vector<49xf32>
    %412 = vector.shape_cast %411 : vector<49xf32> to vector<49x1xf32>
    %413 = vector.broadcast %412 : vector<49x1xf32> to vector<49x49xf32>
    %414 = arith.cmpf oge, %410, %413 : vector<49x49xf32>
    %cst_149 = arith.constant -1.000000e+30 : f32
    %415 = vector.broadcast %cst_149 : f32 to vector<49x49xf32>
    %416 = arith.select %414, %415, %410 : vector<49x49xi1>, vector<49x49xf32>
    %cst_150 = arith.constant dense<0xFF800000> : vector<49xf32>
    %417 = vector.multi_reduction <maximumf>, %416, %cst_150 [1] : vector<49x49xf32> to vector<49xf32>
    %418 = vector.shape_cast %417 : vector<49xf32> to vector<49x1xf32>
    %419 = vector.broadcast %418 : vector<49x1xf32> to vector<49x49xf32>
    %420 = arith.cmpf oge, %416, %419 : vector<49x49xf32>
    %cst_151 = arith.constant -1.000000e+30 : f32
    %421 = vector.broadcast %cst_151 : f32 to vector<49x49xf32>
    %422 = arith.select %420, %421, %416 : vector<49x49xi1>, vector<49x49xf32>
    %cst_152 = arith.constant dense<0xFF800000> : vector<49xf32>
    %423 = vector.multi_reduction <maximumf>, %422, %cst_152 [1] : vector<49x49xf32> to vector<49xf32>
    %424 = vector.shape_cast %423 : vector<49xf32> to vector<49x1xf32>
    %425 = vector.broadcast %424 : vector<49x1xf32> to vector<49x49xf32>
    %426 = arith.cmpf oge, %422, %425 : vector<49x49xf32>
    %cst_153 = arith.constant -1.000000e+30 : f32
    %427 = vector.broadcast %cst_153 : f32 to vector<49x49xf32>
    %428 = arith.select %426, %427, %422 : vector<49x49xi1>, vector<49x49xf32>
    %cst_154 = arith.constant dense<0xFF800000> : vector<49xf32>
    %429 = vector.multi_reduction <maximumf>, %428, %cst_154 [1] : vector<49x49xf32> to vector<49xf32>
    %430 = vector.shape_cast %429 : vector<49xf32> to vector<49x1xf32>
    %431 = vector.broadcast %430 : vector<49x1xf32> to vector<49x49xf32>
    %432 = arith.cmpf oge, %428, %431 : vector<49x49xf32>
    %cst_155 = arith.constant -1.000000e+30 : f32
    %433 = vector.broadcast %cst_155 : f32 to vector<49x49xf32>
    %434 = arith.select %432, %433, %428 : vector<49x49xi1>, vector<49x49xf32>
    %cst_156 = arith.constant dense<0xFF800000> : vector<49xf32>
    %435 = vector.multi_reduction <maximumf>, %434, %cst_156 [1] : vector<49x49xf32> to vector<49xf32>
    %436 = vector.shape_cast %435 : vector<49xf32> to vector<49x1xf32>
    %437 = vector.broadcast %436 : vector<49x1xf32> to vector<49x49xf32>
    %438 = arith.cmpf oge, %434, %437 : vector<49x49xf32>
    %cst_157 = arith.constant -1.000000e+30 : f32
    %439 = vector.broadcast %cst_157 : f32 to vector<49x49xf32>
    %440 = arith.select %438, %439, %434 : vector<49x49xi1>, vector<49x49xf32>
    %cst_158 = arith.constant dense<0xFF800000> : vector<49xf32>
    %441 = vector.multi_reduction <maximumf>, %440, %cst_158 [1] : vector<49x49xf32> to vector<49xf32>
    %442 = vector.shape_cast %441 : vector<49xf32> to vector<49x1xf32>
    %443 = vector.broadcast %442 : vector<49x1xf32> to vector<49x49xf32>
    %444 = arith.cmpf oge, %440, %443 : vector<49x49xf32>
    %cst_159 = arith.constant -1.000000e+30 : f32
    %445 = vector.broadcast %cst_159 : f32 to vector<49x49xf32>
    %446 = arith.select %444, %445, %440 : vector<49x49xi1>, vector<49x49xf32>
    %cst_160 = arith.constant dense<0xFF800000> : vector<49xf32>
    %447 = vector.multi_reduction <maximumf>, %446, %cst_160 [1] : vector<49x49xf32> to vector<49xf32>
    %448 = vector.shape_cast %447 : vector<49xf32> to vector<49x1xf32>
    %449 = vector.broadcast %448 : vector<49x1xf32> to vector<49x49xf32>
    %450 = arith.cmpf oge, %446, %449 : vector<49x49xf32>
    %cst_161 = arith.constant -1.000000e+30 : f32
    %451 = vector.broadcast %cst_161 : f32 to vector<49x49xf32>
    %452 = arith.select %450, %451, %446 : vector<49x49xi1>, vector<49x49xf32>
    %cst_162 = arith.constant dense<0xFF800000> : vector<49xf32>
    %453 = vector.multi_reduction <maximumf>, %452, %cst_162 [1] : vector<49x49xf32> to vector<49xf32>
    %454 = vector.shape_cast %453 : vector<49xf32> to vector<49x1xf32>
    %455 = vector.broadcast %454 : vector<49x1xf32> to vector<49x49xf32>
    %456 = arith.cmpf oge, %386, %455 : vector<49x49xf32>
    %cst_163 = arith.constant -1.000000e+30 : f32
    %457 = vector.broadcast %cst_163 : f32 to vector<49x49xf32>
    %458 = arith.select %456, %386, %457 : vector<49x49xi1>, vector<49x49xf32>
    %cst_164 = arith.constant dense<0xFF800000> : vector<49xf32>
    %459 = vector.multi_reduction <maximumf>, %458, %cst_164 [1] : vector<49x49xf32> to vector<49xf32>
    %460 = vector.shape_cast %459 : vector<49xf32> to vector<49x1xf32>
    %461 = vector.broadcast %460 : vector<49x1xf32> to vector<49x49xf32>
    %462 = arith.subf %458, %461 : vector<49x49xf32>
    %463 = math.exp %462 : vector<49x49xf32>
    %cst_165 = arith.constant dense<0.000000e+00> : vector<49xf32>
    %464 = vector.multi_reduction <add>, %463, %cst_165 [1] : vector<49x49xf32> to vector<49xf32>
    %465 = vector.shape_cast %464 : vector<49xf32> to vector<49x1xf32>
    %466 = vector.broadcast %465 : vector<49x1xf32> to vector<49x49xf32>
    %467 = arith.divf %463, %466 : vector<49x49xf32>
    %cst_166 = arith.constant dense<0.000000e+00> : vector<49x16xf32>
    %468 = tpu.matmul %467, %380, %cst_166 {dimension_numbers = #tpu.dot_dimension_numbers<[1], [0], [0], [1], [0, 0, 1, 1], [], []>} : vector<49x49xf32>, vector<49x16xf32>, vector<49x16xf32> -> vector<49x16xf32>
    %c0_167 = arith.constant 0 : index
    %c64 = arith.constant 64 : index
    %469 = vector.load %arg11[%c0_167, %c64] : memref<49x128xf32, #tpu.memory_space<vmem>>, vector<49x16xf32>
    tpu.vector_store %arg11[%c0_167, %c64], %468 {strides = array<i32>} : memref<49x128xf32, #tpu.memory_space<vmem>>, vector<49x16xf32>,
    %470 = vector.extract_strided_slice %7 {offsets = [0, 40], sizes = [49, 8], strides = [1, 1]} : vector<49x64xf32> to vector<49x8xf32>
    %471 = vector.extract_strided_slice %8 {offsets = [0, 40], sizes = [49, 8], strides = [1, 1]} : vector<49x64xf32> to vector<49x8xf32>
    %472 = vector.extract_strided_slice %9 {offsets = [0, 80], sizes = [49, 16], strides = [1, 1]} : vector<49x128xf32> to vector<49x16xf32>
    %cst_168 = arith.constant dense<0.000000e+00> : vector<49x49xf32>
    %473 = tpu.matmul %470, %471, %cst_168 {dimension_numbers = #tpu.dot_dimension_numbers<[1], [1], [0], [0], [0, 0, 1, 0], [], []>} : vector<49x8xf32>, vector<49x8xf32>, vector<49x49xf32> -> vector<49x49xf32>
    %cst_169 = arith.constant 0.353553385 : f32
    %474 = vector.broadcast %cst_169 : f32 to vector<49x49xf32>
    %475 = arith.mulf %473, %474 : vector<49x49xf32>
    %c5 = arith.constant 5 : index
    %c0_170 = arith.constant 0 : index
    %c0_171 = arith.constant 0 : index
    %476 = vector.load %arg4[%c5, %c0_170, %c0_171] : memref<8x49x49xf32, #tpu.memory_space<vmem>>, vector<1x49x49xf32>
    %477 = vector.shape_cast %476 : vector<1x49x49xf32> to vector<49x49xf32>
    %478 = arith.addf %475, %477 : vector<49x49xf32>
    %cst_172 = arith.constant dense<0xFF800000> : vector<49xf32>
    %479 = vector.multi_reduction <maximumf>, %478, %cst_172 [1] : vector<49x49xf32> to vector<49xf32>
    %480 = vector.shape_cast %479 : vector<49xf32> to vector<49x1xf32>
    %481 = vector.broadcast %480 : vector<49x1xf32> to vector<49x49xf32>
    %482 = arith.cmpf oge, %478, %481 : vector<49x49xf32>
    %cst_173 = arith.constant -1.000000e+30 : f32
    %483 = vector.broadcast %cst_173 : f32 to vector<49x49xf32>
    %484 = arith.select %482, %483, %478 : vector<49x49xi1>, vector<49x49xf32>
    %cst_174 = arith.constant dense<0xFF800000> : vector<49xf32>
    %485 = vector.multi_reduction <maximumf>, %484, %cst_174 [1] : vector<49x49xf32> to vector<49xf32>
    %486 = vector.shape_cast %485 : vector<49xf32> to vector<49x1xf32>
    %487 = vector.broadcast %486 : vector<49x1xf32> to vector<49x49xf32>
    %488 = arith.cmpf oge, %484, %487 : vector<49x49xf32>
    %cst_175 = arith.constant -1.000000e+30 : f32
    %489 = vector.broadcast %cst_175 : f32 to vector<49x49xf32>
    %490 = arith.select %488, %489, %484 : vector<49x49xi1>, vector<49x49xf32>
    %cst_176 = arith.constant dense<0xFF800000> : vector<49xf32>
    %491 = vector.multi_reduction <maximumf>, %490, %cst_176 [1] : vector<49x49xf32> to vector<49xf32>
    %492 = vector.shape_cast %491 : vector<49xf32> to vector<49x1xf32>
    %493 = vector.broadcast %492 : vector<49x1xf32> to vector<49x49xf32>
    %494 = arith.cmpf oge, %490, %493 : vector<49x49xf32>
    %cst_177 = arith.constant -1.000000e+30 : f32
    %495 = vector.broadcast %cst_177 : f32 to vector<49x49xf32>
    %496 = arith.select %494, %495, %490 : vector<49x49xi1>, vector<49x49xf32>
    %cst_178 = arith.constant dense<0xFF800000> : vector<49xf32>
    %497 = vector.multi_reduction <maximumf>, %496, %cst_178 [1] : vector<49x49xf32> to vector<49xf32>
    %498 = vector.shape_cast %497 : vector<49xf32> to vector<49x1xf32>
    %499 = vector.broadcast %498 : vector<49x1xf32> to vector<49x49xf32>
    %500 = arith.cmpf oge, %496, %499 : vector<49x49xf32>
    %cst_179 = arith.constant -1.000000e+30 : f32
    %501 = vector.broadcast %cst_179 : f32 to vector<49x49xf32>
    %502 = arith.select %500, %501, %496 : vector<49x49xi1>, vector<49x49xf32>
    %cst_180 = arith.constant dense<0xFF800000> : vector<49xf32>
    %503 = vector.multi_reduction <maximumf>, %502, %cst_180 [1] : vector<49x49xf32> to vector<49xf32>
    %504 = vector.shape_cast %503 : vector<49xf32> to vector<49x1xf32>
    %505 = vector.broadcast %504 : vector<49x1xf32> to vector<49x49xf32>
    %506 = arith.cmpf oge, %502, %505 : vector<49x49xf32>
    %cst_181 = arith.constant -1.000000e+30 : f32
    %507 = vector.broadcast %cst_181 : f32 to vector<49x49xf32>
    %508 = arith.select %506, %507, %502 : vector<49x49xi1>, vector<49x49xf32>
    %cst_182 = arith.constant dense<0xFF800000> : vector<49xf32>
    %509 = vector.multi_reduction <maximumf>, %508, %cst_182 [1] : vector<49x49xf32> to vector<49xf32>
    %510 = vector.shape_cast %509 : vector<49xf32> to vector<49x1xf32>
    %511 = vector.broadcast %510 : vector<49x1xf32> to vector<49x49xf32>
    %512 = arith.cmpf oge, %508, %511 : vector<49x49xf32>
    %cst_183 = arith.constant -1.000000e+30 : f32
    %513 = vector.broadcast %cst_183 : f32 to vector<49x49xf32>
    %514 = arith.select %512, %513, %508 : vector<49x49xi1>, vector<49x49xf32>
    %cst_184 = arith.constant dense<0xFF800000> : vector<49xf32>
    %515 = vector.multi_reduction <maximumf>, %514, %cst_184 [1] : vector<49x49xf32> to vector<49xf32>
    %516 = vector.shape_cast %515 : vector<49xf32> to vector<49x1xf32>
    %517 = vector.broadcast %516 : vector<49x1xf32> to vector<49x49xf32>
    %518 = arith.cmpf oge, %514, %517 : vector<49x49xf32>
    %cst_185 = arith.constant -1.000000e+30 : f32
    %519 = vector.broadcast %cst_185 : f32 to vector<49x49xf32>
    %520 = arith.select %518, %519, %514 : vector<49x49xi1>, vector<49x49xf32>
    %cst_186 = arith.constant dense<0xFF800000> : vector<49xf32>
    %521 = vector.multi_reduction <maximumf>, %520, %cst_186 [1] : vector<49x49xf32> to vector<49xf32>
    %522 = vector.shape_cast %521 : vector<49xf32> to vector<49x1xf32>
    %523 = vector.broadcast %522 : vector<49x1xf32> to vector<49x49xf32>
    %524 = arith.cmpf oge, %520, %523 : vector<49x49xf32>
    %cst_187 = arith.constant -1.000000e+30 : f32
    %525 = vector.broadcast %cst_187 : f32 to vector<49x49xf32>
    %526 = arith.select %524, %525, %520 : vector<49x49xi1>, vector<49x49xf32>
    %cst_188 = arith.constant dense<0xFF800000> : vector<49xf32>
    %527 = vector.multi_reduction <maximumf>, %526, %cst_188 [1] : vector<49x49xf32> to vector<49xf32>
    %528 = vector.shape_cast %527 : vector<49xf32> to vector<49x1xf32>
    %529 = vector.broadcast %528 : vector<49x1xf32> to vector<49x49xf32>
    %530 = arith.cmpf oge, %526, %529 : vector<49x49xf32>
    %cst_189 = arith.constant -1.000000e+30 : f32
    %531 = vector.broadcast %cst_189 : f32 to vector<49x49xf32>
    %532 = arith.select %530, %531, %526 : vector<49x49xi1>, vector<49x49xf32>
    %cst_190 = arith.constant dense<0xFF800000> : vector<49xf32>
    %533 = vector.multi_reduction <maximumf>, %532, %cst_190 [1] : vector<49x49xf32> to vector<49xf32>
    %534 = vector.shape_cast %533 : vector<49xf32> to vector<49x1xf32>
    %535 = vector.broadcast %534 : vector<49x1xf32> to vector<49x49xf32>
    %536 = arith.cmpf oge, %532, %535 : vector<49x49xf32>
    %cst_191 = arith.constant -1.000000e+30 : f32
    %537 = vector.broadcast %cst_191 : f32 to vector<49x49xf32>
    %538 = arith.select %536, %537, %532 : vector<49x49xi1>, vector<49x49xf32>
    %cst_192 = arith.constant dense<0xFF800000> : vector<49xf32>
    %539 = vector.multi_reduction <maximumf>, %538, %cst_192 [1] : vector<49x49xf32> to vector<49xf32>
    %540 = vector.shape_cast %539 : vector<49xf32> to vector<49x1xf32>
    %541 = vector.broadcast %540 : vector<49x1xf32> to vector<49x49xf32>
    %542 = arith.cmpf oge, %538, %541 : vector<49x49xf32>
    %cst_193 = arith.constant -1.000000e+30 : f32
    %543 = vector.broadcast %cst_193 : f32 to vector<49x49xf32>
    %544 = arith.select %542, %543, %538 : vector<49x49xi1>, vector<49x49xf32>
    %cst_194 = arith.constant dense<0xFF800000> : vector<49xf32>
    %545 = vector.multi_reduction <maximumf>, %544, %cst_194 [1] : vector<49x49xf32> to vector<49xf32>
    %546 = vector.shape_cast %545 : vector<49xf32> to vector<49x1xf32>
    %547 = vector.broadcast %546 : vector<49x1xf32> to vector<49x49xf32>
    %548 = arith.cmpf oge, %478, %547 : vector<49x49xf32>
    %cst_195 = arith.constant -1.000000e+30 : f32
    %549 = vector.broadcast %cst_195 : f32 to vector<49x49xf32>
    %550 = arith.select %548, %478, %549 : vector<49x49xi1>, vector<49x49xf32>
    %cst_196 = arith.constant dense<0xFF800000> : vector<49xf32>
    %551 = vector.multi_reduction <maximumf>, %550, %cst_196 [1] : vector<49x49xf32> to vector<49xf32>
    %552 = vector.shape_cast %551 : vector<49xf32> to vector<49x1xf32>
    %553 = vector.broadcast %552 : vector<49x1xf32> to vector<49x49xf32>
    %554 = arith.subf %550, %553 : vector<49x49xf32>
    %555 = math.exp %554 : vector<49x49xf32>
    %cst_197 = arith.constant dense<0.000000e+00> : vector<49xf32>
    %556 = vector.multi_reduction <add>, %555, %cst_197 [1] : vector<49x49xf32> to vector<49xf32>
    %557 = vector.shape_cast %556 : vector<49xf32> to vector<49x1xf32>
    %558 = vector.broadcast %557 : vector<49x1xf32> to vector<49x49xf32>
    %559 = arith.divf %555, %558 : vector<49x49xf32>
    %cst_198 = arith.constant dense<0.000000e+00> : vector<49x16xf32>
    %560 = tpu.matmul %559, %472, %cst_198 {dimension_numbers = #tpu.dot_dimension_numbers<[1], [0], [0], [1], [0, 0, 1, 1], [], []>} : vector<49x49xf32>, vector<49x16xf32>, vector<49x16xf32> -> vector<49x16xf32>
    %c0_199 = arith.constant 0 : index
    %c80 = arith.constant 80 : index
    %561 = vector.load %arg11[%c0_199, %c80] : memref<49x128xf32, #tpu.memory_space<vmem>>, vector<49x16xf32>
    tpu.vector_store %arg11[%c0_199, %c80], %560 {strides = array<i32>} : memref<49x128xf32, #tpu.memory_space<vmem>>, vector<49x16xf32>,
    %562 = vector.extract_strided_slice %7 {offsets = [0, 48], sizes = [49, 8], strides = [1, 1]} : vector<49x64xf32> to vector<49x8xf32>
    %563 = vector.extract_strided_slice %8 {offsets = [0, 48], sizes = [49, 8], strides = [1, 1]} : vector<49x64xf32> to vector<49x8xf32>
    %564 = vector.extract_strided_slice %9 {offsets = [0, 96], sizes = [49, 16], strides = [1, 1]} : vector<49x128xf32> to vector<49x16xf32>
    %cst_200 = arith.constant dense<0.000000e+00> : vector<49x49xf32>
    %565 = tpu.matmul %562, %563, %cst_200 {dimension_numbers = #tpu.dot_dimension_numbers<[1], [1], [0], [0], [0, 0, 1, 0], [], []>} : vector<49x8xf32>, vector<49x8xf32>, vector<49x49xf32> -> vector<49x49xf32>
    %cst_201 = arith.constant 0.353553385 : f32
    %566 = vector.broadcast %cst_201 : f32 to vector<49x49xf32>
    %567 = arith.mulf %565, %566 : vector<49x49xf32>
    %c6 = arith.constant 6 : index
    %c0_202 = arith.constant 0 : index
    %c0_203 = arith.constant 0 : index
    %568 = vector.load %arg4[%c6, %c0_202, %c0_203] : memref<8x49x49xf32, #tpu.memory_space<vmem>>, vector<1x49x49xf32>
    %569 = vector.shape_cast %568 : vector<1x49x49xf32> to vector<49x49xf32>
    %570 = arith.addf %567, %569 : vector<49x49xf32>
    %cst_204 = arith.constant dense<0xFF800000> : vector<49xf32>
    %571 = vector.multi_reduction <maximumf>, %570, %cst_204 [1] : vector<49x49xf32> to vector<49xf32>
    %572 = vector.shape_cast %571 : vector<49xf32> to vector<49x1xf32>
    %573 = vector.broadcast %572 : vector<49x1xf32> to vector<49x49xf32>
    %574 = arith.subf %570, %573 : vector<49x49xf32>
    %575 = math.exp %574 : vector<49x49xf32>
    %cst_205 = arith.constant dense<0.000000e+00> : vector<49xf32>
    %576 = vector.multi_reduction <add>, %575, %cst_205 [1] : vector<49x49xf32> to vector<49xf32>
    %577 = vector.shape_cast %576 : vector<49xf32> to vector<49x1xf32>
    %578 = vector.broadcast %577 : vector<49x1xf32> to vector<49x49xf32>
    %579 = arith.divf %575, %578 : vector<49x49xf32>
    %cst_206 = arith.constant dense<0.000000e+00> : vector<49x16xf32>
    %580 = tpu.matmul %579, %564, %cst_206 {dimension_numbers = #tpu.dot_dimension_numbers<[1], [0], [0], [1], [0, 0, 1, 1], [], []>} : vector<49x49xf32>, vector<49x16xf32>, vector<49x16xf32> -> vector<49x16xf32>
    %c0_207 = arith.constant 0 : index
    %c96 = arith.constant 96 : index
    %581 = vector.load %arg11[%c0_207, %c96] : memref<49x128xf32, #tpu.memory_space<vmem>>, vector<49x16xf32>
    tpu.vector_store %arg11[%c0_207, %c96], %580 {strides = array<i32>} : memref<49x128xf32, #tpu.memory_space<vmem>>, vector<49x16xf32>,
    %582 = vector.extract_strided_slice %7 {offsets = [0, 56], sizes = [49, 8], strides = [1, 1]} : vector<49x64xf32> to vector<49x8xf32>
    %583 = vector.extract_strided_slice %8 {offsets = [0, 56], sizes = [49, 8], strides = [1, 1]} : vector<49x64xf32> to vector<49x8xf32>
    %584 = vector.extract_strided_slice %9 {offsets = [0, 112], sizes = [49, 16], strides = [1, 1]} : vector<49x128xf32> to vector<49x16xf32>
    %cst_208 = arith.constant dense<0.000000e+00> : vector<49x49xf32>
    %585 = tpu.matmul %582, %583, %cst_208 {dimension_numbers = #tpu.dot_dimension_numbers<[1], [1], [0], [0], [0, 0, 1, 0], [], []>} : vector<49x8xf32>, vector<49x8xf32>, vector<49x49xf32> -> vector<49x49xf32>
    %cst_209 = arith.constant 0.353553385 : f32
    %586 = vector.broadcast %cst_209 : f32 to vector<49x49xf32>
    %587 = arith.mulf %585, %586 : vector<49x49xf32>
    %c7 = arith.constant 7 : index
    %c0_210 = arith.constant 0 : index
    %c0_211 = arith.constant 0 : index
    %588 = vector.load %arg4[%c7, %c0_210, %c0_211] : memref<8x49x49xf32, #tpu.memory_space<vmem>>, vector<1x49x49xf32>
    %589 = vector.shape_cast %588 : vector<1x49x49xf32> to vector<49x49xf32>
    %590 = arith.addf %587, %589 : vector<49x49xf32>
    %cst_212 = arith.constant dense<0xFF800000> : vector<49xf32>
    %591 = vector.multi_reduction <maximumf>, %590, %cst_212 [1] : vector<49x49xf32> to vector<49xf32>
    %592 = vector.shape_cast %591 : vector<49xf32> to vector<49x1xf32>
    %593 = vector.broadcast %592 : vector<49x1xf32> to vector<49x49xf32>
    %594 = arith.subf %590, %593 : vector<49x49xf32>
    %595 = math.exp %594 : vector<49x49xf32>
    %cst_213 = arith.constant dense<0.000000e+00> : vector<49xf32>
    %596 = vector.multi_reduction <add>, %595, %cst_213 [1] : vector<49x49xf32> to vector<49xf32>
    %597 = vector.shape_cast %596 : vector<49xf32> to vector<49x1xf32>
    %598 = vector.broadcast %597 : vector<49x1xf32> to vector<49x49xf32>
    %599 = arith.divf %595, %598 : vector<49x49xf32>
    %cst_214 = arith.constant dense<0.000000e+00> : vector<49x16xf32>
    %600 = tpu.matmul %599, %584, %cst_214 {dimension_numbers = #tpu.dot_dimension_numbers<[1], [0], [0], [1], [0, 0, 1, 1], [], []>} : vector<49x49xf32>, vector<49x16xf32>, vector<49x16xf32> -> vector<49x16xf32>
    %c0_215 = arith.constant 0 : index
    %c112 = arith.constant 112 : index
    %601 = vector.load %arg11[%c0_215, %c112] : memref<49x128xf32, #tpu.memory_space<vmem>>, vector<49x16xf32>
    tpu.vector_store %arg11[%c0_215, %c112], %600 {strides = array<i32>} : memref<49x128xf32, #tpu.memory_space<vmem>>, vector<49x16xf32>,
    %cst_216 = arith.constant 0.000000e+00 : f32
    %602 = vector.broadcast %cst_216 : f32 to vector<9x9x128xf32>
    %c0_217 = arith.constant 0 : index
    %c0_218 = arith.constant 0 : index
    %c0_219 = arith.constant 0 : index
    %603 = vector.load %arg10[%c0_217, %c0_218, %c0_219] : memref<9x9x128xf32, #tpu.memory_space<vmem>>, vector<9x9x128xf32>
    tpu.vector_store %arg10[%c0_217, %c0_218, %c0_219], %602 {strides = array<i32>} : memref<9x9x128xf32, #tpu.memory_space<vmem>>, vector<9x9x128xf32>,
    %604 = vector.extract_strided_slice %9 {offsets = [0, 0], sizes = [7, 128], strides = [1, 1]} : vector<49x128xf32> to vector<7x128xf32>
    %c1_220 = arith.constant 1 : index
    %c1_221 = arith.constant 1 : index
    %c0_222 = arith.constant 0 : index
    %605 = vector.load %arg10[%c1_220, %c1_221, %c0_222] : memref<9x9x128xf32, #tpu.memory_space<vmem>>, vector<1x7x128xf32>
    %606 = vector.shape_cast %605 : vector<1x7x128xf32> to vector<7x128xf32>
    %607 = vector.shape_cast %604 : vector<7x128xf32> to vector<1x7x128xf32>
    tpu.vector_store %arg10[%c1_220, %c1_221, %c0_222], %607 {strides = array<i32>} : memref<9x9x128xf32, #tpu.memory_space<vmem>>, vector<1x7x128xf32>,
    %608 = vector.extract_strided_slice %9 {offsets = [7, 0], sizes = [7, 128], strides = [1, 1]} : vector<49x128xf32> to vector<7x128xf32>
    %c2_223 = arith.constant 2 : index
    %c1_224 = arith.constant 1 : index
    %c0_225 = arith.constant 0 : index
    %609 = vector.load %arg10[%c2_223, %c1_224, %c0_225] : memref<9x9x128xf32, #tpu.memory_space<vmem>>, vector<1x7x128xf32>
    %610 = vector.shape_cast %609 : vector<1x7x128xf32> to vector<7x128xf32>
    %611 = vector.shape_cast %608 : vector<7x128xf32> to vector<1x7x128xf32>
    tpu.vector_store %arg10[%c2_223, %c1_224, %c0_225], %611 {strides = array<i32>} : memref<9x9x128xf32, #tpu.memory_space<vmem>>, vector<1x7x128xf32>,
    %612 = vector.extract_strided_slice %9 {offsets = [14, 0], sizes = [7, 128], strides = [1, 1]} : vector<49x128xf32> to vector<7x128xf32>
    %c3_226 = arith.constant 3 : index
    %c1_227 = arith.constant 1 : index
    %c0_228 = arith.constant 0 : index
    %613 = vector.load %arg10[%c3_226, %c1_227, %c0_228] : memref<9x9x128xf32, #tpu.memory_space<vmem>>, vector<1x7x128xf32>
    %614 = vector.shape_cast %613 : vector<1x7x128xf32> to vector<7x128xf32>
    %615 = vector.shape_cast %612 : vector<7x128xf32> to vector<1x7x128xf32>
    tpu.vector_store %arg10[%c3_226, %c1_227, %c0_228], %615 {strides = array<i32>} : memref<9x9x128xf32, #tpu.memory_space<vmem>>, vector<1x7x128xf32>,
    %616 = vector.extract_strided_slice %9 {offsets = [21, 0], sizes = [7, 128], strides = [1, 1]} : vector<49x128xf32> to vector<7x128xf32>
    %c4_229 = arith.constant 4 : index
    %c1_230 = arith.constant 1 : index
    %c0_231 = arith.constant 0 : index
    %617 = vector.load %arg10[%c4_229, %c1_230, %c0_231] : memref<9x9x128xf32, #tpu.memory_space<vmem>>, vector<1x7x128xf32>
    %618 = vector.shape_cast %617 : vector<1x7x128xf32> to vector<7x128xf32>
    %619 = vector.shape_cast %616 : vector<7x128xf32> to vector<1x7x128xf32>
    tpu.vector_store %arg10[%c4_229, %c1_230, %c0_231], %619 {strides = array<i32>} : memref<9x9x128xf32, #tpu.memory_space<vmem>>, vector<1x7x128xf32>,
    %620 = vector.extract_strided_slice %9 {offsets = [28, 0], sizes = [7, 128], strides = [1, 1]} : vector<49x128xf32> to vector<7x128xf32>
    %c5_232 = arith.constant 5 : index
    %c1_233 = arith.constant 1 : index
    %c0_234 = arith.constant 0 : index
    %621 = vector.load %arg10[%c5_232, %c1_233, %c0_234] : memref<9x9x128xf32, #tpu.memory_space<vmem>>, vector<1x7x128xf32>
    %622 = vector.shape_cast %621 : vector<1x7x128xf32> to vector<7x128xf32>
    %623 = vector.shape_cast %620 : vector<7x128xf32> to vector<1x7x128xf32>
    tpu.vector_store %arg10[%c5_232, %c1_233, %c0_234], %623 {strides = array<i32>} : memref<9x9x128xf32, #tpu.memory_space<vmem>>, vector<1x7x128xf32>,
    %624 = vector.extract_strided_slice %9 {offsets = [35, 0], sizes = [7, 128], strides = [1, 1]} : vector<49x128xf32> to vector<7x128xf32>
    %c6_235 = arith.constant 6 : index
    %c1_236 = arith.constant 1 : index
    %c0_237 = arith.constant 0 : index
    %625 = vector.load %arg10[%c6_235, %c1_236, %c0_237] : memref<9x9x128xf32, #tpu.memory_space<vmem>>, vector<1x7x128xf32>
    %626 = vector.shape_cast %625 : vector<1x7x128xf32> to vector<7x128xf32>
    %627 = vector.shape_cast %624 : vector<7x128xf32> to vector<1x7x128xf32>
    tpu.vector_store %arg10[%c6_235, %c1_236, %c0_237], %627 {strides = array<i32>} : memref<9x9x128xf32, #tpu.memory_space<vmem>>, vector<1x7x128xf32>,
    %628 = vector.extract_strided_slice %9 {offsets = [42, 0], sizes = [7, 128], strides = [1, 1]} : vector<49x128xf32> to vector<7x128xf32>
    %c7_238 = arith.constant 7 : index
    %c1_239 = arith.constant 1 : index
    %c0_240 = arith.constant 0 : index
    %629 = vector.load %arg10[%c7_238, %c1_239, %c0_240] : memref<9x9x128xf32, #tpu.memory_space<vmem>>, vector<1x7x128xf32>
    %630 = vector.shape_cast %629 : vector<1x7x128xf32> to vector<7x128xf32>
    %631 = vector.shape_cast %628 : vector<7x128xf32> to vector<1x7x128xf32>
    tpu.vector_store %arg10[%c7_238, %c1_239, %c0_240], %631 {strides = array<i32>} : memref<9x9x128xf32, #tpu.memory_space<vmem>>, vector<1x7x128xf32>,
    %c0_241 = arith.constant 0 : index
    %c0_242 = arith.constant 0 : index
    %c0_243 = arith.constant 0 : index
    %632 = vector.load %arg10[%c0_241, %c0_242, %c0_243] : memref<9x9x128xf32, #tpu.memory_space<vmem>>, vector<7x9x128xf32>
    %633 = vector.extract_strided_slice %632 {offsets = [0, 0, 0], sizes = [7, 7, 128], strides = [1, 1, 1]} : vector<7x9x128xf32> to vector<7x7x128xf32>
    %c0_244 = arith.constant 0 : index
    %c0_245 = arith.constant 0 : index
    %634 = vector.load %arg5[%c0_244, %c0_245] : memref<9x128xf32, #tpu.memory_space<vmem>>, vector<1x128xf32>
    %635 = vector.shape_cast %634 : vector<1x128xf32> to vector<1x1x128xf32>
    %636 = vector.broadcast %635 : vector<1x1x128xf32> to vector<7x7x128xf32>
    %637 = arith.mulf %633, %636 : vector<7x7x128xf32>
    %638 = vector.extract_strided_slice %632 {offsets = [0, 1, 0], sizes = [7, 7, 128], strides = [1, 1, 1]} : vector<7x9x128xf32> to vector<7x7x128xf32>
    %c1_246 = arith.constant 1 : index
    %c0_247 = arith.constant 0 : index
    %639 = vector.load %arg5[%c1_246, %c0_247] : memref<9x128xf32, #tpu.memory_space<vmem>>, vector<1x128xf32>
    %640 = vector.shape_cast %639 : vector<1x128xf32> to vector<1x1x128xf32>
    %641 = vector.broadcast %640 : vector<1x1x128xf32> to vector<7x7x128xf32>
    %642 = arith.mulf %638, %641 : vector<7x7x128xf32>
    %643 = arith.addf %637, %642 : vector<7x7x128xf32>
    %644 = vector.extract_strided_slice %632 {offsets = [0, 2, 0], sizes = [7, 7, 128], strides = [1, 1, 1]} : vector<7x9x128xf32> to vector<7x7x128xf32>
    %c2_248 = arith.constant 2 : index
    %c0_249 = arith.constant 0 : index
    %645 = vector.load %arg5[%c2_248, %c0_249] : memref<9x128xf32, #tpu.memory_space<vmem>>, vector<1x128xf32>
    %646 = vector.shape_cast %645 : vector<1x128xf32> to vector<1x1x128xf32>
    %647 = vector.broadcast %646 : vector<1x1x128xf32> to vector<7x7x128xf32>
    %648 = arith.mulf %644, %647 : vector<7x7x128xf32>
    %649 = arith.addf %643, %648 : vector<7x7x128xf32>
    %c1_250 = arith.constant 1 : index
    %c0_251 = arith.constant 0 : index
    %c0_252 = arith.constant 0 : index
    %650 = vector.load %arg10[%c1_250, %c0_251, %c0_252] : memref<9x9x128xf32, #tpu.memory_space<vmem>>, vector<7x9x128xf32>
    %651 = vector.extract_strided_slice %650 {offsets = [0, 0, 0], sizes = [7, 7, 128], strides = [1, 1, 1]} : vector<7x9x128xf32> to vector<7x7x128xf32>
    %c3_253 = arith.constant 3 : index
    %c0_254 = arith.constant 0 : index
    %652 = vector.load %arg5[%c3_253, %c0_254] : memref<9x128xf32, #tpu.memory_space<vmem>>, vector<1x128xf32>
    %653 = vector.shape_cast %652 : vector<1x128xf32> to vector<1x1x128xf32>
    %654 = vector.broadcast %653 : vector<1x1x128xf32> to vector<7x7x128xf32>
    %655 = arith.mulf %651, %654 : vector<7x7x128xf32>
    %656 = arith.addf %649, %655 : vector<7x7x128xf32>
    %657 = vector.extract_strided_slice %650 {offsets = [0, 1, 0], sizes = [7, 7, 128], strides = [1, 1, 1]} : vector<7x9x128xf32> to vector<7x7x128xf32>
    %c4_255 = arith.constant 4 : index
    %c0_256 = arith.constant 0 : index
    %658 = vector.load %arg5[%c4_255, %c0_256] : memref<9x128xf32, #tpu.memory_space<vmem>>, vector<1x128xf32>
    %659 = vector.shape_cast %658 : vector<1x128xf32> to vector<1x1x128xf32>
    %660 = vector.broadcast %659 : vector<1x1x128xf32> to vector<7x7x128xf32>
    %661 = arith.mulf %657, %660 : vector<7x7x128xf32>
    %662 = arith.addf %656, %661 : vector<7x7x128xf32>
    %663 = vector.extract_strided_slice %650 {offsets = [0, 2, 0], sizes = [7, 7, 128], strides = [1, 1, 1]} : vector<7x9x128xf32> to vector<7x7x128xf32>
    %c5_257 = arith.constant 5 : index
    %c0_258 = arith.constant 0 : index
    %664 = vector.load %arg5[%c5_257, %c0_258] : memref<9x128xf32, #tpu.memory_space<vmem>>, vector<1x128xf32>
    %665 = vector.shape_cast %664 : vector<1x128xf32> to vector<1x1x128xf32>
    %666 = vector.broadcast %665 : vector<1x1x128xf32> to vector<7x7x128xf32>
    %667 = arith.mulf %663, %666 : vector<7x7x128xf32>
    %668 = arith.addf %662, %667 : vector<7x7x128xf32>
    %c2_259 = arith.constant 2 : index
    %c0_260 = arith.constant 0 : index
    %c0_261 = arith.constant 0 : index
    %669 = vector.load %arg10[%c2_259, %c0_260, %c0_261] : memref<9x9x128xf32, #tpu.memory_space<vmem>>, vector<7x9x128xf32>
    %670 = vector.extract_strided_slice %669 {offsets = [0, 0, 0], sizes = [7, 7, 128], strides = [1, 1, 1]} : vector<7x9x128xf32> to vector<7x7x128xf32>
    %c6_262 = arith.constant 6 : index
    %c0_263 = arith.constant 0 : index
    %671 = vector.load %arg5[%c6_262, %c0_263] : memref<9x128xf32, #tpu.memory_space<vmem>>, vector<1x128xf32>
    %672 = vector.shape_cast %671 : vector<1x128xf32> to vector<1x1x128xf32>
    %673 = vector.broadcast %672 : vector<1x1x128xf32> to vector<7x7x128xf32>
    %674 = arith.mulf %670, %673 : vector<7x7x128xf32>
    %675 = arith.addf %668, %674 : vector<7x7x128xf32>
    %676 = vector.extract_strided_slice %669 {offsets = [0, 1, 0], sizes = [7, 7, 128], strides = [1, 1, 1]} : vector<7x9x128xf32> to vector<7x7x128xf32>
    %c7_264 = arith.constant 7 : index
    %c0_265 = arith.constant 0 : index
    %677 = vector.load %arg5[%c7_264, %c0_265] : memref<9x128xf32, #tpu.memory_space<vmem>>, vector<1x128xf32>
    %678 = vector.shape_cast %677 : vector<1x128xf32> to vector<1x1x128xf32>
    %679 = vector.broadcast %678 : vector<1x1x128xf32> to vector<7x7x128xf32>
    %680 = arith.mulf %676, %679 : vector<7x7x128xf32>
    %681 = arith.addf %675, %680 : vector<7x7x128xf32>
    %682 = vector.extract_strided_slice %669 {offsets = [0, 2, 0], sizes = [7, 7, 128], strides = [1, 1, 1]} : vector<7x9x128xf32> to vector<7x7x128xf32>
    %c8 = arith.constant 8 : index
    %c0_266 = arith.constant 0 : index
    %683 = vector.load %arg5[%c8, %c0_266] : memref<9x128xf32, #tpu.memory_space<vmem>>, vector<1x128xf32>
    %684 = vector.shape_cast %683 : vector<1x128xf32> to vector<1x1x128xf32>
    %685 = vector.broadcast %684 : vector<1x1x128xf32> to vector<7x7x128xf32>
    %686 = arith.mulf %682, %685 : vector<7x7x128xf32>
    %687 = arith.addf %681, %686 : vector<7x7x128xf32>
    %c0_267 = arith.constant 0 : index
    %c0_268 = arith.constant 0 : index
    %688 = vector.load %arg11[%c0_267, %c0_268] : memref<49x128xf32, #tpu.memory_space<vmem>>, vector<7x128xf32>
    %689 = vector.extract_strided_slice %687 {offsets = [0, 0, 0], sizes = [1, 7, 128], strides = [1, 1, 1]} : vector<7x7x128xf32> to vector<1x7x128xf32>
    %690 = vector.shape_cast %689 : vector<1x7x128xf32> to vector<7x128xf32>
    %691 = arith.addf %688, %690 : vector<7x128xf32>
    %c0_269 = arith.constant 0 : index
    %c0_270 = arith.constant 0 : index
    %692 = vector.load %arg11[%c0_269, %c0_270] : memref<49x128xf32, #tpu.memory_space<vmem>>, vector<7x128xf32>
    tpu.vector_store %arg11[%c0_269, %c0_270], %691 {strides = array<i32>} : memref<49x128xf32, #tpu.memory_space<vmem>>, vector<7x128xf32>,
    %c7_271 = arith.constant 7 : index
    %c0_272 = arith.constant 0 : index
    %693 = vector.load %arg11[%c7_271, %c0_272] : memref<49x128xf32, #tpu.memory_space<vmem>>, vector<7x128xf32>
    %694 = vector.extract_strided_slice %687 {offsets = [1, 0, 0], sizes = [1, 7, 128], strides = [1, 1, 1]} : vector<7x7x128xf32> to vector<1x7x128xf32>
    %695 = vector.shape_cast %694 : vector<1x7x128xf32> to vector<7x128xf32>
    %696 = arith.addf %693, %695 : vector<7x128xf32>
    %c7_273 = arith.constant 7 : index
    %c0_274 = arith.constant 0 : index
    %697 = vector.load %arg11[%c7_273, %c0_274] : memref<49x128xf32, #tpu.memory_space<vmem>>, vector<7x128xf32>
    tpu.vector_store %arg11[%c7_273, %c0_274], %696 {strides = array<i32>} : memref<49x128xf32, #tpu.memory_space<vmem>>, vector<7x128xf32>,
    %c14 = arith.constant 14 : index
    %c0_275 = arith.constant 0 : index
    %698 = vector.load %arg11[%c14, %c0_275] : memref<49x128xf32, #tpu.memory_space<vmem>>, vector<7x128xf32>
    %699 = vector.extract_strided_slice %687 {offsets = [2, 0, 0], sizes = [1, 7, 128], strides = [1, 1, 1]} : vector<7x7x128xf32> to vector<1x7x128xf32>
    %700 = vector.shape_cast %699 : vector<1x7x128xf32> to vector<7x128xf32>
    %701 = arith.addf %698, %700 : vector<7x128xf32>
    %c14_276 = arith.constant 14 : index
    %c0_277 = arith.constant 0 : index
    %702 = vector.load %arg11[%c14_276, %c0_277] : memref<49x128xf32, #tpu.memory_space<vmem>>, vector<7x128xf32>
    tpu.vector_store %arg11[%c14_276, %c0_277], %701 {strides = array<i32>} : memref<49x128xf32, #tpu.memory_space<vmem>>, vector<7x128xf32>,
    %c21 = arith.constant 21 : index
    %c0_278 = arith.constant 0 : index
    %703 = vector.load %arg11[%c21, %c0_278] : memref<49x128xf32, #tpu.memory_space<vmem>>, vector<7x128xf32>
    %704 = vector.extract_strided_slice %687 {offsets = [3, 0, 0], sizes = [1, 7, 128], strides = [1, 1, 1]} : vector<7x7x128xf32> to vector<1x7x128xf32>
    %705 = vector.shape_cast %704 : vector<1x7x128xf32> to vector<7x128xf32>
    %706 = arith.addf %703, %705 : vector<7x128xf32>
    %c21_279 = arith.constant 21 : index
    %c0_280 = arith.constant 0 : index
    %707 = vector.load %arg11[%c21_279, %c0_280] : memref<49x128xf32, #tpu.memory_space<vmem>>, vector<7x128xf32>
    tpu.vector_store %arg11[%c21_279, %c0_280], %706 {strides = array<i32>} : memref<49x128xf32, #tpu.memory_space<vmem>>, vector<7x128xf32>,
    %c28 = arith.constant 28 : index
    %c0_281 = arith.constant 0 : index
    %708 = vector.load %arg11[%c28, %c0_281] : memref<49x128xf32, #tpu.memory_space<vmem>>, vector<7x128xf32>
    %709 = vector.extract_strided_slice %687 {offsets = [4, 0, 0], sizes = [1, 7, 128], strides = [1, 1, 1]} : vector<7x7x128xf32> to vector<1x7x128xf32>
    %710 = vector.shape_cast %709 : vector<1x7x128xf32> to vector<7x128xf32>
    %711 = arith.addf %708, %710 : vector<7x128xf32>
    %c28_282 = arith.constant 28 : index
    %c0_283 = arith.constant 0 : index
    %712 = vector.load %arg11[%c28_282, %c0_283] : memref<49x128xf32, #tpu.memory_space<vmem>>, vector<7x128xf32>
    tpu.vector_store %arg11[%c28_282, %c0_283], %711 {strides = array<i32>} : memref<49x128xf32, #tpu.memory_space<vmem>>, vector<7x128xf32>,
    %c35 = arith.constant 35 : index
    %c0_284 = arith.constant 0 : index
    %713 = vector.load %arg11[%c35, %c0_284] : memref<49x128xf32, #tpu.memory_space<vmem>>, vector<7x128xf32>
    %714 = vector.extract_strided_slice %687 {offsets = [5, 0, 0], sizes = [1, 7, 128], strides = [1, 1, 1]} : vector<7x7x128xf32> to vector<1x7x128xf32>
    %715 = vector.shape_cast %714 : vector<1x7x128xf32> to vector<7x128xf32>
    %716 = arith.addf %713, %715 : vector<7x128xf32>
    %c35_285 = arith.constant 35 : index
    %c0_286 = arith.constant 0 : index
    %717 = vector.load %arg11[%c35_285, %c0_286] : memref<49x128xf32, #tpu.memory_space<vmem>>, vector<7x128xf32>
    tpu.vector_store %arg11[%c35_285, %c0_286], %716 {strides = array<i32>} : memref<49x128xf32, #tpu.memory_space<vmem>>, vector<7x128xf32>,
    %c42 = arith.constant 42 : index
    %c0_287 = arith.constant 0 : index
    %718 = vector.load %arg11[%c42, %c0_287] : memref<49x128xf32, #tpu.memory_space<vmem>>, vector<7x128xf32>
    %719 = vector.extract_strided_slice %687 {offsets = [6, 0, 0], sizes = [1, 7, 128], strides = [1, 1, 1]} : vector<7x7x128xf32> to vector<1x7x128xf32>
    %720 = vector.shape_cast %719 : vector<1x7x128xf32> to vector<7x128xf32>
    %721 = arith.addf %718, %720 : vector<7x128xf32>
    %c42_288 = arith.constant 42 : index
    %c0_289 = arith.constant 0 : index
    %722 = vector.load %arg11[%c42_288, %c0_289] : memref<49x128xf32, #tpu.memory_space<vmem>>, vector<7x128xf32>
    tpu.vector_store %arg11[%c42_288, %c0_289], %721 {strides = array<i32>} : memref<49x128xf32, #tpu.memory_space<vmem>>, vector<7x128xf32>,
    %c0_290 = arith.constant 0 : index
    %c0_291 = arith.constant 0 : index
    %723 = vector.load %arg11[%c0_290, %c0_291] : memref<49x128xf32, #tpu.memory_space<vmem>>, vector<49x128xf32>
    %c0_292 = arith.constant 0 : index
    %c0_293 = arith.constant 0 : index
    %724 = vector.load %arg6[%c0_292, %c0_293] : memref<1x128xf32, #tpu.memory_space<vmem>>, vector<1x128xf32>
    %725 = vector.broadcast %724 : vector<1x128xf32> to vector<49x128xf32>
    %726 = arith.addf %723, %725 : vector<49x128xf32>
    %cst_294 = arith.constant 0.000000e+00 : f32
    %727 = vector.broadcast %cst_294 : f32 to vector<49x128xf32>
    %728 = arith.maximumf %726, %727 : vector<49x128xf32>
    %c0_295 = arith.constant 0 : index
    %c0_296 = arith.constant 0 : index
    %729 = vector.load %arg7[%c0_295, %c0_296] : memref<128x32xf32, #tpu.memory_space<vmem>>, vector<128x32xf32>
    %cst_297 = arith.constant dense<0.000000e+00> : vector<49x32xf32>
    %730 = tpu.matmul %728, %729, %cst_297 {dimension_numbers = #tpu.dot_dimension_numbers<[1], [0], [0], [1], [0, 0, 1, 1], [], []>} : vector<49x128xf32>, vector<128x32xf32>, vector<49x32xf32> -> vector<49x32xf32>
    %c0_298 = arith.constant 0 : index
    %c0_299 = arith.constant 0 : index
    %731 = vector.load %arg8[%c0_298, %c0_299] : memref<1x32xf32, #tpu.memory_space<vmem>>, vector<1x32xf32>
    %732 = vector.broadcast %731 : vector<1x32xf32> to vector<49x32xf32>
    %733 = arith.addf %730, %732 : vector<49x32xf32>
    %c0_300 = arith.constant 0 : index
    %c0_301 = arith.constant 0 : index
    %c0_302 = arith.constant 0 : index
    %734 = vector.load %arg9[%c0_300, %c0_301, %c0_302] : memref<1x49x32xf32, #tpu.memory_space<vmem>>, vector<1x49x32xf32>
    %735 = vector.shape_cast %734 : vector<1x49x32xf32> to vector<49x32xf32>
    %736 = vector.shape_cast %733 : vector<49x32xf32> to vector<1x49x32xf32>
    tpu.vector_store %arg9[%c0_300, %c0_301, %c0_302], %736 {strides = array<i32>} : memref<1x49x32xf32, #tpu.memory_space<vmem>>, vector<1x49x32xf32>,
    return
  }
  func.func @transform_0(%arg0: i32) -> (i32, i32, i32) {
    %c0_i32 = arith.constant 0 : i32
    %c0_i32_0 = arith.constant 0 : i32
    %c0_i32_1 = arith.constant 0 : i32
    return %arg0, %c0_i32, %c0_i32_0 : i32, i32, i32
  }
  func.func @transform_1(%arg0: i32) -> (i32, i32) {
    %c0_i32 = arith.constant 0 : i32
    %c0_i32_0 = arith.constant 0 : i32
    %c0_i32_1 = arith.constant 0 : i32
    return %c0_i32, %c0_i32_0 : i32, i32
  }
  func.func @transform_2(%arg0: i32) -> (i32, i32) {
    %c0_i32 = arith.constant 0 : i32
    %c0_i32_0 = arith.constant 0 : i32
    %c0_i32_1 = arith.constant 0 : i32
    return %c0_i32, %c0_i32_0 : i32, i32
  }
  func.func @transform_3(%arg0: i32) -> (i32, i32, i32) {
    %c0_i32 = arith.constant 0 : i32
    %c0_i32_0 = arith.constant 0 : i32
    %c0_i32_1 = arith.constant 0 : i32
    %c0_i32_2 = arith.constant 0 : i32
    return %c0_i32, %c0_i32_0, %c0_i32_1 : i32, i32, i32
  }
  func.func @transform_4(%arg0: i32) -> (i32, i32) {
    %c0_i32 = arith.constant 0 : i32
    %c0_i32_0 = arith.constant 0 : i32
    %c0_i32_1 = arith.constant 0 : i32
    return %c0_i32, %c0_i32_0 : i32, i32
  }
  func.func @transform_5(%arg0: i32) -> (i32, i32) {
    %c0_i32 = arith.constant 0 : i32
    %c0_i32_0 = arith.constant 0 : i32
    %c0_i32_1 = arith.constant 0 : i32
    return %c0_i32, %c0_i32_0 : i32, i32
  }
  func.func @transform_6(%arg0: i32) -> (i32, i32) {
    %c0_i32 = arith.constant 0 : i32
    %c0_i32_0 = arith.constant 0 : i32
    %c0_i32_1 = arith.constant 0 : i32
    return %c0_i32, %c0_i32_0 : i32, i32
  }
  func.func @transform_7(%arg0: i32) -> (i32, i32) {
    %c0_i32 = arith.constant 0 : i32
    %c0_i32_0 = arith.constant 0 : i32
    %c0_i32_1 = arith.constant 0 : i32
    return %c0_i32, %c0_i32_0 : i32, i32
  }
  func.func @transform_8(%arg0: i32) -> (i32, i32, i32) {
    %c0_i32 = arith.constant 0 : i32
    %c0_i32_0 = arith.constant 0 : i32
    %c0_i32_1 = arith.constant 0 : i32
    return %arg0, %c0_i32, %c0_i32_0 : i32, i32, i32
  }
}

</mosaic_0001>

<bundles_post_ra>
// kernel: attention4d_knn_forward.1
= control target key start
LH: loop header
LB: loop body
LE: loop exit
PB: predicated region body
PF: predicated region fallthrough
CT: control target
= control target key end

     0   :  { %s8575_s27 = smov 0   ;;  %s14248_s0 = inlined_call_operand.vmem [shape: f32[2,49,32], index: 0, kind: input, shape index: {}]   ;;  %s14249_s1 = inlined_call_operand.vmem [shape: f32[32,256], index: 1, kind: input, shape index: {}]   ;;  %s14250_s2 = inlined_call_operand.vmem [shape: f32[1,256], index: 2, kind: input, shape index: {}]   ;;  %s14251_s3 = inlined_call_operand.vmem [shape: f32[8,49,49], index: 3, kind: input, shape index: {}]   ;;  %s14252_s4 = inlined_call_operand.vmem [shape: f32[9,128], index: 4, kind: input, shape index: {}]   ;;  %s14253_s5 = inlined_call_operand.vmem [shape: f32[1,128], index: 5, kind: input, shape index: {}]   ;;  %s14254_s6 = inlined_call_operand.vmem [shape: f32[128,32], index: 6, kind: input, shape index: {}]   ;;  %s14255_s7 = inlined_call_operand.vmem [shape: f32[1,32], index: 7, kind: input, shape index: {}]   ;;  %s14256_s8 = inlined_call_operand.vmem [shape: f32[2,49,32], index: 8, kind: output, shape index: {}]  }
   0x1 LB: > { %s7107_s28 = sadd.s32 4294967295, %s8511_s27   ;;  %p7111_p0 = scmp.ge.s32.totalorder %s8511_s27, 1  ;;  %s8511_s27 = sphi %s8575_s27, %s18_s27  }
   0x2   : > { %p262_p1 = scmp.lt.s32.totalorder %s8511_s27, 3 }
   0x4   : > { %p263_p2 = pnand %p7111_p0, %p262_p1 }
   0x6   : > { %266 = sbr.rel (%p263_p2) target bundleno = 3936 (0xf60), region = 52 }
   0xb   : > { %v320_v0 = vld [vmem:[%s14249_s1 + $0x38] sm:$0xff]  ;;  %v319_v1 = vld [vmem:[%s14249_s1 + $0x30] sm:$0xff]  ;;  %v318_v2 = vld [vmem:[%s14249_s1 + $0x28] sm:$0xff]  ;;  %p8594_p3 = scmp.lt.s32.totalorder %s7107_s28, 1  ;;  %v14257_v4 = vmov 0.0   ;;  %vm333_vm0 = vcmask 261120   ;;  %v323_v16 = vlaneseq }
   0xc   : > { %379 = vmatprep.subr.mxu0 %v320_v0  ;;  %v317_v3 = vld [vmem:[%s14249_s1 + $0x20] sm:$0xff]  ;;  %419 = vmatprep.mubr.f32.mxu0 %v14257_v4  ;;  %6417 = vst [vmem:[#allocation2] sm:$0xff] %v14257_v4  ;;  %6418 = vst [vmem:[#allocation2 + $0x8] sm:$0x1] %v14257_v4  ;;  %v316_v5 = vld [vmem:[%s14249_s1 + $0x18] sm:$0xff]  ;;  %s8514_s10 = smov 56  }
   0xd   : > { %6419 = vst [vmem:[#allocation2 + $0x10] sm:$0xff] %v14257_v4  ;;  %6420 = vst [vmem:[#allocation2 + $0x18] sm:$0x1] %v14257_v4  ;;  %380 = vmatpush1.msra.mxu0 %v319_v1  ;;  %s14618_s28 = smov (!%p8594_p3, %s7107_s28), 1  ;;  %7606 = vmatprep.subr.mxu1 %v14257_v4  ;;  %v315_v6 = vld [vmem:[%s14249_s1 + $0x10] sm:$0xff]  ;;  %v314_v7 = vld [vmem:[%s14249_s1 + $0x8] sm:$0xff] }
   0xe   : > { %6421 = vst [vmem:[#allocation2 + $0x20] sm:$0xff] %v14257_v4  ;;  %6422 = vst [vmem:[#allocation2 + $0x28] sm:$0x1] %v14257_v4  ;;  %381 = vmatprep.subr.mxu0 %v318_v2  ;;  %s8251_s22 = smul.u32 56, %s14618_s28  ;;  %v313_v8 = vld [vmem:[%s14249_s1] sm:$0xff]  ;;  %v324_v17 = vshrl.u32 %v323_v16, 7 }
   0xf   : > { %6423 = vst [vmem:[#allocation2 + $0x30] sm:$0xff] %v14257_v4  ;;  %6424 = vst [vmem:[#allocation2 + $0x38] sm:$0x1] %v14257_v4  ;;  %382 = vmatpush1.msra.mxu0 %v317_v3  ;;  %v321_v19 = vld [vmem:[%s14250_s2] sm:$0x3]  ;;  %s8515_s11 = smov 64  }
  0x10   : > { %6425 = vst [vmem:[#allocation2 + $0x40] sm:$0xff] %v14257_v4  ;;  %6426 = vst [vmem:[#allocation2 + $0x48] sm:$0x1] %v14257_v4  ;;  %383 = vmatprep.subr.mxu0 %v316_v5  ;;  %s300_s29 = scalar_lea.vmem %s14248_s0, %s8251_s22  ;;  %v325_v18 = vsub.s32 0, %v324_v17  ;;  %v329_v20 = vsub.s32 1, %v324_v17  ;;  %s8516_s12 = smov 48  }
  0x11   : > { %6427 = vst [vmem:[#allocation2 + $0x50] sm:$0xff] %v14257_v4  ;;  %6428 = vst [vmem:[#allocation2 + $0x58] sm:$0x1] %v14257_v4  ;;  %384 = vmatpush1.msra.mxu0 %v315_v6  ;;  %v306_v9 = vld [vmem:[%s300_s29] sm:$0xff]  ;;  %v307_v10 = vld [vmem:[%s300_s29 + $0x8] sm:$0xff]  ;;  %s8517_s13 = smov 120  }
  0x12   : > { %6429 = vst [vmem:[#allocation2 + $0x60] sm:$0xff] %v14257_v4  ;;  %6430 = vst [vmem:[#allocation2 + $0x68] sm:$0x1] %v14257_v4  ;;  %385 = vmatprep.subr.mxu0 %v314_v7  ;;  %v308_v11 = vld [vmem:[%s300_s29 + $0x10] sm:$0xff]  ;;  %v309_v12 = vld [vmem:[%s300_s29 + $0x18] sm:$0xff]  ;;  %v8661_v21 = vrot.slane %v321_v19, %v325_v18  ;;  %v330_v22 = vrot.slane %v321_v19, %v329_v20  ;;  %s8518_s14 = smov 40  }
  0x13   : > { %6431 = vst [vmem:[#allocation2 + $0x70] sm:$0xff] %v14257_v4  ;;  %6432 = vst [vmem:[#allocation2 + $0x78] sm:$0x1] %v14257_v4  ;;  %386 = vmatpush1.msra.mxu0 %v313_v8  ;;  %v310_v13 = vld [vmem:[%s300_s29 + $0x20] sm:$0xff]  ;;  %v311_v14 = vld [vmem:[%s300_s29 + $0x28] sm:$0xff]  ;;  %s8519_s15 = smov 112  }
  0x14   : > { %6434 = vst [vmem:[#allocation2 + $0x88] sm:$0x1] %v14257_v4  ;;  %7114 = vmatmul.mubr.msk.f32.vlgmr.msra.gmra.mxu0 %vm333_vm0, %v306_v9  ;;  %7641 = vmatprep.subr.mxu0 %v14257_v4  ;;  %v312_v15 = vld [vmem:[%s300_s29 + $0x30] sm:$0x1]  ;;  %s8520_s16 = smov 32   ;;  %s8521_s17 = smov 104  }
  0x15   : > { %425 = vmatprep.mubr.f32.mxu0 %v14257_v4  ;;  %s8522_s18 = smov 24   ;;  %s8523_s19 = smov 96   ;;  %vm1153_vm1 = vcmask 1040384   ;;  %vm8527_vm2 = vmmov 0   ;;  %vm483_vm3 = vcmask 64512   ;;  %vm633_vm4 = vcmask 400384  }
  0x16   : > { %s8524_s20 = smov 80   ;;  %s8525_s21 = smov 88   ;;  %7620 = vmatprep.mubr.msk.f32.mxu1 %vm8527_vm2, %v14257_v4  ;;  %vm652_vm5 = vcmask 393216  }
  0x17   : > { %s8526_s23 = smov 16   ;;  %s8528_s24 = smov 8  }
  0x18   : > { %7115 = vmatmul.mubr.msk.f32.gmra.mxu0 %vm333_vm0, %v307_v10  ;;  %s8529_s25 = smov 72  }
  0x19   : > { %431 = vmatprep.mubr.f32.mxu0 %v14257_v4 }
  0x1c   : > { %7116 = vmatmul.mubr.msk.f32.gmra.mxu0 %vm333_vm0, %v308_v11 }
  0x1d   : > { %437 = vmatprep.mubr.f32.mxu0 %v14257_v4 }
  0x20   : > { %7117 = vmatmul.mubr.msk.f32.gmra.mxu0 %vm333_vm0, %v309_v12 }
  0x21   : > { %443 = vmatprep.mubr.f32.mxu0 %v14257_v4 }
  0x24   : > { %7118 = vmatmul.mubr.msk.f32.gmra.mxu0 %vm333_vm0, %v310_v13 }
  0x25   : > { %449 = vmatprep.mubr.f32.mxu0 %v14257_v4 }
  0x28   : > { %7119 = vmatmul.mubr.msk.f32.gmra.mxu0 %vm333_vm0, %v311_v14 }
  0x29   : > { %455 = vmatprep.mubr.f32.mxu0 %v14257_v4 }
  0x2c   : > { %7120 = vmatmul.mubr.msk.f32.gmra.mxu0 %vm333_vm0, %v312_v15 }
  0x2d   : > { %7655 = vmatprep.mubr.msk.f32.mxu0 %vm8527_vm2, %v14257_v4 }
  0xd4   : > { %v421_v23 = vpop.f32.mrf.mxu0 }
  0xd5   : > { %v8664_v24 = vadd.f32 %v421_v23, %v8661_v21 }
  0xd6   : > { %v423_v25 = vpop.f32.mrf.mxu0 }
  0xd7   : > { %v8666_v26 = vadd.f32 %v423_v25, %v330_v22  ;;  %1280 = vrot.lane.b32.xlu1 %v8664_v24, %s8514_s10  ;;  %469 = vrot.lane.b32.xlu0 %v8664_v24, %s8515_s11 }
  0xd8   : > { %v427_v27 = vpop.f32.mrf.mxu0 }
  0xd9   : > { %14367 = vst [vmem:[#allocation4_spill] sm:$0xff] %v8666_v26  ;;  %6436 = vst [vmem:[#allocation2 + $0x11] sm:$0x7f] %v8666_v26  ;;  %v8716_v43 = vadd.f32 %v427_v27, %v8661_v21 }
  0xda   : > { %6438 = vst [vmem:[#allocation2 + $0x1a] sm:$0x80] %v8666_v26  ;;  %v429_v28 = vpop.f32.mrf.mxu0 }
  0xdb   : > { %v8674_v29 = vadd.f32 %v429_v28, %v330_v22  ;;  %2141 = vrot.lane.b32.xlu1 %v8664_v24, %s8516_s12  ;;  %1266 = vrot.lane.b32.xlu0 %v8664_v24, %s8517_s13 }
  0xdc   : > { %v8680_v30 = vpop.f32.mrf.mxu0 }
  0xdd   : > { %14368 = vst [vmem:[#allocation5_spill] sm:$0xff] %v8674_v29  ;;  %6439 = vst [vmem:[#allocation2 + $0x22] sm:$0x3f] %v8674_v29  ;;  %v8771_v49 = vadd.f32 %v8680_v30, %v8661_v21 }
  0xde   : > { %6441 = vst [vmem:[#allocation2 + $0x2b] sm:$0xc0] %v8674_v29  ;;  %v435_v31 = vpop.f32.mrf.mxu0 }
  0xdf   : > { %v8684_v32 = vadd.f32 %v435_v31, %v330_v22  ;;  %2996 = vrot.lane.b32.xlu1 %v8664_v24, %s8518_s14  ;;  %2127 = vrot.lane.b32.xlu0 %v8664_v24, %s8519_s15 }
  0xe0   : > { %v8690_v33 = vpop.f32.mrf.mxu0 }
  0xe1   : > { %14369 = vst [vmem:[#allocation6_spill] sm:$0xff] %v8684_v32  ;;  %6442 = vst [vmem:[#allocation2 + $0x33] sm:$0x1f] %v8684_v32  ;;  %v8797_v50 = vadd.f32 %v8690_v33, %v8661_v21 }
  0xe2   : > { %6444 = vst [vmem:[#allocation2 + $0x3c] sm:$0xe0] %v8684_v32  ;;  %v441_v34 = vpop.f32.mrf.mxu0 }
  0xe3   : > { %v8694_v35 = vadd.f32 %v441_v34, %v330_v22  ;;  %3851 = vrot.lane.b32.xlu1 %v8664_v24, %s8520_s16  ;;  %2982 = vrot.lane.b32.xlu0 %v8664_v24, %s8521_s17 }
  0xe4   : > { %v445_v36 = vpop.f32.mrf.mxu0 }
  0xe5   : > { %14370 = vst [vmem:[#allocation7_spill] sm:$0xff] %v8694_v35  ;;  %6445 = vst [vmem:[#allocation2 + $0x44] ss:$13 sps:$4 sm:$0xff] %v8694_v35   ;;  %v8702_v37 = vadd.f32 %v445_v36, %v8661_v21 }
  0xe6   : > { %v447_v38 = vpop.f32.mrf.mxu0 }
  0xe7   : > { %v8704_v39 = vadd.f32 %v447_v38, %v330_v22  ;;  %4706 = vrot.lane.b32.xlu1 %v8664_v24, %s8522_s18  ;;  %3837 = vrot.lane.b32.xlu0 %v8664_v24, %s8523_s19 }
  0xe8   : > { %v451_v40 = vpop.f32.mrf.mxu0 }
  0xe9   : > { %14371 = vst [vmem:[#allocation8_spill] sm:$0xff] %v8704_v39  ;;  %6448 = vst [vmem:[#allocation2 + $0x55] sm:$0x7] %v8704_v39  ;;  %v8713_v41 = vadd.f32 %v451_v40, %v8661_v21 }
  0xea   : > { %6450 = vst [vmem:[#allocation2 + $0x5e] sm:$0xf8] %v8704_v39  ;;  %v453_v42 = vpop.f32.mrf.mxu0 }
  0xeb   : > { %v8718_v44 = vadd.f32 %v453_v42, %v330_v22  ;;  %5547 = vrot.lane.b32.xlu1 %v8664_v24, %s8524_s20  ;;  %4692 = vrot.lane.b32.xlu0 %v8664_v24, %s8525_s21 }
  0xec   : > { %v457_v45 = vpop.f32.mrf.mxu0 }
  0xed   : > { %14372 = vst [vmem:[#allocation9_spill] sm:$0xff] %v8718_v44  ;;  %6451 = vst [vmem:[#allocation2 + $0x66] sm:$0x3] %v8718_v44  ;;  %v8727_v46 = vadd.f32 %v457_v45, %v8661_v21 }
  0xee   : > { %6453 = vst [vmem:[#allocation2 + $0x6f] sm:$0xfc] %v8718_v44  ;;  %v459_v47 = vpop.f32.mrf.mxu0 }
  0xef   : > { %v8729_v48 = vadd.f32 %v459_v47, %v330_v22  ;;  %471 = vrot.lane.b32.xlu1 %v8716_v43, %s8515_s11  ;;  %5561 = vrot.lane.b32.xlu0 %v8664_v24, %s8526_s23 }
  0xf1   : > { %14373 = vst [vmem:[#allocation10_spill] sm:$0xff] %v8729_v48  ;;  %6454 = vst [vmem:[#allocation2 + $0x77] sm:$0x1] %v8729_v48  ;;  %7642 = vmatpush3.msk.msra.mxu0 %vm1153_vm1, %v8729_v48 }
  0xf2   : > { %7643 = vmatprep.subr.mxu0 %v14257_v4 }
  0xf3   : > { %7644 = vmatpush3.msra.mxu0 %v8718_v44  ;;  %2143 = vrot.lane.b32.xlu1 %v8716_v43, %s8516_s12 }
  0xf4   : > { %1282 = vrot.lane.b32.xlu0 %v8716_v43, %s8514_s10  ;;  %7645 = vmatprep.subr.mxu0 %v14257_v4 }
  0xf5   : > { %7646 = vmatpush3.msra.mxu0 %v8704_v39 }
  0xf6   : > { %7647 = vmatprep.subr.mxu0 %v14257_v4 }
  0xf7   : > { %7648 = vmatpush3.msra.mxu0 %v8694_v35  ;;  %2998 = vrot.lane.b32.xlu1 %v8716_v43, %s8518_s14 }
  0xf8   : > { %1268 = vrot.lane.b32.xlu0 %v8716_v43, %s8517_s13  ;;  %7649 = vmatprep.subr.mxu0 %v14257_v4 }
  0xf9   : > { %7650 = vmatpush3.msra.mxu0 %v8684_v32 }
  0xfa   : > { %7651 = vmatprep.subr.mxu0 %v14257_v4 }
  0xfb   : > { %7652 = vmatpush3.msra.mxu0 %v8674_v29  ;;  %3853 = vrot.lane.b32.xlu1 %v8716_v43, %s8520_s16 }
  0xfc   : > { %2129 = vrot.lane.b32.xlu0 %v8716_v43, %s8519_s15  ;;  %7653 = vmatprep.subr.mxu0 %v14257_v4 }
  0xfd   : > { %7654 = vmatpush3.msra.mxu0 %v8666_v26 }
  0xfe   : > { %7711 = vmatprep.subr.mxu0 %v14257_v4 }
  0xff   : > { %4708 = vrot.lane.b32.xlu1 %v8716_v43, %s8522_s18 }
 0x100   : > { %2984 = vrot.lane.b32.xlu0 %v8716_v43, %s8521_s17 }
 0x103   : > { %4694 = vrot.lane.b32.xlu1 %v8716_v43, %s8525_s21 }
 0x104   : > { %3839 = vrot.lane.b32.xlu0 %v8716_v43, %s8523_s19 }
 0x107   : > { %5563 = vrot.lane.b32.xlu1 %v8716_v43, %s8526_s23 }
 0x108   : > { %473 = vrot.lane.b32.xlu0 %v8771_v49, %s8515_s11 }
 0x10b   : > { %1284 = vrot.lane.b32.xlu1 %v8771_v49, %s8514_s10 }
 0x10c   : > { %1270 = vrot.lane.b32.xlu0 %v8771_v49, %s8517_s13 }
 0x10f   : > { %2145 = vrot.lane.b32.xlu1 %v8771_v49, %s8516_s12 }
 0x110   : > { %2131 = vrot.lane.b32.xlu0 %v8771_v49, %s8519_s15 }
 0x113   : > { %3000 = vrot.lane.b32.xlu1 %v8771_v49, %s8518_s14 }
 0x114   : > { %2986 = vrot.lane.b32.xlu0 %v8771_v49, %s8521_s17 }
 0x117   : > { %3855 = vrot.lane.b32.xlu1 %v8771_v49, %s8520_s16 }
 0x118   : > { %3841 = vrot.lane.b32.xlu0 %v8771_v49, %s8523_s19 }
 0x11b   : > { %4710 = vrot.lane.b32.xlu1 %v8771_v49, %s8522_s18 }
 0x11c   : > { %4696 = vrot.lane.b32.xlu0 %v8771_v49, %s8525_s21 }
 0x11f   : > { %475 = vrot.lane.b32.xlu1 %v8797_v50, %s8515_s11 }
 0x120   : > { %5565 = vrot.lane.b32.xlu0 %v8771_v49, %s8526_s23 }
 0x123   : > { %2147 = vrot.lane.b32.xlu1 %v8797_v50, %s8516_s12 }
 0x124   : > { %1286 = vrot.lane.b32.xlu0 %v8797_v50, %s8514_s10 }
 0x127   : > { %3002 = vrot.lane.b32.xlu1 %v8797_v50, %s8518_s14 }
 0x128   : > { %1272 = vrot.lane.b32.xlu0 %v8797_v50, %s8517_s13 }
 0x12b   : > { %3857 = vrot.lane.b32.xlu1 %v8797_v50, %s8520_s16 }
 0x12c   : > { %2133 = vrot.lane.b32.xlu0 %v8797_v50, %s8519_s15 }
 0x12f   : > { %4712 = vrot.lane.b32.xlu1 %v8797_v50, %s8522_s18 }
 0x130   : > { %2988 = vrot.lane.b32.xlu0 %v8797_v50, %s8521_s17 }
 0x133   : > { %4698 = vrot.lane.b32.xlu1 %v8797_v50, %s8525_s21 }
 0x134   : > { %3843 = vrot.lane.b32.xlu0 %v8797_v50, %s8523_s19 }
 0x137   : > { %5567 = vrot.lane.b32.xlu1 %v8797_v50, %s8526_s23 }
 0x138   : > { %1274 = vrot.lane.b32.xlu0 %v8702_v37, %s8517_s13 }
 0x13b   : > { %477 = vrot.lane.b32.xlu1 %v8702_v37, %s8515_s11 }
 0x13c   : > { %2135 = vrot.lane.b32.xlu0 %v8702_v37, %s8519_s15 }
 0x13f   : > { %1288 = vrot.lane.b32.xlu1 %v8702_v37, %s8514_s10 }
 0x140   : > { %2990 = vrot.lane.b32.xlu0 %v8702_v37, %s8521_s17 }
 0x143   : > { %2149 = vrot.lane.b32.xlu1 %v8702_v37, %s8516_s12 }
 0x144   : > { %3845 = vrot.lane.b32.xlu0 %v8702_v37, %s8523_s19 }
 0x147   : > { %3004 = vrot.lane.b32.xlu1 %v8702_v37, %s8518_s14 }
 0x148   : > { %4700 = vrot.lane.b32.xlu0 %v8702_v37, %s8525_s21 }
 0x149   : > { %v8847_v51 = vpop.permute.xlu1 %1280  ;;  %v8849_v52 = vpop.permute.xlu0 %469 }
 0x14b   : > { %3859 = vrot.lane.b32.xlu1 %v8702_v37, %s8520_s16 }
 0x14c   : > { %479 = vrot.lane.b32.xlu0 %v8713_v41, %s8515_s11 }
 0x14d   : > { %v8855_v53 = vpop.permute.xlu1 %2141  ;;  %v8857_v54 = vpop.permute.xlu0 %1266 }
 0x14f   : > { %4714 = vrot.lane.b32.xlu1 %v8702_v37, %s8522_s18 }
 0x150   : > { %1290 = vrot.lane.b32.xlu0 %v8713_v41, %s8514_s10 }
 0x151   : > { %v8863_v55 = vpop.permute.xlu1 %2996  ;;  %v8865_v56 = vpop.permute.xlu0 %2127 }
 0x153   : > { %5569 = vrot.lane.b32.xlu1 %v8702_v37, %s8526_s23 }
 0x154   : > { %1276 = vrot.lane.b32.xlu0 %v8713_v41, %s8517_s13 }
 0x155   : > { %v8871_v57 = vpop.permute.xlu1 %3851  ;;  %v8873_v58 = vpop.permute.xlu0 %2982 }
 0x157   : > { %2151 = vrot.lane.b32.xlu1 %v8713_v41, %s8516_s12 }
 0x158   : > { %2137 = vrot.lane.b32.xlu0 %v8713_v41, %s8519_s15 }
 0x159   : > { %v8879_v59 = vpop.permute.xlu1 %4706  ;;  %v8881_v60 = vpop.permute.xlu0 %3837 }
 0x15a   : > { %14374 = vst [vmem:[#allocation11_spill] sm:$0xff] %v8879_v59 }
 0x15b   : > { %3006 = vrot.lane.b32.xlu1 %v8713_v41, %s8518_s14 }
 0x15c   : > { %2992 = vrot.lane.b32.xlu0 %v8713_v41, %s8521_s17 }
 0x15d   : > { %v8887_v61 = vpop.permute.xlu1 %5547  ;;  %v8889_v62 = vpop.permute.xlu0 %4692 }
 0x15e   : > { %14375 = vst [vmem:[#allocation12_spill] sm:$0xff] %v8887_v61  ;;  %14376 = vst [vmem:[#allocation13_spill] sm:$0xff] %v8889_v62 }
 0x15f   : > { %3861 = vrot.lane.b32.xlu1 %v8713_v41, %s8520_s16 }
 0x160   : > { %3847 = vrot.lane.b32.xlu0 %v8713_v41, %s8523_s19 }
 0x161   : > { %v8895_v63 = vpop.permute.xlu1 %471  ;;  %v8897_v0 = vpop.permute.xlu0 %5561 }
 0x162   : > { %14377 = vst [vmem:[#allocation14_spill] sm:$0xff] %v8897_v0 }
 0x163   : > { %4716 = vrot.lane.b32.xlu1 %v8713_v41, %s8522_s18 }
 0x164   : > { %5571 = vrot.lane.b32.xlu0 %v8713_v41, %s8526_s23 }
 0x165   : > { %v8903_v1 = vpop.permute.xlu1 %2143 }
 0x166   : > { %v8905_v2 = vpop.permute.xlu0 %1282 }
 0x167   : > { %4702 = vrot.lane.b32.xlu1 %v8713_v41, %s8525_s21 }
 0x168   : > { %481 = vrot.lane.b32.xlu0 %v8727_v46, %s8515_s11 }
 0x169   : > { %v8911_v3 = vpop.permute.xlu1 %2998 }
 0x16a   : > { %v8913_v5 = vpop.permute.xlu0 %1268 }
 0x16b   : > { %1292 = vrot.lane.b32.xlu1 %v8727_v46, %s8514_s10 }
 0x16c   : > { %1278 = vrot.lane.b32.xlu0 %v8727_v46, %s8517_s13 }
 0x16d   : > { %v8919_v6 = vpop.permute.xlu1 %3853 }
 0x16e   : > { %v8921_v7 = vpop.permute.xlu0 %2129 }
 0x16f   : > { %2153 = vrot.lane.b32.xlu1 %v8727_v46, %s8516_s12 }
 0x170   : > { %2139 = vrot.lane.b32.xlu0 %v8727_v46, %s8519_s15 }
 0x171   : > { %v8927_v8 = vpop.permute.xlu1 %4708 }
 0x172   : > { %14378 = vst [vmem:[#allocation15_spill] sm:$0xff] %v8927_v8  ;;  %v8929_v9 = vpop.permute.xlu0 %2984 }
 0x173   : > { %3008 = vrot.lane.b32.xlu1 %v8727_v46, %s8518_s14  ;;  %s305_s14 = scalar_lea.vmem %s14256_s8, %s8251_s22 }
 0x174   : > { %2994 = vrot.lane.b32.xlu0 %v8727_v46, %s8521_s17 }
 0x175   : > { %v8937_v10 = vpop.permute.xlu1 %4694 }
 0x176   : > { %14379 = vst [vmem:[#allocation16_spill] sm:$0xff] %v8937_v10  ;;  %v8941_v11 = vpop.permute.xlu0 %3839 }
 0x177   : > { %3863 = vrot.lane.b32.xlu1 %v8727_v46, %s8520_s16 }
 0x178   : > { %3849 = vrot.lane.b32.xlu0 %v8727_v46, %s8523_s19 }
 0x179   : > { %v8947_v12 = vpop.permute.xlu1 %5563 }
 0x17a   : > { %14380 = vst [vmem:[#allocation17_spill] sm:$0xff] %v8947_v12  ;;  %v8949_v13 = vpop.permute.xlu0 %473 }
 0x17b   : > { %4718 = vrot.lane.b32.xlu1 %v8727_v46, %s8522_s18 }
 0x17c   : > { %4704 = vrot.lane.b32.xlu0 %v8727_v46, %s8525_s21 }
 0x17d   : > { %v8955_v14 = vpop.permute.xlu1 %1284 }
 0x17e   : > { %v8957_v15 = vpop.permute.xlu0 %1270 }
 0x17f   : > { %5573 = vrot.lane.b32.xlu1 %v8727_v46, %s8526_s23 }
 0x180   : > { %6008 = vrot.lane.b32.xlu0 %v8727_v46, %s8528_s24 }
 0x181   : > { %v8962_v16 = vpop.permute.xlu1 %2145 }
 0x182   : > { %v8964_v17 = vpop.permute.xlu0 %2131 }
 0x183   : > { %5549 = vrot.lane.b32.xlu1 %v8716_v43, %s8524_s20 }
 0x184   : > { %6006 = vrot.lane.b32.xlu0 %v8713_v41, %s8528_s24 }
 0x185   : > { %v8969_v18 = vpop.permute.xlu1 %3000 }
 0x186   : > { %v8971_v19 = vpop.permute.xlu0 %2986 }
 0x187   : > { %5551 = vrot.lane.b32.xlu1 %v8771_v49, %s8524_s20 }
 0x188   : > { %6004 = vrot.lane.b32.xlu0 %v8702_v37, %s8528_s24 }
 0x189   : > { %v8976_v20 = vpop.permute.xlu1 %3855 }
 0x18a   : > { %v8978_v21 = vpop.permute.xlu0 %3841 }
 0x18b   : > { %5553 = vrot.lane.b32.xlu1 %v8797_v50, %s8524_s20 }
 0x18c   : > { %6002 = vrot.lane.b32.xlu0 %v8797_v50, %s8528_s24 }
 0x18d   : > { %v8983_v22 = vpop.permute.xlu1 %4710 }
 0x18e   : > { %14381 = vst [vmem:[#allocation18_spill] sm:$0xff] %v8983_v22  ;;  %v8985_v23 = vpop.permute.xlu0 %4696 }
 0x18f   : > { %14382 = vst [vmem:[#allocation19_spill] sm:$0xff] %v8985_v23  ;;  %5555 = vrot.lane.b32.xlu1 %v8702_v37, %s8524_s20 }
 0x190   : > { %5557 = vrot.lane.b32.xlu0 %v8713_v41, %s8524_s20 }
 0x191   : > { %v8991_v25 = vpop.permute.xlu1 %475 }
 0x192   : > { %v8993_v27 = vpop.permute.xlu0 %5565 }
 0x193   : > { %14383 = vst [vmem:[#allocation20_spill] sm:$0xff] %v8993_v27  ;;  %6000 = vrot.lane.b32.xlu1 %v8771_v49, %s8528_s24 }
 0x194   : > { %5559 = vrot.lane.b32.xlu0 %v8727_v46, %s8524_s20 }
 0x195   : > { %v8998_v28 = vpop.permute.xlu1 %2147 }
 0x196   : > { %v9000_v30 = vpop.permute.xlu0 %1286 }
 0x197   : > { %5998 = vrot.lane.b32.xlu1 %v8716_v43, %s8528_s24 }
 0x198   : > { %5982 = vrot.lane.b32.xlu0 %v8664_v24, %s8529_s25 }
 0x199   : > { %v9004_v31 = vpop.permute.xlu1 %3002 }
 0x19a   : > { %v9006_v33 = vpop.permute.xlu0 %1272 }
 0x19b   : > { %5996 = vrot.lane.b32.xlu1 %v8664_v24, %s8528_s24 }
 0x19c   : > { %5986 = vrot.lane.b32.xlu0 %v8771_v49, %s8529_s25 }
 0x19d   : > { %v9010_v34 = vpop.permute.xlu1 %3857 }
 0x19e   : > { %v9012_v36 = vpop.permute.xlu0 %2133 }
 0x19f   : > { %5984 = vrot.lane.b32.xlu1 %v8716_v43, %s8529_s25 }
 0x1a0   : > { %5990 = vrot.lane.b32.xlu0 %v8702_v37, %s8529_s25 }
 0x1a1   : > { %v9016_v38 = vpop.permute.xlu1 %4712 }
 0x1a2   : > { %14384 = vst [vmem:[#allocation21_spill] sm:$0xff] %v9016_v38  ;;  %v9018_v40 = vpop.permute.xlu0 %2988 }
 0x1a3   : > { %5988 = vrot.lane.b32.xlu1 %v8797_v50, %s8529_s25 }
 0x1a4   : > { %5994 = vrot.lane.b32.xlu0 %v8727_v46, %s8529_s25 }
 0x1a5   : > { %v9022_v42 = vpop.permute.xlu1 %4698 }
 0x1a6   : > { %14385 = vst [vmem:[#allocation22_spill] sm:$0xff] %v9022_v42  ;;  %v9024_v45 = vpop.permute.xlu0 %3843 }
 0x1a7   : > { %5992 = vrot.lane.b32.xlu1 %v8713_v41, %s8529_s25 }
 0x1a8   : > { %1959 = vrot.lane.b32.xlu0 %v8729_v48, %s8519_s15 }
 0x1a9   : > { %v9029_v47 = vpop.permute.xlu1 %5567 }
 0x1aa   : > { %14386 = vst [vmem:[#allocation23_spill] sm:$0xff] %v9029_v47  ;;  %v9031_v4 = vpop.permute.xlu0 %1274 }
 0x1ab   : > { %1957 = vrot.lane.b32.xlu1 %v8718_v44, %s8519_s15 }
 0x1ac   : > { %1955 = vrot.lane.b32.xlu0 %v8704_v39, %s8519_s15 }
 0x1ad   : > { %v478_v61 = vpop.permute.xlu1 %477 }
 0x1ae   : > { %v9037_v0 = vpop.permute.xlu0 %2135 }
 0x1af   : > { %1951 = vrot.lane.b32.xlu1 %v8684_v32, %s8519_s15 }
 0x1b0   : > { %1953 = vrot.lane.b32.xlu0 %v8694_v35, %s8519_s15 }
 0x1b1   : > { %v1289_v27 = vpop.permute.xlu1 %1288 }
 0x1b2   : > { %v9043_v12 = vpop.permute.xlu0 %2990 }
 0x1b3   : > { %1947 = vrot.lane.b32.xlu1 %v8666_v26, %s8519_s15 }
 0x1b4   : > { %1949 = vrot.lane.b32.xlu0 %v8674_v29, %s8519_s15 }
 0x1b5   : > { %v9055_v32 = vpop.permute.xlu1 %2149 }
 0x1b6   : > { %v9049_v47 = vpop.permute.xlu0 %3845 }
 0x1b7   : > { %14387 = vst [vmem:[#allocation24_spill] sm:$0xff] %v9049_v47  ;;  %2814 = vrot.lane.b32.xlu1 %v8729_v48, %s8523_s19  ;;  %v14390_v47 = vmov 0.0  }
 0x1b8   : > { %2812 = vrot.lane.b32.xlu0 %v8718_v44, %s8523_s19 }
 0x1b9   : > { %v9063_v29 = vpop.permute.xlu1 %3004 }
 0x1ba   : > { %v9057_v42 = vpop.permute.xlu0 %4700 }
 0x1bb   : > { %14388 = vst [vmem:[#allocation25_spill] sm:$0xff] %v9057_v42  ;;  %2810 = vrot.lane.b32.xlu1 %v8704_v39, %s8523_s19 }
 0x1bd   : > { %v9065_v10 = vpop.permute.xlu1 %3859 }
 0x1be   : > { %v480_v26 = vpop.permute.xlu0 %479 }
 0x1bf   : > { %2808 = vrot.lane.b32.xlu1 %v8694_v35, %s8523_s19 }
 0x1c1   : > { %v9071_v44 = vpop.permute.xlu1 %4714 }
 0x1c2   : > { %v1291_v23 = vpop.permute.xlu0 %1290 }
 0x1c5   : > { %v9075_v42 = vpop.permute.xlu1 %5569 }
 0x1c6   : > { %v9067_v48 = vpop.permute.xlu0 %1276  ;;  %14389 = vst [vmem:[#allocation26_spill] sm:$0xff] %v9075_v42 }
 0x1c9   : > { %v2152_v35 = vpop.permute.xlu1 %2151 }
 0x1ca   : > { %v9069_v62 = vpop.permute.xlu0 %2137 }
 0x1cd   : > { %v9083_v38 = vpop.permute.xlu1 %3006 }
 0x1ce   : > { %v9073_v59 = vpop.permute.xlu0 %2992 }
 0x1d1   : > { %v9088_v42 = vpop.permute.xlu1 %3861 }
 0x1d2   : > { %v9077_v39 = vpop.permute.xlu0 %3847 }
 0x1d6   : > { %v9079_v8 = vpop.permute.xlu0 %5571 }
 0x1da   : > { %v482_v22 = vpop.permute.xlu0 %481 }
 0x1db   : > { %7607 = vmatpush3.xpose.msk.msra.mxu1 %vm483_vm3, %v482_v22  ;;  %v9094_v22 = vpop.permute.xlu1 %4716 }
 0x1dc   : > { %7608 = vmatprep.subr.mxu1 %v14390_v47 }
 0x1df   : > { %7609 = vmatpush3.xpose.msk.msra.mxu1 %vm483_vm3, %v480_v26  ;;  %v9101_v26 = vpop.permute.xlu1 %4702 }
 0x1e0   : > { %7610 = vmatprep.subr.mxu1 %v14390_v47 }
 0x1e3   : > { %7611 = vmatpush3.xpose.msk.msra.mxu1 %vm483_vm3, %v478_v61  ;;  %v1293_v61 = vpop.permute.xlu1 %1292 }
 0x1e4   : > { %7612 = vmatprep.subr.mxu1 %v14390_v47 }
 0x1e7   : > { %7613 = vmatpush3.xpose.msk.msra.mxu1 %vm483_vm3, %v8991_v25 }
 0x1e8   : > { %7614 = vmatprep.subr.mxu1 %v14390_v47 }
 0x1eb   : > { %7615 = vmatpush3.xpose.msk.msra.mxu1 %vm483_vm3, %v8949_v13 }
 0x1ec   : > { %7616 = vmatprep.subr.mxu1 %v14390_v47 }
 0x1ef   : > { %7617 = vmatpush3.xpose.msk.msra.mxu1 %vm483_vm3, %v8895_v63  ;;  %v14404_v63 = vld [vmem:[#allocation17_spill] sm:$0xff] }
 0x1f0   : > { %7618 = vmatprep.subr.mxu1 %v14390_v47 }
 0x1f3   : > { %7619 = vmatpush3.xpose.msk.msra.mxu1 %vm483_vm3, %v8849_v52  ;;  %v14397_v52 = vld [vmem:[#allocation16_spill] sm:$0xff] }
 0x1f4   : > { %7676 = vmatprep.subr.mxu1 %v14390_v47 }
 0x1f6   : > { %7621 = vmatmul.mubr.msk.f32.vlgmr.msra.gmra.mxu1 %vm483_vm3, %v8664_v24  ;;  %v2154_v24 = vpop.permute.xlu1 %2153 }
 0x1f7   : > { %7677 = vmatpush3.xpose.msk.msra.mxu1 %vm483_vm3, %v1293_v61  ;;  %7623 = vmatprep.mubr.msk.f32.mxu1 %vm8527_vm2, %v14390_v47 }
 0x1f8   : > { %7678 = vmatprep.subr.mxu1 %v14390_v47 }
 0x1fa   : > { %7624 = vmatmul.mubr.msk.f32.gmra.mxu1 %vm483_vm3, %v8716_v43  ;;  %v14391_v43 = vld [vmem:[#allocation21_spill] sm:$0xff] }
 0x1fb   : > { %7679 = vmatpush3.xpose.msk.msra.mxu1 %vm483_vm3, %v1291_v23  ;;  %7626 = vmatprep.mubr.msk.f32.mxu1 %vm8527_vm2, %v14390_v47  ;;  %v620_v23 = vld [vmem:[%s14251_s3 + $0x8] sm:$0xff] }
 0x1fc   : > { %7680 = vmatprep.subr.mxu1 %v14390_v47 }
 0x1fe   : > { %7627 = vmatmul.mubr.msk.f32.gmra.mxu1 %vm483_vm3, %v8771_v49 }
 0x1ff   : > { %7681 = vmatpush3.xpose.msk.msra.mxu1 %vm483_vm3, %v1289_v27  ;;  %7629 = vmatprep.mubr.msk.f32.mxu1 %vm8527_vm2, %v14390_v47 }
 0x200   : > { %7682 = vmatprep.subr.mxu1 %v14390_v47 }
 0x202   : > { %7630 = vmatmul.mubr.msk.f32.gmra.mxu1 %vm483_vm3, %v8797_v50  ;;  %v14395_v50 = vld [vmem:[#allocation11_spill] sm:$0xff] }
 0x203   : > { %7683 = vmatpush3.xpose.msk.msra.mxu1 %vm483_vm3, %v9000_v30  ;;  %7632 = vmatprep.mubr.msk.f32.mxu1 %vm8527_vm2, %v14390_v47 }
 0x204   : > { %7684 = vmatprep.subr.mxu1 %v14390_v47 }
 0x206   : > { %7633 = vmatmul.mubr.msk.f32.gmra.mxu1 %vm483_vm3, %v8702_v37 }
 0x207   : > { %7685 = vmatpush3.xpose.msk.msra.mxu1 %vm483_vm3, %v8955_v14  ;;  %7635 = vmatprep.mubr.msk.f32.mxu1 %vm8527_vm2, %v14390_v47 }
 0x208   : > { %7686 = vmatprep.subr.mxu1 %v14390_v47 }
 0x20a   : > { %7636 = vmatmul.mubr.msk.f32.gmra.mxu1 %vm483_vm3, %v8713_v41 }
 0x20b   : > { %7687 = vmatpush3.xpose.msk.msra.mxu1 %vm483_vm3, %v8905_v2  ;;  %7638 = vmatprep.mubr.msk.f32.mxu1 %vm8527_vm2, %v14390_v47 }
 0x20c   : > { %7688 = vmatprep.subr.mxu1 %v14390_v47 }
 0x20e   : > { %7639 = vmatmul.mubr.msk.f32.gmra.mxu1 %vm483_vm3, %v8727_v46  ;;  %v14392_v46 = vld [vmem:[#allocation24_spill] sm:$0xff] }
 0x20f   : > { %7689 = vmatpush3.xpose.msk.msra.mxu1 %vm483_vm3, %v8847_v51  ;;  %7690 = vmatprep.mubr.msk.f32.mxu1 %vm8527_vm2, %v14390_v47  ;;  %v14396_v51 = vld [vmem:[#allocation13_spill] sm:$0xff] }
 0x210   : > { %7746 = vmatprep.subr.mxu1 %v14390_v47 }
 0x212   : > { %7691 = vmatmul.mubr.msk.f32.vlgmr.msra.gmra.mxu1 %vm483_vm3, %v8857_v54  ;;  %v14399_v54 = vld [vmem:[#allocation26_spill] sm:$0xff] }
 0x213   : > { %7747 = vmatpush3.xpose.msk.msra.mxu1 %vm483_vm3, %v2154_v24  ;;  %7693 = vmatprep.mubr.msk.f32.mxu1 %vm8527_vm2, %v14390_v47 }
 0x214   : > { %7748 = vmatprep.subr.mxu1 %v14390_v47 }
 0x216   : > { %7694 = vmatmul.mubr.msk.f32.gmra.mxu1 %vm483_vm3, %v8913_v5 }
 0x217   : > { %7749 = vmatpush3.xpose.msk.msra.mxu1 %vm483_vm3, %v2152_v35  ;;  %7696 = vmatprep.mubr.msk.f32.mxu1 %vm8527_vm2, %v14390_v47 }
 0x218   : > { %7750 = vmatprep.subr.mxu1 %v14390_v47 }
 0x21a   : > { %7697 = vmatmul.mubr.msk.f32.gmra.mxu1 %vm483_vm3, %v8957_v15 }
 0x21b   : > { %7751 = vmatpush3.xpose.msk.msra.mxu1 %vm483_vm3, %v9055_v32  ;;  %7699 = vmatprep.mubr.msk.f32.mxu1 %vm8527_vm2, %v14390_v47  ;;  %v3009_v32 = vpop.permute.xlu1 %3008 }
 0x21c   : > { %7752 = vmatprep.subr.mxu1 %v14390_v47 }
 0x21e   : > { %7700 = vmatmul.mubr.msk.f32.gmra.mxu1 %vm483_vm3, %v9006_v33 }
 0x21f   : > { %7753 = vmatpush3.xpose.msk.msra.mxu1 %vm483_vm3, %v8998_v28  ;;  %7702 = vmatprep.mubr.msk.f32.mxu1 %vm8527_vm2, %v14390_v47  ;;  %v3864_v35 = vpop.permute.xlu1 %3863 }
 0x220   : > { %7754 = vmatprep.subr.mxu1 %v14390_v47 }
 0x222   : > { %7703 = vmatmul.mubr.msk.f32.gmra.mxu1 %vm483_vm3, %v9031_v4  ;;  %v1279_v4 = vpop.permute.xlu0 %1278 }
 0x223   : > { %7755 = vmatpush3.xpose.msk.msra.mxu1 %vm483_vm3, %v8962_v16  ;;  %7705 = vmatprep.mubr.msk.f32.mxu1 %vm8527_vm2, %v14390_v47  ;;  %v4719_v41 = vpop.permute.xlu1 %4718  ;;  %v619_v16 = vld [vmem:[%s14251_s3] sm:$0xff] }
 0x224   : > { %7756 = vmatprep.subr.mxu1 %v14390_v47 }
 0x226   : > { %7706 = vmatmul.mubr.msk.f32.gmra.mxu1 %vm483_vm3, %v9067_v48  ;;  %v14394_v48 = vld [vmem:[#allocation15_spill] sm:$0xff] }
 0x227   : > { %7757 = vmatpush3.xpose.msk.msra.mxu1 %vm483_vm3, %v8903_v1  ;;  %7708 = vmatprep.mubr.msk.f32.mxu1 %vm8527_vm2, %v14390_v47 }
 0x228   : > { %7758 = vmatprep.subr.mxu1 %v14390_v47 }
 0x22a   : > { %7709 = vmatmul.mubr.msk.f32.gmra.mxu1 %vm483_vm3, %v1279_v4 }
 0x22b   : > { %7759 = vmatpush3.xpose.msk.msra.mxu1 %vm483_vm3, %v8855_v53  ;;  %7760 = vmatprep.mubr.msk.f32.mxu1 %vm8527_vm2, %v14390_v47  ;;  %v14398_v53 = vld [vmem:[#allocation19_spill] sm:$0xff] }
 0x22c   : > { %7816 = vmatprep.subr.mxu1 %v14390_v47 }
 0x22e   : > { %7761 = vmatmul.mubr.msk.f32.vlgmr.msra.gmra.mxu1 %vm483_vm3, %v8865_v56 }
 0x22f   : > { %7817 = vmatpush3.xpose.msk.msra.mxu1 %vm483_vm3, %v3009_v32  ;;  %7763 = vmatprep.mubr.msk.f32.mxu1 %vm8527_vm2, %v14390_v47 }
 0x230   : > { %7818 = vmatprep.subr.mxu1 %v14390_v47 }
 0x232   : > { %7764 = vmatmul.mubr.msk.f32.gmra.mxu1 %vm483_vm3, %v8921_v7 }
 0x233   : > { %7819 = vmatpush3.xpose.msk.msra.mxu1 %vm483_vm3, %v9083_v38  ;;  %7766 = vmatprep.mubr.msk.f32.mxu1 %vm8527_vm2, %v14390_v47 }
 0x234   : > { %7820 = vmatprep.subr.mxu1 %v14390_v47 }
 0x236   : > { %7767 = vmatmul.mubr.msk.f32.gmra.mxu1 %vm483_vm3, %v8964_v17 }
 0x237   : > { %7821 = vmatpush3.xpose.msk.msra.mxu1 %vm483_vm3, %v9063_v29  ;;  %7769 = vmatprep.mubr.msk.f32.mxu1 %vm8527_vm2, %v14390_v47  ;;  %v2140_v29 = vpop.permute.xlu0 %2139 }
 0x238   : > { %7822 = vmatprep.subr.mxu1 %v14390_v47 }
 0x23a   : > { %7770 = vmatmul.mubr.msk.f32.gmra.mxu1 %vm483_vm3, %v9012_v36 }
 0x23b   : > { %7823 = vmatpush3.xpose.msk.msra.mxu1 %vm483_vm3, %v9004_v31  ;;  %7772 = vmatprep.mubr.msk.f32.mxu1 %vm8527_vm2, %v14390_v47  ;;  %v2995_v37 = vpop.permute.xlu0 %2994 }
 0x23c   : > { %7824 = vmatprep.subr.mxu1 %v14390_v47 }
 0x23e   : > { %7773 = vmatmul.mubr.msk.f32.gmra.mxu1 %vm483_vm3, %v9037_v0  ;;  %v9378_v0 = vld [vmem:[#allocation2] sm:$0xff] }
 0x23f   : > { %7825 = vmatpush3.xpose.msk.msra.mxu1 %vm483_vm3, %v8969_v18  ;;  %7775 = vmatprep.mubr.msk.f32.mxu1 %vm8527_vm2, %v14390_v47  ;;  %v3850_v49 = vpop.permute.xlu0 %3849 }
 0x240   : > { %7826 = vmatprep.subr.mxu1 %v14390_v47 }
 0x242   : > { %7776 = vmatmul.mubr.msk.f32.gmra.mxu1 %vm483_vm3, %v9069_v62 }
 0x243   : > { %7827 = vmatpush3.xpose.msk.msra.mxu1 %vm483_vm3, %v8911_v3  ;;  %7778 = vmatprep.mubr.msk.f32.mxu1 %vm8527_vm2, %v14390_v47  ;;  %v4705_v56 = vpop.permute.xlu0 %4704  ;;  %v14405_v3 = vld [vmem:[#allocation14_spill] sm:$0xff] }
 0x244   : > { %7828 = vmatprep.subr.mxu1 %v14390_v47 }
 0x246   : > { %7779 = vmatmul.mubr.msk.f32.gmra.mxu1 %vm483_vm3, %v2140_v29 }
 0x247   : > { %7829 = vmatpush3.xpose.msk.msra.mxu1 %vm483_vm3, %v8863_v55  ;;  %7830 = vmatprep.mubr.msk.f32.mxu1 %vm8527_vm2, %v14390_v47  ;;  %v14400_v55 = vld [vmem:[#allocation22_spill] sm:$0xff]  ;;  %v6009_v62 = vpop.permute.xlu0 %6008 }
 0x248   : > { %7886 = vmatprep.subr.mxu1 %v14390_v47 }
 0x24a   : > { %7831 = vmatmul.mubr.msk.f32.vlgmr.msra.gmra.mxu1 %vm483_vm3, %v8873_v58 }
 0x24b   : > { %7887 = vmatpush3.xpose.msk.msra.mxu1 %vm483_vm3, %v3864_v35  ;;  %7833 = vmatprep.mubr.msk.f32.mxu1 %vm8527_vm2, %v14390_v47  ;;  %v6007_v2 = vpop.permute.xlu0 %6006  ;;  %v623_v35 = vld [vmem:[%s14251_s3 + $0x20] sm:$0xff] }
 0x24c   : > { %7888 = vmatprep.subr.mxu1 %v14390_v47 }
 0x24e   : > { %7834 = vmatmul.mubr.msk.f32.gmra.mxu1 %vm483_vm3, %v8929_v9 }
 0x24f   : > { %7889 = vmatpush3.xpose.msk.msra.mxu1 %vm483_vm3, %v9088_v42  ;;  %7836 = vmatprep.mubr.msk.f32.mxu1 %vm8527_vm2, %v14390_v47  ;;  %v6005_v7 = vpop.permute.xlu0 %6004 }
 0x250   : > { %7890 = vmatprep.subr.mxu1 %v14390_v47 }
 0x252   : > { %7837 = vmatmul.mubr.msk.f32.gmra.mxu1 %vm483_vm3, %v8971_v19 }
 0x253   : > { %7891 = vmatpush3.xpose.msk.msra.mxu1 %vm483_vm3, %v9065_v10  ;;  %7839 = vmatprep.mubr.msk.f32.mxu1 %vm8527_vm2, %v14390_v47  ;;  %v6003_v9 = vpop.permute.xlu0 %6002 }
 0x254   : > { %7892 = vmatprep.subr.mxu1 %v14390_v47 }
 0x256   : > { %7840 = vmatmul.mubr.msk.f32.gmra.mxu1 %vm483_vm3, %v9018_v40 }
 0x257   : > { %7893 = vmatpush3.xpose.msk.msra.mxu1 %vm483_vm3, %v9010_v34  ;;  %7842 = vmatprep.mubr.msk.f32.mxu1 %vm8527_vm2, %v14390_v47  ;;  %v621_v34 = vld [vmem:[%s14251_s3 + $0x10] sm:$0xff] }
 0x258   : > { %7894 = vmatprep.subr.mxu1 %v14390_v47 }
 0x25a   : > { %7843 = vmatmul.mubr.msk.f32.gmra.mxu1 %vm483_vm3, %v9043_v12 }
 0x25b   : > { %7895 = vmatpush3.xpose.msk.msra.mxu1 %vm483_vm3, %v8976_v20  ;;  %7845 = vmatprep.mubr.msk.f32.mxu1 %vm8527_vm2, %v14390_v47 }
 0x25c   : > { %7896 = vmatprep.subr.mxu1 %v14390_v47 }
 0x25e   : > { %7846 = vmatmul.mubr.msk.f32.gmra.mxu1 %vm483_vm3, %v9073_v59  ;;  %v14402_v59 = vld [vmem:[#allocation25_spill] sm:$0xff] }
 0x25f   : > { %7897 = vmatpush3.xpose.msk.msra.mxu1 %vm483_vm3, %v8919_v6  ;;  %7848 = vmatprep.mubr.msk.f32.mxu1 %vm8527_vm2, %v14390_v47  ;;  %v14406_v6 = vld [vmem:[#allocation12_spill] sm:$0xff] }
 0x260   : > { %7898 = vmatprep.subr.mxu1 %v14390_v47 }
 0x262   : > { %7849 = vmatmul.mubr.msk.f32.gmra.mxu1 %vm483_vm3, %v2995_v37 }
 0x263   : > { %7899 = vmatpush3.xpose.msk.msra.mxu1 %vm483_vm3, %v8871_v57  ;;  %7900 = vmatprep.mubr.msk.f32.mxu1 %vm8527_vm2, %v14390_v47  ;;  %v14401_v57 = vld [vmem:[#allocation23_spill] sm:$0xff] }
 0x264   : > { %7956 = vmatprep.subr.mxu1 %v14390_v47 }
 0x266   : > { %7901 = vmatmul.mubr.msk.f32.vlgmr.msra.gmra.mxu1 %vm483_vm3, %v8881_v60  ;;  %v14403_v60 = vld [vmem:[#allocation20_spill] sm:$0xff] }
 0x267   : > { %7957 = vmatpush3.xpose.msk.msra.mxu1 %vm483_vm3, %v4719_v41  ;;  %7903 = vmatprep.mubr.msk.f32.mxu1 %vm8527_vm2, %v14390_v47 }
 0x268   : > { %7958 = vmatprep.subr.mxu1 %v14390_v47 }
 0x26a   : > { %7904 = vmatmul.mubr.msk.f32.gmra.mxu1 %vm483_vm3, %v8941_v11  ;;  %v5558_v11 = vpop.permute.xlu0 %5557 }
 0x26b   : > { %7959 = vmatpush3.xpose.msk.msra.mxu1 %vm483_vm3, %v9094_v22  ;;  %7906 = vmatprep.mubr.msk.f32.mxu1 %vm8527_vm2, %v14390_v47  ;;  %v622_v22 = vld [vmem:[%s14251_s3 + $0x18] sm:$0xff] }
 0x26c   : > { %7960 = vmatprep.subr.mxu1 %v14390_v47 }
 0x26e   : > { %7907 = vmatmul.mubr.msk.f32.gmra.mxu1 %vm483_vm3, %v8978_v21  ;;  %v5560_v13 = vpop.permute.xlu0 %5559 }
 0x26f   : > { %7961 = vmatpush3.xpose.msk.msra.mxu1 %vm483_vm3, %v9071_v44  ;;  %7909 = vmatprep.mubr.msk.f32.mxu1 %vm8527_vm2, %v14390_v47  ;;  %v14393_v44 = vld [vmem:[#allocation18_spill] sm:$0xff] }
 0x270   : > { %7962 = vmatprep.subr.mxu1 %v14390_v47 }
 0x272   : > { %7910 = vmatmul.mubr.msk.f32.gmra.mxu1 %vm483_vm3, %v9024_v45  ;;  %v5983_v19 = vpop.permute.xlu0 %5982 }
 0x273   : > { %7963 = vmatpush3.xpose.msk.msra.mxu1 %vm483_vm3, %v14391_v43  ;;  %7912 = vmatprep.mubr.msk.f32.mxu1 %vm8527_vm2, %v14390_v47 }
 0x274   : > { %7964 = vmatprep.subr.mxu1 %v14390_v47 }
 0x276   : > { %7913 = vmatmul.mubr.msk.f32.gmra.mxu1 %vm483_vm3, %v14392_v46  ;;  %v5987_v42 = vpop.permute.xlu0 %5986 }
 0x277   : > { %7965 = vmatpush3.xpose.msk.msra.mxu1 %vm483_vm3, %v14393_v44  ;;  %7915 = vmatprep.mubr.msk.f32.mxu1 %vm8527_vm2, %v14390_v47 }
 0x278   : > { %7966 = vmatprep.subr.mxu1 %v14390_v47 }
 0x27a   : > { %7916 = vmatmul.mubr.msk.f32.gmra.mxu1 %vm483_vm3, %v9077_v39  ;;  %v5574_v39 = vpop.permute.xlu1 %5573  ;;  %v5991_v46 = vpop.permute.xlu0 %5990 }
 0x27b   : > { %7967 = vmatpush3.xpose.msk.msra.mxu1 %vm483_vm3, %v14394_v48  ;;  %7918 = vmatprep.mubr.msk.f32.mxu1 %vm8527_vm2, %v14390_v47 }
 0x27c   : > { %7968 = vmatprep.subr.mxu1 %v14390_v47 }
 0x27e   : > { %7919 = vmatmul.mubr.msk.f32.gmra.mxu1 %vm483_vm3, %v3850_v49  ;;  %v5550_v58 = vpop.permute.xlu1 %5549  ;;  %v624_v49 = vld [vmem:[%s14251_s3 + $0x28] sm:$0xff] }
 0x27f   : > { %7969 = vmatpush3.xpose.msk.msra.mxu1 %vm483_vm3, %v14395_v50  ;;  %7970 = vmatprep.mubr.msk.f32.mxu1 %vm8527_vm2, %v14390_v47 }
 0x280   : > { %8026 = vmatprep.subr.mxu1 %v14390_v47 }
 0x282   : > { %7971 = vmatmul.mubr.msk.f32.vlgmr.msra.gmra.mxu1 %vm483_vm3, %v14396_v51  ;;  %v5552_v1 = vpop.permute.xlu1 %5551 }
 0x283   : > { %8027 = vmatpush3.xpose.msk.msra.mxu1 %vm483_vm3, %v5574_v39  ;;  %7973 = vmatprep.mubr.msk.f32.mxu1 %vm8527_vm2, %v14390_v47 }
 0x284   : > { %8028 = vmatprep.subr.mxu1 %v14390_v47 }
 0x286   : > { %7974 = vmatmul.mubr.msk.f32.gmra.mxu1 %vm483_vm3, %v14397_v52  ;;  %v5554_v5 = vpop.permute.xlu1 %5553 }
 0x287   : > { %8029 = vmatpush3.xpose.msk.msra.mxu1 %vm483_vm3, %v9079_v8  ;;  %7976 = vmatprep.mubr.msk.f32.mxu1 %vm8527_vm2, %v14390_v47 }
 0x288   : > { %8030 = vmatprep.subr.mxu1 %v14390_v47 }
 0x28a   : > { %7977 = vmatmul.mubr.msk.f32.gmra.mxu1 %vm483_vm3, %v14398_v53  ;;  %v5556_v8 = vpop.permute.xlu1 %5555 }
 0x28b   : > { %8031 = vmatpush3.xpose.msk.msra.mxu1 %vm483_vm3, %v14399_v54  ;;  %7979 = vmatprep.mubr.msk.f32.mxu1 %vm8527_vm2, %v14390_v47 }
 0x28c   : > { %8032 = vmatprep.subr.mxu1 %v14390_v47 }
 0x28e   : > { %7980 = vmatmul.mubr.msk.f32.gmra.mxu1 %vm483_vm3, %v14400_v55  ;;  %v6001_v10 = vpop.permute.xlu1 %6000  ;;  %v625_v55 = vld [vmem:[%s14251_s3 + $0x30] sm:$0x1] }
 0x28f   : > { %8033 = vmatpush3.xpose.msk.msra.mxu1 %vm483_vm3, %v14401_v57  ;;  %7982 = vmatprep.mubr.msk.f32.mxu1 %vm8527_vm2, %v14390_v47 }
 0x290   : > { %8034 = vmatprep.subr.mxu1 %v14390_v47 }
 0x292   : > { %7983 = vmatmul.mubr.msk.f32.gmra.mxu1 %vm483_vm3, %v14402_v59  ;;  %v5999_v12 = vpop.permute.xlu1 %5998  ;;  %v5995_v59 = vpop.permute.xlu0 %5994 }
 0x293   : > { %8035 = vmatpush3.xpose.msk.msra.mxu1 %vm483_vm3, %v14403_v60  ;;  %7985 = vmatprep.mubr.msk.f32.mxu1 %vm8527_vm2, %v14390_v47 }
 0x294   : > { %8036 = vmatprep.subr.mxu1 %v14390_v47 }
 0x296   : > { %7986 = vmatmul.mubr.msk.f32.gmra.mxu1 %vm483_vm3, %v9101_v26  ;;  %v5997_v14 = vpop.permute.xlu1 %5996 }
 0x297   : > { %8037 = vmatpush3.xpose.msk.msra.mxu1 %vm483_vm3, %v14404_v63  ;;  %7988 = vmatprep.mubr.msk.f32.mxu1 %vm8527_vm2, %v9378_v0 }
 0x298   : > { %8038 = vmatprep.subr.mxu1 %v9378_v0 }
 0x29a   : > { %7989 = vmatmul.mubr.msk.f32.gmra.mxu1 %vm483_vm3, %v4705_v56  ;;  %v5985_v30 = vpop.permute.xlu1 %5984 }
 0x29b   : > { %8039 = vmatpush3.xpose.msk.msra.mxu1 %vm483_vm3, %v14405_v3  ;;  %8040 = vmatprep.mubr.msk.f32.mxu1 %vm8527_vm2, %v9378_v0 }
 0x29c   : > { %8096 = vmatprep.subr.mxu1 %v9378_v0 }
 0x29e   : > { %8041 = vmatmul.mubr.msk.f32.vlgmr.msra.gmra.mxu1 %vm483_vm3, %v14406_v6  ;;  %v5989_v4 = vpop.permute.xlu1 %5988 }
 0x29f   : > { %8097 = vmatpush3.xpose.msk.msra.mxu1 %vm483_vm3, %v6009_v62  ;;  %8043 = vmatprep.mubr.msk.f32.mxu1 %vm8527_vm2, %v9378_v0 }
 0x2a0   : > { %8098 = vmatprep.subr.mxu1 %v9378_v0 }
 0x2a2   : > { %8044 = vmatmul.mubr.msk.f32.gmra.mxu1 %vm483_vm3, %v5550_v58  ;;  %v5993_v52 = vpop.permute.xlu1 %5992 }
 0x2a3   : > { %8099 = vmatpush3.xpose.msk.msra.mxu1 %vm483_vm3, %v6007_v2  ;;  %8046 = vmatprep.mubr.msk.f32.mxu1 %vm8527_vm2, %v9378_v0 }
 0x2a4   : > { %8100 = vmatprep.subr.mxu1 %v9378_v0 }
 0x2a6   : > { %8047 = vmatmul.mubr.msk.f32.gmra.mxu1 %vm483_vm3, %v5552_v1 }
 0x2a7   : > { %8101 = vmatpush3.xpose.msk.msra.mxu1 %vm483_vm3, %v6005_v7  ;;  %8049 = vmatprep.mubr.msk.f32.mxu1 %vm8527_vm2, %v9378_v0 }
 0x2a8   : > { %8102 = vmatprep.subr.mxu1 %v9378_v0 }
 0x2aa   : > { %8050 = vmatmul.mubr.msk.f32.gmra.mxu1 %vm483_vm3, %v5554_v5 }
 0x2ab   : > { %8103 = vmatpush3.xpose.msk.msra.mxu1 %vm483_vm3, %v6003_v9  ;;  %8052 = vmatprep.mubr.msk.f32.mxu1 %vm8527_vm2, %v9378_v0  ;;  %v14414_v9 = vld [vmem:[#allocation5_spill] sm:$0xff] }
 0x2ac   : > { %8104 = vmatprep.subr.mxu1 %v9378_v0 }
 0x2ae   : > { %8053 = vmatmul.mubr.msk.f32.gmra.mxu1 %vm483_vm3, %v5556_v8 }
 0x2af   : > { %8105 = vmatpush3.xpose.msk.msra.mxu1 %vm483_vm3, %v6001_v10  ;;  %8055 = vmatprep.mubr.msk.f32.mxu1 %vm8527_vm2, %v9378_v0 }
 0x2b0   : > { %8106 = vmatprep.subr.mxu1 %v9378_v0 }
 0x2b2   : > { %8056 = vmatmul.mubr.msk.f32.gmra.mxu1 %vm483_vm3, %v5558_v11 }
 0x2b3   : > { %8107 = vmatpush3.xpose.msk.msra.mxu1 %vm483_vm3, %v5999_v12  ;;  %8058 = vmatprep.mubr.msk.f32.mxu1 %vm8527_vm2, %v9378_v0 }
 0x2b4   : > { %8108 = vmatprep.subr.mxu1 %v9378_v0 }
 0x2b6   : > { %v578_v15 = vpop.f32.mrf.mxu1  ;;  %8059 = vmatmul.mubr.msk.f32.gmra.mxu1 %vm483_vm3, %v5560_v13 }
 0x2b7   : > { %v612_v17 = vmul.f32 0.35355338, %v578_v15  ;;  %8109 = vmatpush3.xpose.msk.msra.mxu1 %vm483_vm3, %v5997_v14  ;;  %8110 = vmatprep.mubr.msk.f32.mxu1 %vm8527_vm2, %v9378_v0  ;;  %v14415_v14 = vld [vmem:[#allocation6_spill] sm:$0xff] }
 0x2b8   : > { %v7622_v18 = vpop.f32.mrf.mxu1  ;;  %8219 = vmatprep.subr.mxu1 %v9378_v0 }
 0x2b9   : > { %v9428_v20 = vadd.f32 %v619_v16, %v612_v17 }
 0x2ba   : > { %v583_v21 = vpop.f32.mrf.mxu1  ;;  %8111 = vmatmul.mubr.msk.f32.vlgmr.msra.gmra.mxu1 %vm483_vm3, %v5983_v19 }
 0x2bb   : > { %14407 = vst [vmem:[#allocation21_spill] sm:$0xff] %v9428_v20  ;;  %v613_v25 = vmul.f32 0.35355338, %v583_v21  ;;  %v634_v27 = vsel %vm633_vm4, %v9428_v20, -inf  ;;  %8113 = vmatprep.mubr.msk.f32.mxu1 %vm8527_vm2, %v9378_v0 }
 0x2bc   : > { %635 = vmax.xlane.f32.xlu1 %v634_v27  ;;  %v7625_v28 = vpop.f32.mrf.mxu1 }
 0x2bd   : > { %v9438_v31 = vadd.f32 %v620_v23, %v613_v25 }
 0x2be   : > { %v588_v33 = vpop.f32.mrf.mxu1  ;;  %8114 = vmatmul.mubr.msk.f32.gmra.mxu1 %vm483_vm3, %v5985_v30  ;;  %v7157_v30 = vld [vmem:[%s14251_s3 + $0x38] sm:$0xff] }
 0x2bf   : > { %14408 = vst [vmem:[#allocation24_spill] sm:$0xff] %v9438_v31  ;;  %v614_v36 = vmul.f32 0.35355338, %v588_v33  ;;  %v637_v38 = vsel %vm633_vm4, %v9438_v31, -inf  ;;  %8116 = vmatprep.mubr.msk.f32.mxu1 %vm8527_vm2, %v9378_v0 }
 0x2c0   : > { %638 = vmax.xlane.f32.xlu0 %v637_v38  ;;  %v7628_v40 = vpop.f32.mrf.mxu1  ;;  %v7158_v38 = vld [vmem:[%s14251_s3 + $0x40] sm:$0xff] }
 0x2c1   : > { %v9448_v45 = vadd.f32 %v621_v34, %v614_v36 }
 0x2c2   : > { %v593_v47 = vpop.f32.mrf.mxu1  ;;  %8117 = vmatmul.mubr.msk.f32.gmra.mxu1 %vm483_vm3, %v5987_v42 }
 0x2c3   : > { %14409 = vst [vmem:[#allocation18_spill] sm:$0xff] %v9448_v45  ;;  %v615_v26 = vmul.f32 0.35355338, %v593_v47  ;;  %v640_v61 = vsel %vm633_vm4, %v9448_v45, -inf  ;;  %8119 = vmatprep.mubr.msk.f32.mxu1 %vm8527_vm2, %v9378_v0  ;;  %v7159_v47 = vld [vmem:[%s14251_s3 + $0x48] sm:$0xff] }
 0x2c4   : > { %641 = vmax.xlane.f32.xlu0 %v640_v61  ;;  %v7631_v24 = vpop.f32.mrf.mxu1 }
 0x2c5   : > { %v9458_v32 = vadd.f32 %v622_v22, %v615_v26 }
 0x2c6   : > { %v598_v29 = vpop.f32.mrf.mxu1  ;;  %8120 = vmatmul.mubr.msk.f32.gmra.mxu1 %vm483_vm3, %v5989_v4 }
 0x2c7   : > { %14410 = vst [vmem:[#allocation15_spill] sm:$0xff] %v9458_v32  ;;  %v616_v37 = vmul.f32 0.35355338, %v598_v29  ;;  %v643_v41 = vsel %vm633_vm4, %v9458_v32, -inf  ;;  %8122 = vmatprep.mubr.msk.f32.mxu1 %vm8527_vm2, %v9378_v0 }
 0x2c8   : > { %644 = vmax.xlane.f32.xlu1 %v643_v41  ;;  %v7634_v43 = vpop.f32.mrf.mxu1  ;;  %v7161_v41 = vld [vmem:[%s14251_s3 + $0x58] sm:$0xff] }
 0x2c9   : > { %v9468_v44 = vadd.f32 %v623_v35, %v616_v37  ;;  %v7160_v37 = vld [vmem:[%s14251_s3 + $0x50] sm:$0xff] }
 0x2ca   : > { %v603_v48 = vpop.f32.mrf.mxu1  ;;  %8123 = vmatmul.mubr.msk.f32.gmra.mxu1 %vm483_vm3, %v5991_v46 }
 0x2cb   : > { %14411 = vst [vmem:[#allocation11_spill] sm:$0xff] %v9468_v44  ;;  %v617_v50 = vmul.f32 0.35355338, %v603_v48  ;;  %v646_v39 = vsel %vm633_vm4, %v9468_v44, -inf  ;;  %8125 = vmatprep.mubr.msk.f32.mxu1 %vm8527_vm2, %v9378_v0 }
 0x2cc   : > { %647 = vmax.xlane.f32.xlu0 %v646_v39  ;;  %v7637_v51 = vpop.f32.mrf.mxu1  ;;  %v7162_v39 = vld [vmem:[%s14251_s3 + $0x60] sm:$0xff] }
 0x2cd   : > { %v9478_v53 = vadd.f32 %v624_v49, %v617_v50 }
 0x2ce   : > { %v608_v54 = vpop.f32.mrf.mxu1  ;;  %8126 = vmatmul.mubr.msk.f32.gmra.mxu1 %vm483_vm3, %v5993_v52 }
 0x2cf   : > { %14412 = vst [vmem:[#allocation13_spill] sm:$0xff] %v9478_v53  ;;  %v618_v56 = vmul.f32 0.35355338, %v608_v54  ;;  %v649_v57 = vsel %vm633_vm4, %v9478_v53, -inf  ;;  %8128 = vmatprep.mubr.msk.f32.mxu1 %vm8527_vm2, %v9378_v0 }
 0x2d0   : > { %650 = vmax.xlane.f32.xlu1 %v649_v57  ;;  %v7640_v58 = vpop.f32.mrf.mxu1 }
 0x2d1   : > { %v9488_v60 = vadd.f32 %v625_v55, %v618_v56  ;;  %v7163_v55 = vld [vmem:[%s14251_s3 + $0x68] sm:$0x1] }
 0x2d2   : > { %v1388_v62 = vpop.f32.mrf.mxu1  ;;  %8129 = vmatmul.mubr.msk.f32.gmra.mxu1 %vm483_vm3, %v5995_v59 }
 0x2d3   : > { %14413 = vst [vmem:[#allocation16_spill] sm:$0xff] %v9488_v60  ;;  %v653_v63 = vsel %vm652_vm5, %v9488_v60, -inf  ;;  %8204 = vmatprep.mubr.msk.f32.mxu1 %vm8527_vm2, %v9378_v0  ;;  %v1422_v27 = vmul.f32 0.35355338, %v1388_v62  ;;  %v7186_v62 = vld [vmem:[%s14251_s3 + $0x70] sm:$0xff] }
 0x2d4   : > { %654 = vmax.xlane.f32.xlu0 %v653_v63  ;;  %v7692_v1 = vpop.f32.mrf.mxu1 }
 0x2d5   : > { %v9502_v36 = vadd.f32 %v7157_v30, %v1422_v27 }
 0x2d6   : > { %v1393_v2 = vpop.f32.mrf.mxu1 }
 0x2d7   : > { %v1423_v34 = vmul.f32 0.35355338, %v1393_v2  ;;  %14416 = vst [vmem:[#allocation19_spill] sm:$0xff] %v9502_v36  ;;  %v1444_v35 = vsel %vm633_vm4, %v9502_v36, -inf }
 0x2d8   : > { %v7695_v3 = vpop.f32.mrf.mxu1 }
 0x2d9   : > { %v9510_v26 = vadd.f32 %v7158_v38, %v1423_v34 }
 0x2da   : > { %v1398_v5 = vpop.f32.mrf.mxu1 }
 0x2db   : > { %v1424_v40 = vmul.f32 0.35355338, %v1398_v5  ;;  %14417 = vst [vmem:[#allocation26_spill] sm:$0xff] %v9510_v26  ;;  %v1447_v48 = vsel %vm633_vm4, %v9510_v26, -inf  ;;  %v7187_v5 = vld [vmem:[%s14251_s3 + $0x78] sm:$0xff] }
 0x2dc   : > { %v7698_v6 = vpop.f32.mrf.mxu1 }
 0x2dd   : > { %v9512_v61 = vadd.f32 %v7159_v47, %v1424_v40  ;;  %v7191_v47 = vld [vmem:[%s14251_s3 + $0x98] sm:$0xff] }
 0x2de   : > { %v1403_v7 = vpop.f32.mrf.mxu1 }
 0x2df   : > { %14418 = vst [vmem:[#allocation22_spill] sm:$0xff] %v9512_v61  ;;  %v1425_v24 = vmul.f32 0.35355338, %v1403_v7  ;;  %v1450_v54 = vsel %vm633_vm4, %v9512_v61, -inf }
 0x2e0   : > { %v7701_v8 = vpop.f32.mrf.mxu1 }
 0x2e1   : > { %2804 = vrot.lane.b32.xlu1 %v14414_v9, %s8523_s19  ;;  %v9524_v49 = vadd.f32 %v7160_v37, %v1425_v24  ;;  %v7192_v37 = vld [vmem:[%s14251_s3 + $0xa0] sm:$0x1] }
 0x2e2   : > { %v1408_v10 = vpop.f32.mrf.mxu1 }
 0x2e3   : > { %v1426_v4 = vmul.f32 0.35355338, %v1408_v10  ;;  %14419 = vst [vmem:[#allocation23_spill] sm:$0xff] %v9524_v49  ;;  %v1453_v2 = vsel %vm633_vm4, %v9524_v49, -inf }
 0x2e4   : > { %v7704_v11 = vpop.f32.mrf.mxu1 }
 0x2e5   : > { %v9526_v50 = vadd.f32 %v7161_v41, %v1426_v4 }
 0x2e6   : > { %v1413_v12 = vpop.f32.mrf.mxu1 }
 0x2e7   : > { %v1427_v46 = vmul.f32 0.35355338, %v1413_v12  ;;  %14420 = vst [vmem:[#allocation25_spill] sm:$0xff] %v9526_v50  ;;  %v1456_v3 = vsel %vm633_vm4, %v9526_v50, -inf }
 0x2e8   : > { %v7707_v13 = vpop.f32.mrf.mxu1 }
 0x2e9   : > { %v9536_v57 = vadd.f32 %v7162_v39, %v1427_v46 }
 0x2ea   : > { %2806 = vrot.lane.b32.xlu0 %v14415_v14, %s8523_s19  ;;  %v1418_v15 = vpop.f32.mrf.mxu1 }
 0x2eb   : > { %v1428_v51 = vmul.f32 0.35355338, %v1418_v15  ;;  %14421 = vst [vmem:[#allocation20_spill] sm:$0xff] %v9536_v57  ;;  %v1459_v8 = vsel %vm633_vm4, %v9536_v57, -inf }
 0x2ec   : > { %v7710_v0 = vpop.f32.mrf.mxu1 }
 0x2ed   : > { %v9538_v59 = vadd.f32 %v7163_v55, %v1428_v51  ;;  %v7188_v0 = vld [vmem:[%s14251_s3 + $0x80] sm:$0xff] }
 0x2ee   : > { %v2249_v16 = vpop.f32.mrf.mxu1 }
 0x2ef   : > { %v2283_v58 = vmul.f32 0.35355338, %v2249_v16  ;;  %14422 = vst [vmem:[#allocation17_spill] sm:$0xff] %v9538_v59  ;;  %v1462_v15 = vsel %vm652_vm5, %v9538_v59, -inf  ;;  %v7189_v16 = vld [vmem:[%s14251_s3 + $0x88] sm:$0xff] }
 0x2f0   : > { %v7762_v17 = vpop.f32.mrf.mxu1 }
 0x2f1   : > { %v9550_v7 = vadd.f32 %v7186_v62, %v2283_v58 }
 0x2f2   : > { %v2254_v18 = vpop.f32.mrf.mxu1 }
 0x2f3   : > { %v2284_v63 = vmul.f32 0.35355338, %v2254_v18  ;;  %14423 = vst [vmem:[#allocation14_spill] sm:$0xff] %v9550_v7  ;;  %v2305_v18 = vsel %vm633_vm4, %v9550_v7, -inf }
 0x2f4   : > { %v7765_v19 = vpop.f32.mrf.mxu1 }
 0x2f5   : > { %v9554_v10 = vadd.f32 %v7187_v5, %v2284_v63 }
 0x2f6   : > { %v2259_v21 = vpop.f32.mrf.mxu1 }
 0x2f7   : > { %14424 = vst [vmem:[#allocation12_spill] sm:$0xff] %v9554_v10  ;;  %v2285_v11 = vmul.f32 0.35355338, %v2259_v21  ;;  %v2308_v27 = vsel %vm633_vm4, %v9554_v10, -inf }
 0x2f8   : > { %v7768_v23 = vpop.f32.mrf.mxu1 }
 0x2f9   : > { %v9566_v19 = vadd.f32 %v7188_v0, %v2285_v11 }
 0x2fa   : > { %v2264_v25 = vpop.f32.mrf.mxu1 }
 0x2fb   : > { %v2286_v12 = vmul.f32 0.35355338, %v2264_v25  ;;  %14425 = vst [vmem:[#allocation6_spill] sm:$0xff] %v9566_v19 }
 0x2fc   : > { %v7771_v28 = vpop.f32.mrf.mxu1 }
 0x2fd   : > { %v9568_v21 = vadd.f32 %v7189_v16, %v2286_v12  ;;  %v7190_v28 = vld [vmem:[%s14251_s3 + $0x90] sm:$0xff] }
 0x2fe   : > { %v2269_v33 = vpop.f32.mrf.mxu1 }
 0x2ff   : > { %14426 = vst [vmem:[#allocation27_spill] sm:$0xff] %v9568_v21  ;;  %v2287_v23 = vmul.f32 0.35355338, %v2269_v33  ;;  %v2314_v33 = vsel %vm633_vm4, %v9568_v21, -inf }
 0x300   : > { %v7774_v42 = vpop.f32.mrf.mxu1 }
 0x301   : > { %v9575_v34 = vadd.f32 %v7190_v28, %v2287_v23  ;;  %v2311_v42 = vsel %vm633_vm4, %v9566_v19, -inf }
 0x302   : > { %v2274_v22 = vpop.f32.mrf.mxu1 }
 0x303   : > { %14427 = vst [vmem:[#allocation28_spill] sm:$0xff] %v9575_v34  ;;  %v2288_v38 = vmul.f32 0.35355338, %v2274_v22  ;;  %v2317_v22 = vsel %vm633_vm4, %v9575_v34, -inf }
 0x304   : > { %v7777_v29 = vpop.f32.mrf.mxu1 }
 0x305   : > { %1445 = vmax.xlane.f32.xlu1 %v1444_v35  ;;  %v9584_v4 = vadd.f32 %v7191_v47, %v2288_v38 }
 0x306   : > { %v2279_v43 = vpop.f32.mrf.mxu1 }
 0x307   : > { %14428 = vst [vmem:[#allocation29_spill] sm:$0xff] %v9584_v4  ;;  %v2289_v29 = vmul.f32 0.35355338, %v2279_v43  ;;  %v2320_v51 = vsel %vm633_vm4, %v9584_v4, -inf  ;;  %v7215_v43 = vld [vmem:[%s14251_s3 + $0xa8] sm:$0xff] }
 0x308   : > { %v7780_v52 = vpop.f32.mrf.mxu1 }
 0x309   : > { %1448 = vmax.xlane.f32.xlu0 %v1447_v48  ;;  %1451 = vmax.xlane.f32.xlu1 %v1450_v54  ;;  %v9591_v46 = vadd.f32 %v7192_v37, %v2289_v29  ;;  %v9598_v54 = vpop.permute.xlu1 %1957  ;;  %v7220_v37 = vld [vmem:[%s14251_s3 + $0xd0] sm:$0xff] }
 0x30a   : > { %v3104_v56 = vpop.f32.mrf.mxu1  ;;  %14430 = vst [vmem:[#allocation31_spill] sm:$0xff] %v9598_v54 }
 0x30b   : > { %14429 = vst [vmem:[#allocation30_spill] sm:$0xff] %v9591_v46  ;;  %v3138_v48 = vmul.f32 0.35355338, %v3104_v56  ;;  %v2323_v63 = vsel %vm652_vm5, %v9591_v46, -inf  ;;  %v7216_v56 = vld [vmem:[%s14251_s3 + $0xb0] sm:$0xff] }
 0x30c   : > { %v7832_v1 = vpop.f32.mrf.mxu1 }
 0x30d   : > { %1454 = vmax.xlane.f32.xlu0 %v1453_v2  ;;  %1457 = vmax.xlane.f32.xlu1 %v1456_v3  ;;  %v9600_v55 = vadd.f32 %v7215_v43, %v3138_v48  ;;  %v9611_v11 = vpop.permute.xlu1 %1951 }
 0x30e   : > { %v3109_v6 = vpop.f32.mrf.mxu1  ;;  %14433 = vst [vmem:[#allocation34_spill] sm:$0xff] %v9611_v11 }
 0x30f   : > { %14431 = vst [vmem:[#allocation32_spill] sm:$0xff] %v9600_v55  ;;  %v3139_v58 = vmul.f32 0.35355338, %v3109_v6  ;;  %v7217_v6 = vld [vmem:[%s14251_s3 + $0xb8] sm:$0xff] }
 0x310   : > { %v7835_v13 = vpop.f32.mrf.mxu1 }
 0x311   : > { %1460 = vmax.xlane.f32.xlu0 %v1459_v8  ;;  %1463 = vmax.xlane.f32.xlu1 %v1462_v15  ;;  %v9607_v2 = vadd.f32 %v7216_v56, %v3139_v58  ;;  %v3160_v8 = vsel %vm633_vm4, %v9600_v55, -inf }
 0x312   : > { %v3114_v17 = vpop.f32.mrf.mxu1 }
 0x313   : > { %14432 = vst [vmem:[#allocation33_spill] sm:$0xff] %v9607_v2  ;;  %v3140_v3 = vmul.f32 0.35355338, %v3114_v17  ;;  %v3163_v16 = vsel %vm633_vm4, %v9607_v2, -inf  ;;  %v9620_v17 = vpop.permute.xlu0 %1959 }
 0x314   : > { %v7838_v25 = vpop.f32.mrf.mxu1  ;;  %14435 = vst [vmem:[#allocation36_spill] sm:$0xff] %v9620_v17 }
 0x315   : > { %2306 = vmax.xlane.f32.xlu0 %v2305_v18  ;;  %2309 = vmax.xlane.f32.xlu1 %v2308_v27  ;;  %v9616_v13 = vadd.f32 %v7217_v6, %v3140_v3  ;;  %v7218_v18 = vld [vmem:[%s14251_s3 + $0xc0] sm:$0xff]  ;;  %v9625_v25 = vpop.permute.xlu1 %1947 }
 0x316   : > { %v3119_v30 = vpop.f32.mrf.mxu1  ;;  %14436 = vst [vmem:[#allocation37_spill] sm:$0xff] %v9625_v25  ;;  %v7244_v6 = vld [vmem:[%s14251_s3 + $0xe0] sm:$0xff] }
 0x317   : > { %14434 = vst [vmem:[#allocation35_spill] sm:$0xff] %v9616_v13  ;;  %v3141_v15 = vmul.f32 0.35355338, %v3119_v30  ;;  %v3166_v30 = vsel %vm633_vm4, %v9616_v13, -inf }
 0x318   : > { %v7841_v40 = vpop.f32.mrf.mxu1 }
 0x319   : > { %2312 = vmax.xlane.f32.xlu0 %v2311_v42  ;;  %2315 = vmax.xlane.f32.xlu1 %v2314_v33  ;;  %v9627_v27 = vadd.f32 %v7218_v18, %v3141_v15  ;;  %v7219_v40 = vld [vmem:[%s14251_s3 + $0xc8] sm:$0xff]  ;;  %v9634_v33 = vpop.permute.xlu0 %1955 }
 0x31a   : > { %v3124_v24 = vpop.f32.mrf.mxu1  ;;  %14438 = vst [vmem:[#allocation39_spill] sm:$0xff] %v9634_v33 }
 0x31b   : > { %14437 = vst [vmem:[#allocation38_spill] sm:$0xff] %v9627_v27  ;;  %v3142_v28 = vmul.f32 0.35355338, %v3124_v24  ;;  %v9640_v24 = vpop.permute.xlu1 %2814 }
 0x31c   : > { %v7844_v35 = vpop.f32.mrf.mxu1  ;;  %14440 = vst [vmem:[#allocation41_spill] sm:$0xff] %v9640_v24 }
 0x31d   : > { %2318 = vmax.xlane.f32.xlu0 %v2317_v22  ;;  %v9636_v47 = vadd.f32 %v7219_v40, %v3142_v28  ;;  %v3169_v22 = vsel %vm633_vm4, %v9627_v27, -inf }
 0x31e   : > { %v3129_v41 = vpop.f32.mrf.mxu1 }
 0x31f   : > { %14439 = vst [vmem:[#allocation40_spill] sm:$0xff] %v9636_v47  ;;  %v3143_v29 = vmul.f32 0.35355338, %v3129_v41  ;;  %v3172_v58 = vsel %vm633_vm4, %v9636_v47, -inf  ;;  %v9649_v41 = vpop.permute.xlu0 %1953  ;;  %v9654_v56 = vpop.permute.xlu1 %2810 }
 0x320   : > { %v7847_v39 = vpop.f32.mrf.mxu1  ;;  %14442 = vst [vmem:[#allocation43_spill] sm:$0xff] %v9649_v41  ;;  %14443 = vst [vmem:[#allocation44_spill] sm:$0xff] %v9654_v56 }
 0x321   : > { %2321 = vmax.xlane.f32.xlu0 %v2320_v51  ;;  %v9645_v39 = vadd.f32 %v7220_v37, %v3143_v29 }
 0x322   : > { %v3134_v52 = vpop.f32.mrf.mxu1 }
 0x323   : > { %14441 = vst [vmem:[#allocation42_spill] sm:$0xff] %v9645_v39  ;;  %v3144_v51 = vmul.f32 0.35355338, %v3134_v52  ;;  %v3175_v52 = vsel %vm633_vm4, %v9645_v39, -inf }
 0x324   : > { %v7850_v62 = vpop.f32.mrf.mxu1 }
 0x325   : > { %2324 = vmax.xlane.f32.xlu0 %v2323_v63  ;;  %v7221_v62 = vld [vmem:[%s14251_s3 + $0xd8] sm:$0x1] }
 0x326   : > { %v3959_v1 = vpop.f32.mrf.mxu1  ;;  %v9656_v3 = vadd.f32 %v7221_v62, %v3144_v51  ;;  %v7246_v51 = vld [vmem:[%s14251_s3 + $0xf0] sm:$0xff] }
 0x328   : > { %v7902_v5 = vpop.f32.mrf.mxu1  ;;  %14444 = vst [vmem:[#allocation45_spill] sm:$0xff] %v9656_v3 }
 0x329   : > { %3161 = vmax.xlane.f32.xlu0 %v3160_v8  ;;  %v3993_v5 = vmul.f32 0.35355338, %v3959_v1  ;;  %v9669_v1 = vpop.permute.xlu1 %2808 }
 0x32a   : > { %v3964_v12 = vpop.f32.mrf.mxu1  ;;  %14446 = vst [vmem:[#allocation47_spill] sm:$0xff] %v9669_v1 }
 0x32b   : > { %v3994_v18 = vmul.f32 0.35355338, %v3964_v12 }
 0x32c   : > { %v7905_v0 = vpop.f32.mrf.mxu1 }
 0x32d   : > { %3164 = vmax.xlane.f32.xlu0 %v3163_v16  ;;  %v9663_v0 = vpop.permute.xlu0 %1949  ;;  %v9665_v16 = vadd.f32 %v7244_v6, %v3993_v5 }
 0x32e   : > { %v3969_v23 = vpop.f32.mrf.mxu1  ;;  %14445 = vst [vmem:[#allocation46_spill] sm:$0xff] %v9663_v0 }
 0x32f   : > { %v4015_v12 = vsel %vm633_vm4, %v9665_v16, -inf }
 0x330   : > { %v7908_v38 = vpop.f32.mrf.mxu1 }
 0x331   : > { %3167 = vmax.xlane.f32.xlu0 %v3166_v30  ;;  %v3178_v38 = vsel %vm652_vm5, %v9656_v3, -inf  ;;  %v7245_v30 = vld [vmem:[%s14251_s3 + $0xe8] sm:$0xff]  ;;  %v9680_v37 = vpop.permute.xlu0 %2812 }
 0x332   : > { %v3974_v42 = vpop.f32.mrf.mxu1  ;;  %v9676_v29 = vadd.f32 %v7245_v30, %v3994_v18  ;;  %14448 = vst [vmem:[#allocation49_spill] sm:$0xff] %v9680_v37  ;;  %v7247_v18 = vld [vmem:[%s14251_s3 + $0xf8] sm:$0xff]  ;;  %v7250_v37 = vld [vmem:[%s14251_s3 + $0x110] sm:$0x1] }
 0x333   : > { %v3996_v5 = vmul.f32 0.35355338, %v3974_v42  ;;  %v7275_v42 = vld [vmem:[%s14251_s3 + $0x128] sm:$0xff] }
 0x334   : > { %v7911_v35 = vpop.f32.mrf.mxu1  ;;  %14447 = vst [vmem:[#allocation48_spill] sm:$0xff] %v9676_v29  ;;  %v4018_v6 = vsel %vm633_vm4, %v9676_v29, -inf }
 0x335   : > { %3170 = vmax.xlane.f32.xlu0 %v3169_v22  ;;  %v3995_v35 = vmul.f32 0.35355338, %v3969_v23 }
 0x336   : > { %v3979_v48 = vpop.f32.mrf.mxu1 }
 0x337   : > { %v9691_v23 = vadd.f32 %v7246_v51, %v3995_v35 }
 0x338   : > { %v7914_v43 = vpop.f32.mrf.mxu1 }
 0x339   : > { %3173 = vmax.xlane.f32.xlu0 %v3172_v58 }
 0x33a   : > { %v3984_v63 = vpop.f32.mrf.mxu1 }
 0x33c   : > { %v7917_v8 = vpop.f32.mrf.mxu1 }
 0x33d   : > { %3176 = vmax.xlane.f32.xlu0 %v3175_v52 }
 0x33e   : > { %v3989_v15 = vpop.f32.mrf.mxu1 }
 0x340   : > { %v7920_v28 = vpop.f32.mrf.mxu1 }
 0x341   : > { %3179 = vmax.xlane.f32.xlu0 %v3178_v38 }
 0x342   : > { %v9674_v40 = vpop.f32.mrf.mxu1 }
 0x344   : > { %v7972_v22 = vpop.f32.mrf.mxu1 }
 0x345   : > { %v636_v43 = vpop.xlane.xlu1 %635  ;;  %4016 = vmax.xlane.f32.xlu0 %v4015_v12  ;;  %v9707_v22 = vadd.f32 %v7247_v18, %v3996_v5  ;;  %v3997_v12 = vmul.f32 0.35355338, %v3979_v48  ;;  %v3998_v48 = vmul.f32 0.35355338, %v3984_v63 }
 0x346   : > { %vm656_vm6 = vcmp.ge.f32.partialorder %v9428_v20, %v636_v43  ;;  %v9686_v58 = vpop.f32.mrf.mxu1  ;;  %v4021_v43 = vsel %vm633_vm4, %v9691_v23, -inf }
 0x347   : > { %v9689_v62 = vsel %vm656_vm6, -1e+30, %v9428_v20  ;;  %14449 = vst [vmem:[#allocation50_spill] sm:$0xff] %v9707_v22 }
 0x348   : > { %v7975_v8 = vpop.f32.mrf.mxu1  ;;  %v670_v52 = vsel %vm633_vm4, %v9689_v62, -inf }
 0x349   : > { %671 = vmax.xlane.f32.xlu1 %v670_v52  ;;  %4019 = vmax.xlane.f32.xlu0 %v4018_v6  ;;  %v639_v28 = vpop.xlane.xlu0 %638  ;;  %v7248_v52 = vld [vmem:[%s14251_s3 + $0x100] sm:$0xff] }
 0x34a   : > { %vm657_vm7 = vcmp.ge.f32.partialorder %v9438_v31, %v639_v28  ;;  %v4824_v38 = vpop.f32.mrf.mxu1 }
 0x34b   : > { %v9705_v30 = vsel %vm657_vm7, -1e+30, %v9438_v31  ;;  %v4850_v35 = vmul.f32 0.35355338, %v4824_v38  ;;  %v9723_v38 = vadd.f32 %v7248_v52, %v3997_v12  ;;  %v3999_v12 = vmul.f32 0.35355338, %v3989_v15 }
 0x34c   : > { %v7978_v51 = vpop.f32.mrf.mxu1  ;;  %v673_v8 = vsel %vm633_vm4, %v9705_v30, -inf }
 0x34d   : > { %v9716_v6 = vadd.f32 %v7275_v42, %v4850_v35  ;;  %4022 = vmax.xlane.f32.xlu0 %v4021_v43  ;;  %674 = vmax.xlane.f32.xlu1 %v673_v8  ;;  %v642_v28 = vpop.xlane.xlu0 %641  ;;  %v7249_v51 = vld [vmem:[%s14251_s3 + $0x108] sm:$0xff]  ;;  %v4024_v42 = vsel %vm633_vm4, %v9707_v22, -inf }
 0x34e   : > { %vm658_vm8 = vcmp.ge.f32.partialorder %v9448_v45, %v642_v28  ;;  %v9719_v5 = vpop.f32.mrf.mxu1  ;;  %v9734_v8 = vadd.f32 %v7249_v51, %v3998_v48  ;;  %v7277_v48 = vld [vmem:[%s14251_s3 + $0x138] sm:$0xff] }
 0x34f   : > { %14450 = vst [vmem:[#allocation51_spill] sm:$0xff] %v9716_v6  ;;  %v4876_v18 = vsel %vm633_vm4, %v9716_v6, -inf  ;;  %v9731_v35 = vsel %vm658_vm8, -1e+30, %v9448_v45 }
 0x350   : > { %v7981_v1 = vpop.f32.mrf.mxu1  ;;  %14451 = vst [vmem:[#allocation52_spill] sm:$0xff] %v9734_v8  ;;  %v676_v56 = vsel %vm633_vm4, %v9731_v35, -inf }
 0x351   : > { %v645_v43 = vpop.xlane.xlu1 %644  ;;  %4025 = vmax.xlane.f32.xlu0 %v4024_v42  ;;  %4877 = vmax.xlane.f32.xlu1 %v4876_v18  ;;  %v4027_v1 = vsel %vm633_vm4, %v9723_v38, -inf  ;;  %v4030_v42 = vsel %vm633_vm4, %v9734_v8, -inf }
 0x352   : > { %vm659_vm9 = vcmp.ge.f32.partialorder %v9458_v32, %v645_v43  ;;  %v4834_v63 = vpop.f32.mrf.mxu1  ;;  %v9753_v43 = vadd.f32 %v7250_v37, %v3999_v12  ;;  %v4849_v37 = vmul.f32 0.35355338, %v9686_v58 }
 0x353   : > { %v4852_v52 = vmul.f32 0.35355338, %v4834_v63  ;;  %v9744_v18 = vsel %vm659_vm9, -1e+30, %v9458_v32  ;;  %v4848_v63 = vmul.f32 0.35355338, %v9674_v40 }
 0x354   : > { %v7984_v28 = vpop.f32.mrf.mxu1  ;;  %v679_v25 = vsel %vm633_vm4, %v9744_v18, -inf }
 0x355   : > { %4028 = vmax.xlane.f32.xlu0 %v4027_v1  ;;  %677 = vmax.xlane.f32.xlu1 %v676_v56  ;;  %v648_v51 = vpop.xlane.xlu0 %647  ;;  %v9756_v28 = vadd.f32 %v7277_v48, %v4852_v52  ;;  %v7273_v56 = vld [vmem:[%s14251_s3 + $0x118] sm:$0xff]  ;;  %v7274_v52 = vld [vmem:[%s14251_s3 + $0x120] sm:$0xff] }
 0x356   : > { %v9749_v15 = vpop.f32.mrf.mxu1  ;;  %vm660_vm10 = vcmp.ge.f32.partialorder %v9468_v44, %v648_v51  ;;  %v9764_v0 = vadd.f32 %v7273_v56, %v4848_v63  ;;  %v9777_v51 = vadd.f32 %v7274_v52, %v4849_v37 }
 0x357   : > { %14452 = vst [vmem:[#allocation53_spill] sm:$0xff] %v9756_v28  ;;  %v4882_v12 = vsel %vm633_vm4, %v9756_v28, -inf }
 0x358   : > { %v7987_v24 = vpop.f32.mrf.mxu1  ;;  %14453 = vst [vmem:[#allocation54_spill] sm:$0xff] %v9764_v0  ;;  %14454 = vst [vmem:[#allocation55_spill] sm:$0xff] %v9777_v51  ;;  %v4873_v11 = vsel %vm633_vm4, %v9777_v51, -inf }
 0x359   : > { %4031 = vmax.xlane.f32.xlu0 %v4030_v42  ;;  %680 = vmax.xlane.f32.xlu1 %v679_v25  ;;  %v4033_v24 = vsel %vm652_vm5, %v9753_v43, -inf  ;;  %v9775_v25 = vsel %vm660_vm10, -1e+30, %v9468_v44  ;;  %v4870_v42 = vsel %vm633_vm4, %v9764_v0, -inf }
 0x35a   : > { %v4844_v1 = vpop.f32.mrf.mxu1  ;;  %v682_v63 = vsel %vm633_vm4, %v9775_v25, -inf }
 0x35c   : > { %v7990_v40 = vpop.f32.mrf.mxu1 }
 0x35d   : > { %4034 = vmax.xlane.f32.xlu0 %v4033_v24  ;;  %4883 = vmax.xlane.f32.xlu1 %v4882_v12 }
 0x35e   : > { %v5669_v48 = vpop.f32.mrf.mxu1 }
 0x360   : > { %v8042_v58 = vpop.f32.mrf.mxu1 }
 0x361   : > { %4871 = vmax.xlane.f32.xlu0 %v4870_v42  ;;  %683 = vmax.xlane.f32.xlu1 %v682_v63  ;;  %v14455_v42 = vld [vmem:[#allocation9_spill] sm:$0xff] }
 0x362   : > { %v5674_v56 = vpop.f32.mrf.mxu1 }
 0x364   : > { %v8045_v40 = vpop.f32.mrf.mxu1 }
 0x365   : > { %4874 = vmax.xlane.f32.xlu0 %v4873_v11  ;;  %v14456_v11 = vld [vmem:[#allocation4_spill] sm:$0xff] }
 0x366   : > { %v9785_v24 = vpop.f32.mrf.mxu1 }
 0x368   : > { %v8048_v12 = vpop.f32.mrf.mxu1 }
 0x36a   : > { %v9787_v37 = vpop.f32.mrf.mxu1 }
 0x36c   : > { %v8051_v52 = vpop.f32.mrf.mxu1 }
 0x36e   : > { %v9789_v58 = vpop.f32.mrf.mxu1 }
 0x370   : > { %v8054_v41 = vpop.f32.mrf.mxu1 }
 0x372   : > { %v9791_v33 = vpop.f32.mrf.mxu1  ;;  %3667 = vrot.lane.b32.xlu1 %v14455_v42, %s8524_s20 }
 0x374   : > { %v8057_v63 = vpop.f32.mrf.mxu1 }
 0x375   : > { %v651_v63 = vpop.xlane.xlu1 %650 }
 0x376   : > { %v9795_v40 = vpop.f32.mrf.mxu1  ;;  %vm661_vm11 = vcmp.ge.f32.partialorder %v9478_v53, %v651_v63 }
 0x378   : > { %v8060_v54 = vpop.f32.mrf.mxu1 }
 0x37a   : > { %v9797_v17 = vpop.f32.mrf.mxu1 }
 0x37b   : > { %2802 = vrot.lane.b32.xlu0 %v14456_v11, %s8523_s19  ;;  %v4854_v11 = vmul.f32 0.35355338, %v4844_v1 }
 0x37c   : > { %v8112_v12 = vpop.f32.mrf.mxu1 }
 0x37d   : > { %v4851_v12 = vmul.f32 0.35355338, %v9719_v5 }
 0x37e   : > { %v9801_v44 = vpop.f32.mrf.mxu1 }
 0x37f   : > { %14457 = vst [vmem:[#allocation56_spill] sm:$0xff] %v9801_v44  ;;  %v9835_v44 = vpop.permute.xlu1 %2804 }
 0x380   : > { %v8115_v52 = vpop.f32.mrf.mxu1  ;;  %14463 = vst [vmem:[#allocation62_spill] sm:$0xff] %v9835_v44 }
 0x381   : > { %v7276_v52 = vld [vmem:[%s14251_s3 + $0x130] sm:$0xff] }
 0x382   : > { %v9803_v32 = vpop.f32.mrf.mxu1  ;;  %v9824_v63 = vadd.f32 %v7276_v52, %v4851_v12  ;;  %v7302_v52 = vld [vmem:[%s14251_s3 + $0x150] sm:$0xff] }
 0x383   : > { %14458 = vst [vmem:[#allocation57_spill] sm:$0xff] %v9803_v32 }
 0x384   : > { %v8118_v41 = vpop.f32.mrf.mxu1  ;;  %14461 = vst [vmem:[#allocation60_spill] sm:$0xff] %v9824_v63 }
 0x385   : > { %v9817_v41 = vsel %vm661_vm11, -1e+30, %v9478_v53  ;;  %v7278_v53 = vld [vmem:[%s14251_s3 + $0x140] sm:$0xff] }
 0x386   : > { %v9805_v45 = vpop.f32.mrf.mxu1  ;;  %v685_v1 = vsel %vm633_vm4, %v9817_v41, -inf }
 0x388   : > { %v8121_v20 = vpop.f32.mrf.mxu1 }
 0x389   : > { %v7279_v20 = vld [vmem:[%s14251_s3 + $0x148] sm:$0x1] }
 0x38a   : > { %v9807_v31 = vpop.f32.mrf.mxu1  ;;  %v9827_v5 = vadd.f32 %v7279_v20, %v4854_v11 }
 0x38c   : > { %v8124_v42 = vpop.f32.mrf.mxu1  ;;  %14462 = vst [vmem:[#allocation61_spill] sm:$0xff] %v9827_v5  ;;  %v4888_v11 = vsel %vm652_vm5, %v9827_v5, -inf }
 0x38e   : > { %v9809_v54 = vpop.f32.mrf.mxu1 }
 0x38f   : > { %14459 = vst [vmem:[#allocation58_spill] sm:$0xff] %v9809_v54  ;;  %v655_v54 = vpop.xlane.xlu0 %654 }
 0x390   : > { %v8127_v9 = vpop.f32.mrf.mxu1  ;;  %vm662_vm12 = vcmp.ge.f32.partialorder %v9488_v60, %v655_v54  ;;  %v1446_v54 = vpop.xlane.xlu1 %1445 }
 0x391   : > { %v4853_v9 = vmul.f32 0.35355338, %v9749_v15  ;;  %v4879_v15 = vsel %vm633_vm4, %v9824_v63, -inf  ;;  %v9844_v12 = vsel %vm662_vm12, -1e+30, %v9488_v60  ;;  %vm1465_vm13 = vcmp.ge.f32.partialorder %v9502_v36, %v1446_v54 }
 0x392   : > { %v9822_v42 = vpop.f32.mrf.mxu1 }
 0x393   : > { %14460 = vst [vmem:[#allocation59_spill] sm:$0xff] %v9822_v42  ;;  %v9837_v42 = vadd.f32 %v7278_v53, %v4853_v9  ;;  %v9856_v9 = vpop.permute.xlu0 %2806 }
 0x394   : > { %v8130_v32 = vpop.f32.mrf.mxu1  ;;  %14466 = vst [vmem:[#allocation65_spill] sm:$0xff] %v9856_v9 }
 0x395   : > { %14464 = vst [vmem:[#allocation63_spill] sm:$0xff] %v9837_v42  ;;  %v5703_v32 = vmul.f32 0.35355338, %v5669_v48  ;;  %v4885_v53 = vsel %vm633_vm4, %v9837_v42, -inf  ;;  %v688_v48 = vsel %vm652_vm5, %v9844_v12, -inf }
 0x396   : > { %686 = vmax.xlane.f32.xlu1 %v685_v1  ;;  %v5704_v1 = vmul.f32 0.35355338, %v5674_v56  ;;  %v5705_v56 = vmul.f32 0.35355338, %v9785_v24 }
 0x397   : > { %v9849_v20 = vadd.f32 %v7302_v52, %v5703_v32  ;;  %v7303_v32 = vld [vmem:[%s14251_s3 + $0x158] sm:$0xff]  ;;  %v1449_v52 = vpop.xlane.xlu0 %1448 }
 0x398   : > { %v9866_v44 = vadd.f32 %v7303_v32, %v5704_v1  ;;  %vm1466_vm14 = vcmp.ge.f32.partialorder %v9510_v26, %v1449_v52  ;;  %v1452_v1 = vpop.xlane.xlu1 %1451 }
 0x399   : > { %14465 = vst [vmem:[#allocation64_spill] sm:$0xff] %v9849_v20  ;;  %vm1467_vm15 = vcmp.ge.f32.partialorder %v9512_v61, %v1452_v1 }
 0x39a   : > { %4880 = vmax.xlane.f32.xlu0 %v4879_v15  ;;  %4889 = vmax.xlane.f32.xlu1 %v4888_v11  ;;  %v5725_v15 = vsel %vm633_vm4, %v9849_v20, -inf  ;;  %v9864_v11 = vsel %vm1465_vm13, -1e+30, %v9502_v36  ;;  %14467 = vst [vmem:[#allocation66_spill] sm:$0xff] %v9866_v44 }
 0x39b   : > { %v1479_v54 = vsel %vm633_vm4, %v9864_v11, -inf  ;;  %v1455_v32 = vpop.xlane.xlu0 %1454 }
 0x39c   : > { %vm1468_vm3 = vcmp.ge.f32.partialorder %v9524_v49, %v1455_v32  ;;  %v7307_v32 = vld [vmem:[%s14251_s3 + $0x178] sm:$0xff] }
 0x39e   : > { %4886 = vmax.xlane.f32.xlu0 %v4885_v53  ;;  %689 = vmax.xlane.f32.xlu1 %v688_v48  ;;  %v5728_v53 = vsel %vm633_vm4, %v9866_v44, -inf  ;;  %v7304_v48 = vld [vmem:[%s14251_s3 + $0x160] sm:$0xff] }
 0x39f   : > { %v9880_v20 = vadd.f32 %v7304_v48, %v5705_v56  ;;  %v1461_v44 = vpop.xlane.xlu0 %1460  ;;  %v14469_v56 = vld [vmem:[#allocation10_spill] sm:$0xff] }
 0x3a0   : > { %vm1470_vm7 = vcmp.ge.f32.partialorder %v9536_v57, %v1461_v44 }
 0x3a1   : > { %14468 = vst [vmem:[#allocation67_spill] sm:$0xff] %v9880_v20  ;;  %v5731_v24 = vsel %vm633_vm4, %v9880_v20, -inf  ;;  %v5708_v20 = vmul.f32 0.35355338, %v9791_v33 }
 0x3a2   : > { %5726 = vmax.xlane.f32.xlu1 %v5725_v15  ;;  %v9878_v15 = vsel %vm1466_vm14, -1e+30, %v9510_v26  ;;  %v9916_v26 = vsel %vm1470_vm7, -1e+30, %v9536_v57  ;;  %v5707_v57 = vmul.f32 0.35355338, %v9789_v58 }
 0x3a3   : > { %v1482_v52 = vsel %vm633_vm4, %v9878_v15, -inf  ;;  %v2307_v1 = vpop.xlane.xlu0 %2306 }
 0x3a4   : > { %vm2326_vm9 = vcmp.ge.f32.partialorder %v9550_v7, %v2307_v1 }
 0x3a6   : > { %1480 = vmax.xlane.f32.xlu1 %v1479_v54  ;;  %v9888_v54 = vsel %vm1467_vm15, -1e+30, %v9512_v61  ;;  %v9908_v61 = vadd.f32 %v7307_v32, %v5708_v20  ;;  %v1494_v20 = vsel %vm633_vm4, %v9916_v26, -inf }
 0x3a7   : > { %v1485_v48 = vsel %vm633_vm4, %v9888_v54, -inf }
 0x3a8   : > { %14470 = vst [vmem:[#allocation68_spill] sm:$0xff] %v9908_v61 }
 0x3aa   : > { %5729 = vmax.xlane.f32.xlu1 %v5728_v53  ;;  %v1458_v53 = vpop.xlane.xlu1 %1457 }
 0x3ab   : > { %vm1469_vm6 = vcmp.ge.f32.partialorder %v9526_v50, %v1458_v53  ;;  %v2313_v53 = vpop.xlane.xlu0 %2312 }
 0x3ac   : > { %v9906_v9 = vsel %vm1469_vm6, -1e+30, %v9526_v50  ;;  %vm2328_vm11 = vcmp.ge.f32.partialorder %v9566_v19, %v2313_v53 }
 0x3ae   : > { %1483 = vmax.xlane.f32.xlu1 %v1482_v52  ;;  %v9896_v52 = vsel %vm1468_vm3, -1e+30, %v9524_v49  ;;  %v1464_v33 = vpop.xlane.xlu1 %1463  ;;  %v5740_v49 = vsel %vm633_vm4, %v9908_v61, -inf  ;;  %v5706_v61 = vmul.f32 0.35355338, %v9787_v37 }
 0x3af   : > { %vm1471_vm8 = vcmp.ge.f32.partialorder %v9538_v59, %v1464_v33 }
 0x3b0   : > { %v9922_v32 = vsel %vm1471_vm8, -1e+30, %v9538_v59  ;;  %v7305_v59 = vld [vmem:[%s14251_s3 + $0x168] sm:$0xff] }
 0x3b2   : > { %5732 = vmax.xlane.f32.xlu1 %v5731_v24  ;;  %v1488_v24 = vsel %vm633_vm4, %v9896_v52, -inf  ;;  %v2310_v44 = vpop.xlane.xlu1 %2309 }
 0x3b3   : > { %vm2327_vm10 = vcmp.ge.f32.partialorder %v9554_v10, %v2310_v44 }
 0x3b4   : > { %3669 = vrot.lane.b32.xlu0 %v14469_v56, %s8524_s20  ;;  %v9943_v37 = vsel %vm2327_vm10, -1e+30, %v9554_v10 }
 0x3b5   : > { %v2343_v44 = vsel %vm633_vm4, %v9943_v37, -inf }
 0x3b6   : > { %1486 = vmax.xlane.f32.xlu1 %v1485_v48  ;;  %v1491_v48 = vsel %vm633_vm4, %v9906_v9, -inf }
 0x3ba   : > { %1489 = vmax.xlane.f32.xlu1 %v1488_v24  ;;  %v2319_v24 = vpop.xlane.xlu0 %2318 }
 0x3bb   : > { %vm2330_vm13 = vcmp.ge.f32.partialorder %v9575_v34, %v2319_v24 }
 0x3be   : > { %1492 = vmax.xlane.f32.xlu1 %v1491_v48  ;;  %v1497_v48 = vsel %vm652_vm5, %v9922_v32, -inf  ;;  %v9931_v33 = vpop.xlane.xlu0 %2321 }
 0x3c2   : > { %5741 = vmax.xlane.f32.xlu1 %v5740_v49  ;;  %v9929_v49 = vsel %vm2326_vm9, -1e+30, %v9550_v7  ;;  %v2316_v7 = vpop.xlane.xlu1 %2315  ;;  %v2325_v50 = vpop.xlane.xlu0 %2324  ;;  %vm2331_vm9 = vcmp.ge.f32.partialorder %v9584_v4, %v9931_v33 }
 0x3c3   : > { %v2340_v1 = vsel %vm633_vm4, %v9929_v49, -inf  ;;  %vm2329_vm12 = vcmp.ge.f32.partialorder %v9568_v21, %v2316_v7  ;;  %v9972_v7 = vsel %vm2330_vm13, -1e+30, %v9575_v34  ;;  %vm2332_vm14 = vcmp.ge.f32.partialorder %v9591_v46, %v2325_v50 }
 0x3c6   : > { %1495 = vmax.xlane.f32.xlu1 %v1494_v20  ;;  %v9939_v20 = vadd.f32 %v7305_v59, %v5706_v61  ;;  %v9954_v61 = vsel %vm2328_vm11, -1e+30, %v9566_v19 }
 0x3c7   : > { %v2346_v53 = vsel %vm633_vm4, %v9954_v61, -inf }
 0x3c8   : > { %14471 = vst [vmem:[#allocation69_spill] sm:$0xff] %v9939_v20  ;;  %v5734_v58 = vsel %vm633_vm4, %v9939_v20, -inf }
 0x3ca   : > { %1498 = vmax.xlane.f32.xlu1 %v1497_v48  ;;  %v7306_v48 = vld [vmem:[%s14251_s3 + $0x170] sm:$0xff] }
 0x3cb   : > { %v9951_v36 = vadd.f32 %v7306_v48, %v5707_v57  ;;  %v3162_v57 = vpop.xlane.xlu0 %3161 }
 0x3cc   : > { %vm3181_vm10 = vcmp.ge.f32.partialorder %v9600_v55, %v3162_v57 }
 0x3cd   : > { %14472 = vst [vmem:[#allocation70_spill] sm:$0xff] %v9951_v36  ;;  %v5737_v19 = vsel %vm633_vm4, %v9951_v36, -inf }
 0x3ce   : > { %2341 = vmax.xlane.f32.xlu1 %v2340_v1  ;;  %v9964_v1 = vsel %vm2329_vm12, -1e+30, %v9568_v21  ;;  %v9978_v21 = vsel %vm2332_vm14, -1e+30, %v9591_v46 }
 0x3cf   : > { %v3165_v20 = vpop.xlane.xlu0 %3164  ;;  %v2358_v24 = vsel %vm652_vm5, %v9978_v21, -inf }
 0x3d0   : > { %vm3182_vm15 = vcmp.ge.f32.partialorder %v9607_v2, %v3165_v20 }
 0x3d1   : > { %v9986_v36 = vsel %vm3182_vm15, -1e+30, %v9607_v2 }
 0x3d2   : > { %v9956_v59 = vpop.xlane.xlu1 %671  ;;  %2344 = vmax.xlane.f32.xlu1 %v2343_v44  ;;  %v2349_v44 = vsel %vm633_vm4, %v9964_v1, -inf  ;;  %v3198_v50 = vsel %vm633_vm4, %v9986_v36, -inf }
 0x3d3   : > { %5735 = vmax.xlane.f32.xlu0 %v5734_v58 }
 0x3d6   : > { %v675_v48 = vpop.xlane.xlu1 %674  ;;  %2347 = vmax.xlane.f32.xlu1 %v2346_v53  ;;  %v2352_v53 = vsel %vm633_vm4, %v9972_v7, -inf }
 0x3d7   : > { %5738 = vmax.xlane.f32.xlu0 %v5737_v19  ;;  %vm692_vm3 = vcmp.ge.f32.partialorder %v9705_v30, %v675_v48 }
 0x3da   : > { %v4878_v58 = vpop.xlane.xlu1 %4877  ;;  %2350 = vmax.xlane.f32.xlu1 %v2349_v44  ;;  %v9992_v44 = vsel %vm692_vm3, -1e+30, %v9705_v30 }
 0x3db   : > { %vm4893_vm6 = vcmp.ge.f32.partialorder %v9716_v6, %v4878_v58  ;;  %v708_v20 = vsel %vm633_vm4, %v9992_v44, -inf }
 0x3dc   : > { %v9998_v46 = vsel %vm4893_vm6, -1e+30, %v9716_v6  ;;  %v3168_v6 = vpop.xlane.xlu0 %3167 }
 0x3dd   : > { %v4911_v30 = vsel %vm633_vm4, %v9998_v46, -inf  ;;  %vm3183_vm11 = vcmp.ge.f32.partialorder %v9616_v13, %v3168_v6 }
 0x3de   : > { %2353 = vmax.xlane.f32.xlu1 %v2352_v53  ;;  %v9981_v19 = vpop.xlane.xlu1 %677 }
 0x3e0   : > { %v3171_v2 = vpop.xlane.xlu0 %3170 }
 0x3e1   : > { %vm3184_vm12 = vcmp.ge.f32.partialorder %v9627_v27, %v3171_v2 }
 0x3e2   : > { %2359 = vmax.xlane.f32.xlu1 %v2358_v24  ;;  %v681_v53 = vpop.xlane.xlu1 %680  ;;  %v14473_v24 = vld [vmem:[#allocation8_spill] sm:$0xff] }
 0x3e3   : > { %vm694_vm7 = vcmp.ge.f32.partialorder %v9744_v18, %v681_v53 }
 0x3e4   : > { %v3174_v34 = vpop.xlane.xlu0 %3173 }
 0x3e5   : > { %vm3185_vm13 = vcmp.ge.f32.partialorder %v9636_v47, %v3174_v34 }
 0x3e6   : > { %3199 = vmax.xlane.f32.xlu1 %v3198_v50  ;;  %v4884_v48 = vpop.xlane.xlu1 %4883  ;;  %v10006_v50 = vsel %vm694_vm7, -1e+30, %v9744_v18  ;;  %v10021_v18 = vsel %vm2331_vm9, -1e+30, %v9584_v4  ;;  %v10039_v4 = vsel %vm3184_vm12, -1e+30, %v9627_v27 }
 0x3e7   : > { %vm4895_vm8 = vcmp.ge.f32.partialorder %v9756_v28, %v4884_v48  ;;  %v714_v58 = vsel %vm633_vm4, %v10006_v50, -inf }
 0x3e8   : > { %v3177_v10 = vpop.xlane.xlu0 %3176 }
 0x3e9   : > { %vm3186_vm14 = vcmp.ge.f32.partialorder %v9645_v39, %v3177_v10 }
 0x3ea   : > { %709 = vmax.xlane.f32.xlu1 %v708_v20  ;;  %v10012_v20 = vsel %vm4895_vm8, -1e+30, %v9756_v28  ;;  %v10042_v6 = vpop.xlane.xlu1 %683 }
 0x3eb   : > { %v4917_v53 = vsel %vm633_vm4, %v10012_v20, -inf }
 0x3ec   : > { %v3180_v48 = vpop.xlane.xlu0 %3179 }
 0x3ed   : > { %3665 = vrot.lane.b32.xlu0 %v14473_v24, %s8524_s20  ;;  %vm3187_vm15 = vcmp.ge.f32.partialorder %v9656_v3, %v3180_v48 }
 0x3ee   : > { %4912 = vmax.xlane.f32.xlu1 %v4911_v30  ;;  %v2355_v30 = vsel %vm633_vm4, %v10021_v18, -inf  ;;  %v10050_v2 = vpop.permute.xlu1 %3667 }
 0x3ef   : > { %14474 = vst [vmem:[#allocation71_spill] sm:$0xff] %v10050_v2 }
 0x3f0   : > { %v4017_v28 = vpop.xlane.xlu0 %4016 }
 0x3f1   : > { %vm4036_vm3 = vcmp.ge.f32.partialorder %v9665_v16, %v4017_v28 }
 0x3f2   : > { %715 = vmax.xlane.f32.xlu1 %v714_v58  ;;  %v10027_v58 = vsel %vm3181_vm10, -1e+30, %v9600_v55  ;;  %v3204_v55 = vsel %vm633_vm4, %v10039_v4, -inf  ;;  %v10067_v60 = vsel %vm4036_vm3, -1e+30, %v9665_v16 }
 0x3f3   : > { %v3195_v33 = vsel %vm633_vm4, %v10027_v58, -inf }
 0x3f6   : > { %4918 = vmax.xlane.f32.xlu1 %v4917_v53  ;;  %v10033_v53 = vsel %vm3183_vm11, -1e+30, %v9616_v13  ;;  %v10047_v13 = vsel %vm3185_vm13, -1e+30, %v9636_v47 }
 0x3f7   : > { %v3201_v57 = vsel %vm633_vm4, %v10033_v53, -inf }
 0x407   : > { %3661 = vrot.lane.b32.xlu1 %v14415_v14, %s8524_s20 }
 0x40c   : > { %2356 = vmax.xlane.f32.xlu0 %v2355_v30  ;;  %v4020_v30 = vpop.xlane.xlu0 %4019 }
 0x40d   : > { %vm4037_vm7 = vcmp.ge.f32.partialorder %v9676_v29, %v4020_v30 }
 0x40e   : > { %v10077_v28 = vsel %vm4037_vm7, -1e+30, %v9676_v29 }
 0x40f   : > { %v4053_v30 = vsel %vm633_vm4, %v10077_v28, -inf }
 0x410   : > { %3196 = vmax.xlane.f32.xlu0 %v3195_v33  ;;  %v3207_v33 = vsel %vm633_vm4, %v10047_v13, -inf  ;;  %v4023_v34 = vpop.xlane.xlu0 %4022 }
 0x411   : > { %vm4038_vm9 = vcmp.ge.f32.partialorder %v9691_v23, %v4023_v34 }
 0x412   : > { %v10091_v29 = vsel %vm4038_vm9, -1e+30, %v9691_v23 }
 0x414   : > { %3202 = vmax.xlane.f32.xlu0 %v3201_v57  ;;  %v10055_v57 = vsel %vm3186_vm14, -1e+30, %v9645_v39  ;;  %v4026_v10 = vpop.xlane.xlu0 %4025 }
 0x415   : > { %v3210_v47 = vsel %vm633_vm4, %v10055_v57, -inf  ;;  %vm4039_vm11 = vcmp.ge.f32.partialorder %v9707_v22, %v4026_v10 }
 0x418   : > { %3205 = vmax.xlane.f32.xlu0 %v3204_v55  ;;  %v10061_v55 = vsel %vm3187_vm15, -1e+30, %v9656_v3  ;;  %v4029_v3 = vpop.xlane.xlu0 %4028 }
 0x419   : > { %v3213_v39 = vsel %vm652_vm5, %v10061_v55, -inf  ;;  %vm4040_vm13 = vcmp.ge.f32.partialorder %v9723_v38, %v4029_v3 }
 0x41c   : > { %3208 = vmax.xlane.f32.xlu0 %v3207_v33 }
 0x41f   : > { %v687_v27 = vpop.xlane.xlu1 %686 }
 0x420   : > { %3211 = vmax.xlane.f32.xlu0 %v3210_v47  ;;  %vm696_vm6 = vcmp.ge.f32.partialorder %v9817_v41, %v687_v27  ;;  %v4050_v47 = vsel %vm633_vm4, %v10067_v60, -inf }
 0x421   : > { %v10072_v48 = vsel %vm696_vm6, -1e+30, %v9817_v41 }
 0x422   : > { %v720_v27 = vsel %vm633_vm4, %v10072_v48, -inf }
 0x423   : > { %v4890_v2 = vpop.xlane.xlu1 %4889 }
 0x424   : > { %3214 = vmax.xlane.f32.xlu0 %v3213_v39  ;;  %vm4897_vm8 = vcmp.ge.f32.partialorder %v9827_v5, %v4890_v2  ;;  %v4032_v2 = vpop.xlane.xlu0 %4031 }
 0x425   : > { %v10084_v39 = vsel %vm4897_vm8, -1e+30, %v9827_v5  ;;  %v10103_v5 = vsel %vm4039_vm11, -1e+30, %v9707_v22  ;;  %vm4041_vm14 = vcmp.ge.f32.partialorder %v9734_v8, %v4032_v2  ;;  %vm691_vm8 = vcmp.ge.f32.partialorder %v9689_v62, %v9956_v59 }
 0x426   : > { %v4923_v34 = vsel %vm652_vm5, %v10084_v39, -inf }
 0x427   : > { %v690_v33 = vpop.xlane.xlu1 %689 }
 0x428   : > { %4051 = vmax.xlane.f32.xlu0 %v4050_v47  ;;  %vm697_vm10 = vcmp.ge.f32.partialorder %v9844_v12, %v690_v33  ;;  %v4035_v22 = vpop.xlane.xlu0 %4034 }
 0x429   : > { %v10098_v47 = vsel %vm697_vm10, -1e+30, %v9844_v12  ;;  %vm4042_vm3 = vcmp.ge.f32.partialorder %v9753_v43, %v4035_v22 }
 0x42a   : > { %v723_v10 = vsel %vm652_vm5, %v10098_v47, -inf }
 0x42b   : > { %v10086_v41 = vpop.xlane.xlu1 %5726  ;;  %721 = vmax.xlane.f32.xlu1 %v720_v27  ;;  %v4056_v27 = vsel %vm633_vm4, %v10091_v29, -inf }
 0x42c   : > { %14475 = vst [vmem:[#allocation72_spill] sm:$0xff] %v10086_v41  ;;  %4054 = vmax.xlane.f32.xlu0 %v4053_v30  ;;  %v4059_v30 = vsel %vm633_vm4, %v10103_v5, -inf  ;;  %v4872_v2 = vpop.xlane.xlu0 %4871 }
 0x42d   : > { %vm4891_vm6 = vcmp.ge.f32.partialorder %v9764_v0, %v4872_v2 }
 0x42f   : > { %v1481_v41 = vpop.xlane.xlu1 %1480  ;;  %4924 = vmax.xlane.f32.xlu1 %v4923_v34  ;;  %v10117_v34 = vsel %vm4040_vm13, -1e+30, %v9723_v38 }
 0x430   : > { %vm1500_vm12 = vcmp.ge.f32.partialorder %v9864_v11, %v1481_v41  ;;  %4057 = vmax.xlane.f32.xlu0 %v4056_v27  ;;  %v10125_v27 = vsel %vm4041_vm14, -1e+30, %v9734_v8  ;;  %v10139_v8 = vsel %vm4042_vm3, -1e+30, %v9753_v43 }
 0x431   : > { %v10110_v33 = vsel %vm1500_vm12, -1e+30, %v9864_v11  ;;  %v4062_v11 = vsel %vm633_vm4, %v10117_v34, -inf  ;;  %vm693_vm12 = vcmp.ge.f32.partialorder %v9731_v35, %v9981_v19 }
 0x432   : > { %v1514_v3 = vsel %vm633_vm4, %v10110_v33, -inf }
 0x433   : > { %v10112_v12 = vpop.xlane.xlu1 %5729  ;;  %724 = vmax.xlane.f32.xlu1 %v723_v10 }
 0x434   : > { %14476 = vst [vmem:[#allocation73_spill] sm:$0xff] %v10112_v12  ;;  %4060 = vmax.xlane.f32.xlu0 %v4059_v30 }
 0x437   : > { %v1484_v41 = vpop.xlane.xlu1 %1483  ;;  %1515 = vmax.xlane.f32.xlu1 %v1514_v3  ;;  %v4065_v3 = vsel %vm633_vm4, %v10125_v27, -inf }
 0x438   : > { %vm1501_vm15 = vcmp.ge.f32.partialorder %v9878_v15, %v1484_v41  ;;  %4063 = vmax.xlane.f32.xlu0 %v4062_v11  ;;  %v10145_v41 = vsel %vm4891_vm6, -1e+30, %v9764_v0  ;;  %v4875_v11 = vpop.xlane.xlu0 %4874  ;;  %v10158_v0 = vsel %vm691_vm8, -1e+30, %v9689_v62 }
 0x439   : > { %v10130_v10 = vsel %vm1501_vm15, -1e+30, %v9878_v15  ;;  %v4068_v15 = vsel %vm652_vm5, %v10139_v8, -inf  ;;  %vm4892_vm10 = vcmp.ge.f32.partialorder %v9777_v51, %v4875_v11  ;;  %vm695_vm15 = vcmp.ge.f32.partialorder %v9775_v25, %v10042_v6 }
 0x43a   : > { %v1517_v30 = vsel %vm633_vm4, %v10130_v10, -inf  ;;  %v10172_v62 = vsel %vm4892_vm10, -1e+30, %v9777_v51 }
 0x43b   : > { %v10134_v12 = vpop.xlane.xlu1 %5732  ;;  %1518 = vmax.xlane.f32.xlu1 %v1517_v30 }
 0x43c   : > { %14477 = vst [vmem:[#allocation74_spill] sm:$0xff] %v10134_v12  ;;  %4066 = vmax.xlane.f32.xlu0 %v4065_v3  ;;  %v4905_v12 = vsel %vm633_vm4, %v10145_v41, -inf }
 0x43f   : > { %v1487_v22 = vpop.xlane.xlu1 %1486 }
 0x440   : > { %vm1502_vm7 = vcmp.ge.f32.partialorder %v9888_v54, %v1487_v22  ;;  %4069 = vmax.xlane.f32.xlu0 %v4068_v15 }
 0x441   : > { %v10151_v30 = vsel %vm1502_vm7, -1e+30, %v9888_v54  ;;  %v10165_v54 = vpop.permute.xlu0 %2802 }
 0x442   : > { %v1520_v2 = vsel %vm633_vm4, %v10151_v30, -inf  ;;  %14478 = vst [vmem:[#allocation75_spill] sm:$0xff] %v10165_v54  ;;  %v10187_v54 = vsel %vm693_vm12, -1e+30, %v9731_v35 }
 0x443   : > { %v1490_v3 = vpop.xlane.xlu1 %1489  ;;  %1521 = vmax.xlane.f32.xlu1 %v1520_v2  ;;  %v705_v2 = vsel %vm633_vm4, %v10158_v0, -inf }
 0x444   : > { %vm1503_vm9 = vcmp.ge.f32.partialorder %v9896_v52, %v1490_v3  ;;  %4906 = vmax.xlane.f32.xlu0 %v4905_v12 }
 0x445   : > { %v10163_v59 = vsel %vm1503_vm9, -1e+30, %v9896_v52  ;;  %v4881_v12 = vpop.xlane.xlu0 %4880 }
 0x446   : > { %v1523_v22 = vsel %vm633_vm4, %v10163_v59, -inf  ;;  %vm4894_vm13 = vcmp.ge.f32.partialorder %v9824_v63, %v4881_v12 }
 0x447   : > { %v1493_v15 = vpop.xlane.xlu1 %1492  ;;  %1524 = vmax.xlane.f32.xlu1 %v1523_v22  ;;  %v4908_v22 = vsel %vm633_vm4, %v10172_v62, -inf }
 0x448   : > { %vm1504_vm11 = vcmp.ge.f32.partialorder %v9906_v9, %v1493_v15  ;;  %706 = vmax.xlane.f32.xlu0 %v705_v2  ;;  %v10193_v15 = vsel %vm4894_vm13, -1e+30, %v9824_v63 }
 0x449   : > { %v10178_v52 = vsel %vm1504_vm11, -1e+30, %v9906_v9  ;;  %v711_v9 = vsel %vm633_vm4, %v10187_v54, -inf  ;;  %v4887_v35 = vpop.xlane.xlu0 %4886 }
 0x44a   : > { %v1526_v11 = vsel %vm633_vm4, %v10178_v52, -inf  ;;  %vm4896_vm6 = vcmp.ge.f32.partialorder %v9837_v42, %v4887_v35 }
 0x44b   : > { %v10182_v3 = vpop.xlane.xlu1 %5741  ;;  %1527 = vmax.xlane.f32.xlu1 %v1526_v11 }
 0x44c   : > { %14479 = vst [vmem:[#allocation76_spill] sm:$0xff] %v10182_v3  ;;  %4909 = vmax.xlane.f32.xlu0 %v4908_v22  ;;  %v4914_v22 = vsel %vm633_vm4, %v10193_v15, -inf  ;;  %v10206_v3 = vsel %vm695_vm15, -1e+30, %v9775_v25  ;;  %v7308_v25 = vld [vmem:[%s14251_s3 + $0x180] sm:$0x1] }
 0x44f   : > { %v1496_v19 = vpop.xlane.xlu1 %1495 }
 0x450   : > { %vm1505_vm14 = vcmp.ge.f32.partialorder %v9916_v26, %v1496_v19  ;;  %712 = vmax.xlane.f32.xlu0 %v711_v9  ;;  %v5709_v19 = vmul.f32 0.35355338, %v9795_v40 }
 0x451   : > { %v10199_v2 = vsel %vm1505_vm14, -1e+30, %v9916_v26 }
 0x452   : > { %v1529_v12 = vsel %vm633_vm4, %v10199_v2, -inf  ;;  %v10230_v35 = vadd.f32 %v7308_v25, %v5709_v19 }
 0x453   : > { %v1499_v11 = vpop.xlane.xlu1 %1498  ;;  %1530 = vmax.xlane.f32.xlu1 %v1529_v12  ;;  %v717_v12 = vsel %vm633_vm4, %v10206_v3, -inf }
 0x454   : > { %vm1506_vm3 = vcmp.ge.f32.partialorder %v9922_v32, %v1499_v11  ;;  %4915 = vmax.xlane.f32.xlu0 %v4914_v22  ;;  %v10222_v11 = vsel %vm4896_vm6, -1e+30, %v9837_v42  ;;  %14480 = vst [vmem:[#allocation77_spill] sm:$0xff] %v10230_v35  ;;  %v5743_v19 = vsel %vm652_vm5, %v10230_v35, -inf  ;;  %v14486_v35 = vld [vmem:[#allocation4_spill] sm:$0xff] }
 0x455   : > { %v10211_v26 = vsel %vm1506_vm3, -1e+30, %v9922_v32 }
 0x456   : > { %v1532_v6 = vsel %vm652_vm5, %v10211_v26, -inf }
 0x457   : > { %v2342_v9 = vpop.xlane.xlu1 %2341  ;;  %1533 = vmax.xlane.f32.xlu1 %v1532_v6  ;;  %v4920_v6 = vsel %vm633_vm4, %v10222_v11, -inf }
 0x458   : > { %vm2361_vm7 = vcmp.ge.f32.partialorder %v9929_v49, %v2342_v9  ;;  %718 = vmax.xlane.f32.xlu0 %v717_v12 }
 0x459   : > { %v10226_v32 = vsel %vm2361_vm7, -1e+30, %v9929_v49 }
 0x45a   : > { %v2375_v40 = vsel %vm633_vm4, %v10226_v32, -inf }
 0x45b   : > { %v2345_v22 = vpop.xlane.xlu1 %2344  ;;  %2376 = vmax.xlane.f32.xlu1 %v2375_v40 }
 0x45c   : > { %vm2362_vm8 = vcmp.ge.f32.partialorder %v9943_v37, %v2345_v22  ;;  %4921 = vmax.xlane.f32.xlu0 %v4920_v6 }
 0x45d   : > { %v10236_v42 = vsel %vm2362_vm8, -1e+30, %v9943_v37 }
 0x45e   : > { %v2378_v49 = vsel %vm633_vm4, %v10236_v42, -inf }
 0x45f   : > { %v2348_v9 = vpop.xlane.xlu1 %2347  ;;  %2379 = vmax.xlane.f32.xlu1 %v2378_v49 }
 0x460   : > { %vm2363_vm9 = vcmp.ge.f32.partialorder %v9954_v61, %v2348_v9  ;;  %5744 = vmax.xlane.f32.xlu0 %v5743_v19 }
 0x461   : > { %v10244_v12 = vsel %vm2363_vm9, -1e+30, %v9954_v61 }
 0x462   : > { %v2381_v25 = vsel %vm633_vm4, %v10244_v12, -inf }
 0x463   : > { %v2351_v40 = vpop.xlane.xlu1 %2350  ;;  %2382 = vmax.xlane.f32.xlu1 %v2381_v25 }
 0x464   : > { %vm2364_vm10 = vcmp.ge.f32.partialorder %v9964_v1, %v2351_v40 }
 0x465   : > { %v10250_v37 = vsel %vm2364_vm10, -1e+30, %v9964_v1 }
 0x466   : > { %v2384_v22 = vsel %vm633_vm4, %v10250_v37, -inf }
 0x467   : > { %v2354_v6 = vpop.xlane.xlu1 %2353  ;;  %2385 = vmax.xlane.f32.xlu1 %v2384_v22 }
 0x468   : > { %vm2365_vm11 = vcmp.ge.f32.partialorder %v9972_v7, %v2354_v6  ;;  %v14481_v6 = vld [vmem:[#allocation7_spill] sm:$0xff] }
 0x469   : > { %v10256_v61 = vsel %vm2365_vm11, -1e+30, %v9972_v7 }
 0x46a   : > { %v2387_v49 = vsel %vm633_vm4, %v10256_v61, -inf }
 0x46b   : > { %v2360_v9 = vpop.xlane.xlu1 %2359  ;;  %2388 = vmax.xlane.f32.xlu1 %v2387_v49 }
 0x46c   : > { %vm2367_vm12 = vcmp.ge.f32.partialorder %v9978_v21, %v2360_v9 }
 0x46d   : > { %v10262_v1 = vsel %vm2367_vm12, -1e+30, %v9978_v21 }
 0x46e   : > { %v2393_v19 = vsel %vm652_vm5, %v10262_v1, -inf }
 0x46f   : > { %2394 = vmax.xlane.f32.xlu1 %v2393_v19  ;;  %v3200_v25 = vpop.xlane.xlu1 %3199 }
 0x470   : > { %vm3217_vm13 = vcmp.ge.f32.partialorder %v9986_v36, %v3200_v25 }
 0x471   : > { %v10268_v7 = vsel %vm3217_vm13, -1e+30, %v9986_v36 }
 0x472   : > { %v3233_v40 = vsel %vm633_vm4, %v10268_v7, -inf }
 0x473   : > { %3234 = vmax.xlane.f32.xlu1 %v3233_v40  ;;  %v710_v22 = vpop.xlane.xlu1 %709 }
 0x474   : > { %vm727_vm14 = vcmp.ge.f32.partialorder %v9992_v44, %v710_v22 }
 0x475   : > { %v10274_v21 = vsel %vm727_vm14, -1e+30, %v9992_v44 }
 0x476   : > { %3663 = vrot.lane.b32.xlu0 %v14481_v6, %s8524_s20  ;;  %v743_v49 = vsel %vm633_vm4, %v10274_v21, -inf }
 0x477   : > { %744 = vmax.xlane.f32.xlu1 %v743_v49  ;;  %v4913_v9 = vpop.xlane.xlu1 %4912  ;;  %v10293_v49 = vpop.permute.xlu0 %3669 }
 0x478   : > { %vm4928_vm15 = vcmp.ge.f32.partialorder %v9998_v46, %v4913_v9  ;;  %14482 = vst [vmem:[#allocation78_spill] sm:$0xff] %v10293_v49 }
 0x479   : > { %v10282_v36 = vsel %vm4928_vm15, -1e+30, %v9998_v46 }
 0x47a   : > { %v4946_v19 = vsel %vm633_vm4, %v10282_v36, -inf }
 0x47b   : > { %4947 = vmax.xlane.f32.xlu1 %v4946_v19  ;;  %v716_v25 = vpop.xlane.xlu1 %715  ;;  %v10300_v19 = vpop.xlane.xlu0 %5735 }
 0x47c   : > { %vm729_vm3 = vcmp.ge.f32.partialorder %v10006_v50, %v716_v25  ;;  %14483 = vst [vmem:[#allocation79_spill] sm:$0xff] %v10300_v19 }
 0x47d   : > { %v10288_v44 = vsel %vm729_vm3, -1e+30, %v10006_v50 }
 0x47e   : > { %v749_v40 = vsel %vm633_vm4, %v10288_v44, -inf }
 0x47f   : > { %750 = vmax.xlane.f32.xlu1 %v749_v40  ;;  %v4919_v22 = vpop.xlane.xlu1 %4918  ;;  %v10302_v50 = vpop.xlane.xlu0 %5738  ;;  %v6138_v40 = vmul.f32 0.35355338, %v9797_v17 }
 0x480   : > { %vm4930_vm6 = vcmp.ge.f32.partialorder %v10012_v20, %v4919_v22  ;;  %14484 = vst [vmem:[#allocation80_spill] sm:$0xff] %v10302_v50 }
 0x481   : > { %v10296_v46 = vsel %vm4930_vm6, -1e+30, %v10012_v20  ;;  %v7331_v20 = vld [vmem:[%s14251_s3 + $0x188] sm:$0xff] }
 0x482   : > { %v4952_v9 = vsel %vm633_vm4, %v10296_v46, -inf  ;;  %v10316_v19 = vadd.f32 %v7331_v20, %v6138_v40 }
 0x483   : > { %4953 = vmax.xlane.f32.xlu1 %v4952_v9  ;;  %v10304_v25 = vpop.permute.xlu0 %3665 }
 0x484   : > { %14485 = vst [vmem:[#allocation81_spill] sm:$0xff] %v10304_v25  ;;  %14487 = vst [vmem:[#allocation82_spill] sm:$0xff] %v10316_v19  ;;  %v6160_v25 = vsel %vm633_vm4, %v10316_v19, -inf }
 0x494   : > { %3657 = vrot.lane.b32.xlu1 %v14486_v35, %s8524_s20 }
 0x495   : > { %v2357_v22 = vpop.xlane.xlu0 %2356 }
 0x496   : > { %vm2366_vm7 = vcmp.ge.f32.partialorder %v10021_v18, %v2357_v22 }
 0x497   : > { %v10314_v9 = vsel %vm2366_vm7, -1e+30, %v10021_v18 }
 0x498   : > { %v2390_v50 = vsel %vm633_vm4, %v10314_v9, -inf }
 0x499   : > { %2391 = vmax.xlane.f32.xlu0 %v2390_v50  ;;  %v3197_v17 = vpop.xlane.xlu0 %3196 }
 0x49a   : > { %vm3216_vm8 = vcmp.ge.f32.partialorder %v10027_v58, %v3197_v17 }
 0x49b   : > { %v10324_v49 = vsel %vm3216_vm8, -1e+30, %v10027_v58 }
 0x49c   : > { %v3230_v18 = vsel %vm633_vm4, %v10324_v49, -inf }
 0x49d   : > { %6161 = vmax.xlane.f32.xlu0 %v6160_v25  ;;  %v3203_v22 = vpop.xlane.xlu0 %3202 }
 0x49e   : > { %vm3218_vm9 = vcmp.ge.f32.partialorder %v10033_v53, %v3203_v22 }
 0x49f   : > { %v10330_v40 = vsel %vm3218_vm9, -1e+30, %v10033_v53 }
 0x4a0   : > { %v3236_v20 = vsel %vm633_vm4, %v10330_v40, -inf }
 0x4a1   : > { %3231 = vmax.xlane.f32.xlu0 %v3230_v18  ;;  %v3206_v50 = vpop.xlane.xlu0 %3205 }
 0x4a2   : > { %vm3219_vm10 = vcmp.ge.f32.partialorder %v10039_v4, %v3206_v50 }
 0x4a3   : > { %v10336_v58 = vsel %vm3219_vm10, -1e+30, %v10039_v4 }
 0x4a4   : > { %v3239_v17 = vsel %vm633_vm4, %v10336_v58, -inf }
 0x4a5   : > { %3237 = vmax.xlane.f32.xlu0 %v3236_v20  ;;  %v3209_v25 = vpop.xlane.xlu0 %3208  ;;  %v10351_v20 = vpop.permute.xlu1 %3661 }
 0x4a6   : > { %vm3220_vm11 = vcmp.ge.f32.partialorder %v10047_v13, %v3209_v25  ;;  %14488 = vst [vmem:[#allocation83_spill] sm:$0xff] %v10351_v20 }
 0x4a7   : > { %v10342_v53 = vsel %vm3220_vm11, -1e+30, %v10047_v13 }
 0x4a8   : > { %v3242_v18 = vsel %vm633_vm4, %v10342_v53, -inf }
 0x4a9   : > { %3240 = vmax.xlane.f32.xlu0 %v3239_v17  ;;  %v3212_v22 = vpop.xlane.xlu0 %3211 }
 0x4aa   : > { %vm3221_vm12 = vcmp.ge.f32.partialorder %v10055_v57, %v3212_v22 }
 0x4ab   : > { %v10348_v4 = vsel %vm3221_vm12, -1e+30, %v10055_v57 }
 0x4ac   : > { %v3245_v13 = vsel %vm633_vm4, %v10348_v4, -inf }
 0x4ad   : > { %3243 = vmax.xlane.f32.xlu0 %v3242_v18  ;;  %v3215_v50 = vpop.xlane.xlu0 %3214 }
 0x4ae   : > { %vm3222_vm13 = vcmp.ge.f32.partialorder %v10061_v55, %v3215_v50 }
 0x4af   : > { %v10356_v25 = vsel %vm3222_vm13, -1e+30, %v10061_v55 }
 0x4b0   : > { %v3248_v57 = vsel %vm652_vm5, %v10356_v25, -inf }
 0x4b1   : > { %3246 = vmax.xlane.f32.xlu0 %v3245_v13  ;;  %v4052_v17 = vpop.xlane.xlu0 %4051 }
 0x4b2   : > { %vm4071_vm14 = vcmp.ge.f32.partialorder %v10067_v60, %v4052_v17 }
 0x4b3   : > { %v10362_v18 = vsel %vm4071_vm14, -1e+30, %v10067_v60 }
 0x4b4   : > { %v722_v22 = vpop.xlane.xlu1 %721  ;;  %v4085_v17 = vsel %vm633_vm4, %v10362_v18, -inf }
 0x4b5   : > { %vm731_vm15 = vcmp.ge.f32.partialorder %v10072_v48, %v722_v22  ;;  %3249 = vmax.xlane.f32.xlu0 %v3248_v57  ;;  %v4055_v50 = vpop.xlane.xlu0 %4054 }
 0x4b6   : > { %v10366_v19 = vsel %vm731_vm15, -1e+30, %v10072_v48  ;;  %vm4072_vm3 = vcmp.ge.f32.partialorder %v10077_v28, %v4055_v50 }
 0x4b7   : > { %v755_v55 = vsel %vm633_vm4, %v10366_v19, -inf  ;;  %v10374_v60 = vsel %vm4072_vm3, -1e+30, %v10077_v28 }
 0x4b8   : > { %756 = vmax.xlane.f32.xlu1 %v755_v55  ;;  %v4925_v13 = vpop.xlane.xlu1 %4924  ;;  %v4088_v55 = vsel %vm633_vm4, %v10374_v60, -inf }
 0x4b9   : > { %vm4932_vm6 = vcmp.ge.f32.partialorder %v10084_v39, %v4925_v13  ;;  %4086 = vmax.xlane.f32.xlu0 %v4085_v17  ;;  %v4058_v22 = vpop.xlane.xlu0 %4057 }
 0x4ba   : > { %v10378_v48 = vsel %vm4932_vm6, -1e+30, %v10084_v39  ;;  %vm4073_vm7 = vcmp.ge.f32.partialorder %v10091_v29, %v4058_v22 }
 0x4bb   : > { %v4958_v57 = vsel %vm652_vm5, %v10378_v48, -inf  ;;  %v10386_v28 = vsel %vm4073_vm7, -1e+30, %v10091_v29 }
 0x4bc   : > { %4959 = vmax.xlane.f32.xlu1 %v4958_v57  ;;  %v725_v50 = vpop.xlane.xlu1 %724  ;;  %v4091_v57 = vsel %vm633_vm4, %v10386_v28, -inf }
 0x4bd   : > { %vm732_vm8 = vcmp.ge.f32.partialorder %v10098_v47, %v725_v50  ;;  %4089 = vmax.xlane.f32.xlu0 %v4088_v55  ;;  %v4061_v13 = vpop.xlane.xlu0 %4060 }
 0x4be   : > { %v10390_v39 = vsel %vm732_vm8, -1e+30, %v10098_v47  ;;  %vm4074_vm9 = vcmp.ge.f32.partialorder %v10103_v5, %v4061_v13 }
 0x4bf   : > { %v758_v17 = vsel %vm652_vm5, %v10390_v39, -inf  ;;  %v10398_v29 = vsel %vm4074_vm9, -1e+30, %v10103_v5 }
 0x4c0   : > { %759 = vmax.xlane.f32.xlu1 %v758_v17  ;;  %v1516_v22 = vpop.xlane.xlu1 %1515  ;;  %v4094_v17 = vsel %vm633_vm4, %v10398_v29, -inf }
 0x4c1   : > { %vm1535_vm10 = vcmp.ge.f32.partialorder %v10110_v33, %v1516_v22  ;;  %4092 = vmax.xlane.f32.xlu0 %v4091_v57  ;;  %v4064_v50 = vpop.xlane.xlu0 %4063 }
 0x4c2   : > { %v10402_v47 = vsel %vm1535_vm10, -1e+30, %v10110_v33  ;;  %vm4075_vm11 = vcmp.ge.f32.partialorder %v10117_v34, %v4064_v50 }
 0x4c3   : > { %v1549_v55 = vsel %vm633_vm4, %v10402_v47, -inf  ;;  %v10410_v5 = vsel %vm4075_vm11, -1e+30, %v10117_v34 }
 0x4c4   : > { %1550 = vmax.xlane.f32.xlu1 %v1549_v55  ;;  %v1519_v13 = vpop.xlane.xlu1 %1518  ;;  %v4097_v50 = vsel %vm633_vm4, %v10410_v5, -inf }
 0x4c5   : > { %vm1536_vm12 = vcmp.ge.f32.partialorder %v10130_v10, %v1519_v13  ;;  %4095 = vmax.xlane.f32.xlu0 %v4094_v17  ;;  %v4067_v22 = vpop.xlane.xlu0 %4066 }
 0x4c6   : > { %v10414_v33 = vsel %vm1536_vm12, -1e+30, %v10130_v10  ;;  %vm4076_vm13 = vcmp.ge.f32.partialorder %v10125_v27, %v4067_v22 }
 0x4c7   : > { %v1552_v57 = vsel %vm633_vm4, %v10414_v33, -inf  ;;  %v10422_v55 = vsel %vm4076_vm13, -1e+30, %v10125_v27 }
 0x4c8   : > { %1553 = vmax.xlane.f32.xlu1 %v1552_v57  ;;  %v4100_v10 = vsel %vm633_vm4, %v10422_v55, -inf }
 0x4c9   : > { %4098 = vmax.xlane.f32.xlu0 %v4097_v50  ;;  %v4070_v34 = vpop.xlane.xlu0 %4069 }
 0x4ca   : > { %vm4077_vm14 = vcmp.ge.f32.partialorder %v10139_v8, %v4070_v34 }
 0x4cb   : > { %v10428_v17 = vsel %vm4077_vm14, -1e+30, %v10139_v8 }
 0x4cc   : > { %v1522_v13 = vpop.xlane.xlu1 %1521  ;;  %v4103_v34 = vsel %vm652_vm5, %v10428_v17, -inf }
 0x4cd   : > { %vm1537_vm15 = vcmp.ge.f32.partialorder %v10151_v30, %v1522_v13  ;;  %4101 = vmax.xlane.f32.xlu0 %v4100_v10  ;;  %v4907_v22 = vpop.xlane.xlu0 %4906 }
 0x4ce   : > { %v10432_v57 = vsel %vm1537_vm15, -1e+30, %v10151_v30  ;;  %vm4926_vm3 = vcmp.ge.f32.partialorder %v10145_v41, %v4907_v22 }
 0x4cf   : > { %v1555_v27 = vsel %vm633_vm4, %v10432_v57, -inf  ;;  %v10440_v8 = vsel %vm4926_vm3, -1e+30, %v10145_v41 }
 0x4d0   : > { %1556 = vmax.xlane.f32.xlu1 %v1555_v27  ;;  %v1525_v50 = vpop.xlane.xlu1 %1524  ;;  %v4940_v27 = vsel %vm633_vm4, %v10440_v8, -inf }
 0x4d1   : > { %vm1538_vm6 = vcmp.ge.f32.partialorder %v10163_v59, %v1525_v50  ;;  %4104 = vmax.xlane.f32.xlu0 %v4103_v34  ;;  %v707_v13 = vpop.xlane.xlu0 %706 }
 0x4d2   : > { %v10444_v30 = vsel %vm1538_vm6, -1e+30, %v10163_v59  ;;  %vm726_vm7 = vcmp.ge.f32.partialorder %v10158_v0, %v707_v13 }
 0x4d3   : > { %v1558_v10 = vsel %vm633_vm4, %v10444_v30, -inf  ;;  %v10452_v41 = vsel %vm726_vm7, -1e+30, %v10158_v0 }
 0x4d4   : > { %1559 = vmax.xlane.f32.xlu1 %v1558_v10  ;;  %v1528_v22 = vpop.xlane.xlu1 %1527  ;;  %v740_v13 = vsel %vm633_vm4, %v10452_v41, -inf }
 0x4d5   : > { %vm1539_vm8 = vcmp.ge.f32.partialorder %v10178_v52, %v1528_v22  ;;  %4941 = vmax.xlane.f32.xlu0 %v4940_v27  ;;  %v4910_v50 = vpop.xlane.xlu0 %4909 }
 0x4d6   : > { %v10456_v59 = vsel %vm1539_vm8, -1e+30, %v10178_v52  ;;  %vm4927_vm9 = vcmp.ge.f32.partialorder %v10172_v62, %v4910_v50 }
 0x4d7   : > { %v1561_v34 = vsel %vm633_vm4, %v10456_v59, -inf  ;;  %v10464_v10 = vsel %vm4927_vm9, -1e+30, %v10172_v62 }
 0x4d8   : > { %1562 = vmax.xlane.f32.xlu1 %v1561_v34  ;;  %v4943_v52 = vsel %vm633_vm4, %v10464_v10, -inf }
 0x4d9   : > { %741 = vmax.xlane.f32.xlu0 %v740_v13  ;;  %v713_v0 = vpop.xlane.xlu0 %712 }
 0x4da   : > { %vm728_vm10 = vcmp.ge.f32.partialorder %v10187_v54, %v713_v0 }
 0x4db   : > { %v10470_v27 = vsel %vm728_vm10, -1e+30, %v10187_v54 }
 0x4dc   : > { %v1531_v22 = vpop.xlane.xlu1 %1530  ;;  %v746_v0 = vsel %vm633_vm4, %v10470_v27, -inf }
 0x4dd   : > { %vm1540_vm11 = vcmp.ge.f32.partialorder %v10199_v2, %v1531_v22  ;;  %4944 = vmax.xlane.f32.xlu0 %v4943_v52  ;;  %v4916_v50 = vpop.xlane.xlu0 %4915 }
 0x4de   : > { %v10474_v34 = vsel %vm1540_vm11, -1e+30, %v10199_v2  ;;  %vm4929_vm12 = vcmp.ge.f32.partialorder %v10193_v15, %v4916_v50 }
 0x4df   : > { %v1564_v62 = vsel %vm633_vm4, %v10474_v34, -inf  ;;  %v10482_v54 = vsel %vm4929_vm12, -1e+30, %v10193_v15 }
 0x4e0   : > { %1565 = vmax.xlane.f32.xlu1 %v1564_v62  ;;  %v1534_v13 = vpop.xlane.xlu1 %1533  ;;  %v4949_v62 = vsel %vm633_vm4, %v10482_v54, -inf }
 0x4e1   : > { %vm1541_vm13 = vcmp.ge.f32.partialorder %v10211_v26, %v1534_v13  ;;  %747 = vmax.xlane.f32.xlu0 %v746_v0  ;;  %v719_v22 = vpop.xlane.xlu0 %718 }
 0x4e2   : > { %v10486_v2 = vsel %vm1541_vm13, -1e+30, %v10211_v26  ;;  %vm730_vm14 = vcmp.ge.f32.partialorder %v10206_v3, %v719_v22 }
 0x4e3   : > { %v1567_v52 = vsel %vm652_vm5, %v10486_v2, -inf  ;;  %v10494_v15 = vsel %vm730_vm14, -1e+30, %v10206_v3 }
 0x4e4   : > { %1568 = vmax.xlane.f32.xlu1 %v1567_v52  ;;  %v2377_v50 = vpop.xlane.xlu1 %2376  ;;  %v752_v52 = vsel %vm633_vm4, %v10494_v15, -inf }
 0x4e5   : > { %vm2396_vm15 = vcmp.ge.f32.partialorder %v10226_v32, %v2377_v50  ;;  %4950 = vmax.xlane.f32.xlu0 %v4949_v62  ;;  %v4922_v13 = vpop.xlane.xlu0 %4921 }
 0x4e6   : > { %v10498_v26 = vsel %vm2396_vm15, -1e+30, %v10226_v32  ;;  %vm4931_vm3 = vcmp.ge.f32.partialorder %v10222_v11, %v4922_v13 }
 0x4e7   : > { %v2410_v0 = vsel %vm633_vm4, %v10498_v26, -inf  ;;  %v10506_v3 = vsel %vm4931_vm3, -1e+30, %v10222_v11 }
 0x4e8   : > { %2411 = vmax.xlane.f32.xlu1 %v2410_v0  ;;  %v2380_v22 = vpop.xlane.xlu1 %2379  ;;  %v4955_v13 = vsel %vm633_vm4, %v10506_v3, -inf }
 0x4e9   : > { %vm2397_vm6 = vcmp.ge.f32.partialorder %v10236_v42, %v2380_v22  ;;  %753 = vmax.xlane.f32.xlu0 %v752_v52  ;;  %v6141_v52 = vmul.f32 0.35355338, %v9805_v45 }
 0x4ea   : > { %v10510_v50 = vsel %vm2397_vm6, -1e+30, %v10236_v42 }
 0x4eb   : > { %v2413_v32 = vsel %vm633_vm4, %v10510_v50, -inf }
 0x4ec   : > { %2414 = vmax.xlane.f32.xlu1 %v2413_v32  ;;  %v2383_v62 = vpop.xlane.xlu1 %2382 }
 0x4ed   : > { %vm2398_vm7 = vcmp.ge.f32.partialorder %v10244_v12, %v2383_v62  ;;  %4956 = vmax.xlane.f32.xlu0 %v4955_v13 }
 0x4ee   : > { %v10518_v11 = vsel %vm2398_vm7, -1e+30, %v10244_v12  ;;  %v7334_v12 = vld [vmem:[%s14251_s3 + $0x1a0] sm:$0xff] }
 0x4ef   : > { %v2416_v0 = vsel %vm633_vm4, %v10518_v11, -inf }
 0x4f0   : > { %2417 = vmax.xlane.f32.xlu1 %v2416_v0  ;;  %v2386_v42 = vpop.xlane.xlu1 %2385  ;;  %v10536_v0 = vadd.f32 %v7334_v12, %v6141_v52  ;;  %v10554_v52 = vpop.xlane.xlu0 %5744  ;;  %v14493_v12 = vld [vmem:[#allocation56_spill] sm:$0xff] }
 0x4f1   : > { %vm2399_vm8 = vcmp.ge.f32.partialorder %v10250_v37, %v2386_v42  ;;  %v7335_v42 = vld [vmem:[%s14251_s3 + $0x1a8] sm:$0xff]  ;;  %14492 = vst [vmem:[#allocation86_spill] sm:$0xff] %v10554_v52  ;;  %v7333_v52 = vld [vmem:[%s14251_s3 + $0x198] sm:$0xff] }
 0x4f2   : > { %v10524_v22 = vsel %vm2399_vm8, -1e+30, %v10250_v37  ;;  %14489 = vst [vmem:[#allocation84_spill] sm:$0xff] %v10536_v0  ;;  %v6142_v37 = vmul.f32 0.35355338, %v9807_v31  ;;  %v14491_v31 = vld [vmem:[#allocation5_spill] sm:$0xff] }
 0x4f3   : > { %v2419_v32 = vsel %vm633_vm4, %v10524_v22, -inf }
 0x4f4   : > { %2420 = vmax.xlane.f32.xlu1 %v2419_v32  ;;  %v2389_v62 = vpop.xlane.xlu1 %2388  ;;  %v10544_v20 = vadd.f32 %v7335_v42, %v6142_v37  ;;  %v6169_v32 = vsel %vm633_vm4, %v10536_v0, -inf  ;;  %v7332_v37 = vld [vmem:[%s14251_s3 + $0x190] sm:$0xff]  ;;  %v10562_v42 = vpop.permute.xlu0 %3663 }
 0x4f5   : > { %vm2400_vm9 = vcmp.ge.f32.partialorder %v10256_v61, %v2389_v62  ;;  %v6139_v62 = vmul.f32 0.35355338, %v14493_v12  ;;  %14495 = vst [vmem:[#allocation87_spill] sm:$0xff] %v10562_v42 }
 0x4f6   : > { %v10534_v13 = vsel %vm2400_vm9, -1e+30, %v10256_v61  ;;  %14490 = vst [vmem:[#allocation85_spill] sm:$0xff] %v10544_v20  ;;  %v6172_v61 = vsel %vm633_vm4, %v10544_v20, -inf }
 0x4f7   : > { %v2422_v45 = vsel %vm633_vm4, %v10534_v13, -inf }
 0x4f8   : > { %2423 = vmax.xlane.f32.xlu1 %v2422_v45  ;;  %v10560_v45 = vadd.f32 %v7332_v37, %v6139_v62  ;;  %v2395_v20 = vpop.xlane.xlu1 %2394 }
 0x4f9   : > { %vm2402_vm12 = vcmp.ge.f32.partialorder %v10262_v1, %v2395_v20 }
 0x4fa   : > { %14494 = vst [vmem:[#allocation56_spill] sm:$0xff] %v10560_v45  ;;  %v6163_v0 = vsel %vm633_vm4, %v10560_v45, -inf }
 0x4fc   : > { %6170 = vmax.xlane.f32.xlu1 %v6169_v32  ;;  %v14496_v32 = vld [vmem:[#allocation57_spill] sm:$0xff]  ;;  %v3235_v45 = vpop.xlane.xlu1 %3234 }
 0x4fd   : > { %vm3252_vm14 = vcmp.ge.f32.partialorder %v10268_v7, %v3235_v45 }
 0x500   : > { %6173 = vmax.xlane.f32.xlu1 %v6172_v61  ;;  %v6140_v61 = vmul.f32 0.35355338, %v14496_v32 }
 0x502   : > { %v10574_v62 = vadd.f32 %v7333_v52, %v6140_v61 }
 0x503   : > { %3659 = vrot.lane.b32.xlu0 %v14491_v31, %s8524_s20 }
 0x504   : > { %14497 = vst [vmem:[#allocation57_spill] sm:$0xff] %v10574_v62  ;;  %v6166_v42 = vsel %vm633_vm4, %v10574_v62, -inf }
 0x511   : > { %4524 = vrot.lane.b32.xlu1 %v14469_v56, %s8515_s11 }
 0x522   : > { %6164 = vmax.xlane.f32.xlu0 %v6163_v0  ;;  %v2392_v12 = vpop.xlane.xlu0 %2391 }
 0x523   : > { %vm2401_vm10 = vcmp.ge.f32.partialorder %v10314_v9, %v2392_v12 }
 0x524   : > { %v10572_v56 = vsel %vm2401_vm10, -1e+30, %v10314_v9  ;;  %v745_v9 = vpop.xlane.xlu1 %744 }
 0x525   : > { %v2425_v37 = vsel %vm633_vm4, %v10572_v56, -inf  ;;  %vm762_vm3 = vcmp.ge.f32.partialorder %v10274_v21, %v745_v9 }
 0x526   : > { %2426 = vmax.xlane.f32.xlu0 %v2425_v37  ;;  %v10578_v32 = vpop.xlane.xlu0 %6161 }
 0x527   : > { %14498 = vst [vmem:[#allocation88_spill] sm:$0xff] %v10578_v32  ;;  %v7336_v32 = vld [vmem:[%s14251_s3 + $0x1b0] sm:$0xff] }
 0x528   : > { %v4948_v62 = vpop.xlane.xlu1 %4947 }
 0x529   : > { %vm4963_vm7 = vcmp.ge.f32.partialorder %v10282_v36, %v4948_v62 }
 0x52a   : > { %6167 = vmax.xlane.f32.xlu0 %v6166_v42  ;;  %v3232_v0 = vpop.xlane.xlu0 %3231  ;;  %v10594_v42 = vsel %vm2402_vm12, -1e+30, %v10262_v1 }
 0x52b   : > { %vm3251_vm11 = vcmp.ge.f32.partialorder %v10324_v49, %v3232_v0 }
 0x52c   : > { %v10584_v12 = vsel %vm3251_vm11, -1e+30, %v10324_v49 }
 0x52d   : > { %v3265_v52 = vsel %vm633_vm4, %v10584_v12, -inf }
 0x52e   : > { %3266 = vmax.xlane.f32.xlu0 %v3265_v52  ;;  %v3238_v61 = vpop.xlane.xlu0 %3237  ;;  %v10606_v52 = vsel %vm3252_vm14, -1e+30, %v10268_v7  ;;  %v751_v7 = vpop.xlane.xlu1 %750 }
 0x52f   : > { %vm3253_vm13 = vcmp.ge.f32.partialorder %v10330_v40, %v3238_v61  ;;  %vm764_vm9 = vcmp.ge.f32.partialorder %v10288_v44, %v751_v7 }
 0x530   : > { %v10591_v37 = vsel %vm3253_vm13, -1e+30, %v10330_v40  ;;  %v2428_v40 = vsel %vm652_vm5, %v10594_v42, -inf }
 0x531   : > { %v3271_v49 = vsel %vm633_vm4, %v10591_v37, -inf }
 0x532   : > { %3272 = vmax.xlane.f32.xlu0 %v3271_v49  ;;  %v3241_v0 = vpop.xlane.xlu0 %3240  ;;  %v10618_v49 = vsel %vm762_vm3, -1e+30, %v10274_v21  ;;  %v10630_v21 = vsel %vm4963_vm7, -1e+30, %v10282_v36  ;;  %v10642_v36 = vsel %vm764_vm9, -1e+30, %v10288_v44 }
 0x533   : > { %vm3254_vm15 = vcmp.ge.f32.partialorder %v10336_v58, %v3241_v0 }
 0x534   : > { %v10601_v20 = vsel %vm3254_vm15, -1e+30, %v10336_v58  ;;  %v3268_v58 = vsel %vm633_vm4, %v10606_v52, -inf }
 0x535   : > { %2429 = vmax.xlane.f32.xlu1 %v2428_v40  ;;  %v3274_v1 = vsel %vm633_vm4, %v10601_v20, -inf  ;;  %v778_v40 = vsel %vm633_vm4, %v10618_v49, -inf }
 0x536   : > { %3275 = vmax.xlane.f32.xlu0 %v3274_v1  ;;  %v3244_v45 = vpop.xlane.xlu0 %3243 }
 0x537   : > { %vm3255_vm6 = vcmp.ge.f32.partialorder %v10342_v53, %v3244_v45  ;;  %v4954_v45 = vpop.xlane.xlu1 %4953 }
 0x538   : > { %v10613_v61 = vsel %vm3255_vm6, -1e+30, %v10342_v53  ;;  %vm4965_vm11 = vcmp.ge.f32.partialorder %v10296_v46, %v4954_v45 }
 0x539   : > { %3269 = vmax.xlane.f32.xlu1 %v3268_v58  ;;  %v3277_v0 = vsel %vm633_vm4, %v10613_v61, -inf  ;;  %v4981_v58 = vsel %vm633_vm4, %v10630_v21, -inf }
 0x53a   : > { %3278 = vmax.xlane.f32.xlu0 %v3277_v0  ;;  %v3247_v9 = vpop.xlane.xlu0 %3246 }
 0x53b   : > { %vm3256_vm8 = vcmp.ge.f32.partialorder %v10348_v4, %v3247_v9 }
 0x53c   : > { %v10625_v53 = vsel %vm3256_vm8, -1e+30, %v10348_v4 }
 0x53d   : > { %779 = vmax.xlane.f32.xlu1 %v778_v40  ;;  %v3280_v1 = vsel %vm633_vm4, %v10625_v53, -inf  ;;  %v10654_v40 = vsel %vm4965_vm11, -1e+30, %v10296_v46 }
 0x53e   : > { %3281 = vmax.xlane.f32.xlu0 %v3280_v1  ;;  %v3250_v62 = vpop.xlane.xlu0 %3249 }
 0x53f   : > { %vm3257_vm10 = vcmp.ge.f32.partialorder %v10356_v25, %v3250_v62 }
 0x540   : > { %v10637_v4 = vsel %vm3257_vm10, -1e+30, %v10356_v25  ;;  %v784_v25 = vsel %vm633_vm4, %v10642_v36, -inf }
 0x541   : > { %4982 = vmax.xlane.f32.xlu1 %v4981_v58  ;;  %v3283_v0 = vsel %vm652_vm5, %v10637_v4, -inf }
 0x542   : > { %3284 = vmax.xlane.f32.xlu0 %v3283_v0  ;;  %v4087_v7 = vpop.xlane.xlu0 %4086 }
 0x543   : > { %vm4106_vm12 = vcmp.ge.f32.partialorder %v10362_v18, %v4087_v7 }
 0x544   : > { %v10649_v9 = vsel %vm4106_vm12, -1e+30, %v10362_v18  ;;  %v4987_v18 = vsel %vm633_vm4, %v10654_v40, -inf }
 0x545   : > { %785 = vmax.xlane.f32.xlu1 %v784_v25  ;;  %v4120_v44 = vsel %vm633_vm4, %v10649_v9, -inf }
 0x546   : > { %4121 = vmax.xlane.f32.xlu0 %v4120_v44  ;;  %v4090_v1 = vpop.xlane.xlu0 %4089 }
 0x547   : > { %vm4107_vm13 = vcmp.ge.f32.partialorder %v10374_v60, %v4090_v1 }
 0x548   : > { %v10660_v62 = vsel %vm4107_vm13, -1e+30, %v10374_v60 }
 0x549   : > { %4988 = vmax.xlane.f32.xlu1 %v4987_v18  ;;  %v4123_v45 = vsel %vm633_vm4, %v10660_v62, -inf }
 0x54a   : > { %4124 = vmax.xlane.f32.xlu0 %v4123_v45  ;;  %v4093_v46 = vpop.xlane.xlu0 %4092 }
 0x54b   : > { %vm4108_vm14 = vcmp.ge.f32.partialorder %v10386_v28, %v4093_v46 }
 0x54c   : > { %v10668_v58 = vsel %vm4108_vm14, -1e+30, %v10386_v28 }
 0x54d   : > { %v4126_v0 = vsel %vm633_vm4, %v10668_v58, -inf }
 0x54e   : > { %4127 = vmax.xlane.f32.xlu0 %v4126_v0  ;;  %v4096_v60 = vpop.xlane.xlu0 %4095 }
 0x54f   : > { %vm4109_vm15 = vcmp.ge.f32.partialorder %v10398_v29, %v4096_v60 }
 0x550   : > { %v10674_v7 = vsel %vm4109_vm15, -1e+30, %v10398_v29 }
 0x551   : > { %v4129_v25 = vsel %vm633_vm4, %v10674_v7, -inf }
 0x552   : > { %4130 = vmax.xlane.f32.xlu0 %v4129_v25  ;;  %v4099_v44 = vpop.xlane.xlu0 %4098 }
 0x553   : > { %vm4110_vm3 = vcmp.ge.f32.partialorder %v10410_v5, %v4099_v44 }
 0x554   : > { %v10680_v28 = vsel %vm4110_vm3, -1e+30, %v10410_v5 }
 0x555   : > { %v4132_v1 = vsel %vm633_vm4, %v10680_v28, -inf }
 0x556   : > { %4133 = vmax.xlane.f32.xlu0 %v4132_v1  ;;  %v4102_v18 = vpop.xlane.xlu0 %4101 }
 0x557   : > { %vm4111_vm6 = vcmp.ge.f32.partialorder %v10422_v55, %v4102_v18 }
 0x558   : > { %v10686_v29 = vsel %vm4111_vm6, -1e+30, %v10422_v55 }
 0x559   : > { %v4135_v45 = vsel %vm633_vm4, %v10686_v29, -inf }
 0x55a   : > { %4520 = vrot.lane.b32.xlu1 %v14473_v24, %s8515_s11  ;;  %4136 = vmax.xlane.f32.xlu0 %v4135_v45  ;;  %v4105_v46 = vpop.xlane.xlu0 %4104 }
 0x55b   : > { %vm4112_vm7 = vcmp.ge.f32.partialorder %v10428_v17, %v4105_v46 }
 0x55c   : > { %v10694_v5 = vsel %vm4112_vm7, -1e+30, %v10428_v17 }
 0x55d   : > { %v4138_v0 = vsel %vm652_vm5, %v10694_v5, -inf }
 0x55e   : > { %4139 = vmax.xlane.f32.xlu0 %v4138_v0  ;;  %v4942_v60 = vpop.xlane.xlu0 %4941 }
 0x55f   : > { %vm4961_vm8 = vcmp.ge.f32.partialorder %v10440_v8, %v4942_v60 }
 0x560   : > { %v10700_v55 = vsel %vm4961_vm8, -1e+30, %v10440_v8 }
 0x561   : > { %v4975_v25 = vsel %vm633_vm4, %v10700_v55, -inf }
 0x562   : > { %4976 = vmax.xlane.f32.xlu0 %v4975_v25  ;;  %v742_v44 = vpop.xlane.xlu0 %741  ;;  %v10726_v25 = vpop.permute.xlu1 %3657 }
 0x563   : > { %vm761_vm9 = vcmp.ge.f32.partialorder %v10452_v41, %v742_v44  ;;  %14499 = vst [vmem:[#allocation89_spill] sm:$0xff] %v10726_v25 }
 0x564   : > { %v10706_v17 = vsel %vm761_vm9, -1e+30, %v10452_v41 }
 0x565   : > { %v775_v1 = vsel %vm633_vm4, %v10706_v17, -inf }
 0x566   : > { %776 = vmax.xlane.f32.xlu0 %v775_v1  ;;  %v4945_v18 = vpop.xlane.xlu0 %4944 }
 0x567   : > { %vm4962_vm10 = vcmp.ge.f32.partialorder %v10464_v10, %v4945_v18  ;;  %v14500_v18 = vld [vmem:[#allocation58_spill] sm:$0xff] }
 0x568   : > { %v10712_v8 = vsel %vm4962_vm10, -1e+30, %v10464_v10 }
 0x569   : > { %v4978_v45 = vsel %vm633_vm4, %v10712_v8, -inf }
 0x56a   : > { %4979 = vmax.xlane.f32.xlu0 %v4978_v45  ;;  %v748_v46 = vpop.xlane.xlu0 %747  ;;  %v6143_v45 = vmul.f32 0.35355338, %v14500_v18 }
 0x56b   : > { %vm763_vm11 = vcmp.ge.f32.partialorder %v10470_v27, %v748_v46  ;;  %v14501_v46 = vld [vmem:[#allocation59_spill] sm:$0xff] }
 0x56c   : > { %v10718_v41 = vsel %vm763_vm11, -1e+30, %v10470_v27  ;;  %v10748_v18 = vadd.f32 %v7336_v32, %v6143_v45  ;;  %v14504_v45 = vld [vmem:[#allocation9_spill] sm:$0xff] }
 0x56d   : > { %v781_v0 = vsel %vm633_vm4, %v10718_v41, -inf }
 0x56e   : > { %782 = vmax.xlane.f32.xlu0 %v781_v0  ;;  %v4951_v60 = vpop.xlane.xlu0 %4950  ;;  %v6144_v0 = vmul.f32 0.35355338, %v14501_v46  ;;  %14502 = vst [vmem:[#allocation58_spill] sm:$0xff] %v10748_v18 }
 0x56f   : > { %vm4964_vm12 = vcmp.ge.f32.partialorder %v10482_v54, %v4951_v60  ;;  %v757_v60 = vpop.xlane.xlu1 %756 }
 0x570   : > { %v10724_v10 = vsel %vm4964_vm12, -1e+30, %v10482_v54  ;;  %vm766_vm15 = vcmp.ge.f32.partialorder %v10366_v19, %v757_v60 }
 0x571   : > { %v4984_v44 = vsel %vm633_vm4, %v10724_v10, -inf }
 0x572   : > { %4985 = vmax.xlane.f32.xlu0 %v4984_v44  ;;  %v754_v1 = vpop.xlane.xlu0 %753  ;;  %v7337_v44 = vld [vmem:[%s14251_s3 + $0x1b8] sm:$0x1] }
 0x573   : > { %vm765_vm13 = vcmp.ge.f32.partialorder %v10494_v15, %v754_v1  ;;  %v10750_v46 = vadd.f32 %v7337_v44, %v6144_v0  ;;  %v4960_v24 = vpop.xlane.xlu1 %4959 }
 0x574   : > { %v10732_v27 = vsel %vm765_vm13, -1e+30, %v10494_v15  ;;  %vm4967_vm3 = vcmp.ge.f32.partialorder %v10378_v48, %v4960_v24 }
 0x575   : > { %v787_v54 = vsel %vm633_vm4, %v10732_v27, -inf  ;;  %14503 = vst [vmem:[#allocation59_spill] sm:$0xff] %v10750_v46  ;;  %v6178_v35 = vsel %vm652_vm5, %v10750_v46, -inf  ;;  %v10788_v60 = vsel %vm4967_vm3, -1e+30, %v10378_v48 }
 0x576   : > { %788 = vmax.xlane.f32.xlu0 %v787_v54  ;;  %v4957_v1 = vpop.xlane.xlu0 %4956  ;;  %v6175_v54 = vsel %vm633_vm4, %v10748_v18, -inf }
 0x577   : > { %vm4966_vm14 = vcmp.ge.f32.partialorder %v10506_v3, %v4957_v1  ;;  %v760_v1 = vpop.xlane.xlu1 %759 }
 0x578   : > { %v10746_v15 = vsel %vm4966_vm14, -1e+30, %v10506_v3  ;;  %vm767_vm7 = vcmp.ge.f32.partialorder %v10390_v39, %v760_v1 }
 0x579   : > { %v4990_v25 = vsel %vm633_vm4, %v10746_v15, -inf }
 0x57a   : > { %4991 = vmax.xlane.f32.xlu0 %v4990_v25  ;;  %v10768_v18 = vpop.permute.xlu0 %3659 }
 0x57b   : > { %v1551_v3 = vpop.xlane.xlu1 %1550  ;;  %14505 = vst [vmem:[#allocation90_spill] sm:$0xff] %v10768_v18 }
 0x57c   : > { %vm1570_vm8 = vcmp.ge.f32.partialorder %v10402_v47, %v1551_v3 }
 0x57e   : > { %6179 = vmax.xlane.f32.xlu1 %v6178_v35  ;;  %6176 = vmax.xlane.f32.xlu0 %v6175_v54 }
 0x57f   : > { %v1554_v31 = vpop.xlane.xlu1 %1553 }
 0x580   : > { %vm1571_vm10 = vcmp.ge.f32.partialorder %v10414_v33, %v1554_v31 }
 0x583   : > { %v1557_v32 = vpop.xlane.xlu1 %1556 }
 0x584   : > { %vm1572_vm12 = vcmp.ge.f32.partialorder %v10432_v57, %v1557_v32 }
 0x587   : > { %v1560_v25 = vpop.xlane.xlu1 %1559 }
 0x588   : > { %vm1573_vm14 = vcmp.ge.f32.partialorder %v10444_v30, %v1560_v25 }
 0x58b   : > { %v10762_v0 = vpop.xlane.xlu1 %1562 }
 0x58c   : > { %vm1574_vm3 = vcmp.ge.f32.partialorder %v10456_v59, %v10762_v0 }
 0x58f   : > { %4518 = vrot.lane.b32.xlu1 %v14481_v6, %s8515_s11  ;;  %v10764_v44 = vpop.xlane.xlu1 %1565  ;;  %v10776_v6 = vsel %vm766_vm15, -1e+30, %v10366_v19 }
 0x590   : > { %v790_v18 = vsel %vm633_vm4, %v10776_v6, -inf }
 0x593   : > { %v10766_v46 = vpop.xlane.xlu1 %1568 }
 0x594   : > { %4522 = vrot.lane.b32.xlu0 %v14504_v45, %s8515_s11 }
 0x597   : > { %v10773_v54 = vpop.xlane.xlu1 %2411 }
 0x59b   : > { %v10790_v51 = vpop.xlane.xlu1 %2414 }
 0x59f   : > { %v10802_v48 = vpop.xlane.xlu1 %2417 }
 0x5ab   : > { %v10770_v35 = vpop.xlane.xlu0 %6164 }
 0x5ac   : > { %14506 = vst [vmem:[#allocation91_spill] sm:$0xff] %v10770_v35 }
 0x5af   : > { %v2427_v63 = vpop.xlane.xlu0 %2426 }
 0x5b0   : > { %vm2436_vm6 = vcmp.ge.f32.partialorder %v10572_v56, %v2427_v63  ;;  %v4993_v63 = vsel %vm652_vm5, %v10788_v60, -inf }
 0x5b1   : > { %v10781_v45 = vsel %vm2436_vm6, -1e+30, %v10572_v56  ;;  %v10798_v56 = vsel %vm767_vm7, -1e+30, %v10390_v39  ;;  %v10812_v39 = vsel %vm1570_vm8, -1e+30, %v10402_v47  ;;  %v10826_v47 = vpop.xlane.xlu1 %2420  ;;  %vm1575_vm7 = vcmp.ge.f32.partialorder %v10474_v34, %v10764_v44 }
 0x5b2   : > { %v2460_v35 = vsel %vm633_vm4, %v10781_v45, -inf  ;;  %v793_v1 = vsel %vm652_vm5, %v10798_v56, -inf }
 0x5b3   : > { %791 = vmax.xlane.f32.xlu1 %v790_v18  ;;  %2461 = vmax.xlane.f32.xlu0 %v2460_v35  ;;  %v10792_v19 = vpop.xlane.xlu0 %6167 }
 0x5b4   : > { %14507 = vst [vmem:[#allocation92_spill] sm:$0xff] %v10792_v19  ;;  %v10824_v19 = vsel %vm1571_vm10, -1e+30, %v10414_v33  ;;  %v10838_v33 = vsel %vm1572_vm12, -1e+30, %v10432_v57 }
 0x5b5   : > { %v10842_v32 = vpop.xlane.xlu1 %2423  ;;  %v10852_v57 = vsel %vm1573_vm14, -1e+30, %v10444_v30  ;;  %v10865_v30 = vsel %vm1574_vm3, -1e+30, %v10456_v59 }
 0x5b6   : > { %v1593_v25 = vsel %vm633_vm4, %v10852_v57, -inf  ;;  %v1596_v0 = vsel %vm633_vm4, %v10865_v30, -inf }
 0x5b7   : > { %4994 = vmax.xlane.f32.xlu1 %v4993_v63  ;;  %v3267_v24 = vpop.xlane.xlu0 %3266 }
 0x5b8   : > { %vm3286_vm9 = vcmp.ge.f32.partialorder %v10584_v12, %v3267_v24 }
 0x5b9   : > { %v10805_v18 = vsel %vm3286_vm9, -1e+30, %v10584_v12  ;;  %v1584_v12 = vsel %vm633_vm4, %v10812_v39, -inf  ;;  %vm1576_vm9 = vcmp.ge.f32.partialorder %v10486_v2, %v10766_v46 }
 0x5ba   : > { %v3300_v35 = vsel %vm633_vm4, %v10805_v18, -inf }
 0x5bb   : > { %794 = vmax.xlane.f32.xlu1 %v793_v1  ;;  %3301 = vmax.xlane.f32.xlu0 %v3300_v35  ;;  %v3273_v63 = vpop.xlane.xlu0 %3272 }
 0x5bc   : > { %vm3288_vm11 = vcmp.ge.f32.partialorder %v10591_v37, %v3273_v63 }
 0x5bd   : > { %v10817_v3 = vsel %vm3288_vm11, -1e+30, %v10591_v37  ;;  %v1587_v37 = vsel %vm633_vm4, %v10824_v19, -inf  ;;  %vm2431_vm11 = vcmp.ge.f32.partialorder %v10498_v26, %v10773_v54 }
 0x5be   : > { %v3306_v24 = vsel %vm633_vm4, %v10817_v3, -inf }
 0x5bf   : > { %1585 = vmax.xlane.f32.xlu1 %v1584_v12  ;;  %3307 = vmax.xlane.f32.xlu0 %v3306_v24  ;;  %v3276_v1 = vpop.xlane.xlu0 %3275  ;;  %v1590_v12 = vsel %vm633_vm4, %v10838_v33, -inf }
 0x5c0   : > { %vm3289_vm13 = vcmp.ge.f32.partialorder %v10601_v20, %v3276_v1 }
 0x5c1   : > { %v10831_v31 = vsel %vm3289_vm13, -1e+30, %v10601_v20  ;;  %vm2432_vm13 = vcmp.ge.f32.partialorder %v10510_v50, %v10790_v51 }
 0x5c2   : > { %v3309_v35 = vsel %vm633_vm4, %v10831_v31, -inf }
 0x5c3   : > { %1588 = vmax.xlane.f32.xlu1 %v1587_v37  ;;  %3310 = vmax.xlane.f32.xlu0 %v3309_v35  ;;  %v3279_v63 = vpop.xlane.xlu0 %3278  ;;  %v10867_v35 = vpop.xlane.xlu1 %6170 }
 0x5c4   : > { %vm3290_vm15 = vcmp.ge.f32.partialorder %v10613_v61, %v3279_v63  ;;  %14508 = vst [vmem:[#allocation93_spill] sm:$0xff] %v10867_v35 }
 0x5c5   : > { %v10845_v20 = vsel %vm3290_vm15, -1e+30, %v10613_v61  ;;  %vm2433_vm15 = vcmp.ge.f32.partialorder %v10518_v11, %v10802_v48 }
 0x5c6   : > { %v3312_v24 = vsel %vm633_vm4, %v10845_v20, -inf }
 0x5c7   : > { %1591 = vmax.xlane.f32.xlu1 %v1590_v12  ;;  %3313 = vmax.xlane.f32.xlu0 %v3312_v24  ;;  %v3282_v1 = vpop.xlane.xlu0 %3281  ;;  %v10880_v12 = vsel %vm1575_vm7, -1e+30, %v10474_v34  ;;  %v10885_v44 = vpop.xlane.xlu1 %6173 }
 0x5c8   : > { %vm3291_vm6 = vcmp.ge.f32.partialorder %v10625_v53, %v3282_v1  ;;  %14509 = vst [vmem:[#allocation94_spill] sm:$0xff] %v10885_v44  ;;  %v1599_v1 = vsel %vm633_vm4, %v10880_v12, -inf }
 0x5c9   : > { %v10858_v61 = vsel %vm3291_vm6, -1e+30, %v10625_v53  ;;  %vm2434_vm6 = vcmp.ge.f32.partialorder %v10524_v22, %v10826_v47 }
 0x5ca   : > { %v3315_v37 = vsel %vm633_vm4, %v10858_v61, -inf }
 0x5cb   : > { %1594 = vmax.xlane.f32.xlu1 %v1593_v25  ;;  %3316 = vmax.xlane.f32.xlu0 %v3315_v37  ;;  %v3285_v63 = vpop.xlane.xlu0 %3284  ;;  %v10895_v25 = vsel %vm1576_vm9, -1e+30, %v10486_v2  ;;  %v10908_v2 = vsel %vm2431_vm11, -1e+30, %v10498_v26 }
 0x5cc   : > { %vm3292_vm8 = vcmp.ge.f32.partialorder %v10637_v4, %v3285_v63  ;;  %v1602_v46 = vsel %vm652_vm5, %v10895_v25, -inf  ;;  %v2445_v54 = vsel %vm633_vm4, %v10908_v2, -inf }
 0x5cd   : > { %v10873_v53 = vsel %vm3292_vm8, -1e+30, %v10637_v4  ;;  %vm2435_vm8 = vcmp.ge.f32.partialorder %v10534_v13, %v10842_v32 }
 0x5ce   : > { %v3318_v59 = vsel %vm652_vm5, %v10873_v53, -inf }
 0x5cf   : > { %1597 = vmax.xlane.f32.xlu1 %v1596_v0  ;;  %3319 = vmax.xlane.f32.xlu0 %v3318_v59  ;;  %v4122_v24 = vpop.xlane.xlu0 %4121  ;;  %v10910_v0 = vpop.permute.xlu1 %4524 }
 0x5d0   : > { %vm4141_vm10 = vcmp.ge.f32.partialorder %v10649_v9, %v4122_v24  ;;  %v10923_v24 = vsel %vm2432_vm13, -1e+30, %v10510_v50  ;;  %v10936_v50 = vsel %vm2433_vm15, -1e+30, %v10518_v11  ;;  %v10949_v11 = vsel %vm2434_vm6, -1e+30, %v10524_v22 }
 0x5d1   : > { %v10888_v4 = vsel %vm4141_vm10, -1e+30, %v10649_v9  ;;  %v2454_v47 = vsel %vm633_vm4, %v10949_v11, -inf  ;;  %v10962_v22 = vsel %vm2435_vm8, -1e+30, %v10534_v13 }
 0x5d2   : > { %v4155_v34 = vsel %vm633_vm4, %v10888_v4, -inf  ;;  %v2457_v32 = vsel %vm633_vm4, %v10962_v22, -inf }
 0x5d3   : > { %1600 = vmax.xlane.f32.xlu1 %v1599_v1  ;;  %4156 = vmax.xlane.f32.xlu0 %v4155_v34  ;;  %v4125_v37 = vpop.xlane.xlu0 %4124  ;;  %v2430_v1 = vpop.xlane.xlu1 %2429 }
 0x5d4   : > { %vm4142_vm12 = vcmp.ge.f32.partialorder %v10660_v62, %v4125_v37  ;;  %vm2437_vm10 = vcmp.ge.f32.partialorder %v10594_v42, %v2430_v1 }
 0x5d5   : > { %v10901_v9 = vsel %vm4142_vm12, -1e+30, %v10660_v62  ;;  %v10974_v13 = vsel %vm2437_vm10, -1e+30, %v10594_v42 }
 0x5d6   : > { %v4158_v63 = vsel %vm633_vm4, %v10901_v9, -inf }
 0x5d7   : > { %1603 = vmax.xlane.f32.xlu1 %v1602_v46  ;;  %4159 = vmax.xlane.f32.xlu0 %v4158_v63  ;;  %v4128_v59 = vpop.xlane.xlu0 %4127  ;;  %v3270_v48 = vpop.xlane.xlu1 %3269  ;;  %v2451_v63 = vsel %vm633_vm4, %v10936_v50, -inf }
 0x5d8   : > { %vm4143_vm14 = vcmp.ge.f32.partialorder %v10668_v58, %v4128_v59  ;;  %vm3287_vm12 = vcmp.ge.f32.partialorder %v10606_v52, %v3270_v48 }
 0x5d9   : > { %v10916_v62 = vsel %vm4143_vm14, -1e+30, %v10668_v58  ;;  %v2448_v58 = vsel %vm633_vm4, %v10923_v24, -inf  ;;  %v10986_v42 = vsel %vm3287_vm12, -1e+30, %v10606_v52 }
 0x5da   : > { %v4161_v26 = vsel %vm633_vm4, %v10916_v62, -inf }
 0x5db   : > { %2446 = vmax.xlane.f32.xlu1 %v2445_v54  ;;  %4162 = vmax.xlane.f32.xlu0 %v4161_v26  ;;  %v4131_v34 = vpop.xlane.xlu0 %4130 }
 0x5dc   : > { %vm4144_vm3 = vcmp.ge.f32.partialorder %v10674_v7, %v4131_v34  ;;  %v780_v34 = vpop.xlane.xlu1 %779 }
 0x5dd   : > { %v10929_v51 = vsel %vm4144_vm3, -1e+30, %v10674_v7  ;;  %vm797_vm14 = vcmp.ge.f32.partialorder %v10618_v49, %v780_v34 }
 0x5de   : > { %v4164_v37 = vsel %vm633_vm4, %v10929_v51, -inf }
 0x5df   : > { %2449 = vmax.xlane.f32.xlu1 %v2448_v58  ;;  %4165 = vmax.xlane.f32.xlu0 %v4164_v37  ;;  %v4134_v46 = vpop.xlane.xlu0 %4133 }
 0x5e0   : > { %vm4145_vm7 = vcmp.ge.f32.partialorder %v10680_v28, %v4134_v46  ;;  %v4983_v1 = vpop.xlane.xlu1 %4982 }
 0x5e1   : > { %v10942_v7 = vsel %vm4145_vm7, -1e+30, %v10680_v28  ;;  %vm4998_vm3 = vcmp.ge.f32.partialorder %v10630_v21, %v4983_v1 }
 0x5e2   : > { %v4167_v59 = vsel %vm633_vm4, %v10942_v7, -inf }
 0x5e3   : > { %2452 = vmax.xlane.f32.xlu1 %v2451_v63  ;;  %4168 = vmax.xlane.f32.xlu0 %v4167_v59  ;;  %v4137_v54 = vpop.xlane.xlu0 %4136  ;;  %v2463_v63 = vsel %vm652_vm5, %v10974_v13, -inf }
 0x5e4   : > { %vm4146_vm9 = vcmp.ge.f32.partialorder %v10686_v29, %v4137_v54  ;;  %v786_v52 = vpop.xlane.xlu1 %785 }
 0x5e5   : > { %v10955_v28 = vsel %vm4146_vm9, -1e+30, %v10686_v29  ;;  %vm799_vm7 = vcmp.ge.f32.partialorder %v10642_v36, %v786_v52 }
 0x5e6   : > { %v4170_v26 = vsel %vm633_vm4, %v10955_v28, -inf }
 0x5e7   : > { %2455 = vmax.xlane.f32.xlu1 %v2454_v47  ;;  %4171 = vmax.xlane.f32.xlu0 %v4170_v26  ;;  %v4140_v58 = vpop.xlane.xlu0 %4139  ;;  %v10998_v26 = vsel %vm797_vm14, -1e+30, %v10618_v49  ;;  %v11010_v49 = vsel %vm4998_vm3, -1e+30, %v10630_v21  ;;  %v11022_v21 = vsel %vm799_vm7, -1e+30, %v10642_v36 }
 0x5e8   : > { %vm4147_vm11 = vcmp.ge.f32.partialorder %v10694_v5, %v4140_v58  ;;  %v813_v34 = vsel %vm633_vm4, %v10998_v26, -inf  ;;  %v5016_v1 = vsel %vm633_vm4, %v11010_v49, -inf }
 0x5e9   : > { %v10967_v29 = vsel %vm4147_vm11, -1e+30, %v10694_v5 }
 0x5ea   : > { %v4173_v37 = vsel %vm652_vm5, %v10967_v29, -inf }
 0x5eb   : > { %2458 = vmax.xlane.f32.xlu1 %v2457_v32  ;;  %4174 = vmax.xlane.f32.xlu0 %v4173_v37  ;;  %v4977_v46 = vpop.xlane.xlu0 %4976 }
 0x5ec   : > { %vm4996_vm13 = vcmp.ge.f32.partialorder %v10700_v55, %v4977_v46  ;;  %v4989_v46 = vpop.xlane.xlu1 %4988 }
 0x5ed   : > { %v10979_v5 = vsel %vm4996_vm13, -1e+30, %v10700_v55  ;;  %v3303_v55 = vsel %vm633_vm4, %v10986_v42, -inf  ;;  %vm5000_vm9 = vcmp.ge.f32.partialorder %v10654_v40, %v4989_v46 }
 0x5ee   : > { %v5010_v59 = vsel %vm633_vm4, %v10979_v5, -inf }
 0x5ef   : > { %2464 = vmax.xlane.f32.xlu1 %v2463_v63  ;;  %5011 = vmax.xlane.f32.xlu0 %v5010_v59  ;;  %v777_v54 = vpop.xlane.xlu0 %776 }
 0x5f0   : > { %vm796_vm15 = vcmp.ge.f32.partialorder %v10706_v17, %v777_v54 }
 0x5f1   : > { %v10991_v48 = vsel %vm796_vm15, -1e+30, %v10706_v17 }
 0x5f2   : > { %v810_v47 = vsel %vm633_vm4, %v10991_v48, -inf }
 0x5f3   : > { %3304 = vmax.xlane.f32.xlu1 %v3303_v55  ;;  %811 = vmax.xlane.f32.xlu0 %v810_v47  ;;  %v4980_v58 = vpop.xlane.xlu0 %4979  ;;  %v11034_v47 = vsel %vm5000_vm9, -1e+30, %v10654_v40 }
 0x5f4   : > { %vm4997_vm6 = vcmp.ge.f32.partialorder %v10712_v8, %v4980_v58 }
 0x5f5   : > { %v11003_v17 = vsel %vm4997_vm6, -1e+30, %v10712_v8 }
 0x5f6   : > { %v5013_v32 = vsel %vm633_vm4, %v11003_v17, -inf }
 0x5f7   : > { %814 = vmax.xlane.f32.xlu1 %v813_v34  ;;  %5014 = vmax.xlane.f32.xlu0 %v5013_v32  ;;  %v783_v37 = vpop.xlane.xlu0 %782 }
 0x5f8   : > { %vm798_vm8 = vcmp.ge.f32.partialorder %v10718_v41, %v783_v37 }
 0x5f9   : > { %v11015_v8 = vsel %vm798_vm8, -1e+30, %v10718_v41  ;;  %v819_v41 = vsel %vm633_vm4, %v11022_v21, -inf }
 0x5fa   : > { %v816_v63 = vsel %vm633_vm4, %v11015_v8, -inf }
 0x5fb   : > { %5017 = vmax.xlane.f32.xlu1 %v5016_v1  ;;  %817 = vmax.xlane.f32.xlu0 %v816_v63  ;;  %v4986_v59 = vpop.xlane.xlu0 %4985 }
 0x5fc   : > { %vm4999_vm10 = vcmp.ge.f32.partialorder %v10724_v10, %v4986_v59 }
 0x5fd   : > { %v11027_v54 = vsel %vm4999_vm10, -1e+30, %v10724_v10  ;;  %v5022_v10 = vsel %vm633_vm4, %v11034_v47, -inf }
 0x5fe   : > { %v5019_v55 = vsel %vm633_vm4, %v11027_v54, -inf }
 0x5ff   : > { %820 = vmax.xlane.f32.xlu1 %v819_v41  ;;  %5020 = vmax.xlane.f32.xlu0 %v5019_v55  ;;  %v789_v36 = vpop.xlane.xlu0 %788 }
 0x600   : > { %vm800_vm11 = vcmp.ge.f32.partialorder %v10732_v27, %v789_v36 }
 0x601   : > { %v11038_v52 = vsel %vm800_vm11, -1e+30, %v10732_v27  ;;  %v11050_v27 = vpop.permute.xlu1 %4520 }
 0x602   : > { %v822_v58 = vsel %vm633_vm4, %v11038_v52, -inf  ;;  %14510 = vst [vmem:[#allocation95_spill] sm:$0xff] %v11050_v27 }
 0x603   : > { %5023 = vmax.xlane.f32.xlu1 %v5022_v10  ;;  %823 = vmax.xlane.f32.xlu0 %v822_v58  ;;  %v4992_v34 = vpop.xlane.xlu0 %4991 }
 0x604   : > { %vm5001_vm12 = vcmp.ge.f32.partialorder %v10746_v15, %v4992_v34 }
 0x605   : > { %v11046_v40 = vsel %vm5001_vm12, -1e+30, %v10746_v15 }
 0x606   : > { %v5025_v32 = vsel %vm633_vm4, %v11046_v40, -inf }
 0x607   : > { %5026 = vmax.xlane.f32.xlu0 %v5025_v32  ;;  %v11052_v37 = vpop.xlane.xlu1 %6179  ;;  %v11054_v46 = vpop.xlane.xlu0 %6176 }
 0x608   : > { %14511 = vst [vmem:[#allocation96_spill] sm:$0xff] %v11052_v37  ;;  %14512 = vst [vmem:[#allocation97_spill] sm:$0xff] %v11054_v46 }
 0x60b   : > { %v11056_v1 = vpop.permute.xlu1 %4518  ;;  %v11058_v63 = vpop.permute.xlu0 %4522 }
 0x60c   : > { %14513 = vst [vmem:[#allocation98_spill] sm:$0xff] %v11056_v1  ;;  %14514 = vst [vmem:[#allocation99_spill] sm:$0xff] %v11058_v63 }
 0x63c   : > { %v792_v59 = vpop.xlane.xlu1 %791  ;;  %v2462_v41 = vpop.xlane.xlu0 %2461 }
 0x63d   : > { %vm801_vm13 = vcmp.ge.f32.partialorder %v10776_v6, %v792_v59  ;;  %vm2471_vm14 = vcmp.ge.f32.partialorder %v10781_v45, %v2462_v41 }
 0x63e   : > { %v11063_v15 = vsel %vm801_vm13, -1e+30, %v10776_v6  ;;  %v11066_v55 = vsel %vm2471_vm14, -1e+30, %v10781_v45 }
 0x63f   : > { %v825_v36 = vsel %vm633_vm4, %v11063_v15, -inf  ;;  %v2495_v10 = vsel %vm633_vm4, %v11066_v55, -inf }
 0x640   : > { %826 = vmax.xlane.f32.xlu1 %v825_v36  ;;  %v4995_v58 = vpop.xlane.xlu1 %4994  ;;  %2496 = vmax.xlane.f32.xlu0 %v2495_v10 }
 0x641   : > { %vm5002_vm15 = vcmp.ge.f32.partialorder %v10788_v60, %v4995_v58 }
 0x642   : > { %v11074_v34 = vsel %vm5002_vm15, -1e+30, %v10788_v60 }
 0x643   : > { %v5028_v6 = vsel %vm652_vm5, %v11074_v34, -inf }
 0x644   : > { %5029 = vmax.xlane.f32.xlu1 %v5028_v6  ;;  %v795_v45 = vpop.xlane.xlu1 %794  ;;  %v3302_v32 = vpop.xlane.xlu0 %3301 }
 0x645   : > { %vm802_vm3 = vcmp.ge.f32.partialorder %v10798_v56, %v795_v45  ;;  %vm3321_vm6 = vcmp.ge.f32.partialorder %v10805_v18, %v3302_v32 }
 0x646   : > { %v11081_v59 = vsel %vm802_vm3, -1e+30, %v10798_v56  ;;  %v11084_v41 = vsel %vm3321_vm6, -1e+30, %v10805_v18 }
 0x647   : > { %v828_v60 = vsel %vm652_vm5, %v11081_v59, -inf  ;;  %v3335_v36 = vsel %vm633_vm4, %v11084_v41, -inf }
 0x648   : > { %829 = vmax.xlane.f32.xlu1 %v828_v60  ;;  %v1586_v10 = vpop.xlane.xlu1 %1585  ;;  %3336 = vmax.xlane.f32.xlu0 %v3335_v36  ;;  %v3308_v58 = vpop.xlane.xlu0 %3307 }
 0x649   : > { %vm1605_vm7 = vcmp.ge.f32.partialorder %v10812_v39, %v1586_v10  ;;  %vm3323_vm8 = vcmp.ge.f32.partialorder %v10817_v3, %v3308_v58 }
 0x64a   : > { %v11093_v56 = vsel %vm1605_vm7, -1e+30, %v10812_v39  ;;  %v11096_v18 = vsel %vm3323_vm8, -1e+30, %v10817_v3 }
 0x64b   : > { %v1619_v6 = vsel %vm633_vm4, %v11093_v56, -inf  ;;  %v3341_v45 = vsel %vm633_vm4, %v11096_v18, -inf }
 0x64c   : > { %1620 = vmax.xlane.f32.xlu1 %v1619_v6  ;;  %v1589_v32 = vpop.xlane.xlu1 %1588  ;;  %3342 = vmax.xlane.f32.xlu0 %v3341_v45  ;;  %v3311_v60 = vpop.xlane.xlu0 %3310 }
 0x64d   : > { %vm1606_vm9 = vcmp.ge.f32.partialorder %v10824_v19, %v1589_v32  ;;  %vm3324_vm10 = vcmp.ge.f32.partialorder %v10831_v31, %v3311_v60 }
 0x64e   : > { %v11105_v39 = vsel %vm1606_vm9, -1e+30, %v10824_v19  ;;  %v11108_v3 = vsel %vm3324_vm10, -1e+30, %v10831_v31 }
 0x64f   : > { %v1622_v36 = vsel %vm633_vm4, %v11105_v39, -inf  ;;  %v3344_v10 = vsel %vm633_vm4, %v11108_v3, -inf }
 0x650   : > { %1623 = vmax.xlane.f32.xlu1 %v1622_v36  ;;  %v1592_v58 = vpop.xlane.xlu1 %1591  ;;  %3345 = vmax.xlane.f32.xlu0 %v3344_v10  ;;  %v3314_v6 = vpop.xlane.xlu0 %3313 }
 0x651   : > { %vm1607_vm11 = vcmp.ge.f32.partialorder %v10838_v33, %v1592_v58  ;;  %vm3325_vm12 = vcmp.ge.f32.partialorder %v10845_v20, %v3314_v6 }
 0x652   : > { %v11117_v19 = vsel %vm1607_vm11, -1e+30, %v10838_v33  ;;  %v11120_v31 = vsel %vm3325_vm12, -1e+30, %v10845_v20 }
 0x653   : > { %v1625_v45 = vsel %vm633_vm4, %v11117_v19, -inf  ;;  %v3347_v32 = vsel %vm633_vm4, %v11120_v31, -inf }
 0x654   : > { %1626 = vmax.xlane.f32.xlu1 %v1625_v45  ;;  %v1595_v60 = vpop.xlane.xlu1 %1594  ;;  %3348 = vmax.xlane.f32.xlu0 %v3347_v32  ;;  %v3317_v36 = vpop.xlane.xlu0 %3316 }
 0x655   : > { %vm1608_vm13 = vcmp.ge.f32.partialorder %v10852_v57, %v1595_v60  ;;  %vm3326_vm14 = vcmp.ge.f32.partialorder %v10858_v61, %v3317_v36 }
 0x656   : > { %v11129_v33 = vsel %vm1608_vm13, -1e+30, %v10852_v57  ;;  %v11132_v20 = vsel %vm3326_vm14, -1e+30, %v10858_v61 }
 0x657   : > { %v1628_v10 = vsel %vm633_vm4, %v11129_v33, -inf  ;;  %v3350_v58 = vsel %vm633_vm4, %v11132_v20, -inf }
 0x658   : > { %1629 = vmax.xlane.f32.xlu1 %v1628_v10  ;;  %v1598_v6 = vpop.xlane.xlu1 %1597  ;;  %3351 = vmax.xlane.f32.xlu0 %v3350_v58  ;;  %v3320_v45 = vpop.xlane.xlu0 %3319 }
 0x659   : > { %vm1609_vm15 = vcmp.ge.f32.partialorder %v10865_v30, %v1598_v6  ;;  %vm3327_vm3 = vcmp.ge.f32.partialorder %v10873_v53, %v3320_v45 }
 0x65a   : > { %v11141_v57 = vsel %vm1609_vm15, -1e+30, %v10865_v30  ;;  %v11144_v61 = vsel %vm3327_vm3, -1e+30, %v10873_v53 }
 0x65b   : > { %v1631_v32 = vsel %vm633_vm4, %v11141_v57, -inf  ;;  %v3353_v60 = vsel %vm652_vm5, %v11144_v61, -inf }
 0x65c   : > { %1632 = vmax.xlane.f32.xlu1 %v1631_v32  ;;  %v1601_v36 = vpop.xlane.xlu1 %1600  ;;  %3354 = vmax.xlane.f32.xlu0 %v3353_v60  ;;  %v4157_v10 = vpop.xlane.xlu0 %4156 }
 0x65d   : > { %vm1610_vm6 = vcmp.ge.f32.partialorder %v10880_v12, %v1601_v36  ;;  %vm4176_vm7 = vcmp.ge.f32.partialorder %v10888_v4, %v4157_v10 }
 0x65e   : > { %v11153_v30 = vsel %vm1610_vm6, -1e+30, %v10880_v12  ;;  %v11156_v53 = vsel %vm4176_vm7, -1e+30, %v10888_v4 }
 0x65f   : > { %v1634_v58 = vsel %vm633_vm4, %v11153_v30, -inf  ;;  %v4190_v6 = vsel %vm633_vm4, %v11156_v53, -inf }
 0x660   : > { %1635 = vmax.xlane.f32.xlu1 %v1634_v58  ;;  %v1604_v45 = vpop.xlane.xlu1 %1603  ;;  %4191 = vmax.xlane.f32.xlu0 %v4190_v6  ;;  %v4160_v32 = vpop.xlane.xlu0 %4159 }
 0x661   : > { %vm1611_vm8 = vcmp.ge.f32.partialorder %v10895_v25, %v1604_v45  ;;  %vm4177_vm9 = vcmp.ge.f32.partialorder %v10901_v9, %v4160_v32 }
 0x662   : > { %v11165_v12 = vsel %vm1611_vm8, -1e+30, %v10895_v25  ;;  %v11168_v4 = vsel %vm4177_vm9, -1e+30, %v10901_v9 }
 0x663   : > { %v1637_v60 = vsel %vm652_vm5, %v11165_v12, -inf  ;;  %v4193_v36 = vsel %vm633_vm4, %v11168_v4, -inf }
 0x664   : > { %1638 = vmax.xlane.f32.xlu1 %v1637_v60  ;;  %v2447_v10 = vpop.xlane.xlu1 %2446  ;;  %4194 = vmax.xlane.f32.xlu0 %v4193_v36  ;;  %v4163_v58 = vpop.xlane.xlu0 %4162 }
 0x665   : > { %vm2466_vm10 = vcmp.ge.f32.partialorder %v10908_v2, %v2447_v10  ;;  %vm4178_vm11 = vcmp.ge.f32.partialorder %v10916_v62, %v4163_v58 }
 0x666   : > { %v11177_v25 = vsel %vm2466_vm10, -1e+30, %v10908_v2  ;;  %v11180_v9 = vsel %vm4178_vm11, -1e+30, %v10916_v62 }
 0x667   : > { %v2480_v6 = vsel %vm633_vm4, %v11177_v25, -inf  ;;  %v4196_v45 = vsel %vm633_vm4, %v11180_v9, -inf }
 0x668   : > { %2481 = vmax.xlane.f32.xlu1 %v2480_v6  ;;  %v2450_v32 = vpop.xlane.xlu1 %2449  ;;  %4197 = vmax.xlane.f32.xlu0 %v4196_v45  ;;  %v4166_v60 = vpop.xlane.xlu0 %4165 }
 0x669   : > { %vm2467_vm12 = vcmp.ge.f32.partialorder %v10923_v24, %v2450_v32  ;;  %vm4179_vm13 = vcmp.ge.f32.partialorder %v10929_v51, %v4166_v60 }
 0x66a   : > { %v11189_v2 = vsel %vm2467_vm12, -1e+30, %v10923_v24  ;;  %v11192_v62 = vsel %vm4179_vm13, -1e+30, %v10929_v51 }
 0x66b   : > { %v2483_v36 = vsel %vm633_vm4, %v11189_v2, -inf  ;;  %v4199_v10 = vsel %vm633_vm4, %v11192_v62, -inf }
 0x66c   : > { %2484 = vmax.xlane.f32.xlu1 %v2483_v36  ;;  %v2453_v58 = vpop.xlane.xlu1 %2452  ;;  %4200 = vmax.xlane.f32.xlu0 %v4199_v10  ;;  %v4169_v6 = vpop.xlane.xlu0 %4168 }
 0x66d   : > { %vm2468_vm14 = vcmp.ge.f32.partialorder %v10936_v50, %v2453_v58  ;;  %vm4180_vm15 = vcmp.ge.f32.partialorder %v10942_v7, %v4169_v6 }
 0x66e   : > { %v11201_v24 = vsel %vm2468_vm14, -1e+30, %v10936_v50  ;;  %v11204_v51 = vsel %vm4180_vm15, -1e+30, %v10942_v7 }
 0x66f   : > { %v2486_v45 = vsel %vm633_vm4, %v11201_v24, -inf  ;;  %v4202_v32 = vsel %vm633_vm4, %v11204_v51, -inf }
 0x670   : > { %2487 = vmax.xlane.f32.xlu1 %v2486_v45  ;;  %v2456_v60 = vpop.xlane.xlu1 %2455  ;;  %4203 = vmax.xlane.f32.xlu0 %v4202_v32  ;;  %v4172_v36 = vpop.xlane.xlu0 %4171 }
 0x671   : > { %vm2469_vm3 = vcmp.ge.f32.partialorder %v10949_v11, %v2456_v60  ;;  %vm4181_vm6 = vcmp.ge.f32.partialorder %v10955_v28, %v4172_v36 }
 0x672   : > { %v11213_v50 = vsel %vm2469_vm3, -1e+30, %v10949_v11  ;;  %v11216_v7 = vsel %vm4181_vm6, -1e+30, %v10955_v28 }
 0x673   : > { %v2489_v10 = vsel %vm633_vm4, %v11213_v50, -inf  ;;  %v4205_v58 = vsel %vm633_vm4, %v11216_v7, -inf }
 0x674   : > { %2490 = vmax.xlane.f32.xlu1 %v2489_v10  ;;  %v2459_v6 = vpop.xlane.xlu1 %2458  ;;  %4206 = vmax.xlane.f32.xlu0 %v4205_v58  ;;  %v4175_v45 = vpop.xlane.xlu0 %4174 }
 0x675   : > { %vm2470_vm7 = vcmp.ge.f32.partialorder %v10962_v22, %v2459_v6  ;;  %vm4182_vm8 = vcmp.ge.f32.partialorder %v10967_v29, %v4175_v45 }
 0x676   : > { %v11225_v11 = vsel %vm2470_vm7, -1e+30, %v10962_v22  ;;  %v11228_v28 = vsel %vm4182_vm8, -1e+30, %v10967_v29 }
 0x677   : > { %v2492_v32 = vsel %vm633_vm4, %v11225_v11, -inf  ;;  %v4208_v60 = vsel %vm652_vm5, %v11228_v28, -inf }
 0x678   : > { %2493 = vmax.xlane.f32.xlu1 %v2492_v32  ;;  %v2465_v36 = vpop.xlane.xlu1 %2464  ;;  %4209 = vmax.xlane.f32.xlu0 %v4208_v60  ;;  %v5012_v10 = vpop.xlane.xlu0 %5011 }
 0x679   : > { %vm2472_vm9 = vcmp.ge.f32.partialorder %v10974_v13, %v2465_v36  ;;  %vm5031_vm10 = vcmp.ge.f32.partialorder %v10979_v5, %v5012_v10 }
 0x67a   : > { %v11237_v22 = vsel %vm2472_vm9, -1e+30, %v10974_v13  ;;  %v11240_v29 = vsel %vm5031_vm10, -1e+30, %v10979_v5 }
 0x67b   : > { %v2498_v58 = vsel %vm652_vm5, %v11237_v22, -inf  ;;  %v5045_v6 = vsel %vm633_vm4, %v11240_v29, -inf }
 0x67c   : > { %2499 = vmax.xlane.f32.xlu1 %v2498_v58  ;;  %v3305_v45 = vpop.xlane.xlu1 %3304  ;;  %5046 = vmax.xlane.f32.xlu0 %v5045_v6  ;;  %v812_v32 = vpop.xlane.xlu0 %811 }
 0x67d   : > { %vm3322_vm11 = vcmp.ge.f32.partialorder %v10986_v42, %v3305_v45  ;;  %vm831_vm12 = vcmp.ge.f32.partialorder %v10991_v48, %v812_v32 }
 0x67e   : > { %v11249_v13 = vsel %vm3322_vm11, -1e+30, %v10986_v42  ;;  %v11252_v5 = vsel %vm831_vm12, -1e+30, %v10991_v48 }
 0x67f   : > { %v3338_v60 = vsel %vm633_vm4, %v11249_v13, -inf  ;;  %v845_v36 = vsel %vm633_vm4, %v11252_v5, -inf }
 0x680   : > { %3339 = vmax.xlane.f32.xlu1 %v3338_v60  ;;  %v815_v10 = vpop.xlane.xlu1 %814  ;;  %846 = vmax.xlane.f32.xlu0 %v845_v36  ;;  %v5015_v58 = vpop.xlane.xlu0 %5014 }
 0x681   : > { %vm832_vm13 = vcmp.ge.f32.partialorder %v10998_v26, %v815_v10  ;;  %vm5032_vm14 = vcmp.ge.f32.partialorder %v11003_v17, %v5015_v58 }
 0x682   : > { %v11261_v42 = vsel %vm832_vm13, -1e+30, %v10998_v26  ;;  %v11264_v48 = vsel %vm5032_vm14, -1e+30, %v11003_v17 }
 0x683   : > { %v848_v6 = vsel %vm633_vm4, %v11261_v42, -inf  ;;  %v5048_v45 = vsel %vm633_vm4, %v11264_v48, -inf }
 0x684   : > { %849 = vmax.xlane.f32.xlu1 %v848_v6  ;;  %v5018_v32 = vpop.xlane.xlu1 %5017  ;;  %5049 = vmax.xlane.f32.xlu0 %v5048_v45  ;;  %v818_v60 = vpop.xlane.xlu0 %817 }
 0x685   : > { %vm5033_vm15 = vcmp.ge.f32.partialorder %v11010_v49, %v5018_v32  ;;  %vm833_vm3 = vcmp.ge.f32.partialorder %v11015_v8, %v818_v60 }
 0x686   : > { %v11273_v26 = vsel %vm5033_vm15, -1e+30, %v11010_v49  ;;  %v11276_v17 = vsel %vm833_vm3, -1e+30, %v11015_v8 }
 0x687   : > { %v5051_v36 = vsel %vm633_vm4, %v11273_v26, -inf  ;;  %v851_v10 = vsel %vm633_vm4, %v11276_v17, -inf }
 0x688   : > { %5052 = vmax.xlane.f32.xlu1 %v5051_v36  ;;  %v821_v58 = vpop.xlane.xlu1 %820  ;;  %852 = vmax.xlane.f32.xlu0 %v851_v10  ;;  %v5021_v6 = vpop.xlane.xlu0 %5020 }
 0x689   : > { %vm834_vm6 = vcmp.ge.f32.partialorder %v11022_v21, %v821_v58  ;;  %vm5034_vm7 = vcmp.ge.f32.partialorder %v11027_v54, %v5021_v6 }
 0x68a   : > { %v11285_v49 = vsel %vm834_vm6, -1e+30, %v11022_v21  ;;  %v11288_v8 = vsel %vm5034_vm7, -1e+30, %v11027_v54 }
 0x68b   : > { %v854_v45 = vsel %vm633_vm4, %v11285_v49, -inf  ;;  %v5054_v32 = vsel %vm633_vm4, %v11288_v8, -inf }
 0x68c   : > { %855 = vmax.xlane.f32.xlu1 %v854_v45  ;;  %v5024_v60 = vpop.xlane.xlu1 %5023  ;;  %5055 = vmax.xlane.f32.xlu0 %v5054_v32  ;;  %v824_v36 = vpop.xlane.xlu0 %823 }
 0x68d   : > { %vm5035_vm8 = vcmp.ge.f32.partialorder %v11034_v47, %v5024_v60  ;;  %vm835_vm9 = vcmp.ge.f32.partialorder %v11038_v52, %v824_v36 }
 0x68e   : > { %v11297_v21 = vsel %vm5035_vm8, -1e+30, %v11034_v47  ;;  %v11300_v54 = vsel %vm835_vm9, -1e+30, %v11038_v52 }
 0x68f   : > { %v5057_v10 = vsel %vm633_vm4, %v11297_v21, -inf  ;;  %v857_v58 = vsel %vm633_vm4, %v11300_v54, -inf }
 0x690   : > { %5058 = vmax.xlane.f32.xlu1 %v5057_v10  ;;  %858 = vmax.xlane.f32.xlu0 %v857_v58  ;;  %v5027_v6 = vpop.xlane.xlu0 %5026 }
 0x691   : > { %vm5036_vm10 = vcmp.ge.f32.partialorder %v11046_v40, %v5027_v6 }
 0x692   : > { %v11308_v45 = vsel %vm5036_vm10, -1e+30, %v11046_v40 }
 0x693   : > { %v5060_v47 = vsel %vm633_vm4, %v11308_v45, -inf }
 0x694   : > { %5061 = vmax.xlane.f32.xlu0 %v5060_v47 }
 0x6c9   : > { %v827_v52 = vpop.xlane.xlu1 %826  ;;  %v2497_v32 = vpop.xlane.xlu0 %2496 }
 0x6ca   : > { %vm836_vm11 = vcmp.ge.f32.partialorder %v11063_v15, %v827_v52  ;;  %vm2506_vm12 = vcmp.ge.f32.partialorder %v11066_v55, %v2497_v32 }
 0x6cb   : > { %v11315_v60 = vsel %vm836_vm11, -1e+30, %v11063_v15  ;;  %v11318_v36 = vsel %vm2506_vm12, -1e+30, %v11066_v55 }
 0x6cc   : > { %v860_v40 = vsel %vm633_vm4, %v11315_v60, -inf  ;;  %v2530_v10 = vsel %vm633_vm4, %v11318_v36, -inf }
 0x6cd   : > { %861 = vmax.xlane.f32.xlu1 %v860_v40  ;;  %v5030_v58 = vpop.xlane.xlu1 %5029  ;;  %2531 = vmax.xlane.f32.xlu0 %v2530_v10 }
 0x6ce   : > { %vm5037_vm13 = vcmp.ge.f32.partialorder %v11074_v34, %v5030_v58 }
 0x6cf   : > { %v11326_v6 = vsel %vm5037_vm13, -1e+30, %v11074_v34 }
 0x6d0   : > { %v5063_v15 = vsel %vm652_vm5, %v11326_v6, -inf }
 0x6d1   : > { %5064 = vmax.xlane.f32.xlu1 %v5063_v15  ;;  %v830_v55 = vpop.xlane.xlu1 %829  ;;  %v3337_v47 = vpop.xlane.xlu0 %3336 }
 0x6d2   : > { %vm837_vm14 = vcmp.ge.f32.partialorder %v11081_v59, %v830_v55  ;;  %vm3356_vm15 = vcmp.ge.f32.partialorder %v11084_v41, %v3337_v47 }
 0x6d3   : > { %v11333_v52 = vsel %vm837_vm14, -1e+30, %v11081_v59  ;;  %v11336_v32 = vsel %vm3356_vm15, -1e+30, %v11084_v41 }
 0x6d4   : > { %v863_v34 = vsel %vm652_vm5, %v11333_v52, -inf  ;;  %v3370_v40 = vsel %vm633_vm4, %v11336_v32, -inf }
 0x6d5   : > { %864 = vmax.xlane.f32.xlu1 %v863_v34  ;;  %v1621_v10 = vpop.xlane.xlu1 %1620  ;;  %3371 = vmax.xlane.f32.xlu0 %v3370_v40  ;;  %v3343_v58 = vpop.xlane.xlu0 %3342 }
 0x6d6   : > { %vm1640_vm3 = vcmp.ge.f32.partialorder %v11093_v56, %v1621_v10  ;;  %vm3358_vm6 = vcmp.ge.f32.partialorder %v11096_v18, %v3343_v58 }
 0x6d7   : > { %v11345_v59 = vsel %vm1640_vm3, -1e+30, %v11093_v56  ;;  %v11348_v41 = vsel %vm3358_vm6, -1e+30, %v11096_v18 }
 0x6d8   : > { %v1654_v15 = vsel %vm633_vm4, %v11345_v59, -inf  ;;  %v3376_v55 = vsel %vm633_vm4, %v11348_v41, -inf }
 0x6d9   : > { %1655 = vmax.xlane.f32.xlu1 %v1654_v15  ;;  %v1624_v47 = vpop.xlane.xlu1 %1623  ;;  %3377 = vmax.xlane.f32.xlu0 %v3376_v55  ;;  %v3346_v34 = vpop.xlane.xlu0 %3345 }
 0x6da   : > { %vm1641_vm7 = vcmp.ge.f32.partialorder %v11105_v39, %v1624_v47  ;;  %vm3359_vm8 = vcmp.ge.f32.partialorder %v11108_v3, %v3346_v34 }
 0x6db   : > { %v11357_v56 = vsel %vm1641_vm7, -1e+30, %v11105_v39  ;;  %v11360_v18 = vsel %vm3359_vm8, -1e+30, %v11108_v3 }
 0x6dc   : > { %v1657_v40 = vsel %vm633_vm4, %v11357_v56, -inf  ;;  %v3379_v10 = vsel %vm633_vm4, %v11360_v18, -inf }
 0x6dd   : > { %1658 = vmax.xlane.f32.xlu1 %v1657_v40  ;;  %v1627_v58 = vpop.xlane.xlu1 %1626  ;;  %3380 = vmax.xlane.f32.xlu0 %v3379_v10  ;;  %v3349_v15 = vpop.xlane.xlu0 %3348 }
 0x6de   : > { %vm1642_vm9 = vcmp.ge.f32.partialorder %v11117_v19, %v1627_v58  ;;  %vm3360_vm10 = vcmp.ge.f32.partialorder %v11120_v31, %v3349_v15 }
 0x6df   : > { %v11369_v39 = vsel %vm1642_vm9, -1e+30, %v11117_v19  ;;  %v11372_v3 = vsel %vm3360_vm10, -1e+30, %v11120_v31 }
 0x6e0   : > { %v1660_v55 = vsel %vm633_vm4, %v11369_v39, -inf  ;;  %v3382_v47 = vsel %vm633_vm4, %v11372_v3, -inf }
 0x6e1   : > { %1661 = vmax.xlane.f32.xlu1 %v1660_v55  ;;  %v1630_v34 = vpop.xlane.xlu1 %1629  ;;  %3383 = vmax.xlane.f32.xlu0 %v3382_v47  ;;  %v3352_v40 = vpop.xlane.xlu0 %3351 }
 0x6e2   : > { %vm1643_vm11 = vcmp.ge.f32.partialorder %v11129_v33, %v1630_v34  ;;  %vm3361_vm12 = vcmp.ge.f32.partialorder %v11132_v20, %v3352_v40 }
 0x6e3   : > { %v11381_v19 = vsel %vm1643_vm11, -1e+30, %v11129_v33  ;;  %v11384_v31 = vsel %vm3361_vm12, -1e+30, %v11132_v20 }
 0x6e4   : > { %v1663_v10 = vsel %vm633_vm4, %v11381_v19, -inf  ;;  %v3385_v58 = vsel %vm633_vm4, %v11384_v31, -inf }
 0x6e5   : > { %1664 = vmax.xlane.f32.xlu1 %v1663_v10  ;;  %v1633_v15 = vpop.xlane.xlu1 %1632  ;;  %3386 = vmax.xlane.f32.xlu0 %v3385_v58  ;;  %v3355_v55 = vpop.xlane.xlu0 %3354 }
 0x6e6   : > { %vm1644_vm13 = vcmp.ge.f32.partialorder %v11141_v57, %v1633_v15  ;;  %vm3362_vm14 = vcmp.ge.f32.partialorder %v11144_v61, %v3355_v55 }
 0x6e7   : > { %v11393_v33 = vsel %vm1644_vm13, -1e+30, %v11141_v57  ;;  %v11396_v20 = vsel %vm3362_vm14, -1e+30, %v11144_v61 }
 0x6e8   : > { %v1666_v47 = vsel %vm633_vm4, %v11393_v33, -inf  ;;  %v3388_v34 = vsel %vm652_vm5, %v11396_v20, -inf }
 0x6e9   : > { %1667 = vmax.xlane.f32.xlu1 %v1666_v47  ;;  %v1636_v40 = vpop.xlane.xlu1 %1635  ;;  %3389 = vmax.xlane.f32.xlu0 %v3388_v34  ;;  %v4192_v10 = vpop.xlane.xlu0 %4191 }
 0x6ea   : > { %vm1645_vm15 = vcmp.ge.f32.partialorder %v11153_v30, %v1636_v40  ;;  %vm4211_vm3 = vcmp.ge.f32.partialorder %v11156_v53, %v4192_v10 }
 0x6eb   : > { %v11405_v57 = vsel %vm1645_vm15, -1e+30, %v11153_v30  ;;  %v11408_v61 = vsel %vm4211_vm3, -1e+30, %v11156_v53 }
 0x6ec   : > { %v1669_v58 = vsel %vm633_vm4, %v11405_v57, -inf  ;;  %v4225_v15 = vsel %vm633_vm4, %v11408_v61, -inf }
 0x6ed   : > { %1670 = vmax.xlane.f32.xlu1 %v1669_v58  ;;  %v1639_v55 = vpop.xlane.xlu1 %1638  ;;  %4226 = vmax.xlane.f32.xlu0 %v4225_v15  ;;  %v4195_v47 = vpop.xlane.xlu0 %4194 }
 0x6ee   : > { %vm1646_vm6 = vcmp.ge.f32.partialorder %v11165_v12, %v1639_v55  ;;  %vm4212_vm7 = vcmp.ge.f32.partialorder %v11168_v4, %v4195_v47 }
 0x6ef   : > { %v11417_v30 = vsel %vm1646_vm6, -1e+30, %v11165_v12  ;;  %v11420_v53 = vsel %vm4212_vm7, -1e+30, %v11168_v4 }
 0x6f0   : > { %v1672_v34 = vsel %vm652_vm5, %v11417_v30, -inf  ;;  %v4228_v40 = vsel %vm633_vm4, %v11420_v53, -inf }
 0x6f1   : > { %1673 = vmax.xlane.f32.xlu1 %v1672_v34  ;;  %v2482_v10 = vpop.xlane.xlu1 %2481  ;;  %4229 = vmax.xlane.f32.xlu0 %v4228_v40  ;;  %v4198_v58 = vpop.xlane.xlu0 %4197 }
 0x6f2   : > { %vm2501_vm8 = vcmp.ge.f32.partialorder %v11177_v25, %v2482_v10  ;;  %vm4213_vm9 = vcmp.ge.f32.partialorder %v11180_v9, %v4198_v58 }
 0x6f3   : > { %v11429_v12 = vsel %vm2501_vm8, -1e+30, %v11177_v25  ;;  %v11432_v4 = vsel %vm4213_vm9, -1e+30, %v11180_v9 }
 0x6f4   : > { %v2515_v15 = vsel %vm633_vm4, %v11429_v12, -inf  ;;  %v4231_v55 = vsel %vm633_vm4, %v11432_v4, -inf }
 0x6f5   : > { %2516 = vmax.xlane.f32.xlu1 %v2515_v15  ;;  %v2485_v47 = vpop.xlane.xlu1 %2484  ;;  %4232 = vmax.xlane.f32.xlu0 %v4231_v55  ;;  %v4201_v34 = vpop.xlane.xlu0 %4200 }
 0x6f6   : > { %vm2502_vm10 = vcmp.ge.f32.partialorder %v11189_v2, %v2485_v47  ;;  %vm4214_vm11 = vcmp.ge.f32.partialorder %v11192_v62, %v4201_v34 }
 0x6f7   : > { %v11441_v25 = vsel %vm2502_vm10, -1e+30, %v11189_v2  ;;  %v11444_v9 = vsel %vm4214_vm11, -1e+30, %v11192_v62 }
 0x6f8   : > { %v2518_v40 = vsel %vm633_vm4, %v11441_v25, -inf  ;;  %v4234_v10 = vsel %vm633_vm4, %v11444_v9, -inf }
 0x6f9   : > { %2519 = vmax.xlane.f32.xlu1 %v2518_v40  ;;  %v2488_v58 = vpop.xlane.xlu1 %2487  ;;  %4235 = vmax.xlane.f32.xlu0 %v4234_v10  ;;  %v4204_v15 = vpop.xlane.xlu0 %4203 }
 0x6fa   : > { %vm2503_vm12 = vcmp.ge.f32.partialorder %v11201_v24, %v2488_v58  ;;  %vm4215_vm13 = vcmp.ge.f32.partialorder %v11204_v51, %v4204_v15 }
 0x6fb   : > { %v11453_v2 = vsel %vm2503_vm12, -1e+30, %v11201_v24  ;;  %v11456_v62 = vsel %vm4215_vm13, -1e+30, %v11204_v51 }
 0x6fc   : > { %v2521_v55 = vsel %vm633_vm4, %v11453_v2, -inf  ;;  %v4237_v47 = vsel %vm633_vm4, %v11456_v62, -inf }
 0x6fd   : > { %2522 = vmax.xlane.f32.xlu1 %v2521_v55  ;;  %v2491_v34 = vpop.xlane.xlu1 %2490  ;;  %4238 = vmax.xlane.f32.xlu0 %v4237_v47  ;;  %v4207_v40 = vpop.xlane.xlu0 %4206 }
 0x6fe   : > { %vm2504_vm14 = vcmp.ge.f32.partialorder %v11213_v50, %v2491_v34  ;;  %vm4216_vm15 = vcmp.ge.f32.partialorder %v11216_v7, %v4207_v40 }
 0x6ff   : > { %v11465_v24 = vsel %vm2504_vm14, -1e+30, %v11213_v50  ;;  %v11468_v51 = vsel %vm4216_vm15, -1e+30, %v11216_v7 }
 0x700   : > { %v2524_v10 = vsel %vm633_vm4, %v11465_v24, -inf  ;;  %v4240_v58 = vsel %vm633_vm4, %v11468_v51, -inf }
 0x701   : > { %2525 = vmax.xlane.f32.xlu1 %v2524_v10  ;;  %v2494_v15 = vpop.xlane.xlu1 %2493  ;;  %4241 = vmax.xlane.f32.xlu0 %v4240_v58  ;;  %v4210_v55 = vpop.xlane.xlu0 %4209 }
 0x702   : > { %vm2505_vm3 = vcmp.ge.f32.partialorder %v11225_v11, %v2494_v15  ;;  %vm4217_vm6 = vcmp.ge.f32.partialorder %v11228_v28, %v4210_v55 }
 0x703   : > { %v11477_v50 = vsel %vm2505_vm3, -1e+30, %v11225_v11  ;;  %v11480_v7 = vsel %vm4217_vm6, -1e+30, %v11228_v28 }
 0x704   : > { %v2527_v47 = vsel %vm633_vm4, %v11477_v50, -inf  ;;  %v4243_v34 = vsel %vm652_vm5, %v11480_v7, -inf }
 0x705   : > { %2528 = vmax.xlane.f32.xlu1 %v2527_v47  ;;  %v2500_v40 = vpop.xlane.xlu1 %2499  ;;  %4244 = vmax.xlane.f32.xlu0 %v4243_v34  ;;  %v5047_v10 = vpop.xlane.xlu0 %5046 }
 0x706   : > { %vm2507_vm7 = vcmp.ge.f32.partialorder %v11237_v22, %v2500_v40  ;;  %vm5066_vm8 = vcmp.ge.f32.partialorder %v11240_v29, %v5047_v10 }
 0x707   : > { %v11489_v11 = vsel %vm2507_vm7, -1e+30, %v11237_v22  ;;  %v11492_v28 = vsel %vm5066_vm8, -1e+30, %v11240_v29 }
 0x708   : > { %v2533_v58 = vsel %vm652_vm5, %v11489_v11, -inf  ;;  %v5080_v15 = vsel %vm633_vm4, %v11492_v28, -inf }
 0x709   : > { %2534 = vmax.xlane.f32.xlu1 %v2533_v58  ;;  %v3340_v55 = vpop.xlane.xlu1 %3339  ;;  %5081 = vmax.xlane.f32.xlu0 %v5080_v15  ;;  %v847_v47 = vpop.xlane.xlu0 %846 }
 0x70a   : > { %vm3357_vm9 = vcmp.ge.f32.partialorder %v11249_v13, %v3340_v55  ;;  %vm866_vm10 = vcmp.ge.f32.partialorder %v11252_v5, %v847_v47 }
 0x70b   : > { %v11501_v22 = vsel %vm3357_vm9, -1e+30, %v11249_v13  ;;  %v11504_v29 = vsel %vm866_vm10, -1e+30, %v11252_v5 }
 0x70c   : > { %v3373_v34 = vsel %vm633_vm4, %v11501_v22, -inf  ;;  %v880_v40 = vsel %vm633_vm4, %v11504_v29, -inf }
 0x70d   : > { %3374 = vmax.xlane.f32.xlu1 %v3373_v34  ;;  %v850_v10 = vpop.xlane.xlu1 %849  ;;  %881 = vmax.xlane.f32.xlu0 %v880_v40  ;;  %v5050_v58 = vpop.xlane.xlu0 %5049 }
 0x70e   : > { %vm867_vm11 = vcmp.ge.f32.partialorder %v11261_v42, %v850_v10  ;;  %vm5067_vm12 = vcmp.ge.f32.partialorder %v11264_v48, %v5050_v58 }
 0x70f   : > { %v11513_v13 = vsel %vm867_vm11, -1e+30, %v11261_v42  ;;  %v11516_v5 = vsel %vm5067_vm12, -1e+30, %v11264_v48 }
 0x710   : > { %v883_v15 = vsel %vm633_vm4, %v11513_v13, -inf  ;;  %v5083_v55 = vsel %vm633_vm4, %v11516_v5, -inf }
 0x711   : > { %884 = vmax.xlane.f32.xlu1 %v883_v15  ;;  %v5053_v47 = vpop.xlane.xlu1 %5052  ;;  %5084 = vmax.xlane.f32.xlu0 %v5083_v55  ;;  %v853_v34 = vpop.xlane.xlu0 %852 }
 0x712   : > { %vm5068_vm13 = vcmp.ge.f32.partialorder %v11273_v26, %v5053_v47  ;;  %vm868_vm14 = vcmp.ge.f32.partialorder %v11276_v17, %v853_v34 }
 0x713   : > { %v11525_v42 = vsel %vm5068_vm13, -1e+30, %v11273_v26  ;;  %v11528_v48 = vsel %vm868_vm14, -1e+30, %v11276_v17 }
 0x714   : > { %v5086_v40 = vsel %vm633_vm4, %v11525_v42, -inf  ;;  %v886_v10 = vsel %vm633_vm4, %v11528_v48, -inf }
 0x715   : > { %5087 = vmax.xlane.f32.xlu1 %v5086_v40  ;;  %v856_v58 = vpop.xlane.xlu1 %855  ;;  %887 = vmax.xlane.f32.xlu0 %v886_v10  ;;  %v5056_v15 = vpop.xlane.xlu0 %5055 }
 0x716   : > { %vm869_vm15 = vcmp.ge.f32.partialorder %v11285_v49, %v856_v58  ;;  %vm5069_vm3 = vcmp.ge.f32.partialorder %v11288_v8, %v5056_v15 }
 0x717   : > { %v11537_v26 = vsel %vm869_vm15, -1e+30, %v11285_v49  ;;  %v11540_v17 = vsel %vm5069_vm3, -1e+30, %v11288_v8 }
 0x718   : > { %v889_v55 = vsel %vm633_vm4, %v11537_v26, -inf  ;;  %v5089_v47 = vsel %vm633_vm4, %v11540_v17, -inf }
 0x719   : > { %890 = vmax.xlane.f32.xlu1 %v889_v55  ;;  %v5059_v34 = vpop.xlane.xlu1 %5058  ;;  %5090 = vmax.xlane.f32.xlu0 %v5089_v47  ;;  %v859_v40 = vpop.xlane.xlu0 %858 }
 0x71a   : > { %vm5070_vm6 = vcmp.ge.f32.partialorder %v11297_v21, %v5059_v34  ;;  %vm870_vm7 = vcmp.ge.f32.partialorder %v11300_v54, %v859_v40 }
 0x71b   : > { %v11549_v49 = vsel %vm5070_vm6, -1e+30, %v11297_v21  ;;  %v11552_v8 = vsel %vm870_vm7, -1e+30, %v11300_v54 }
 0x71c   : > { %v5092_v10 = vsel %vm633_vm4, %v11549_v49, -inf  ;;  %v892_v58 = vsel %vm633_vm4, %v11552_v8, -inf }
 0x71d   : > { %5093 = vmax.xlane.f32.xlu1 %v5092_v10  ;;  %893 = vmax.xlane.f32.xlu0 %v892_v58  ;;  %v5062_v15 = vpop.xlane.xlu0 %5061 }
 0x71e   : > { %vm5071_vm8 = vcmp.ge.f32.partialorder %v11308_v45, %v5062_v15 }
 0x71f   : > { %v11560_v55 = vsel %vm5071_vm8, -1e+30, %v11308_v45 }
 0x720   : > { %v5095_v21 = vsel %vm633_vm4, %v11560_v55, -inf }
 0x721   : > { %5096 = vmax.xlane.f32.xlu0 %v5095_v21 }
 0x756   : > { %v862_v54 = vpop.xlane.xlu1 %861  ;;  %v2532_v47 = vpop.xlane.xlu0 %2531 }
 0x757   : > { %vm871_vm9 = vcmp.ge.f32.partialorder %v11315_v60, %v862_v54  ;;  %vm2541_vm10 = vcmp.ge.f32.partialorder %v11318_v36, %v2532_v47 }
 0x758   : > { %v11567_v34 = vsel %vm871_vm9, -1e+30, %v11315_v60  ;;  %v11570_v40 = vsel %vm2541_vm10, -1e+30, %v11318_v36 }
 0x759   : > { %v895_v45 = vsel %vm633_vm4, %v11567_v34, -inf  ;;  %v2565_v10 = vsel %vm633_vm4, %v11570_v40, -inf }
 0x75a   : > { %896 = vmax.xlane.f32.xlu1 %v895_v45  ;;  %v5065_v58 = vpop.xlane.xlu1 %5064  ;;  %2566 = vmax.xlane.f32.xlu0 %v2565_v10 }
 0x75b   : > { %vm5072_vm11 = vcmp.ge.f32.partialorder %v11326_v6, %v5065_v58 }
 0x75c   : > { %v11578_v15 = vsel %vm5072_vm11, -1e+30, %v11326_v6 }
 0x75d   : > { %v5098_v60 = vsel %vm652_vm5, %v11578_v15, -inf }
 0x75e   : > { %5099 = vmax.xlane.f32.xlu1 %v5098_v60  ;;  %v865_v36 = vpop.xlane.xlu1 %864  ;;  %v3372_v21 = vpop.xlane.xlu0 %3371 }
 0x75f   : > { %vm872_vm12 = vcmp.ge.f32.partialorder %v11333_v52, %v865_v36  ;;  %vm3391_vm13 = vcmp.ge.f32.partialorder %v11336_v32, %v3372_v21 }
 0x760   : > { %v11585_v54 = vsel %vm872_vm12, -1e+30, %v11333_v52  ;;  %v11588_v47 = vsel %vm3391_vm13, -1e+30, %v11336_v32 }
 0x761   : > { %v898_v6 = vsel %vm652_vm5, %v11585_v54, -inf  ;;  %v3405_v45 = vsel %vm633_vm4, %v11588_v47, -inf }
 0x762   : > { %899 = vmax.xlane.f32.xlu1 %v898_v6  ;;  %v1656_v10 = vpop.xlane.xlu1 %1655  ;;  %3406 = vmax.xlane.f32.xlu0 %v3405_v45  ;;  %v3378_v58 = vpop.xlane.xlu0 %3377 }
 0x763   : > { %vm1675_vm14 = vcmp.ge.f32.partialorder %v11345_v59, %v1656_v10  ;;  %vm3393_vm15 = vcmp.ge.f32.partialorder %v11348_v41, %v3378_v58 }
 0x764   : > { %v11597_v52 = vsel %vm1675_vm14, -1e+30, %v11345_v59  ;;  %v11600_v32 = vsel %vm3393_vm15, -1e+30, %v11348_v41 }
 0x765   : > { %v1689_v60 = vsel %vm633_vm4, %v11597_v52, -inf  ;;  %v3411_v36 = vsel %vm633_vm4, %v11600_v32, -inf }
 0x766   : > { %1690 = vmax.xlane.f32.xlu1 %v1689_v60  ;;  %v1659_v21 = vpop.xlane.xlu1 %1658  ;;  %3412 = vmax.xlane.f32.xlu0 %v3411_v36  ;;  %v3381_v6 = vpop.xlane.xlu0 %3380 }
 0x767   : > { %vm1676_vm3 = vcmp.ge.f32.partialorder %v11357_v56, %v1659_v21  ;;  %vm3394_vm6 = vcmp.ge.f32.partialorder %v11360_v18, %v3381_v6 }
 0x768   : > { %v11609_v59 = vsel %vm1676_vm3, -1e+30, %v11357_v56  ;;  %v11612_v41 = vsel %vm3394_vm6, -1e+30, %v11360_v18 }
 0x769   : > { %v1692_v45 = vsel %vm633_vm4, %v11609_v59, -inf  ;;  %v3414_v10 = vsel %vm633_vm4, %v11612_v41, -inf }
 0x76a   : > { %1693 = vmax.xlane.f32.xlu1 %v1692_v45  ;;  %v1662_v58 = vpop.xlane.xlu1 %1661  ;;  %3415 = vmax.xlane.f32.xlu0 %v3414_v10  ;;  %v3384_v60 = vpop.xlane.xlu0 %3383 }
 0x76b   : > { %vm1677_vm7 = vcmp.ge.f32.partialorder %v11369_v39, %v1662_v58  ;;  %vm3395_vm8 = vcmp.ge.f32.partialorder %v11372_v3, %v3384_v60 }
 0x76c   : > { %v11621_v56 = vsel %vm1677_vm7, -1e+30, %v11369_v39  ;;  %v11624_v18 = vsel %vm3395_vm8, -1e+30, %v11372_v3 }
 0x76d   : > { %v1695_v36 = vsel %vm633_vm4, %v11621_v56, -inf  ;;  %v3417_v21 = vsel %vm633_vm4, %v11624_v18, -inf }
 0x76e   : > { %1696 = vmax.xlane.f32.xlu1 %v1695_v36  ;;  %v1665_v6 = vpop.xlane.xlu1 %1664  ;;  %3418 = vmax.xlane.f32.xlu0 %v3417_v21  ;;  %v3387_v45 = vpop.xlane.xlu0 %3386 }
 0x76f   : > { %vm1678_vm9 = vcmp.ge.f32.partialorder %v11381_v19, %v1665_v6  ;;  %vm3396_vm10 = vcmp.ge.f32.partialorder %v11384_v31, %v3387_v45 }
 0x770   : > { %v11633_v39 = vsel %vm1678_vm9, -1e+30, %v11381_v19  ;;  %v11636_v3 = vsel %vm3396_vm10, -1e+30, %v11384_v31 }
 0x771   : > { %v1698_v10 = vsel %vm633_vm4, %v11633_v39, -inf  ;;  %v3420_v58 = vsel %vm633_vm4, %v11636_v3, -inf }
 0x772   : > { %1699 = vmax.xlane.f32.xlu1 %v1698_v10  ;;  %v1668_v60 = vpop.xlane.xlu1 %1667  ;;  %3421 = vmax.xlane.f32.xlu0 %v3420_v58  ;;  %v3390_v36 = vpop.xlane.xlu0 %3389 }
 0x773   : > { %vm1679_vm11 = vcmp.ge.f32.partialorder %v11393_v33, %v1668_v60  ;;  %vm3397_vm12 = vcmp.ge.f32.partialorder %v11396_v20, %v3390_v36 }
 0x774   : > { %v11645_v19 = vsel %vm1679_vm11, -1e+30, %v11393_v33  ;;  %v11648_v31 = vsel %vm3397_vm12, -1e+30, %v11396_v20 }
 0x775   : > { %v1701_v21 = vsel %vm633_vm4, %v11645_v19, -inf  ;;  %v3423_v6 = vsel %vm652_vm5, %v11648_v31, -inf }
 0x776   : > { %1702 = vmax.xlane.f32.xlu1 %v1701_v21  ;;  %v1671_v45 = vpop.xlane.xlu1 %1670  ;;  %3424 = vmax.xlane.f32.xlu0 %v3423_v6  ;;  %v4227_v10 = vpop.xlane.xlu0 %4226 }
 0x777   : > { %vm1680_vm13 = vcmp.ge.f32.partialorder %v11405_v57, %v1671_v45  ;;  %vm4246_vm14 = vcmp.ge.f32.partialorder %v11408_v61, %v4227_v10 }
 0x778   : > { %v11657_v33 = vsel %vm1680_vm13, -1e+30, %v11405_v57  ;;  %v11660_v20 = vsel %vm4246_vm14, -1e+30, %v11408_v61 }
 0x779   : > { %v1704_v58 = vsel %vm633_vm4, %v11657_v33, -inf  ;;  %v4260_v60 = vsel %vm633_vm4, %v11660_v20, -inf }
 0x77a   : > { %1705 = vmax.xlane.f32.xlu1 %v1704_v58  ;;  %v1674_v36 = vpop.xlane.xlu1 %1673  ;;  %4261 = vmax.xlane.f32.xlu0 %v4260_v60  ;;  %v4230_v21 = vpop.xlane.xlu0 %4229 }
 0x77b   : > { %vm1681_vm15 = vcmp.ge.f32.partialorder %v11417_v30, %v1674_v36  ;;  %vm4247_vm3 = vcmp.ge.f32.partialorder %v11420_v53, %v4230_v21 }
 0x77c   : > { %v11669_v57 = vsel %vm1681_vm15, -1e+30, %v11417_v30  ;;  %v11672_v61 = vsel %vm4247_vm3, -1e+30, %v11420_v53 }
 0x77d   : > { %v1707_v6 = vsel %vm652_vm5, %v11669_v57, -inf  ;;  %v4263_v45 = vsel %vm633_vm4, %v11672_v61, -inf }
 0x77e   : > { %1708 = vmax.xlane.f32.xlu1 %v1707_v6  ;;  %v2517_v10 = vpop.xlane.xlu1 %2516  ;;  %4264 = vmax.xlane.f32.xlu0 %v4263_v45  ;;  %v4233_v58 = vpop.xlane.xlu0 %4232 }
 0x77f   : > { %vm2536_vm6 = vcmp.ge.f32.partialorder %v11429_v12, %v2517_v10  ;;  %vm4248_vm7 = vcmp.ge.f32.partialorder %v11432_v4, %v4233_v58 }
 0x780   : > { %v11681_v30 = vsel %vm2536_vm6, -1e+30, %v11429_v12  ;;  %v11684_v53 = vsel %vm4248_vm7, -1e+30, %v11432_v4 }
 0x781   : > { %v2550_v60 = vsel %vm633_vm4, %v11681_v30, -inf  ;;  %v4266_v36 = vsel %vm633_vm4, %v11684_v53, -inf }
 0x782   : > { %2551 = vmax.xlane.f32.xlu1 %v2550_v60  ;;  %v2520_v21 = vpop.xlane.xlu1 %2519  ;;  %4267 = vmax.xlane.f32.xlu0 %v4266_v36  ;;  %v4236_v6 = vpop.xlane.xlu0 %4235 }
 0x783   : > { %vm2537_vm8 = vcmp.ge.f32.partialorder %v11441_v25, %v2520_v21  ;;  %vm4249_vm9 = vcmp.ge.f32.partialorder %v11444_v9, %v4236_v6 }
 0x784   : > { %v11693_v12 = vsel %vm2537_vm8, -1e+30, %v11441_v25  ;;  %v11696_v4 = vsel %vm4249_vm9, -1e+30, %v11444_v9 }
 0x785   : > { %v2553_v45 = vsel %vm633_vm4, %v11693_v12, -inf  ;;  %v4269_v10 = vsel %vm633_vm4, %v11696_v4, -inf }
 0x786   : > { %2554 = vmax.xlane.f32.xlu1 %v2553_v45  ;;  %v2523_v58 = vpop.xlane.xlu1 %2522  ;;  %4270 = vmax.xlane.f32.xlu0 %v4269_v10  ;;  %v4239_v60 = vpop.xlane.xlu0 %4238 }
 0x787   : > { %vm2538_vm10 = vcmp.ge.f32.partialorder %v11453_v2, %v2523_v58  ;;  %vm4250_vm11 = vcmp.ge.f32.partialorder %v11456_v62, %v4239_v60 }
 0x788   : > { %v11705_v25 = vsel %vm2538_vm10, -1e+30, %v11453_v2  ;;  %v11708_v9 = vsel %vm4250_vm11, -1e+30, %v11456_v62 }
 0x789   : > { %v2556_v36 = vsel %vm633_vm4, %v11705_v25, -inf  ;;  %v4272_v21 = vsel %vm633_vm4, %v11708_v9, -inf }
 0x78a   : > { %2557 = vmax.xlane.f32.xlu1 %v2556_v36  ;;  %v2526_v6 = vpop.xlane.xlu1 %2525  ;;  %4273 = vmax.xlane.f32.xlu0 %v4272_v21  ;;  %v4242_v45 = vpop.xlane.xlu0 %4241 }
 0x78b   : > { %vm2539_vm12 = vcmp.ge.f32.partialorder %v11465_v24, %v2526_v6  ;;  %vm4251_vm13 = vcmp.ge.f32.partialorder %v11468_v51, %v4242_v45 }
 0x78c   : > { %v11717_v2 = vsel %vm2539_vm12, -1e+30, %v11465_v24  ;;  %v11720_v62 = vsel %vm4251_vm13, -1e+30, %v11468_v51 }
 0x78d   : > { %v2559_v10 = vsel %vm633_vm4, %v11717_v2, -inf  ;;  %v4275_v58 = vsel %vm633_vm4, %v11720_v62, -inf }
 0x78e   : > { %2560 = vmax.xlane.f32.xlu1 %v2559_v10  ;;  %v2529_v60 = vpop.xlane.xlu1 %2528  ;;  %4276 = vmax.xlane.f32.xlu0 %v4275_v58  ;;  %v4245_v36 = vpop.xlane.xlu0 %4244 }
 0x78f   : > { %vm2540_vm14 = vcmp.ge.f32.partialorder %v11477_v50, %v2529_v60  ;;  %vm4252_vm15 = vcmp.ge.f32.partialorder %v11480_v7, %v4245_v36 }
 0x790   : > { %v11729_v24 = vsel %vm2540_vm14, -1e+30, %v11477_v50  ;;  %v11732_v51 = vsel %vm4252_vm15, -1e+30, %v11480_v7 }
 0x791   : > { %v2562_v21 = vsel %vm633_vm4, %v11729_v24, -inf  ;;  %v4278_v6 = vsel %vm652_vm5, %v11732_v51, -inf }
 0x792   : > { %2563 = vmax.xlane.f32.xlu1 %v2562_v21  ;;  %v2535_v45 = vpop.xlane.xlu1 %2534  ;;  %4279 = vmax.xlane.f32.xlu0 %v4278_v6  ;;  %v5082_v10 = vpop.xlane.xlu0 %5081 }
 0x793   : > { %vm2542_vm3 = vcmp.ge.f32.partialorder %v11489_v11, %v2535_v45  ;;  %vm5101_vm6 = vcmp.ge.f32.partialorder %v11492_v28, %v5082_v10 }
 0x794   : > { %v11741_v50 = vsel %vm2542_vm3, -1e+30, %v11489_v11  ;;  %v11744_v7 = vsel %vm5101_vm6, -1e+30, %v11492_v28 }
 0x795   : > { %v2568_v58 = vsel %vm652_vm5, %v11741_v50, -inf  ;;  %v5115_v60 = vsel %vm633_vm4, %v11744_v7, -inf }
 0x796   : > { %2569 = vmax.xlane.f32.xlu1 %v2568_v58  ;;  %v3375_v36 = vpop.xlane.xlu1 %3374  ;;  %5116 = vmax.xlane.f32.xlu0 %v5115_v60  ;;  %v882_v21 = vpop.xlane.xlu0 %881 }
 0x797   : > { %vm3392_vm7 = vcmp.ge.f32.partialorder %v11501_v22, %v3375_v36  ;;  %vm901_vm8 = vcmp.ge.f32.partialorder %v11504_v29, %v882_v21 }
 0x798   : > { %v11753_v11 = vsel %vm3392_vm7, -1e+30, %v11501_v22  ;;  %v11756_v28 = vsel %vm901_vm8, -1e+30, %v11504_v29 }
 0x799   : > { %v3408_v6 = vsel %vm633_vm4, %v11753_v11, -inf  ;;  %v915_v45 = vsel %vm633_vm4, %v11756_v28, -inf }
 0x79a   : > { %3409 = vmax.xlane.f32.xlu1 %v3408_v6  ;;  %v885_v10 = vpop.xlane.xlu1 %884  ;;  %916 = vmax.xlane.f32.xlu0 %v915_v45  ;;  %v5085_v58 = vpop.xlane.xlu0 %5084 }
 0x79b   : > { %vm902_vm9 = vcmp.ge.f32.partialorder %v11513_v13, %v885_v10  ;;  %vm5102_vm10 = vcmp.ge.f32.partialorder %v11516_v5, %v5085_v58 }
 0x79c   : > { %v11765_v22 = vsel %vm902_vm9, -1e+30, %v11513_v13  ;;  %v11768_v29 = vsel %vm5102_vm10, -1e+30, %v11516_v5 }
 0x79d   : > { %v918_v60 = vsel %vm633_vm4, %v11765_v22, -inf  ;;  %v5118_v36 = vsel %vm633_vm4, %v11768_v29, -inf }
 0x79e   : > { %919 = vmax.xlane.f32.xlu1 %v918_v60  ;;  %v5088_v21 = vpop.xlane.xlu1 %5087  ;;  %5119 = vmax.xlane.f32.xlu0 %v5118_v36  ;;  %v888_v6 = vpop.xlane.xlu0 %887 }
 0x79f   : > { %vm5103_vm11 = vcmp.ge.f32.partialorder %v11525_v42, %v5088_v21  ;;  %vm903_vm12 = vcmp.ge.f32.partialorder %v11528_v48, %v888_v6 }
 0x7a0   : > { %v11777_v13 = vsel %vm5103_vm11, -1e+30, %v11525_v42  ;;  %v11780_v5 = vsel %vm903_vm12, -1e+30, %v11528_v48 }
 0x7a1   : > { %v5121_v45 = vsel %vm633_vm4, %v11777_v13, -inf  ;;  %v921_v10 = vsel %vm633_vm4, %v11780_v5, -inf }
 0x7a2   : > { %5122 = vmax.xlane.f32.xlu1 %v5121_v45  ;;  %v891_v58 = vpop.xlane.xlu1 %890  ;;  %922 = vmax.xlane.f32.xlu0 %v921_v10  ;;  %v5091_v60 = vpop.xlane.xlu0 %5090 }
 0x7a3   : > { %vm904_vm13 = vcmp.ge.f32.partialorder %v11537_v26, %v891_v58  ;;  %vm5104_vm14 = vcmp.ge.f32.partialorder %v11540_v17, %v5091_v60 }
 0x7a4   : > { %v11789_v42 = vsel %vm904_vm13, -1e+30, %v11537_v26  ;;  %v11792_v48 = vsel %vm5104_vm14, -1e+30, %v11540_v17 }
 0x7a5   : > { %v924_v36 = vsel %vm633_vm4, %v11789_v42, -inf  ;;  %v5124_v21 = vsel %vm633_vm4, %v11792_v48, -inf }
 0x7a6   : > { %925 = vmax.xlane.f32.xlu1 %v924_v36  ;;  %v5094_v6 = vpop.xlane.xlu1 %5093  ;;  %5125 = vmax.xlane.f32.xlu0 %v5124_v21  ;;  %v894_v45 = vpop.xlane.xlu0 %893 }
 0x7a7   : > { %vm5105_vm15 = vcmp.ge.f32.partialorder %v11549_v49, %v5094_v6  ;;  %vm905_vm3 = vcmp.ge.f32.partialorder %v11552_v8, %v894_v45 }
 0x7a8   : > { %v11801_v26 = vsel %vm5105_vm15, -1e+30, %v11549_v49  ;;  %v11804_v17 = vsel %vm905_vm3, -1e+30, %v11552_v8 }
 0x7a9   : > { %v5127_v10 = vsel %vm633_vm4, %v11801_v26, -inf  ;;  %v927_v58 = vsel %vm633_vm4, %v11804_v17, -inf }
 0x7aa   : > { %5128 = vmax.xlane.f32.xlu1 %v5127_v10  ;;  %928 = vmax.xlane.f32.xlu0 %v927_v58  ;;  %v5097_v60 = vpop.xlane.xlu0 %5096 }
 0x7ab   : > { %vm5106_vm6 = vcmp.ge.f32.partialorder %v11560_v55, %v5097_v60 }
 0x7ac   : > { %v11812_v36 = vsel %vm5106_vm6, -1e+30, %v11560_v55 }
 0x7ad   : > { %v5130_v49 = vsel %vm633_vm4, %v11812_v36, -inf }
 0x7ae   : > { %5131 = vmax.xlane.f32.xlu0 %v5130_v49 }
 0x7e3   : > { %v897_v8 = vpop.xlane.xlu1 %896  ;;  %v2567_v21 = vpop.xlane.xlu0 %2566 }
 0x7e4   : > { %vm906_vm7 = vcmp.ge.f32.partialorder %v11567_v34, %v897_v8  ;;  %vm2576_vm8 = vcmp.ge.f32.partialorder %v11570_v40, %v2567_v21 }
 0x7e5   : > { %v11819_v6 = vsel %vm906_vm7, -1e+30, %v11567_v34  ;;  %v11822_v45 = vsel %vm2576_vm8, -1e+30, %v11570_v40 }
 0x7e6   : > { %v930_v55 = vsel %vm633_vm4, %v11819_v6, -inf  ;;  %v2600_v10 = vsel %vm633_vm4, %v11822_v45, -inf }
 0x7e7   : > { %931 = vmax.xlane.f32.xlu1 %v930_v55  ;;  %v5100_v58 = vpop.xlane.xlu1 %5099  ;;  %2601 = vmax.xlane.f32.xlu0 %v2600_v10 }
 0x7e8   : > { %vm5107_vm9 = vcmp.ge.f32.partialorder %v11578_v15, %v5100_v58 }
 0x7e9   : > { %v11830_v60 = vsel %vm5107_vm9, -1e+30, %v11578_v15 }
 0x7ea   : > { %v5133_v34 = vsel %vm652_vm5, %v11830_v60, -inf }
 0x7eb   : > { %5134 = vmax.xlane.f32.xlu1 %v5133_v34  ;;  %v900_v40 = vpop.xlane.xlu1 %899  ;;  %v3407_v49 = vpop.xlane.xlu0 %3406 }
 0x7ec   : > { %vm907_vm10 = vcmp.ge.f32.partialorder %v11585_v54, %v900_v40  ;;  %vm3426_vm11 = vcmp.ge.f32.partialorder %v11588_v47, %v3407_v49 }
 0x7ed   : > { %v11837_v8 = vsel %vm907_vm10, -1e+30, %v11585_v54  ;;  %v11840_v21 = vsel %vm3426_vm11, -1e+30, %v11588_v47 }
 0x7ee   : > { %v933_v15 = vsel %vm652_vm5, %v11837_v8, -inf  ;;  %v3440_v55 = vsel %vm633_vm4, %v11840_v21, -inf }
 0x7ef   : > { %934 = vmax.xlane.f32.xlu1 %v933_v15  ;;  %v1691_v10 = vpop.xlane.xlu1 %1690  ;;  %3441 = vmax.xlane.f32.xlu0 %v3440_v55  ;;  %v3413_v58 = vpop.xlane.xlu0 %3412 }
 0x7f0   : > { %vm1710_vm12 = vcmp.ge.f32.partialorder %v11597_v52, %v1691_v10  ;;  %vm3428_vm13 = vcmp.ge.f32.partialorder %v11600_v32, %v3413_v58 }
 0x7f1   : > { %v11849_v54 = vsel %vm1710_vm12, -1e+30, %v11597_v52  ;;  %v11852_v47 = vsel %vm3428_vm13, -1e+30, %v11600_v32 }
 0x7f2   : > { %v1724_v34 = vsel %vm633_vm4, %v11849_v54, -inf  ;;  %v3446_v40 = vsel %vm633_vm4, %v11852_v47, -inf }
 0x7f3   : > { %1725 = vmax.xlane.f32.xlu1 %v1724_v34  ;;  %v1694_v49 = vpop.xlane.xlu1 %1693  ;;  %3447 = vmax.xlane.f32.xlu0 %v3446_v40  ;;  %v3416_v15 = vpop.xlane.xlu0 %3415 }
 0x7f4   : > { %vm1711_vm14 = vcmp.ge.f32.partialorder %v11609_v59, %v1694_v49  ;;  %vm3429_vm15 = vcmp.ge.f32.partialorder %v11612_v41, %v3416_v15 }
 0x7f5   : > { %v11861_v52 = vsel %vm1711_vm14, -1e+30, %v11609_v59  ;;  %v11864_v32 = vsel %vm3429_vm15, -1e+30, %v11612_v41 }
 0x7f6   : > { %v1727_v55 = vsel %vm633_vm4, %v11861_v52, -inf  ;;  %v3449_v10 = vsel %vm633_vm4, %v11864_v32, -inf }
 0x7f7   : > { %1728 = vmax.xlane.f32.xlu1 %v1727_v55  ;;  %v1697_v58 = vpop.xlane.xlu1 %1696  ;;  %3450 = vmax.xlane.f32.xlu0 %v3449_v10  ;;  %v3419_v34 = vpop.xlane.xlu0 %3418 }
 0x7f8   : > { %vm1712_vm3 = vcmp.ge.f32.partialorder %v11621_v56, %v1697_v58  ;;  %vm3430_vm6 = vcmp.ge.f32.partialorder %v11624_v18, %v3419_v34 }
 0x7f9   : > { %v11873_v59 = vsel %vm1712_vm3, -1e+30, %v11621_v56  ;;  %v11876_v41 = vsel %vm3430_vm6, -1e+30, %v11624_v18 }
 0x7fa   : > { %v1730_v40 = vsel %vm633_vm4, %v11873_v59, -inf  ;;  %v3452_v49 = vsel %vm633_vm4, %v11876_v41, -inf }
 0x7fb   : > { %1731 = vmax.xlane.f32.xlu1 %v1730_v40  ;;  %v1700_v15 = vpop.xlane.xlu1 %1699  ;;  %3453 = vmax.xlane.f32.xlu0 %v3452_v49  ;;  %v3422_v55 = vpop.xlane.xlu0 %3421 }
 0x7fc   : > { %vm1713_vm7 = vcmp.ge.f32.partialorder %v11633_v39, %v1700_v15  ;;  %vm3431_vm8 = vcmp.ge.f32.partialorder %v11636_v3, %v3422_v55 }
 0x7fd   : > { %v11885_v56 = vsel %vm1713_vm7, -1e+30, %v11633_v39  ;;  %v11888_v18 = vsel %vm3431_vm8, -1e+30, %v11636_v3 }
 0x7fe   : > { %v1733_v10 = vsel %vm633_vm4, %v11885_v56, -inf  ;;  %v3455_v58 = vsel %vm633_vm4, %v11888_v18, -inf }
 0x7ff   : > { %1734 = vmax.xlane.f32.xlu1 %v1733_v10  ;;  %v1703_v34 = vpop.xlane.xlu1 %1702  ;;  %3456 = vmax.xlane.f32.xlu0 %v3455_v58  ;;  %v3425_v40 = vpop.xlane.xlu0 %3424 }
 0x800   : > { %vm1714_vm9 = vcmp.ge.f32.partialorder %v11645_v19, %v1703_v34  ;;  %vm3432_vm10 = vcmp.ge.f32.partialorder %v11648_v31, %v3425_v40 }
 0x801   : > { %v11897_v39 = vsel %vm1714_vm9, -1e+30, %v11645_v19  ;;  %v11900_v3 = vsel %vm3432_vm10, -1e+30, %v11648_v31 }
 0x802   : > { %v1736_v49 = vsel %vm633_vm4, %v11897_v39, -inf  ;;  %v3458_v15 = vsel %vm652_vm5, %v11900_v3, -inf }
 0x803   : > { %1737 = vmax.xlane.f32.xlu1 %v1736_v49  ;;  %v1706_v55 = vpop.xlane.xlu1 %1705  ;;  %3459 = vmax.xlane.f32.xlu0 %v3458_v15  ;;  %v4262_v10 = vpop.xlane.xlu0 %4261 }
 0x804   : > { %vm1715_vm11 = vcmp.ge.f32.partialorder %v11657_v33, %v1706_v55  ;;  %vm4281_vm12 = vcmp.ge.f32.partialorder %v11660_v20, %v4262_v10 }
 0x805   : > { %v11909_v19 = vsel %vm1715_vm11, -1e+30, %v11657_v33  ;;  %v11912_v31 = vsel %vm4281_vm12, -1e+30, %v11660_v20 }
 0x806   : > { %v1739_v58 = vsel %vm633_vm4, %v11909_v19, -inf  ;;  %v4295_v34 = vsel %vm633_vm4, %v11912_v31, -inf }
 0x807   : > { %1740 = vmax.xlane.f32.xlu1 %v1739_v58  ;;  %v1709_v40 = vpop.xlane.xlu1 %1708  ;;  %4296 = vmax.xlane.f32.xlu0 %v4295_v34  ;;  %v4265_v49 = vpop.xlane.xlu0 %4264 }
 0x808   : > { %vm1716_vm13 = vcmp.ge.f32.partialorder %v11669_v57, %v1709_v40  ;;  %vm4282_vm14 = vcmp.ge.f32.partialorder %v11672_v61, %v4265_v49 }
 0x809   : > { %v11921_v33 = vsel %vm1716_vm13, -1e+30, %v11669_v57  ;;  %v11924_v20 = vsel %vm4282_vm14, -1e+30, %v11672_v61 }
 0x80a   : > { %v1742_v15 = vsel %vm652_vm5, %v11921_v33, -inf  ;;  %v4298_v55 = vsel %vm633_vm4, %v11924_v20, -inf }
 0x80b   : > { %1743 = vmax.xlane.f32.xlu1 %v1742_v15  ;;  %v2552_v10 = vpop.xlane.xlu1 %2551  ;;  %4299 = vmax.xlane.f32.xlu0 %v4298_v55  ;;  %v4268_v58 = vpop.xlane.xlu0 %4267 }
 0x80c   : > { %vm2571_vm15 = vcmp.ge.f32.partialorder %v11681_v30, %v2552_v10  ;;  %vm4283_vm3 = vcmp.ge.f32.partialorder %v11684_v53, %v4268_v58 }
 0x80d   : > { %v11933_v57 = vsel %vm2571_vm15, -1e+30, %v11681_v30  ;;  %v11936_v61 = vsel %vm4283_vm3, -1e+30, %v11684_v53 }
 0x80e   : > { %v2585_v34 = vsel %vm633_vm4, %v11933_v57, -inf  ;;  %v4301_v40 = vsel %vm633_vm4, %v11936_v61, -inf }
 0x80f   : > { %2586 = vmax.xlane.f32.xlu1 %v2585_v34  ;;  %v2555_v49 = vpop.xlane.xlu1 %2554  ;;  %4302 = vmax.xlane.f32.xlu0 %v4301_v40  ;;  %v4271_v15 = vpop.xlane.xlu0 %4270 }
 0x810   : > { %vm2572_vm6 = vcmp.ge.f32.partialorder %v11693_v12, %v2555_v49  ;;  %vm4284_vm7 = vcmp.ge.f32.partialorder %v11696_v4, %v4271_v15 }
 0x811   : > { %v11945_v30 = vsel %vm2572_vm6, -1e+30, %v11693_v12  ;;  %v11948_v53 = vsel %vm4284_vm7, -1e+30, %v11696_v4 }
 0x812   : > { %v2588_v55 = vsel %vm633_vm4, %v11945_v30, -inf  ;;  %v4304_v10 = vsel %vm633_vm4, %v11948_v53, -inf }
 0x813   : > { %2589 = vmax.xlane.f32.xlu1 %v2588_v55  ;;  %v2558_v58 = vpop.xlane.xlu1 %2557  ;;  %4305 = vmax.xlane.f32.xlu0 %v4304_v10  ;;  %v4274_v34 = vpop.xlane.xlu0 %4273 }
 0x814   : > { %vm2573_vm8 = vcmp.ge.f32.partialorder %v11705_v25, %v2558_v58  ;;  %vm4285_vm9 = vcmp.ge.f32.partialorder %v11708_v9, %v4274_v34 }
 0x815   : > { %v11957_v12 = vsel %vm2573_vm8, -1e+30, %v11705_v25  ;;  %v11960_v4 = vsel %vm4285_vm9, -1e+30, %v11708_v9 }
 0x816   : > { %v2591_v40 = vsel %vm633_vm4, %v11957_v12, -inf  ;;  %v4307_v49 = vsel %vm633_vm4, %v11960_v4, -inf }
 0x817   : > { %2592 = vmax.xlane.f32.xlu1 %v2591_v40  ;;  %v2561_v15 = vpop.xlane.xlu1 %2560  ;;  %4308 = vmax.xlane.f32.xlu0 %v4307_v49  ;;  %v4277_v55 = vpop.xlane.xlu0 %4276 }
 0x818   : > { %vm2574_vm10 = vcmp.ge.f32.partialorder %v11717_v2, %v2561_v15  ;;  %vm4286_vm11 = vcmp.ge.f32.partialorder %v11720_v62, %v4277_v55 }
 0x819   : > { %v11969_v25 = vsel %vm2574_vm10, -1e+30, %v11717_v2  ;;  %v11972_v9 = vsel %vm4286_vm11, -1e+30, %v11720_v62 }
 0x81a   : > { %v2594_v10 = vsel %vm633_vm4, %v11969_v25, -inf  ;;  %v4310_v58 = vsel %vm633_vm4, %v11972_v9, -inf }
 0x81b   : > { %2595 = vmax.xlane.f32.xlu1 %v2594_v10  ;;  %v2564_v34 = vpop.xlane.xlu1 %2563  ;;  %4311 = vmax.xlane.f32.xlu0 %v4310_v58  ;;  %v4280_v40 = vpop.xlane.xlu0 %4279 }
 0x81c   : > { %vm2575_vm12 = vcmp.ge.f32.partialorder %v11729_v24, %v2564_v34  ;;  %vm4287_vm13 = vcmp.ge.f32.partialorder %v11732_v51, %v4280_v40 }
 0x81d   : > { %v11981_v2 = vsel %vm2575_vm12, -1e+30, %v11729_v24  ;;  %v11984_v62 = vsel %vm4287_vm13, -1e+30, %v11732_v51 }
 0x81e   : > { %v2597_v49 = vsel %vm633_vm4, %v11981_v2, -inf  ;;  %v4313_v15 = vsel %vm652_vm5, %v11984_v62, -inf }
 0x81f   : > { %2598 = vmax.xlane.f32.xlu1 %v2597_v49  ;;  %v2570_v55 = vpop.xlane.xlu1 %2569  ;;  %4314 = vmax.xlane.f32.xlu0 %v4313_v15  ;;  %v5117_v10 = vpop.xlane.xlu0 %5116 }
 0x820   : > { %vm2577_vm14 = vcmp.ge.f32.partialorder %v11741_v50, %v2570_v55  ;;  %vm5136_vm15 = vcmp.ge.f32.partialorder %v11744_v7, %v5117_v10 }
 0x821   : > { %v11993_v24 = vsel %vm2577_vm14, -1e+30, %v11741_v50  ;;  %v11996_v51 = vsel %vm5136_vm15, -1e+30, %v11744_v7 }
 0x822   : > { %v2603_v58 = vsel %vm652_vm5, %v11993_v24, -inf  ;;  %v5150_v34 = vsel %vm633_vm4, %v11996_v51, -inf }
 0x823   : > { %2604 = vmax.xlane.f32.xlu1 %v2603_v58  ;;  %v3410_v40 = vpop.xlane.xlu1 %3409  ;;  %5151 = vmax.xlane.f32.xlu0 %v5150_v34  ;;  %v917_v49 = vpop.xlane.xlu0 %916 }
 0x824   : > { %vm3427_vm3 = vcmp.ge.f32.partialorder %v11753_v11, %v3410_v40  ;;  %vm936_vm6 = vcmp.ge.f32.partialorder %v11756_v28, %v917_v49 }
 0x825   : > { %v12005_v50 = vsel %vm3427_vm3, -1e+30, %v11753_v11  ;;  %v12008_v7 = vsel %vm936_vm6, -1e+30, %v11756_v28 }
 0x826   : > { %v3443_v15 = vsel %vm633_vm4, %v12005_v50, -inf  ;;  %v950_v55 = vsel %vm633_vm4, %v12008_v7, -inf }
 0x827   : > { %3444 = vmax.xlane.f32.xlu1 %v3443_v15  ;;  %v920_v10 = vpop.xlane.xlu1 %919  ;;  %951 = vmax.xlane.f32.xlu0 %v950_v55  ;;  %v5120_v58 = vpop.xlane.xlu0 %5119 }
 0x828   : > { %vm937_vm7 = vcmp.ge.f32.partialorder %v11765_v22, %v920_v10  ;;  %vm5137_vm8 = vcmp.ge.f32.partialorder %v11768_v29, %v5120_v58 }
 0x829   : > { %v12017_v11 = vsel %vm937_vm7, -1e+30, %v11765_v22  ;;  %v12020_v28 = vsel %vm5137_vm8, -1e+30, %v11768_v29 }
 0x82a   : > { %v953_v34 = vsel %vm633_vm4, %v12017_v11, -inf  ;;  %v5153_v40 = vsel %vm633_vm4, %v12020_v28, -inf }
 0x82b   : > { %954 = vmax.xlane.f32.xlu1 %v953_v34  ;;  %v5123_v49 = vpop.xlane.xlu1 %5122  ;;  %5154 = vmax.xlane.f32.xlu0 %v5153_v40  ;;  %v923_v15 = vpop.xlane.xlu0 %922 }
 0x82c   : > { %vm5138_vm9 = vcmp.ge.f32.partialorder %v11777_v13, %v5123_v49  ;;  %vm938_vm10 = vcmp.ge.f32.partialorder %v11780_v5, %v923_v15 }
 0x82d   : > { %v12029_v22 = vsel %vm5138_vm9, -1e+30, %v11777_v13  ;;  %v12032_v29 = vsel %vm938_vm10, -1e+30, %v11780_v5 }
 0x82e   : > { %v5156_v55 = vsel %vm633_vm4, %v12029_v22, -inf  ;;  %v956_v10 = vsel %vm633_vm4, %v12032_v29, -inf }
 0x82f   : > { %5157 = vmax.xlane.f32.xlu1 %v5156_v55  ;;  %v926_v58 = vpop.xlane.xlu1 %925  ;;  %957 = vmax.xlane.f32.xlu0 %v956_v10  ;;  %v5126_v34 = vpop.xlane.xlu0 %5125 }
 0x830   : > { %vm939_vm11 = vcmp.ge.f32.partialorder %v11789_v42, %v926_v58  ;;  %vm5139_vm12 = vcmp.ge.f32.partialorder %v11792_v48, %v5126_v34 }
 0x831   : > { %v12041_v13 = vsel %vm939_vm11, -1e+30, %v11789_v42  ;;  %v12044_v5 = vsel %vm5139_vm12, -1e+30, %v11792_v48 }
 0x832   : > { %v959_v40 = vsel %vm633_vm4, %v12041_v13, -inf  ;;  %v5159_v49 = vsel %vm633_vm4, %v12044_v5, -inf }
 0x833   : > { %960 = vmax.xlane.f32.xlu1 %v959_v40  ;;  %v5129_v15 = vpop.xlane.xlu1 %5128  ;;  %5160 = vmax.xlane.f32.xlu0 %v5159_v49  ;;  %v929_v55 = vpop.xlane.xlu0 %928 }
 0x834   : > { %vm5140_vm13 = vcmp.ge.f32.partialorder %v11801_v26, %v5129_v15  ;;  %vm940_vm14 = vcmp.ge.f32.partialorder %v11804_v17, %v929_v55 }
 0x835   : > { %v12053_v42 = vsel %vm5140_vm13, -1e+30, %v11801_v26  ;;  %v12056_v48 = vsel %vm940_vm14, -1e+30, %v11804_v17 }
 0x836   : > { %v5162_v10 = vsel %vm633_vm4, %v12053_v42, -inf  ;;  %v962_v58 = vsel %vm633_vm4, %v12056_v48, -inf }
 0x837   : > { %5163 = vmax.xlane.f32.xlu1 %v5162_v10  ;;  %963 = vmax.xlane.f32.xlu0 %v962_v58  ;;  %v5132_v34 = vpop.xlane.xlu0 %5131 }
 0x838   : > { %vm5141_vm15 = vcmp.ge.f32.partialorder %v11812_v36, %v5132_v34 }
 0x839   : > { %v12064_v40 = vsel %vm5141_vm15, -1e+30, %v11812_v36 }
 0x83a   : > { %v5165_v26 = vsel %vm633_vm4, %v12064_v40, -inf }
 0x83b   : > { %5166 = vmax.xlane.f32.xlu0 %v5165_v26 }
 0x870   : > { %v932_v17 = vpop.xlane.xlu1 %931  ;;  %v2602_v49 = vpop.xlane.xlu0 %2601 }
 0x871   : > { %vm941_vm3 = vcmp.ge.f32.partialorder %v11819_v6, %v932_v17  ;;  %vm2611_vm6 = vcmp.ge.f32.partialorder %v11822_v45, %v2602_v49 }
 0x872   : > { %v12071_v15 = vsel %vm941_vm3, -1e+30, %v11819_v6  ;;  %v12074_v55 = vsel %vm2611_vm6, -1e+30, %v11822_v45 }
 0x873   : > { %v965_v36 = vsel %vm633_vm4, %v12071_v15, -inf  ;;  %v2635_v10 = vsel %vm633_vm4, %v12074_v55, -inf }
 0x874   : > { %966 = vmax.xlane.f32.xlu1 %v965_v36  ;;  %v5135_v58 = vpop.xlane.xlu1 %5134  ;;  %2636 = vmax.xlane.f32.xlu0 %v2635_v10 }
 0x875   : > { %vm5142_vm7 = vcmp.ge.f32.partialorder %v11830_v60, %v5135_v58 }
 0x876   : > { %v12082_v34 = vsel %vm5142_vm7, -1e+30, %v11830_v60 }
 0x877   : > { %v5168_v6 = vsel %vm652_vm5, %v12082_v34, -inf }
 0x878   : > { %5169 = vmax.xlane.f32.xlu1 %v5168_v6  ;;  %v935_v45 = vpop.xlane.xlu1 %934  ;;  %v3442_v26 = vpop.xlane.xlu0 %3441 }
 0x879   : > { %vm942_vm8 = vcmp.ge.f32.partialorder %v11837_v8, %v935_v45  ;;  %vm3461_vm9 = vcmp.ge.f32.partialorder %v11840_v21, %v3442_v26 }
 0x87a   : > { %v12089_v17 = vsel %vm942_vm8, -1e+30, %v11837_v8  ;;  %v12092_v49 = vsel %vm3461_vm9, -1e+30, %v11840_v21 }
 0x87b   : > { %v968_v60 = vsel %vm652_vm5, %v12089_v17, -inf  ;;  %v3475_v36 = vsel %vm633_vm4, %v12092_v49, -inf }
 0x87c   : > { %969 = vmax.xlane.f32.xlu1 %v968_v60  ;;  %v1726_v10 = vpop.xlane.xlu1 %1725  ;;  %3476 = vmax.xlane.f32.xlu0 %v3475_v36  ;;  %v3448_v58 = vpop.xlane.xlu0 %3447 }
 0x87d   : > { %vm1745_vm10 = vcmp.ge.f32.partialorder %v11849_v54, %v1726_v10  ;;  %vm3463_vm11 = vcmp.ge.f32.partialorder %v11852_v47, %v3448_v58 }
 0x87e   : > { %v12101_v8 = vsel %vm1745_vm10, -1e+30, %v11849_v54  ;;  %v12104_v21 = vsel %vm3463_vm11, -1e+30, %v11852_v47 }
 0x87f   : > { %v1759_v6 = vsel %vm633_vm4, %v12101_v8, -inf  ;;  %v3481_v45 = vsel %vm633_vm4, %v12104_v21, -inf }
 0x880   : > { %1760 = vmax.xlane.f32.xlu1 %v1759_v6  ;;  %v1729_v26 = vpop.xlane.xlu1 %1728  ;;  %3482 = vmax.xlane.f32.xlu0 %v3481_v45  ;;  %v3451_v60 = vpop.xlane.xlu0 %3450 }
 0x881   : > { %vm1746_vm12 = vcmp.ge.f32.partialorder %v11861_v52, %v1729_v26  ;;  %vm3464_vm13 = vcmp.ge.f32.partialorder %v11864_v32, %v3451_v60 }
 0x882   : > { %v12113_v54 = vsel %vm1746_vm12, -1e+30, %v11861_v52  ;;  %v12116_v47 = vsel %vm3464_vm13, -1e+30, %v11864_v32 }
 0x883   : > { %v1762_v36 = vsel %vm633_vm4, %v12113_v54, -inf  ;;  %v3484_v10 = vsel %vm633_vm4, %v12116_v47, -inf }
 0x884   : > { %1763 = vmax.xlane.f32.xlu1 %v1762_v36  ;;  %v1732_v58 = vpop.xlane.xlu1 %1731  ;;  %3485 = vmax.xlane.f32.xlu0 %v3484_v10  ;;  %v3454_v6 = vpop.xlane.xlu0 %3453 }
 0x885   : > { %vm1747_vm14 = vcmp.ge.f32.partialorder %v11873_v59, %v1732_v58  ;;  %vm3465_vm15 = vcmp.ge.f32.partialorder %v11876_v41, %v3454_v6 }
 0x886   : > { %v12125_v52 = vsel %vm1747_vm14, -1e+30, %v11873_v59  ;;  %v12128_v32 = vsel %vm3465_vm15, -1e+30, %v11876_v41 }
 0x887   : > { %v1765_v45 = vsel %vm633_vm4, %v12125_v52, -inf  ;;  %v3487_v26 = vsel %vm633_vm4, %v12128_v32, -inf }
 0x888   : > { %1766 = vmax.xlane.f32.xlu1 %v1765_v45  ;;  %v1735_v60 = vpop.xlane.xlu1 %1734  ;;  %3488 = vmax.xlane.f32.xlu0 %v3487_v26  ;;  %v3457_v36 = vpop.xlane.xlu0 %3456 }
 0x889   : > { %vm1748_vm3 = vcmp.ge.f32.partialorder %v11885_v56, %v1735_v60  ;;  %vm3466_vm6 = vcmp.ge.f32.partialorder %v11888_v18, %v3457_v36 }
 0x88a   : > { %v12137_v59 = vsel %vm1748_vm3, -1e+30, %v11885_v56  ;;  %v12140_v41 = vsel %vm3466_vm6, -1e+30, %v11888_v18 }
 0x88b   : > { %v1768_v10 = vsel %vm633_vm4, %v12137_v59, -inf  ;;  %v3490_v58 = vsel %vm633_vm4, %v12140_v41, -inf }
 0x88c   : > { %1769 = vmax.xlane.f32.xlu1 %v1768_v10  ;;  %v1738_v6 = vpop.xlane.xlu1 %1737  ;;  %3491 = vmax.xlane.f32.xlu0 %v3490_v58  ;;  %v3460_v45 = vpop.xlane.xlu0 %3459 }
 0x88d   : > { %vm1749_vm7 = vcmp.ge.f32.partialorder %v11897_v39, %v1738_v6  ;;  %vm3467_vm8 = vcmp.ge.f32.partialorder %v11900_v3, %v3460_v45 }
 0x88e   : > { %v12149_v56 = vsel %vm1749_vm7, -1e+30, %v11897_v39  ;;  %v12152_v18 = vsel %vm3467_vm8, -1e+30, %v11900_v3 }
 0x88f   : > { %v1771_v26 = vsel %vm633_vm4, %v12149_v56, -inf  ;;  %v3493_v60 = vsel %vm652_vm5, %v12152_v18, -inf }
 0x890   : > { %1772 = vmax.xlane.f32.xlu1 %v1771_v26  ;;  %v1741_v36 = vpop.xlane.xlu1 %1740  ;;  %3494 = vmax.xlane.f32.xlu0 %v3493_v60  ;;  %v4297_v10 = vpop.xlane.xlu0 %4296 }
 0x891   : > { %vm1750_vm9 = vcmp.ge.f32.partialorder %v11909_v19, %v1741_v36  ;;  %vm4316_vm10 = vcmp.ge.f32.partialorder %v11912_v31, %v4297_v10 }
 0x892   : > { %v12161_v39 = vsel %vm1750_vm9, -1e+30, %v11909_v19  ;;  %v12164_v3 = vsel %vm4316_vm10, -1e+30, %v11912_v31 }
 0x893   : > { %v1774_v58 = vsel %vm633_vm4, %v12161_v39, -inf  ;;  %v4330_v6 = vsel %vm633_vm4, %v12164_v3, -inf }
 0x894   : > { %1775 = vmax.xlane.f32.xlu1 %v1774_v58  ;;  %v1744_v45 = vpop.xlane.xlu1 %1743  ;;  %4331 = vmax.xlane.f32.xlu0 %v4330_v6  ;;  %v4300_v26 = vpop.xlane.xlu0 %4299 }
 0x895   : > { %vm1751_vm11 = vcmp.ge.f32.partialorder %v11921_v33, %v1744_v45  ;;  %vm4317_vm12 = vcmp.ge.f32.partialorder %v11924_v20, %v4300_v26 }
 0x896   : > { %v12173_v19 = vsel %vm1751_vm11, -1e+30, %v11921_v33  ;;  %v12176_v31 = vsel %vm4317_vm12, -1e+30, %v11924_v20 }
 0x897   : > { %v1777_v60 = vsel %vm652_vm5, %v12173_v19, -inf  ;;  %v4333_v36 = vsel %vm633_vm4, %v12176_v31, -inf }
 0x898   : > { %1778 = vmax.xlane.f32.xlu1 %v1777_v60  ;;  %v2587_v10 = vpop.xlane.xlu1 %2586  ;;  %4334 = vmax.xlane.f32.xlu0 %v4333_v36  ;;  %v4303_v58 = vpop.xlane.xlu0 %4302 }
 0x899   : > { %vm2606_vm13 = vcmp.ge.f32.partialorder %v11933_v57, %v2587_v10  ;;  %vm4318_vm8 = vcmp.ge.f32.partialorder %v11936_v61, %v4303_v58 }
 0x89a   : > { %v12184_v6 = vsel %vm2606_vm13, -1e+30, %v11933_v57 }
 0x89b   : > { %v2620_v33 = vsel %vm633_vm4, %v12184_v6, -inf }
 0x89c   : > { %2621 = vmax.xlane.f32.xlu1 %v2620_v33  ;;  %v2590_v20 = vpop.xlane.xlu1 %2589  ;;  %v4306_v45 = vpop.xlane.xlu0 %4305 }
 0x89d   : > { %vm2607_vm14 = vcmp.ge.f32.partialorder %v11945_v30, %v2590_v20  ;;  %vm4319_vm11 = vcmp.ge.f32.partialorder %v11948_v53, %v4306_v45 }
 0x89e   : > { %v12190_v26 = vsel %vm2607_vm14, -1e+30, %v11945_v30 }
 0x89f   : > { %v2623_v60 = vsel %vm633_vm4, %v12190_v26, -inf }
 0x8a0   : > { %2624 = vmax.xlane.f32.xlu1 %v2623_v60  ;;  %v2593_v36 = vpop.xlane.xlu1 %2592  ;;  %v4309_v10 = vpop.xlane.xlu0 %4308 }
 0x8a1   : > { %vm2608_vm15 = vcmp.ge.f32.partialorder %v11957_v12, %v2593_v36  ;;  %vm4320_vm12 = vcmp.ge.f32.partialorder %v11960_v4, %v4309_v10 }
 0x8a2   : > { %v12196_v57 = vsel %vm2608_vm15, -1e+30, %v11957_v12 }
 0x8a3   : > { %v2626_v33 = vsel %vm633_vm4, %v12196_v57, -inf }
 0x8a4   : > { %2627 = vmax.xlane.f32.xlu1 %v2626_v33  ;;  %v2596_v37 = vpop.xlane.xlu1 %2595  ;;  %v4312_v20 = vpop.xlane.xlu0 %4311 }
 0x8a5   : > { %vm2609_vm3 = vcmp.ge.f32.partialorder %v11969_v25, %v2596_v37  ;;  %vm4321_vm15 = vcmp.ge.f32.partialorder %v11972_v9, %v4312_v20 }
 0x8a6   : > { %v12202_v30 = vsel %vm2609_vm3, -1e+30, %v11969_v25 }
 0x8a7   : > { %v2629_v60 = vsel %vm633_vm4, %v12202_v30, -inf }
 0x8a8   : > { %2630 = vmax.xlane.f32.xlu1 %v2629_v60  ;;  %v2599_v46 = vpop.xlane.xlu1 %2598  ;;  %v4315_v36 = vpop.xlane.xlu0 %4314 }
 0x8a9   : > { %vm2610_vm6 = vcmp.ge.f32.partialorder %v11981_v2, %v2599_v46 }
 0x8aa   : > { %v12208_v12 = vsel %vm2610_vm6, -1e+30, %v11981_v2  ;;  %vm4322_vm6 = vcmp.ge.f32.partialorder %v11984_v62, %v4315_v36 }
 0x8ab   : > { %v2632_v33 = vsel %vm633_vm4, %v12208_v12, -inf }
 0x8ac   : > { %2633 = vmax.xlane.f32.xlu1 %v2632_v33  ;;  %v2605_v44 = vpop.xlane.xlu1 %2604  ;;  %v5152_v37 = vpop.xlane.xlu0 %5151 }
 0x8ad   : > { %vm2612_vm7 = vcmp.ge.f32.partialorder %v11993_v24, %v2605_v44 }
 0x8ae   : > { %v12214_v25 = vsel %vm2612_vm7, -1e+30, %v11993_v24 }
 0x8af   : > { %v2638_v60 = vsel %vm652_vm5, %v12214_v25, -inf }
 0x8b0   : > { %2639 = vmax.xlane.f32.xlu1 %v2638_v60  ;;  %v3445_v35 = vpop.xlane.xlu1 %3444  ;;  %v952_v46 = vpop.xlane.xlu0 %951  ;;  %v12232_v60 = vsel %vm4318_vm8, -1e+30, %v11936_v61  ;;  %vm5171_vm8 = vcmp.ge.f32.partialorder %v11996_v51, %v5152_v37 }
 0x8b1   : > { %vm3462_vm9 = vcmp.ge.f32.partialorder %v12005_v50, %v3445_v35  ;;  %vm971_vm10 = vcmp.ge.f32.partialorder %v12008_v7, %v952_v46 }
 0x8b2   : > { %v12222_v2 = vsel %vm3462_vm9, -1e+30, %v12005_v50  ;;  %v12225_v44 = vsel %vm971_vm10, -1e+30, %v12008_v7  ;;  %v4336_v50 = vsel %vm633_vm4, %v12232_v60, -inf }
 0x8b3   : > { %v3478_v24 = vsel %vm633_vm4, %v12222_v2, -inf  ;;  %v985_v33 = vsel %vm633_vm4, %v12225_v44, -inf  ;;  %v12238_v7 = vsel %vm4319_vm11, -1e+30, %v11948_v53  ;;  %v12251_v53 = vsel %vm4320_vm12, -1e+30, %v11960_v4 }
 0x8b4   : > { %3479 = vmax.xlane.f32.xlu1 %v3478_v24  ;;  %v955_v58 = vpop.xlane.xlu1 %954  ;;  %986 = vmax.xlane.f32.xlu0 %v985_v33  ;;  %v5155_v35 = vpop.xlane.xlu0 %5154  ;;  %v4339_v45 = vsel %vm633_vm4, %v12238_v7, -inf  ;;  %v12263_v4 = vsel %vm4321_vm15, -1e+30, %v11972_v9  ;;  %v12275_v9 = vsel %vm4322_vm6, -1e+30, %v11984_v62 }
 0x8b5   : > { %v4345_v20 = vsel %vm633_vm4, %v12263_v4, -inf  ;;  %vm5172_vm10 = vcmp.ge.f32.partialorder %v12020_v28, %v5155_v35  ;;  %vm972_vm12 = vcmp.ge.f32.partialorder %v12017_v11, %v955_v58 }
 0x8b8   : > { %v5158_v46 = vpop.xlane.xlu1 %5157  ;;  %4337 = vmax.xlane.f32.xlu1 %v4336_v50  ;;  %v958_v1 = vpop.xlane.xlu0 %957 }
 0x8b9   : > { %vm5173_vm13 = vcmp.ge.f32.partialorder %v12029_v22, %v5158_v46  ;;  %vm973_vm14 = vcmp.ge.f32.partialorder %v12032_v29, %v958_v1  ;;  %v4342_v1 = vsel %vm633_vm4, %v12251_v53, -inf }
 0x8ba   : > { %v12244_v61 = vsel %vm5173_vm13, -1e+30, %v12029_v22  ;;  %v12254_v33 = vsel %vm973_vm14, -1e+30, %v12032_v29 }
 0x8bb   : > { %v5191_v24 = vsel %vm633_vm4, %v12244_v61, -inf  ;;  %v991_v22 = vsel %vm633_vm4, %v12254_v33, -inf }
 0x8bc   : > { %v961_v10 = vpop.xlane.xlu1 %960  ;;  %4340 = vmax.xlane.f32.xlu1 %v4339_v45  ;;  %5192 = vmax.xlane.f32.xlu0 %v5191_v24  ;;  %v5161_v50 = vpop.xlane.xlu0 %5160 }
 0x8bd   : > { %vm5174_vm3 = vcmp.ge.f32.partialorder %v12044_v5, %v5161_v50  ;;  %v4348_v50 = vsel %vm652_vm5, %v12275_v9, -inf  ;;  %vm974_vm13 = vcmp.ge.f32.partialorder %v12041_v13, %v961_v10 }
 0x8be   : > { %v12266_v29 = vsel %vm5174_vm3, -1e+30, %v12044_v5 }
 0x8bf   : > { %v5194_v24 = vsel %vm633_vm4, %v12266_v29, -inf }
 0x8c0   : > { %v5164_v46 = vpop.xlane.xlu1 %5163  ;;  %4343 = vmax.xlane.f32.xlu1 %v4342_v1  ;;  %992 = vmax.xlane.f32.xlu0 %v991_v22  ;;  %v964_v45 = vpop.xlane.xlu0 %963  ;;  %v12287_v22 = vsel %vm5171_vm8, -1e+30, %v11996_v51 }
 0x8c1   : > { %vm5175_vm7 = vcmp.ge.f32.partialorder %v12053_v42, %v5164_v46  ;;  %vm975_vm9 = vcmp.ge.f32.partialorder %v12056_v48, %v964_v45  ;;  %v12299_v46 = vsel %vm5172_vm10, -1e+30, %v12020_v28  ;;  %v12310_v45 = vsel %vm972_vm12, -1e+30, %v12017_v11 }
 0x8c2   : > { %v12278_v5 = vsel %vm5175_vm7, -1e+30, %v12053_v42  ;;  %v12290_v62 = vsel %vm975_vm9, -1e+30, %v12056_v48  ;;  %v5185_v42 = vsel %vm633_vm4, %v12287_v22, -inf  ;;  %v5188_v48 = vsel %vm633_vm4, %v12299_v46, -inf }
 0x8c3   : > { %v5197_v1 = vsel %vm633_vm4, %v12278_v5, -inf  ;;  %v997_v37 = vsel %vm633_vm4, %v12290_v62, -inf  ;;  %v988_v28 = vsel %vm633_vm4, %v12310_v45, -inf }
 0x8c4   : > { %4346 = vmax.xlane.f32.xlu1 %v4345_v20  ;;  %5195 = vmax.xlane.f32.xlu0 %v5194_v24  ;;  %v5167_v36 = vpop.xlane.xlu0 %5166 }
 0x8c5   : > { %vm5176_vm11 = vcmp.ge.f32.partialorder %v12064_v40, %v5167_v36 }
 0x8c6   : > { %v12302_v51 = vsel %vm5176_vm11, -1e+30, %v12064_v40  ;;  %v12316_v40 = vsel %vm974_vm13, -1e+30, %v12041_v13 }
 0x8c7   : > { %v5200_v35 = vsel %vm633_vm4, %v12302_v51, -inf  ;;  %v994_v58 = vsel %vm633_vm4, %v12316_v40, -inf }
 0x8c8   : > { %4349 = vmax.xlane.f32.xlu1 %v4348_v50  ;;  %5198 = vmax.xlane.f32.xlu0 %v5197_v1 }
 0x8cc   : > { %5186 = vmax.xlane.f32.xlu1 %v5185_v42  ;;  %998 = vmax.xlane.f32.xlu0 %v997_v37 }
 0x8d0   : > { %5189 = vmax.xlane.f32.xlu1 %v5188_v48  ;;  %5201 = vmax.xlane.f32.xlu0 %v5200_v35 }
 0x8d4   : > { %989 = vmax.xlane.f32.xlu1 %v988_v28 }
 0x8d8   : > { %995 = vmax.xlane.f32.xlu1 %v994_v58 }
 0x8fd   : > { %v967_v20 = vpop.xlane.xlu1 %966 }
 0x8fe   : > { %vm976_vm14 = vcmp.ge.f32.partialorder %v12071_v15, %v967_v20  ;;  %v2637_v20 = vpop.xlane.xlu0 %2636 }
 0x8ff   : > { %v12322_v11 = vsel %vm976_vm14, -1e+30, %v12071_v15 }
 0x900   : > { %v1000_v10 = vsel %vm633_vm4, %v12322_v11, -inf }
 0x901   : > { %v5170_v24 = vpop.xlane.xlu1 %5169  ;;  %1001 = vmax.xlane.f32.xlu1 %v1000_v10 }
 0x902   : > { %vm5177_vm15 = vcmp.ge.f32.partialorder %v12082_v34, %v5170_v24 }
 0x903   : > { %v12328_v13 = vsel %vm5177_vm15, -1e+30, %v12082_v34 }
 0x904   : > { %v5203_v36 = vsel %vm652_vm5, %v12328_v13, -inf }
 0x905   : > { %v970_v50 = vpop.xlane.xlu1 %969  ;;  %5204 = vmax.xlane.f32.xlu1 %v5203_v36  ;;  %v3477_v36 = vpop.xlane.xlu0 %3476 }
 0x906   : > { %vm977_vm3 = vcmp.ge.f32.partialorder %v12089_v17, %v970_v50 }
 0x907   : > { %v12334_v15 = vsel %vm977_vm3, -1e+30, %v12089_v17 }
 0x908   : > { %v1003_v1 = vsel %vm652_vm5, %v12334_v15, -inf }
 0x909   : > { %v1761_v42 = vpop.xlane.xlu1 %1760  ;;  %1004 = vmax.xlane.f32.xlu1 %v1003_v1 }
 0x90a   : > { %vm1780_vm6 = vcmp.ge.f32.partialorder %v12101_v8, %v1761_v42 }
 0x90b   : > { %v12340_v34 = vsel %vm1780_vm6, -1e+30, %v12101_v8  ;;  %vm2646_vm6 = vcmp.ge.f32.partialorder %v12074_v55, %v2637_v20 }
 0x90c   : > { %v1794_v37 = vsel %vm633_vm4, %v12340_v34, -inf }
 0x90d   : > { %v1764_v48 = vpop.xlane.xlu1 %1763  ;;  %1795 = vmax.xlane.f32.xlu1 %v1794_v37 }
 0x90e   : > { %vm1781_vm7 = vcmp.ge.f32.partialorder %v12113_v54, %v1764_v48 }
 0x90f   : > { %v12346_v17 = vsel %vm1781_vm7, -1e+30, %v12113_v54 }
 0x910   : > { %v1797_v35 = vsel %vm633_vm4, %v12346_v17, -inf }
 0x911   : > { %v1767_v28 = vpop.xlane.xlu1 %1766  ;;  %1798 = vmax.xlane.f32.xlu0 %v1797_v35 }
 0x912   : > { %vm1782_vm8 = vcmp.ge.f32.partialorder %v12125_v52, %v1767_v28 }
 0x913   : > { %v12352_v8 = vsel %vm1782_vm8, -1e+30, %v12125_v52  ;;  %vm3496_vm8 = vcmp.ge.f32.partialorder %v12092_v49, %v3477_v36 }
 0x914   : > { %v1800_v58 = vsel %vm633_vm4, %v12352_v8, -inf }
 0x915   : > { %v1770_v10 = vpop.xlane.xlu1 %1769  ;;  %1801 = vmax.xlane.f32.xlu1 %v1800_v58 }
 0x916   : > { %vm1783_vm9 = vcmp.ge.f32.partialorder %v12137_v59, %v1770_v10 }
 0x917   : > { %v12358_v54 = vsel %vm1783_vm9, -1e+30, %v12137_v59  ;;  %v3483_v59 = vpop.xlane.xlu0 %3482 }
 0x918   : > { %v1803_v24 = vsel %vm633_vm4, %v12358_v54, -inf  ;;  %vm3498_vm9 = vcmp.ge.f32.partialorder %v12104_v21, %v3483_v59 }
 0x919   : > { %v1773_v50 = vpop.xlane.xlu1 %1772  ;;  %1804 = vmax.xlane.f32.xlu0 %v1803_v24 }
 0x91a   : > { %vm1784_vm10 = vcmp.ge.f32.partialorder %v12149_v56, %v1773_v50 }
 0x91b   : > { %v12364_v52 = vsel %vm1784_vm10, -1e+30, %v12149_v56  ;;  %v3486_v58 = vpop.xlane.xlu0 %3485 }
 0x91c   : > { %v1806_v1 = vsel %vm633_vm4, %v12364_v52, -inf }
 0x91d   : > { %v1776_v42 = vpop.xlane.xlu1 %1775  ;;  %1807 = vmax.xlane.f32.xlu0 %v1806_v1 }
 0x91e   : > { %vm1785_vm11 = vcmp.ge.f32.partialorder %v12161_v39, %v1776_v42 }
 0x91f   : > { %v12370_v37 = vsel %vm1785_vm11, -1e+30, %v12161_v39  ;;  %vm3499_vm11 = vcmp.ge.f32.partialorder %v12116_v47, %v3486_v58 }
 0x920   : > { %v1809_v48 = vsel %vm633_vm4, %v12370_v37, -inf }
 0x921   : > { %v1779_v35 = vpop.xlane.xlu1 %1778  ;;  %1810 = vmax.xlane.f32.xlu0 %v1809_v48 }
 0x922   : > { %vm1786_vm12 = vcmp.ge.f32.partialorder %v12173_v19, %v1779_v35 }
 0x923   : > { %v12376_v56 = vsel %vm1786_vm12, -1e+30, %v12173_v19  ;;  %v3489_v19 = vpop.xlane.xlu0 %3488 }
 0x924   : > { %v1812_v28 = vsel %vm652_vm5, %v12376_v56, -inf }
 0x925   : > { %v2622_v10 = vpop.xlane.xlu1 %2621  ;;  %1813 = vmax.xlane.f32.xlu0 %v1812_v28 }
 0x926   : > { %vm2641_vm13 = vcmp.ge.f32.partialorder %v12184_v6, %v2622_v10 }
 0x927   : > { %v12382_v39 = vsel %vm2641_vm13, -1e+30, %v12184_v6  ;;  %v3492_v28 = vpop.xlane.xlu0 %3491  ;;  %vm3500_vm13 = vcmp.ge.f32.partialorder %v12128_v32, %v3489_v19 }
 0x928   : > { %v2655_v24 = vsel %vm633_vm4, %v12382_v39, -inf }
 0x929   : > { %v2625_v50 = vpop.xlane.xlu1 %2624  ;;  %2656 = vmax.xlane.f32.xlu0 %v2655_v24 }
 0x92a   : > { %vm2642_vm14 = vcmp.ge.f32.partialorder %v12190_v26, %v2625_v50 }
 0x92b   : > { %v12388_v1 = vsel %vm2642_vm14, -1e+30, %v12190_v26  ;;  %vm3501_vm14 = vcmp.ge.f32.partialorder %v12140_v41, %v3492_v28 }
 0x92c   : > { %v2658_v42 = vsel %vm633_vm4, %v12388_v1, -inf }
 0x92d   : > { %v2628_v48 = vpop.xlane.xlu1 %2627  ;;  %2659 = vmax.xlane.f32.xlu0 %v2658_v42 }
 0x92e   : > { %vm2643_vm15 = vcmp.ge.f32.partialorder %v12196_v57, %v2628_v48 }
 0x92f   : > { %v12394_v6 = vsel %vm2643_vm15, -1e+30, %v12196_v57  ;;  %v3495_v57 = vpop.xlane.xlu0 %3494 }
 0x930   : > { %v2661_v35 = vsel %vm633_vm4, %v12394_v6, -inf  ;;  %vm3502_vm15 = vcmp.ge.f32.partialorder %v12152_v18, %v3495_v57 }
 0x931   : > { %v2631_v10 = vpop.xlane.xlu1 %2630  ;;  %2662 = vmax.xlane.f32.xlu0 %v2661_v35  ;;  %v12412_v35 = vsel %vm2646_vm6, -1e+30, %v12074_v55  ;;  %v12425_v55 = vsel %vm3496_vm8, -1e+30, %v12092_v49  ;;  %v12437_v49 = vsel %vm3499_vm11, -1e+30, %v12116_v47 }
 0x932   : > { %vm2644_vm3 = vcmp.ge.f32.partialorder %v12202_v30, %v2631_v10  ;;  %v2670_v10 = vsel %vm633_vm4, %v12412_v35, -inf  ;;  %v12449_v47 = vsel %vm3500_vm13, -1e+30, %v12128_v32  ;;  %v12461_v32 = vsel %vm3502_vm15, -1e+30, %v12152_v18 }
 0x933   : > { %v12400_v26 = vsel %vm2644_vm3, -1e+30, %v12202_v30  ;;  %v4332_v36 = vpop.xlane.xlu0 %4331  ;;  %v3522_v28 = vsel %vm633_vm4, %v12449_v47, -inf }
 0x934   : > { %v2664_v24 = vsel %vm633_vm4, %v12400_v26, -inf  ;;  %vm4351_vm3 = vcmp.ge.f32.partialorder %v12164_v3, %v4332_v36  ;;  %v3528_v36 = vsel %vm652_vm5, %v12461_v32, -inf }
 0x935   : > { %v2634_v50 = vpop.xlane.xlu1 %2633  ;;  %2665 = vmax.xlane.f32.xlu0 %v2664_v24  ;;  %v12428_v24 = vsel %vm3498_vm9, -1e+30, %v12104_v21 }
 0x936   : > { %vm2645_vm7 = vcmp.ge.f32.partialorder %v12208_v12, %v2634_v50  ;;  %v3516_v59 = vsel %vm633_vm4, %v12428_v24, -inf }
 0x937   : > { %v12407_v42 = vsel %vm2645_vm7, -1e+30, %v12208_v12  ;;  %v4335_v58 = vpop.xlane.xlu0 %4334 }
 0x938   : > { %v2667_v48 = vsel %vm633_vm4, %v12407_v42, -inf  ;;  %vm4352_vm6 = vcmp.ge.f32.partialorder %v12176_v31, %v4335_v58 }
 0x939   : > { %v2640_v30 = vpop.xlane.xlu1 %2639  ;;  %2668 = vmax.xlane.f32.xlu0 %v2667_v48 }
 0x93a   : > { %vm2647_vm10 = vcmp.ge.f32.partialorder %v12214_v25, %v2640_v30 }
 0x93b   : > { %v12418_v20 = vsel %vm2647_vm10, -1e+30, %v12214_v25  ;;  %v3510_v25 = vsel %vm633_vm4, %v12425_v55, -inf }
 0x93c   : > { %v2673_v12 = vsel %vm652_vm5, %v12418_v20, -inf }
 0x93d   : > { %v3480_v50 = vpop.xlane.xlu1 %3479  ;;  %2674 = vmax.xlane.f32.xlu1 %v2673_v12  ;;  %2671 = vmax.xlane.f32.xlu0 %v2670_v10  ;;  %v3519_v12 = vsel %vm633_vm4, %v12437_v49, -inf  ;;  %v987_v19 = vpop.xlane.xlu0 %986 }
 0x93e   : > { %vm3497_vm12 = vcmp.ge.f32.partialorder %v12222_v2, %v3480_v50  ;;  %vm1006_vm9 = vcmp.ge.f32.partialorder %v12225_v44, %v987_v19 }
 0x93f   : > { %v12440_v21 = vsel %vm3497_vm12, -1e+30, %v12222_v2  ;;  %v12452_v2 = vsel %vm3501_vm14, -1e+30, %v12140_v41  ;;  %v12464_v41 = vsel %vm4351_vm3, -1e+30, %v12164_v3 }
 0x940   : > { %v3513_v30 = vsel %vm633_vm4, %v12440_v21, -inf  ;;  %v3525_v50 = vsel %vm633_vm4, %v12452_v2, -inf }
 0x941   : > { %v4338_v48 = vpop.xlane.xlu1 %4337  ;;  %3511 = vmax.xlane.f32.xlu1 %v3510_v25  ;;  %3517 = vmax.xlane.f32.xlu0 %v3516_v59  ;;  %v4365_v59 = vsel %vm633_vm4, %v12464_v41, -inf }
 0x942   : > { %vm4353_vm7 = vcmp.ge.f32.partialorder %v12232_v60, %v4338_v48 }
 0x943   : > { %v12478_v58 = vsel %vm4353_vm7, -1e+30, %v12232_v60 }
 0x945   : > { %v4341_v10 = vpop.xlane.xlu1 %4340  ;;  %3514 = vmax.xlane.f32.xlu1 %v3513_v30  ;;  %3520 = vmax.xlane.f32.xlu0 %v3519_v12  ;;  %v5193_v57 = vpop.xlane.xlu0 %5192  ;;  %v12472_v30 = vsel %vm4352_vm6, -1e+30, %v12176_v31  ;;  %v4371_v31 = vsel %vm633_vm4, %v12478_v58, -inf }
 0x946   : > { %v4368_v3 = vsel %vm633_vm4, %v12472_v30, -inf  ;;  %vm4354_vm8 = vcmp.ge.f32.partialorder %v12238_v7, %v4341_v10  ;;  %vm5208_vm10 = vcmp.ge.f32.partialorder %v12244_v61, %v5193_v57 }
 0x949   : > { %v4344_v25 = vpop.xlane.xlu1 %4343  ;;  %3523 = vmax.xlane.f32.xlu1 %v3522_v28  ;;  %3526 = vmax.xlane.f32.xlu0 %v3525_v50  ;;  %v12480_v12 = vpop.xlane.xlu0 %992  ;;  %v12486_v50 = vsel %vm4354_vm8, -1e+30, %v12238_v7 }
 0x94a   : > { %v4374_v60 = vsel %vm633_vm4, %v12486_v50, -inf  ;;  %vm4355_vm14 = vcmp.ge.f32.partialorder %v12251_v53, %v4344_v25  ;;  %vm1008_vm8 = vcmp.ge.f32.partialorder %v12254_v33, %v12480_v12 }
 0x94d   : > { %v4347_v18 = vpop.xlane.xlu1 %4346  ;;  %3529 = vmax.xlane.f32.xlu1 %v3528_v36  ;;  %4366 = vmax.xlane.f32.xlu0 %v4365_v59  ;;  %v12489_v48 = vpop.xlane.xlu0 %5195 }
 0x94e   : > { %vm4356_vm15 = vcmp.ge.f32.partialorder %v12263_v4, %v4347_v18 }
 0x951   : > { %v4350_v28 = vpop.xlane.xlu1 %4349  ;;  %4369 = vmax.xlane.f32.xlu1 %v4368_v3  ;;  %v1013_v3 = vsel %vm1006_vm9, -1e+30, %v12225_v44  ;;  %v5199_v27 = vpop.xlane.xlu0 %5198 }
 0x952   : > { %v1020_v10 = vsel %vm633_vm4, %v1013_v3, -inf  ;;  %vm5210_vm12 = vcmp.ge.f32.partialorder %v12278_v5, %v5199_v27  ;;  %v12523_v3 = vsel %vm4356_vm15, -1e+30, %v12263_v4  ;;  %vm4357_vm3 = vcmp.ge.f32.partialorder %v12275_v9, %v4350_v28 }
 0x953   : > { %v12508_v57 = vsel %vm5210_vm12, -1e+30, %v12278_v5 }
 0x955   : > { %v5187_v36 = vpop.xlane.xlu1 %5186  ;;  %4372 = vmax.xlane.f32.xlu1 %v4371_v31  ;;  %v12500_v31 = vsel %vm5208_vm10, -1e+30, %v12244_v61  ;;  %v999_v44 = vpop.xlane.xlu0 %998  ;;  %vm5209_vm10 = vcmp.ge.f32.partialorder %v12266_v29, %v12489_v48 }
 0x956   : > { %vm1010_vm13 = vcmp.ge.f32.partialorder %v12290_v62, %v999_v44  ;;  %vm5206_vm6 = vcmp.ge.f32.partialorder %v12287_v22, %v5187_v36 }
 0x957   : > { %v1017_v61 = vsel %vm1010_vm13, -1e+30, %v12290_v62  ;;  %v4380_v62 = vsel %vm633_vm4, %v12523_v3, -inf  ;;  %v12535_v18 = vsel %vm5206_vm6, -1e+30, %v12287_v22 }
 0x958   : > { %v1032_v27 = vsel %vm633_vm4, %v1017_v61, -inf  ;;  %v5220_v28 = vsel %vm633_vm4, %v12535_v18, -inf }
 0x959   : > { %v5190_v59 = vpop.xlane.xlu1 %5189  ;;  %4375 = vmax.xlane.f32.xlu1 %v4374_v60  ;;  %v5226_v60 = vsel %vm633_vm4, %v12500_v31, -inf }
 0x95a   : > { %vm5207_vm7 = vcmp.ge.f32.partialorder %v12299_v46, %v5190_v59 }
 0x95d   : > { %v990_v63 = vpop.xlane.xlu1 %989  ;;  %1021 = vmax.xlane.f32.xlu1 %v1020_v10  ;;  %v12529_v10 = vsel %vm4357_vm3, -1e+30, %v12275_v9  ;;  %v12541_v9 = vsel %vm5207_vm7, -1e+30, %v12299_v46  ;;  %v1015_v46 = vsel %vm1008_vm8, -1e+30, %v12254_v33 }
 0x95e   : > { %vm1007_vm11 = vcmp.ge.f32.partialorder %v12310_v45, %v990_v63  ;;  %v5232_v63 = vsel %vm633_vm4, %v12508_v57, -inf  ;;  %v5223_v36 = vsel %vm633_vm4, %v12541_v9, -inf }
 0x95f   : > { %v1014_v7 = vsel %vm1007_vm11, -1e+30, %v12310_v45  ;;  %v12517_v45 = vsel %vm4355_vm14, -1e+30, %v12251_v53  ;;  %v4383_v53 = vsel %vm652_vm5, %v12529_v10, -inf }
 0x960   : > { %v1023_v19 = vsel %vm633_vm4, %v1014_v7, -inf  ;;  %v4377_v5 = vsel %vm633_vm4, %v12517_v45, -inf }
 0x961   : > { %1024 = vmax.xlane.f32.xlu1 %v1023_v19  ;;  %v996_v25 = vpop.xlane.xlu1 %995 }
 0x962   : > { %vm1009_vm12 = vcmp.ge.f32.partialorder %v12316_v40, %v996_v25 }
 0x963   : > { %4516 = vrot.lane.b32.xlu0 %v14415_v14, %s8515_s11  ;;  %v1016_v61 = vsel %vm1009_vm12, -1e+30, %v12316_v40 }
 0x965   : > { %5227 = vmax.xlane.f32.xlu1 %v5226_v60  ;;  %v12561_v60 = vsel %vm5209_vm10, -1e+30, %v12266_v29  ;;  %v1029_v29 = vsel %vm633_vm4, %v1016_v61, -inf }
 0x966   : > { %v5229_v33 = vsel %vm633_vm4, %v12561_v60, -inf }
 0x969   : > { %5233 = vmax.xlane.f32.xlu1 %v5232_v63  ;;  %v5202_v63 = vpop.xlane.xlu0 %5201 }
 0x96a   : > { %vm5211_vm13 = vcmp.ge.f32.partialorder %v12302_v51, %v5202_v63 }
 0x96d   : > { %1033 = vmax.xlane.f32.xlu1 %v1032_v27 }
 0x982   : > { %4378 = vmax.xlane.f32.xlu0 %v4377_v5  ;;  %v12573_v5 = vsel %vm5211_vm13, -1e+30, %v12302_v51 }
 0x983   : > { %v5235_v40 = vsel %vm633_vm4, %v12573_v5, -inf }
 0x986   : > { %4381 = vmax.xlane.f32.xlu0 %v4380_v62 }
 0x98a   : > { %v1002_v4 = vpop.xlane.xlu1 %1001  ;;  %4384 = vmax.xlane.f32.xlu0 %v4383_v53 }
 0x98b   : > { %vm1011_vm15 = vcmp.ge.f32.partialorder %v12322_v11, %v1002_v4 }
 0x98c   : > { %v1018_v53 = vsel %vm1011_vm15, -1e+30, %v12322_v11 }
 0x98e   : > { %v5205_v7 = vpop.xlane.xlu1 %5204  ;;  %5221 = vmax.xlane.f32.xlu0 %v5220_v28  ;;  %v1035_v28 = vsel %vm633_vm4, %v1018_v53, -inf }
 0x98f   : > { %vm5212_vm9 = vcmp.ge.f32.partialorder %v12328_v13, %v5205_v7 }
 0x990   : > { %v12547_v22 = vsel %vm5212_vm9, -1e+30, %v12328_v13  ;;  %v1026_v13 = vsel %vm633_vm4, %v1015_v46, -inf }
 0x991   : > { %v5238_v59 = vsel %vm652_vm5, %v12547_v22, -inf }
 0x992   : > { %v1005_v19 = vpop.xlane.xlu1 %1004  ;;  %5224 = vmax.xlane.f32.xlu0 %v5223_v36  ;;  %5239 = vmax.xlane.f32.xlu1 %v5238_v59 }
 0x993   : > { %vm1012_vm11 = vcmp.ge.f32.partialorder %v12334_v15, %v1005_v19 }
 0x994   : > { %v1019_v12 = vsel %vm1012_vm11, -1e+30, %v12334_v15 }
 0x995   : > { %v1038_v44 = vsel %vm652_vm5, %v1019_v12, -inf }
 0x996   : > { %1027 = vmax.xlane.f32.xlu0 %v1026_v13  ;;  %1039 = vmax.xlane.f32.xlu1 %v1038_v44  ;;  %v1796_v62 = vpop.xlane.xlu1 %1795 }
 0x997   : > { %vm1815_vm3 = vcmp.ge.f32.partialorder %v12340_v34, %v1796_v62 }
 0x998   : > { %v1822_v36 = vsel %vm1815_vm3, -1e+30, %v12340_v34 }
 0x999   : > { %v1829_v59 = vsel %vm633_vm4, %v1822_v36, -inf }
 0x99a   : > { %5230 = vmax.xlane.f32.xlu0 %v5229_v33  ;;  %v1799_v48 = vpop.xlane.xlu0 %1798 }
 0x99b   : > { %vm1816_vm14 = vcmp.ge.f32.partialorder %v12346_v17, %v1799_v48 }
 0x99c   : > { %v1823_v15 = vsel %vm1816_vm14, -1e+30, %v12346_v17 }
 0x99d   : > { %v1832_v27 = vsel %vm633_vm4, %v1823_v15, -inf }
 0x99e   : > { %1030 = vmax.xlane.f32.xlu0 %v1029_v29  ;;  %1833 = vmax.xlane.f32.xlu1 %v1832_v27  ;;  %v1802_v17 = vpop.xlane.xlu1 %1801 }
 0x99f   : > { %vm1817_vm7 = vcmp.ge.f32.partialorder %v12352_v8, %v1802_v17 }
 0x9a0   : > { %v1824_v46 = vsel %vm1817_vm7, -1e+30, %v12352_v8 }
 0x9a1   : > { %v1835_v34 = vsel %vm633_vm4, %v1824_v46, -inf }
 0x9a2   : > { %5236 = vmax.xlane.f32.xlu0 %v5235_v40  ;;  %v1805_v25 = vpop.xlane.xlu0 %1804 }
 0x9a3   : > { %vm1818_vm6 = vcmp.ge.f32.partialorder %v12358_v54, %v1805_v25 }
 0x9a4   : > { %v1825_v51 = vsel %vm1818_vm6, -1e+30, %v12358_v54 }
 0x9a5   : > { %v1838_v7 = vsel %vm633_vm4, %v1825_v51, -inf }
 0x9a6   : > { %1036 = vmax.xlane.f32.xlu0 %v1035_v28  ;;  %1839 = vmax.xlane.f32.xlu1 %v1838_v7  ;;  %v1808_v4 = vpop.xlane.xlu0 %1807 }
 0x9a7   : > { %vm1819_vm8 = vcmp.ge.f32.partialorder %v12364_v52, %v1808_v4 }
 0x9a8   : > { %v1826_v11 = vsel %vm1819_vm8, -1e+30, %v12364_v52 }
 0x9a9   : > { %v1841_v19 = vsel %vm633_vm4, %v1826_v11, -inf }
 0x9aa   : > { %1830 = vmax.xlane.f32.xlu0 %v1829_v59  ;;  %1842 = vmax.xlane.f32.xlu1 %v1841_v19  ;;  %v1811_v54 = vpop.xlane.xlu0 %1810 }
 0x9ab   : > { %vm1820_vm9 = vcmp.ge.f32.partialorder %v12370_v37, %v1811_v54 }
 0x9ac   : > { %v1827_v12 = vsel %vm1820_vm9, -1e+30, %v12370_v37 }
 0x9ad   : > { %v1844_v13 = vsel %vm633_vm4, %v1827_v12, -inf }
 0x9ae   : > { %1836 = vmax.xlane.f32.xlu0 %v1835_v34  ;;  %1845 = vmax.xlane.f32.xlu1 %v1844_v13  ;;  %v1814_v52 = vpop.xlane.xlu0 %1813 }
 0x9af   : > { %vm1821_vm10 = vcmp.ge.f32.partialorder %v12376_v56, %v1814_v52 }
 0x9b0   : > { %v1828_v44 = vsel %vm1821_vm10, -1e+30, %v12376_v56 }
 0x9b1   : > { %v1847_v63 = vsel %vm652_vm5, %v1828_v44, -inf }
 0x9b2   : > { %1848 = vmax.xlane.f32.xlu1 %v1847_v63  ;;  %v2657_v33 = vpop.xlane.xlu0 %2656 }
 0x9b3   : > { %vm2676_vm11 = vcmp.ge.f32.partialorder %v12382_v39, %v2657_v33 }
 0x9b4   : > { %v2683_v8 = vsel %vm2676_vm11, -1e+30, %v12382_v39 }
 0x9b5   : > { %v2690_v37 = vsel %vm633_vm4, %v2683_v8, -inf }
 0x9b6   : > { %2691 = vmax.xlane.f32.xlu1 %v2690_v37  ;;  %v2660_v48 = vpop.xlane.xlu0 %2659 }
 0x9b7   : > { %vm2677_vm12 = vcmp.ge.f32.partialorder %v12388_v1, %v2660_v48 }
 0x9b8   : > { %v2684_v61 = vsel %vm2677_vm12, -1e+30, %v12388_v1 }
 0x9b9   : > { %v2693_v15 = vsel %vm633_vm4, %v2684_v61, -inf }
 0x9ba   : > { %2694 = vmax.xlane.f32.xlu1 %v2693_v15  ;;  %v2663_v56 = vpop.xlane.xlu0 %2662 }
 0x9bb   : > { %vm2678_vm13 = vcmp.ge.f32.partialorder %v12394_v6, %v2663_v56 }
 0x9bc   : > { %v2685_v29 = vsel %vm2678_vm13, -1e+30, %v12394_v6 }
 0x9bd   : > { %v2696_v27 = vsel %vm633_vm4, %v2685_v29, -inf }
 0x9be   : > { %2697 = vmax.xlane.f32.xlu1 %v2696_v27  ;;  %v2666_v39 = vpop.xlane.xlu0 %2665 }
 0x9bf   : > { %vm2679_vm14 = vcmp.ge.f32.partialorder %v12400_v26, %v2666_v39  ;;  %v14515_v39 = vld [vmem:[#allocation24_spill] sm:$0xff] }
 0x9c0   : > { %v2686_v62 = vsel %vm2679_vm14, -1e+30, %v12400_v26 }
 0x9c1   : > { %v2699_v40 = vsel %vm633_vm4, %v2686_v62, -inf }
 0x9c2   : > { %2700 = vmax.xlane.f32.xlu1 %v2699_v40  ;;  %v2669_v1 = vpop.xlane.xlu0 %2668 }
 0x9c3   : > { %vm2680_vm15 = vcmp.ge.f32.partialorder %v12407_v42, %v2669_v1 }
 0x9c4   : > { %v2687_v25 = vsel %vm2680_vm15, -1e+30, %v12407_v42 }
 0x9c5   : > { %v2702_v53 = vsel %vm633_vm4, %v2687_v25, -inf }
 0x9c6   : > { %v2675_v17 = vpop.xlane.xlu1 %2674  ;;  %2703 = vmax.xlane.f32.xlu1 %v2702_v53  ;;  %v2672_v6 = vpop.xlane.xlu0 %2671 }
 0x9c7   : > { %vm2682_vm3 = vcmp.ge.f32.partialorder %v12418_v20, %v2675_v17  ;;  %vm2681_vm6 = vcmp.ge.f32.partialorder %v12412_v35, %v2672_v6 }
 0x9c8   : > { %v2689_v51 = vsel %vm2682_vm3, -1e+30, %v12418_v20  ;;  %v2688_v26 = vsel %vm2681_vm6, -1e+30, %v12412_v35 }
 0x9c9   : > { %v2708_v28 = vsel %vm652_vm5, %v2689_v51, -inf  ;;  %v2705_v7 = vsel %vm633_vm4, %v2688_v26, -inf }
 0x9ca   : > { %v3512_v4 = vpop.xlane.xlu1 %3511  ;;  %2709 = vmax.xlane.f32.xlu1 %v2708_v28  ;;  %2706 = vmax.xlane.f32.xlu0 %v2705_v7  ;;  %v3518_v42 = vpop.xlane.xlu0 %3517 }
 0x9cb   : > { %vm3531_vm7 = vcmp.ge.f32.partialorder %v12425_v55, %v3512_v4  ;;  %vm3533_vm8 = vcmp.ge.f32.partialorder %v12428_v24, %v3518_v42  ;;  %v14516_v42 = vld [vmem:[#allocation21_spill] sm:$0xff] }
 0x9cc   : > { %v3538_v36 = vsel %vm3531_vm7, -1e+30, %v12425_v55  ;;  %v3540_v35 = vsel %vm3533_vm8, -1e+30, %v12428_v24 }
 0x9cd   : > { %v3545_v11 = vsel %vm633_vm4, %v3538_v36, -inf  ;;  %v3551_v46 = vsel %vm633_vm4, %v3540_v35, -inf }
 0x9ce   : > { %v3515_v59 = vpop.xlane.xlu1 %3514  ;;  %3546 = vmax.xlane.f32.xlu0 %v3545_v11  ;;  %v3521_v20 = vpop.xlane.xlu0 %3520 }
 0x9cf   : > { %vm3532_vm9 = vcmp.ge.f32.partialorder %v12440_v21, %v3515_v59  ;;  %vm3534_vm10 = vcmp.ge.f32.partialorder %v12437_v49, %v3521_v20 }
 0x9d0   : > { %v3539_v19 = vsel %vm3532_vm9, -1e+30, %v12440_v21  ;;  %v3541_v55 = vsel %vm3534_vm10, -1e+30, %v12437_v49 }
 0x9d1   : > { %v3548_v54 = vsel %vm633_vm4, %v3539_v19, -inf  ;;  %v3554_v24 = vsel %vm633_vm4, %v3541_v55, -inf }
 0x9d2   : > { %v3524_v12 = vpop.xlane.xlu1 %3523  ;;  %3549 = vmax.xlane.f32.xlu1 %v3548_v54  ;;  %3552 = vmax.xlane.f32.xlu0 %v3551_v46  ;;  %v3527_v34 = vpop.xlane.xlu0 %3526 }
 0x9d3   : > { %vm3535_vm11 = vcmp.ge.f32.partialorder %v12449_v47, %v3524_v12  ;;  %vm3536_vm12 = vcmp.ge.f32.partialorder %v12452_v2, %v3527_v34  ;;  %v14517_v34 = vld [vmem:[#allocation18_spill] sm:$0xff] }
 0x9d4   : > { %v3542_v52 = vsel %vm3535_vm11, -1e+30, %v12449_v47  ;;  %v3543_v63 = vsel %vm3536_vm12, -1e+30, %v12452_v2 }
 0x9d5   : > { %v3557_v21 = vsel %vm633_vm4, %v3542_v52, -inf  ;;  %v3560_v33 = vsel %vm633_vm4, %v3543_v63, -inf }
 0x9d6   : > { %v3530_v13 = vpop.xlane.xlu1 %3529  ;;  %3555 = vmax.xlane.f32.xlu0 %v3554_v24  ;;  %v4367_v49 = vpop.xlane.xlu0 %4366 }
 0x9d7   : > { %vm3537_vm13 = vcmp.ge.f32.partialorder %v12461_v32, %v3530_v13  ;;  %vm4386_vm14 = vcmp.ge.f32.partialorder %v12464_v41, %v4367_v49 }
 0x9d8   : > { %v3544_v37 = vsel %vm3537_vm13, -1e+30, %v12461_v32  ;;  %v4393_v61 = vsel %vm4386_vm14, -1e+30, %v12464_v41 }
 0x9d9   : > { %v3563_v47 = vsel %vm652_vm5, %v3544_v37, -inf  ;;  %v4400_v2 = vsel %vm633_vm4, %v4393_v61, -inf  ;;  %v14519_v61 = vld [vmem:[#allocation11_spill] sm:$0xff] }
 0x9da   : > { %v4370_v44 = vpop.xlane.xlu1 %4369  ;;  %3558 = vmax.xlane.f32.xlu0 %v3557_v21 }
 0x9db   : > { %vm4387_vm15 = vcmp.ge.f32.partialorder %v12472_v30, %v4370_v44 }
 0x9dc   : > { %v4394_v56 = vsel %vm4387_vm15, -1e+30, %v12472_v30 }
 0x9dd   : > { %v4403_v32 = vsel %vm633_vm4, %v4394_v56, -inf }
 0x9de   : > { %v4373_v8 = vpop.xlane.xlu1 %4372  ;;  %3561 = vmax.xlane.f32.xlu0 %v3560_v33 }
 0x9df   : > { %vm4388_vm3 = vcmp.ge.f32.partialorder %v12478_v58, %v4373_v8 }
 0x9e0   : > { %v4395_v27 = vsel %vm4388_vm3, -1e+30, %v12478_v58  ;;  %v12658_v58 = vpop.permute.xlu0 %4516 }
 0x9e1   : > { %v4406_v30 = vsel %vm633_vm4, %v4395_v27, -inf  ;;  %v14521_v27 = vld [vmem:[#allocation16_spill] sm:$0xff] }
 0x9e2   : > { %v4376_v48 = vpop.xlane.xlu1 %4375  ;;  %3564 = vmax.xlane.f32.xlu0 %v3563_v47 }
 0x9e3   : > { %vm4389_vm6 = vcmp.ge.f32.partialorder %v12486_v50, %v4376_v48 }
 0x9e4   : > { %v4396_v40 = vsel %vm4389_vm6, -1e+30, %v12486_v50 }
 0x9e5   : > { %v4409_v1 = vsel %vm633_vm4, %v4396_v40, -inf }
 0x9e6   : > { %v1022_v15 = vpop.xlane.xlu1 %1021  ;;  %4401 = vmax.xlane.f32.xlu0 %v4400_v2  ;;  %v14520_v2 = vld [vmem:[#allocation13_spill] sm:$0xff] }
 0x9e7   : > { %vm1041_vm11 = vcmp.ge.f32.partialorder %v14516_v42, %v1022_v15 }
 0x9e8   : > { %v12674_v20 = vsel %vm1041_vm11, %v14516_v42, -1e+30 }
 0x9ea   : > { %v1025_v29 = vpop.xlane.xlu1 %1024  ;;  %4404 = vmax.xlane.f32.xlu0 %v4403_v32 }
 0x9eb   : > { %vm1042_vm7 = vcmp.ge.f32.partialorder %v14515_v39, %v1025_v29 }
 0x9ec   : > { %v12651_v41 = vsel %vm1042_vm7, %v14515_v39, -1e+30 }
 0x9ed   : > { %v1058_v62 = vsel %vm633_vm4, %v12651_v41, -inf }
 0x9ee   : > { %1059 = vmax.xlane.f32.xlu1 %v1058_v62  ;;  %4407 = vmax.xlane.f32.xlu0 %v4406_v30  ;;  %v5228_v26 = vpop.xlane.xlu1 %5227 }
 0x9ef   : > { %vm5243_vm14 = vcmp.ge.f32.partialorder %v12500_v31, %v5228_v26 }
 0x9f0   : > { %v5250_v55 = vsel %vm5243_vm14, -1e+30, %v12500_v31 }
 0x9f1   : > { %v5261_v24 = vsel %vm633_vm4, %v5250_v55, -inf  ;;  %v14528_v55 = vld [vmem:[#allocation17_spill] sm:$0xff] }
 0x9f2   : > { %4410 = vmax.xlane.f32.xlu0 %v4409_v1  ;;  %v5234_v36 = vpop.xlane.xlu1 %5233 }
 0x9f3   : > { %vm5245_vm7 = vcmp.ge.f32.partialorder %v12508_v57, %v5234_v36  ;;  %v14525_v36 = vld [vmem:[#allocation23_spill] sm:$0xff] }
 0x9f4   : > { %v5252_v48 = vsel %vm5245_vm7, -1e+30, %v12508_v57 }
 0x9f6   : > { %v1034_v35 = vpop.xlane.xlu1 %1033 }
 0xa0b   : > { %v4379_v25 = vpop.xlane.xlu0 %4378 }
 0xa0c   : > { %vm4390_vm8 = vcmp.ge.f32.partialorder %v12517_v45, %v4379_v25 }
 0xa0d   : > { %v4397_v53 = vsel %vm4390_vm8, -1e+30, %v12517_v45  ;;  %vm1045_vm8 = vcmp.ge.f32.partialorder %v14519_v61, %v1034_v35 }
 0xa0e   : > { %v4412_v17 = vsel %vm633_vm4, %v4397_v53, -inf  ;;  %v12711_v29 = vsel %vm1045_vm8, %v14519_v61, -1e+30  ;;  %v14522_v53 = vld [vmem:[#allocation19_spill] sm:$0xff]  ;;  %v14531_v61 = vld [vmem:[#allocation6_spill] sm:$0xff] }
 0xa0f   : > { %4413 = vmax.xlane.f32.xlu0 %v4412_v17  ;;  %v4382_v6 = vpop.xlane.xlu0 %4381  ;;  %v1067_v62 = vsel %vm633_vm4, %v12711_v29, -inf }
 0xa10   : > { %vm4391_vm9 = vcmp.ge.f32.partialorder %v12523_v3, %v4382_v6 }
 0xa11   : > { %v4398_v51 = vsel %vm4391_vm9, -1e+30, %v12523_v3 }
 0xa12   : > { %v4415_v50 = vsel %vm633_vm4, %v4398_v51, -inf  ;;  %v14523_v51 = vld [vmem:[#allocation26_spill] sm:$0xff] }
 0xa13   : > { %4416 = vmax.xlane.f32.xlu0 %v4415_v50  ;;  %v4385_v28 = vpop.xlane.xlu0 %4384 }
 0xa14   : > { %vm4392_vm10 = vcmp.ge.f32.partialorder %v12529_v10, %v4385_v28 }
 0xa15   : > { %v4399_v7 = vsel %vm4392_vm10, -1e+30, %v12529_v10  ;;  %v1055_v10 = vsel %vm633_vm4, %v12674_v20, -inf }
 0xa16   : > { %v4418_v4 = vsel %vm652_vm5, %v4399_v7, -inf  ;;  %v14524_v7 = vld [vmem:[#allocation22_spill] sm:$0xff] }
 0xa17   : > { %4419 = vmax.xlane.f32.xlu0 %v4418_v4  ;;  %v5222_v45 = vpop.xlane.xlu0 %5221 }
 0xa18   : > { %vm5241_vm12 = vcmp.ge.f32.partialorder %v12535_v18, %v5222_v45 }
 0xa19   : > { %v5248_v3 = vsel %vm5241_vm12, -1e+30, %v12535_v18 }
 0xa1a   : > { %v5255_v11 = vsel %vm633_vm4, %v5248_v3, -inf }
 0xa1b   : > { %5256 = vmax.xlane.f32.xlu0 %v5255_v11  ;;  %v5225_v59 = vpop.xlane.xlu0 %5224  ;;  %v5240_v46 = vpop.xlane.xlu1 %5239 }
 0xa1c   : > { %vm5242_vm13 = vcmp.ge.f32.partialorder %v12541_v9, %v5225_v59  ;;  %vm5247_vm9 = vcmp.ge.f32.partialorder %v12547_v22, %v5240_v46  ;;  %v14526_v59 = vld [vmem:[#allocation25_spill] sm:$0xff] }
 0xa1d   : > { %v5249_v54 = vsel %vm5242_vm13, -1e+30, %v12541_v9  ;;  %v14518_v9 = vld [vmem:[#allocation15_spill] sm:$0xff]  ;;  %v5254_v57 = vsel %vm5247_vm9, -1e+30, %v12547_v22 }
 0xa1e   : > { %v5258_v18 = vsel %vm633_vm4, %v5249_v54, -inf  ;;  %v5273_v30 = vsel %vm652_vm5, %v5254_v57, -inf  ;;  %v14527_v54 = vld [vmem:[#allocation20_spill] sm:$0xff] }
 0xa1f   : > { %1056 = vmax.xlane.f32.xlu0 %v1055_v10  ;;  %v1028_v19 = vpop.xlane.xlu0 %1027  ;;  %v1040_v21 = vpop.xlane.xlu1 %1039 }
 0xa20   : > { %vm1043_vm15 = vcmp.ge.f32.partialorder %v14517_v34, %v1028_v19  ;;  %vm1047_vm11 = vcmp.ge.f32.partialorder %v14521_v27, %v1040_v21 }
 0xa21   : > { %v12686_v52 = vsel %vm1043_vm15, %v14517_v34, -1e+30  ;;  %v12721_v25 = vsel %vm1047_vm11, %v14521_v27, -1e+30 }
 0xa22   : > { %v1061_v31 = vsel %vm633_vm4, %v12686_v52, -inf  ;;  %v1073_v17 = vsel %vm652_vm5, %v12721_v25, -inf }
 0xa23   : > { %5259 = vmax.xlane.f32.xlu0 %v5258_v18  ;;  %v5231_v12 = vpop.xlane.xlu0 %5230 }
 0xa24   : > { %vm5244_vm3 = vcmp.ge.f32.partialorder %v12561_v60, %v5231_v12 }
 0xa25   : > { %v5251_v33 = vsel %vm5244_vm3, -1e+30, %v12561_v60  ;;  %v5267_v60 = vsel %vm633_vm4, %v5252_v48, -inf }
 0xa26   : > { %v5264_v37 = vsel %vm633_vm4, %v5251_v33, -inf  ;;  %v14530_v33 = vld [vmem:[#allocation12_spill] sm:$0xff] }
 0xa27   : > { %5262 = vmax.xlane.f32.xlu0 %v5261_v24  ;;  %v1031_v13 = vpop.xlane.xlu0 %1030  ;;  %v1834_v8 = vpop.xlane.xlu1 %1833 }
 0xa28   : > { %vm1044_vm6 = vcmp.ge.f32.partialorder %v14518_v9, %v1031_v13  ;;  %vm1851_vm14 = vcmp.ge.f32.partialorder %v14523_v51, %v1834_v8 }
 0xa29   : > { %v12691_v44 = vsel %vm1044_vm6, %v14518_v9, -1e+30  ;;  %v12734_v28 = vsel %vm1851_vm14, %v14523_v51, -1e+30  ;;  %v14529_v9 = vld [vmem:[#allocation14_spill] sm:$0xff]  ;;  %v14535_v51 = vld [vmem:[#allocation28_spill] sm:$0xff] }
 0xa2a   : > { %v1064_v63 = vsel %vm633_vm4, %v12691_v44, -inf  ;;  %v1867_v4 = vsel %vm633_vm4, %v12734_v28, -inf }
 0xa2b   : > { %1062 = vmax.xlane.f32.xlu0 %v1061_v31  ;;  %1065 = vmax.xlane.f32.xlu1 %v1064_v63  ;;  %v5237_v49 = vpop.xlane.xlu0 %5236 }
 0xa2c   : > { %vm5246_vm12 = vcmp.ge.f32.partialorder %v12573_v5, %v5237_v49 }
 0xa2d   : > { %v5253_v1 = vsel %vm5246_vm12, -1e+30, %v12573_v5 }
 0xa2e   : > { %v5270_v22 = vsel %vm633_vm4, %v5253_v1, -inf }
 0xa2f   : > { %5265 = vmax.xlane.f32.xlu0 %v5264_v37  ;;  %v1037_v47 = vpop.xlane.xlu0 %1036  ;;  %v1840_v15 = vpop.xlane.xlu1 %1839 }
 0xa30   : > { %vm1046_vm10 = vcmp.ge.f32.partialorder %v14520_v2, %v1037_v47  ;;  %vm1853_vm3 = vcmp.ge.f32.partialorder %v14525_v36, %v1840_v15 }
 0xa31   : > { %v12705_v56 = vsel %vm1046_vm10, %v14520_v2, -1e+30  ;;  %v12746_v11 = vsel %vm1853_vm3, %v14525_v36, -1e+30  ;;  %v14532_v2 = vld [vmem:[#allocation35_spill] sm:$0xff]  ;;  %v14537_v36 = vld [vmem:[#allocation29_spill] sm:$0xff] }
 0xa32   : > { %v1070_v32 = vsel %vm633_vm4, %v12705_v56, -inf  ;;  %v1873_v35 = vsel %vm633_vm4, %v12746_v11, -inf }
 0xa33   : > { %5268 = vmax.xlane.f32.xlu0 %v5267_v60  ;;  %1071 = vmax.xlane.f32.xlu1 %v1070_v32  ;;  %v1831_v39 = vpop.xlane.xlu0 %1830  ;;  %v1843_v40 = vpop.xlane.xlu1 %1842 }
 0xa34   : > { %vm1850_vm13 = vcmp.ge.f32.partialorder %v14522_v53, %v1831_v39  ;;  %vm1854_vm6 = vcmp.ge.f32.partialorder %v14526_v59, %v1843_v40  ;;  %v14533_v39 = vld [vmem:[#allocation27_spill] sm:$0xff] }
 0xa35   : > { %v12728_v6 = vsel %vm1850_vm13, %v14522_v53, -1e+30  ;;  %v12752_v19 = vsel %vm1854_vm6, %v14526_v59, -1e+30 }
 0xa36   : > { %v1864_v5 = vsel %vm633_vm4, %v12728_v6, -inf  ;;  %v1876_v18 = vsel %vm633_vm4, %v12752_v19, -inf }
 0xa37   : > { %1068 = vmax.xlane.f32.xlu0 %v1067_v62  ;;  %5274 = vmax.xlane.f32.xlu1 %v5273_v30  ;;  %v1846_v50 = vpop.xlane.xlu1 %1845  ;;  %v1837_v26 = vpop.xlane.xlu0 %1836  ;;  %v14534_v62 = vld [vmem:[#allocation38_spill] sm:$0xff] }
 0xa38   : > { %vm1852_vm15 = vcmp.ge.f32.partialorder %v14524_v7, %v1837_v26  ;;  %vm1855_vm7 = vcmp.ge.f32.partialorder %v14527_v54, %v1846_v50  ;;  %v14536_v50 = vld [vmem:[#allocation40_spill] sm:$0xff] }
 0xa39   : > { %v12740_v42 = vsel %vm1852_vm15, %v14524_v7, -1e+30  ;;  %v12758_v12 = vsel %vm1855_vm7, %v14527_v54, -1e+30 }
 0xa3a   : > { %v1870_v3 = vsel %vm633_vm4, %v12740_v42, -inf  ;;  %v1879_v34 = vsel %vm633_vm4, %v12758_v12, -inf }
 0xa3b   : > { %5271 = vmax.xlane.f32.xlu0 %v5270_v22  ;;  %1074 = vmax.xlane.f32.xlu1 %v1073_v17  ;;  %v1849_v45 = vpop.xlane.xlu1 %1848 }
 0xa3c   : > { %vm1856_vm8 = vcmp.ge.f32.partialorder %v14528_v55, %v1849_v45 }
 0xa3d   : > { %v12764_v13 = vsel %vm1856_vm8, %v14528_v55, -1e+30  ;;  %v14539_v55 = vld [vmem:[#allocation30_spill] sm:$0xff] }
 0xa3e   : > { %v1882_v31 = vsel %vm652_vm5, %v12764_v13, -inf }
 0xa3f   : > { %1865 = vmax.xlane.f32.xlu1 %v1864_v5  ;;  %v2692_v10 = vpop.xlane.xlu1 %2691 }
 0xa40   : > { %vm2711_vm9 = vcmp.ge.f32.partialorder %v14529_v9, %v2692_v10 }
 0xa41   : > { %v12772_v49 = vsel %vm2711_vm9, %v14529_v9, -1e+30 }
 0xa42   : > { %v2725_v8 = vsel %vm633_vm4, %v12772_v49, -inf }
 0xa43   : > { %1868 = vmax.xlane.f32.xlu1 %v1867_v4  ;;  %v2695_v46 = vpop.xlane.xlu1 %2694 }
 0xa44   : > { %vm2712_vm10 = vcmp.ge.f32.partialorder %v14530_v33, %v2695_v46 }
 0xa45   : > { %v12778_v48 = vsel %vm2712_vm10, %v14530_v33, -1e+30 }
 0xa46   : > { %v2728_v60 = vsel %vm633_vm4, %v12778_v48, -inf }
 0xa47   : > { %1871 = vmax.xlane.f32.xlu1 %v1870_v3  ;;  %v2698_v21 = vpop.xlane.xlu1 %2697  ;;  %v14538_v3 = vld [vmem:[#allocation42_spill] sm:$0xff] }
 0xa48   : > { %vm2713_vm11 = vcmp.ge.f32.partialorder %v14531_v61, %v2698_v21 }
 0xa49   : > { %v12790_v27 = vsel %vm2713_vm11, %v14531_v61, -1e+30 }
 0xa4a   : > { %v2731_v1 = vsel %vm633_vm4, %v12790_v27, -inf }
 0xa4b   : > { %1874 = vmax.xlane.f32.xlu1 %v1873_v35  ;;  %v2701_v37 = vpop.xlane.xlu1 %2700 }
 0xa4c   : > { %vm2714_vm13 = vcmp.ge.f32.partialorder %v14533_v39, %v2701_v37 }
 0xa4d   : > { %v12802_v17 = vsel %vm2714_vm13, %v14533_v39, -1e+30 }
 0xa4e   : > { %v2734_v5 = vsel %vm633_vm4, %v12802_v17, -inf }
 0xa4f   : > { %1877 = vmax.xlane.f32.xlu1 %v1876_v18  ;;  %v2704_v30 = vpop.xlane.xlu1 %2703 }
 0xa50   : > { %vm2715_vm15 = vcmp.ge.f32.partialorder %v14535_v51, %v2704_v30 }
 0xa51   : > { %v12814_v45 = vsel %vm2715_vm15, %v14535_v51, -1e+30 }
 0xa52   : > { %v2737_v35 = vsel %vm633_vm4, %v12814_v45, -inf }
 0xa53   : > { %1880 = vmax.xlane.f32.xlu1 %v1879_v34  ;;  %v2707_v24 = vpop.xlane.xlu0 %2706  ;;  %v2710_v59 = vpop.xlane.xlu1 %2709  ;;  %v14540_v34 = vld [vmem:[#allocation45_spill] sm:$0xff] }
 0xa54   : > { %vm2716_vm6 = vcmp.ge.f32.partialorder %v14537_v36, %v2707_v24  ;;  %vm2717_vm8 = vcmp.ge.f32.partialorder %v14539_v55, %v2710_v59 }
 0xa55   : > { %v12826_v46 = vsel %vm2716_vm6, %v14537_v36, -1e+30  ;;  %v12838_v33 = vsel %vm2717_vm8, %v14539_v55, -1e+30 }
 0xa56   : > { %v2740_v9 = vsel %vm633_vm4, %v12826_v46, -inf  ;;  %v2743_v61 = vsel %vm652_vm5, %v12838_v33, -inf }
 0xa57   : > { %1883 = vmax.xlane.f32.xlu1 %v1882_v31  ;;  %v12769_v63 = vpop.xlane.xlu0 %3546 }
 0xa5b   : > { %2726 = vmax.xlane.f32.xlu1 %v2725_v8  ;;  %v3553_v47 = vpop.xlane.xlu0 %3552  ;;  %v14541_v8 = vld [vmem:[#allocation32_spill] sm:$0xff]  ;;  %v3550_v37 = vpop.xlane.xlu1 %3549 }
 0xa5c   : > { %vm3568_vm12 = vcmp.ge.f32.partialorder %v14532_v2, %v3553_v47  ;;  %vm3566_vm10 = vcmp.ge.f32.partialorder %v14541_v8, %v12769_v63  ;;  %v14543_v63 = vld [vmem:[#allocation48_spill] sm:$0xff] }
 0xa5d   : > { %v12783_v15 = vsel %vm3568_vm12, %v14532_v2, -1e+30 }
 0xa5e   : > { %v3586_v32 = vsel %vm633_vm4, %v12783_v15, -inf }
 0xa5f   : > { %2729 = vmax.xlane.f32.xlu1 %v2728_v60  ;;  %3587 = vmax.xlane.f32.xlu0 %v3586_v32  ;;  %v3556_v57 = vpop.xlane.xlu0 %3555  ;;  %v12851_v32 = vsel %vm3566_vm10, %v14541_v8, -1e+30 }
 0xa60   : > { %vm3569_vm14 = vcmp.ge.f32.partialorder %v14534_v62, %v3556_v57  ;;  %v14542_v57 = vld [vmem:[#allocation33_spill] sm:$0xff] }
 0xa61   : > { %v12795_v40 = vsel %vm3569_vm14, %v14534_v62, -1e+30  ;;  %vm3567_vm12 = vcmp.ge.f32.partialorder %v14542_v57, %v3550_v37 }
 0xa62   : > { %v3589_v53 = vsel %vm633_vm4, %v12795_v40, -inf }
 0xa63   : > { %2732 = vmax.xlane.f32.xlu1 %v2731_v1  ;;  %3590 = vmax.xlane.f32.xlu0 %v3589_v53  ;;  %v3559_v22 = vpop.xlane.xlu0 %3558  ;;  %v12863_v1 = vsel %vm3567_vm12, %v14542_v57, -1e+30 }
 0xa64   : > { %vm3570_vm3 = vcmp.ge.f32.partialorder %v14536_v50, %v3559_v22  ;;  %v3583_v22 = vsel %vm633_vm4, %v12863_v1, -inf }
 0xa65   : > { %v12807_v26 = vsel %vm3570_vm3, %v14536_v50, -1e+30 }
 0xa66   : > { %v3592_v7 = vsel %vm633_vm4, %v12807_v26, -inf }
 0xa67   : > { %2735 = vmax.xlane.f32.xlu1 %v2734_v5  ;;  %3593 = vmax.xlane.f32.xlu0 %v3592_v7  ;;  %v3562_v4 = vpop.xlane.xlu0 %3561  ;;  %v14544_v5 = vld [vmem:[#allocation50_spill] sm:$0xff] }
 0xa68   : > { %vm3571_vm7 = vcmp.ge.f32.partialorder %v14538_v3, %v3562_v4 }
 0xa69   : > { %v12819_v10 = vsel %vm3571_vm7, %v14538_v3, -1e+30 }
 0xa6a   : > { %v3595_v54 = vsel %vm633_vm4, %v12819_v10, -inf }
 0xa6b   : > { %2738 = vmax.xlane.f32.xlu1 %v2737_v35  ;;  %3596 = vmax.xlane.f32.xlu0 %v3595_v54  ;;  %v3565_v18 = vpop.xlane.xlu0 %3564  ;;  %v14545_v35 = vld [vmem:[#allocation52_spill] sm:$0xff] }
 0xa6c   : > { %vm3572_vm9 = vcmp.ge.f32.partialorder %v14540_v34, %v3565_v18 }
 0xa6d   : > { %v12831_v24 = vsel %vm3572_vm9, %v14540_v34, -1e+30 }
 0xa6e   : > { %v3598_v21 = vsel %vm652_vm5, %v12831_v24, -inf }
 0xa6f   : > { %2741 = vmax.xlane.f32.xlu1 %v2740_v9  ;;  %3599 = vmax.xlane.f32.xlu0 %v3598_v21  ;;  %v4402_v31 = vpop.xlane.xlu0 %4401  ;;  %v14546_v21 = vld [vmem:[#allocation54_spill] sm:$0xff] }
 0xa70   : > { %vm4421_vm11 = vcmp.ge.f32.partialorder %v9665_v16, %v4402_v31 }
 0xa71   : > { %v12844_v47 = vsel %vm4421_vm11, %v9665_v16, -1e+30  ;;  %v3580_v16 = vsel %vm633_vm4, %v12851_v32, -inf }
 0xa72   : > { %v4435_v2 = vsel %vm633_vm4, %v12844_v47, -inf }
 0xa73   : > { %2744 = vmax.xlane.f32.xlu1 %v2743_v61  ;;  %4436 = vmax.xlane.f32.xlu0 %v4435_v2  ;;  %v4405_v60 = vpop.xlane.xlu0 %4404 }
 0xa74   : > { %vm4422_vm13 = vcmp.ge.f32.partialorder %v14543_v63, %v4405_v60 }
 0xa75   : > { %v12856_v39 = vsel %vm4422_vm13, %v14543_v63, -1e+30  ;;  %v14547_v63 = vld [vmem:[#allocation55_spill] sm:$0xff] }
 0xa76   : > { %v4438_v62 = vsel %vm633_vm4, %v12856_v39, -inf }
 0xa77   : > { %3581 = vmax.xlane.f32.xlu1 %v3580_v16  ;;  %4439 = vmax.xlane.f32.xlu0 %v4438_v62  ;;  %v4408_v30 = vpop.xlane.xlu0 %4407  ;;  %v1060_v37 = vpop.xlane.xlu1 %1059 }
 0xa78   : > { %vm4423_vm14 = vcmp.ge.f32.partialorder %v9691_v23, %v4408_v30 }
 0xa79   : > { %v12867_v53 = vsel %vm4423_vm14, %v9691_v23, -1e+30 }
 0xa7a   : > { %v4441_v51 = vsel %vm633_vm4, %v12867_v53, -inf }
 0xa7b   : > { %3584 = vmax.xlane.f32.xlu1 %v3583_v22  ;;  %4442 = vmax.xlane.f32.xlu0 %v4441_v51  ;;  %v4411_v50 = vpop.xlane.xlu0 %4410  ;;  %v14548_v51 = vld [vmem:[#allocation51_spill] sm:$0xff] }
 0xa7c   : > { %vm4424_vm15 = vcmp.ge.f32.partialorder %v14544_v5, %v4411_v50 }
 0xa7d   : > { %v12875_v7 = vsel %vm4424_vm15, %v14544_v5, -1e+30  ;;  %vm1257_vm15 = vcmask 130048  }
 0xa7e   : > { %v4444_v4 = vsel %vm633_vm4, %v12875_v7, -inf }
 0xa7f   : > { %4445 = vmax.xlane.f32.xlu0 %v4444_v4 }
 0xa98   : > { %v4414_v23 = vpop.xlane.xlu0 %4413 }
 0xa99   : > { %vm4425_vm3 = vcmp.ge.f32.partialorder %v9723_v38, %v4414_v23 }
 0xa9a   : > { %v12881_v36 = vsel %vm4425_vm3, %v9723_v38, -1e+30  ;;  %vm1264_vm3 = vcmask 122880  }
 0xa9b   : > { %v4447_v3 = vsel %vm633_vm4, %v12881_v36, -inf }
 0xa9c   : > { %4448 = vmax.xlane.f32.xlu0 %v4447_v3  ;;  %v4417_v59 = vpop.xlane.xlu0 %4416 }
 0xa9d   : > { %vm4426_vm6 = vcmp.ge.f32.partialorder %v14545_v35, %v4417_v59 }
 0xa9e   : > { %v12887_v54 = vsel %vm4426_vm6, %v14545_v35, -1e+30  ;;  %v14549_v35 = vld [vmem:[#allocation60_spill] sm:$0xff]  ;;  %vm3828_vm6 = vcmask 523648  }
 0xa9f   : > { %v4450_v18 = vsel %vm633_vm4, %v12887_v54, -inf }
 0xaa0   : > { %4451 = vmax.xlane.f32.xlu1 %v4450_v18  ;;  %v4420_v55 = vpop.xlane.xlu0 %4419 }
 0xaa1   : > { %vm4427_vm7 = vcmp.ge.f32.partialorder %v9753_v43, %v4420_v55 }
 0xaa2   : > { %v12893_v38 = vsel %vm4427_vm7, %v9753_v43, -1e+30  ;;  %v1077_v43 = vsub.f32 %v12651_v41, %v1060_v37  ;;  %vm4683_vm7 = vcmask 654848  }
 0xaa3   : > { %v4453_v34 = vsel %vm652_vm5, %v12893_v38, -inf }
 0xaa4   : > { %4454 = vmax.xlane.f32.xlu0 %v4453_v34  ;;  %v5257_v9 = vpop.xlane.xlu0 %5256  ;;  %v1085_v62 = vmul.f32 1.442695, %v1077_v43 }
 0xaa5   : > { %vm5276_vm8 = vcmp.ge.f32.partialorder %v14546_v21, %v5257_v9 }
 0xaa6   : > { %v12899_v31 = vsel %vm5276_vm8, %v14546_v21, -1e+30  ;;  %vm5538_vm8 = vcmask 786048  }
 0xaa7   : > { %v5290_v8 = vsel %vm633_vm4, %v12899_v31, -inf }
 0xaa8   : > { %5291 = vmax.xlane.f32.xlu0 %v5290_v8  ;;  %v1057_v61 = vpop.xlane.xlu0 %1056  ;;  %v14550_v8 = vld [vmem:[#allocation53_spill] sm:$0xff] }
 0xaa9   : > { %v1076_v2 = vsub.f32 %v12674_v20, %v1057_v61 }
 0xaab   : > { %v1083_v60 = vmul.f32 1.442695, %v1076_v2 }
 0xaac   : > { %v5260_v57 = vpop.xlane.xlu0 %5259 }
 0xaad   : > { %8277 = vpow2.f32 %v1083_v60  ;;  %vm5277_vm9 = vcmp.ge.f32.partialorder %v14547_v63, %v5260_v57 }
 0xaae   : > { %v12907_v16 = vsel %vm5277_vm9, %v14547_v63, -1e+30  ;;  %8279 = vpow2.f32 %v1085_v62  ;;  %v14551_v63 = vld [vmem:[#allocation61_spill] sm:$0xff]  ;;  %vm2125_vm9 = vcmask 254080  }
 0xaaf   : > { %v5293_v30 = vsel %vm633_vm4, %v12907_v16, -inf }
 0xab0   : > { %5294 = vmax.xlane.f32.xlu0 %v5293_v30  ;;  %v5263_v22 = vpop.xlane.xlu0 %5262 }
 0xab1   : > { %vm5278_vm10 = vcmp.ge.f32.partialorder %v14548_v51, %v5263_v22 }
 0xab2   : > { %v12913_v20 = vsel %vm5278_vm10, %v14548_v51, -1e+30  ;;  %vm2980_vm10 = vcmask 385280  }
 0xab3   : > { %v5296_v41 = vsel %vm633_vm4, %v12913_v20, -inf }
 0xab4   : > { %v1066_v50 = vpop.xlane.xlu1 %1065  ;;  %5297 = vmax.xlane.f32.xlu0 %v5296_v41  ;;  %v1063_v5 = vpop.xlane.xlu0 %1062 }
 0xab5   : > { %v1078_v4 = vsub.f32 %v12686_v52, %v1063_v5  ;;  %v1079_v23 = vsub.f32 %v12691_v44, %v1066_v50 }
 0xab7   : > { %v1087_v3 = vmul.f32 1.442695, %v1078_v4  ;;  %v1089_v34 = vmul.f32 1.442695, %v1079_v23  ;;  %v14552_v4 = vld [vmem:[#allocation63_spill] sm:$0xff] }
 0xab8   : > { %v5266_v59 = vpop.xlane.xlu0 %5265 }
 0xab9   : > { %vm5279_vm11 = vcmp.ge.f32.partialorder %v14549_v35, %v5266_v59  ;;  %8281 = vpow2.f32 %v1087_v3 }
 0xaba   : > { %v12920_v18 = vpop.eup %8277  ;;  %v12923_v55 = vsel %vm5279_vm11, %v14549_v35, -1e+30  ;;  %8283 = vpow2.f32 %v1089_v34  ;;  %vm3835_vm11 = vcmask 516480  }
 0xabb   : > { %v1097_v9 = vsel %vm633_vm4, %v12920_v18, 0.0  ;;  %v5299_v21 = vsel %vm633_vm4, %v12923_v55, -inf  ;;  %v12936_v43 = vpop.eup %8279 }
 0xabc   : > { %v1072_v52 = vpop.xlane.xlu1 %1071  ;;  %1098 = vadd.xlane.f32.xlu0 %v1097_v9  ;;  %5300 = vmax.xlane.f32.xlu1 %v5299_v21  ;;  %v5269_v44 = vpop.xlane.xlu0 %5268  ;;  %v1100_v51 = vsel %vm633_vm4, %v12936_v43, 0.0 }
 0xabd   : > { %vm5280_vm12 = vcmp.ge.f32.partialorder %v14550_v8, %v5269_v44  ;;  %v1081_v61 = vsub.f32 %v12705_v56, %v1072_v52 }
 0xabe   : > { %v12931_v37 = vsel %vm5280_vm12, %v14550_v8, -1e+30  ;;  %vm4690_vm12 = vcmask 647680  }
 0xabf   : > { %v5302_v2 = vsel %vm633_vm4, %v12931_v37, -inf  ;;  %v1093_v30 = vmul.f32 1.442695, %v1081_v61 }
 0xac0   : > { %v5275_v60 = vpop.xlane.xlu1 %5274  ;;  %5303 = vmax.xlane.f32.xlu1 %v5302_v2  ;;  %v1069_v57 = vpop.xlane.xlu0 %1068 }
 0xac1   : > { %vm5282_vm13 = vcmp.ge.f32.partialorder %v14551_v63, %v5275_v60  ;;  %v1080_v62 = vsub.f32 %v12711_v29, %v1069_v57 }
 0xac2   : > { %v12943_v50 = vsel %vm5282_vm13, %v14551_v63, -1e+30  ;;  %vm6554_vm13 = vcmask 1045504  }
 0xac3   : > { %v1091_v22 = vmul.f32 1.442695, %v1080_v62  ;;  %v5308_v3 = vsel %vm652_vm5, %v12943_v50, -inf }
 0xac4   : > { %v1075_v41 = vpop.xlane.xlu1 %1074  ;;  %1101 = vadd.xlane.f32.xlu1 %v1100_v51  ;;  %v5272_v56 = vpop.xlane.xlu0 %5271 }
 0xac5   : > { %8285 = vpow2.f32 %v1091_v22  ;;  %v1082_v5 = vsub.f32 %v12721_v25, %v1075_v41  ;;  %vm5281_vm14 = vcmp.ge.f32.partialorder %v14552_v4, %v5272_v56 }
 0xac6   : > { %v12948_v23 = vsel %vm5281_vm14, %v14552_v4, -1e+30  ;;  %8287 = vpow2.f32 %v1093_v30  ;;  %v12954_v35 = vpop.eup %8281  ;;  %vm6408_vm14 = vcmask 1048448  }
 0xac7   : > { %v1095_v29 = vmul.f32 1.442695, %v1082_v5  ;;  %v5305_v59 = vsel %vm633_vm4, %v12948_v23, -inf  ;;  %v1103_v21 = vsel %vm633_vm4, %v12954_v35, 0.0  ;;  %v12959_v52 = vpop.eup %8283 }
 0xac8   : > { %v1866_v34 = vpop.xlane.xlu1 %1865  ;;  %5309 = vmax.xlane.f32.xlu1 %v5308_v3  ;;  %5306 = vmax.xlane.f32.xlu0 %v5305_v59  ;;  %v1106_v2 = vsel %vm633_vm4, %v12959_v52, 0.0 }
 0xac9   : > { %v1885_v25 = vsub.f32 %v12728_v6, %v1866_v34  ;;  %8289 = vpow2.f32 %v1095_v29 }
 0xacb   : > { %v1892_v9 = vmul.f32 1.442695, %v1885_v25 }
 0xacc   : > { %v1869_v44 = vpop.xlane.xlu1 %1868  ;;  %1104 = vadd.xlane.f32.xlu1 %v1103_v21 }
 0xacd   : > { %v1886_v8 = vsub.f32 %v12734_v28, %v1869_v44  ;;  %8291 = vpow2.f32 %v1892_v9 }
 0xacf   : > { %v1894_v61 = vmul.f32 1.442695, %v1886_v8 }
 0xad0   : > { %v1872_v60 = vpop.xlane.xlu1 %1871  ;;  %1107 = vadd.xlane.f32.xlu1 %v1106_v2 }
 0xad1   : > { %v1887_v6 = vsub.f32 %v12740_v42, %v1872_v60  ;;  %8293 = vpow2.f32 %v1894_v61 }
 0xad2   : > { %v12965_v57 = vpop.eup %8285 }
 0xad3   : > { %v1896_v63 = vmul.f32 1.442695, %v1887_v6  ;;  %v1109_v62 = vsel %vm633_vm4, %v12965_v57, 0.0  ;;  %v12969_v30 = vpop.eup %8287 }
 0xad4   : > { %v1875_v22 = vpop.xlane.xlu1 %1874  ;;  %1110 = vadd.xlane.f32.xlu1 %v1109_v62  ;;  %v1112_v41 = vsel %vm633_vm4, %v12969_v30, 0.0 }
 0xad5   : > { %v1888_v28 = vsub.f32 %v12746_v11, %v1875_v22  ;;  %8295 = vpow2.f32 %v1896_v63 }
 0xad6   : > { %v12974_v56 = vpop.eup %8289 }
 0xad7   : > { %v1898_v51 = vmul.f32 1.442695, %v1888_v28  ;;  %v1115_v29 = vsel %vm652_vm5, %v12974_v56, 0.0 }
 0xad8   : > { %v1878_v42 = vpop.xlane.xlu1 %1877  ;;  %1113 = vadd.xlane.f32.xlu1 %v1112_v41 }
 0xad9   : > { %v1889_v5 = vsub.f32 %v12752_v19, %v1878_v42  ;;  %8297 = vpow2.f32 %v1898_v51 }
 0xada   : > { %v12979_v3 = vpop.eup %8291 }
 0xadb   : > { %v1900_v4 = vmul.f32 1.442695, %v1889_v5  ;;  %v1906_v25 = vsel %vm633_vm4, %v12979_v3, 0.0 }
 0xadc   : > { %v1881_v59 = vpop.xlane.xlu1 %1880  ;;  %1116 = vadd.xlane.f32.xlu1 %v1115_v29 }
 0xadd   : > { %v1890_v11 = vsub.f32 %v12758_v12, %v1881_v59  ;;  %8299 = vpow2.f32 %v1900_v4 }
 0xade   : > { %v12984_v9 = vpop.eup %8293 }
 0xadf   : > { %v1902_v34 = vmul.f32 1.442695, %v1890_v11  ;;  %v1909_v8 = vsel %vm633_vm4, %v12984_v9, 0.0 }
 0xae0   : > { %v1884_v21 = vpop.xlane.xlu1 %1883  ;;  %1907 = vadd.xlane.f32.xlu1 %v1906_v25 }
 0xae1   : > { %v1891_v19 = vsub.f32 %v12764_v13, %v1884_v21  ;;  %8301 = vpow2.f32 %v1902_v34 }
 0xae2   : > { %v12989_v61 = vpop.eup %8295 }
 0xae3   : > { %v1904_v44 = vmul.f32 1.442695, %v1891_v19  ;;  %v1912_v6 = vsel %vm633_vm4, %v12989_v61, 0.0 }
 0xae4   : > { %v2727_v2 = vpop.xlane.xlu1 %2726  ;;  %1910 = vadd.xlane.f32.xlu1 %v1909_v8 }
 0xae5   : > { %v2746_v12 = vsub.f32 %v12772_v49, %v2727_v2  ;;  %8303 = vpow2.f32 %v1904_v44 }
 0xae6   : > { %v12994_v63 = vpop.eup %8297 }
 0xae7   : > { %v2753_v60 = vmul.f32 1.442695, %v2746_v12  ;;  %v1915_v51 = vsel %vm633_vm4, %v12994_v63, 0.0 }
 0xae8   : > { %v2730_v62 = vpop.xlane.xlu1 %2729  ;;  %1913 = vadd.xlane.f32.xlu1 %v1912_v6  ;;  %v12996_v13 = vpop.xlane.xlu0 %3587 }
 0xae9   : > { %v2747_v22 = vsub.f32 %v12778_v48, %v2730_v62  ;;  %8305 = vpow2.f32 %v2753_v60 }
 0xaea   : > { %v13001_v41 = vpop.eup %8299 }
 0xaeb   : > { %v2755_v28 = vmul.f32 1.442695, %v2747_v22  ;;  %v1918_v29 = vsel %vm633_vm4, %v13001_v41, 0.0 }
 0xaec   : > { %v2733_v49 = vpop.xlane.xlu1 %2732  ;;  %1916 = vadd.xlane.f32.xlu1 %v1915_v51  ;;  %v13003_v42 = vpop.xlane.xlu0 %3590 }
 0xaed   : > { %8307 = vpow2.f32 %v2755_v28  ;;  %v2748_v5 = vsub.f32 %v12790_v27, %v2733_v49 }
 0xaee   : > { %v13008_v59 = vpop.eup %8301 }
 0xaef   : > { %v2757_v4 = vmul.f32 1.442695, %v2748_v5  ;;  %v1921_v21 = vsel %vm633_vm4, %v13008_v59, 0.0 }
 0xaf0   : > { %v2736_v48 = vpop.xlane.xlu1 %2735  ;;  %1919 = vadd.xlane.f32.xlu1 %v1918_v29  ;;  %v13010_v11 = vpop.xlane.xlu0 %3593 }
 0xaf1   : > { %8309 = vpow2.f32 %v2757_v4  ;;  %v2749_v34 = vsub.f32 %v12802_v17, %v2736_v48 }
 0xaf2   : > { %v13015_v19 = vpop.eup %8303 }
 0xaf3   : > { %v2759_v25 = vmul.f32 1.442695, %v2749_v34  ;;  %v1924_v12 = vsel %vm652_vm5, %v13015_v19, 0.0 }
 0xaf4   : > { %v2739_v27 = vpop.xlane.xlu1 %2738  ;;  %1922 = vadd.xlane.f32.xlu1 %v1921_v21  ;;  %v13017_v44 = vpop.xlane.xlu0 %3596 }
 0xaf5   : > { %8311 = vpow2.f32 %v2759_v25  ;;  %v2750_v8 = vsub.f32 %v12814_v45, %v2739_v27 }
 0xaf6   : > { %v13022_v60 = vpop.eup %8305 }
 0xaf7   : > { %v2761_v2 = vmul.f32 1.442695, %v2750_v8  ;;  %v2767_v51 = vsel %vm633_vm4, %v13022_v60, 0.0 }
 0xaf8   : > { %v2742_v17 = vpop.xlane.xlu1 %2741  ;;  %1925 = vadd.xlane.f32.xlu1 %v1924_v12  ;;  %v13024_v6 = vpop.xlane.xlu0 %3599 }
 0xaf9   : > { %8313 = vpow2.f32 %v2761_v2  ;;  %v2751_v62 = vsub.f32 %v12826_v46, %v2742_v17  ;;  %v3603_v2 = vsub.f32 %v12783_v15, %v12996_v13 }
 0xafa   : > { %v13027_v22 = vpop.eup %8307 }
 0xafb   : > { %v2763_v28 = vmul.f32 1.442695, %v2751_v62  ;;  %v2770_v45 = vsel %vm633_vm4, %v13027_v22, 0.0 }
 0xafc   : > { %v2745_v49 = vpop.xlane.xlu1 %2744  ;;  %2768 = vadd.xlane.f32.xlu1 %v2767_v51  ;;  %2771 = vadd.xlane.f32.xlu0 %v2770_v45  ;;  %v13033_v5 = vpop.xlane.xlu0 %4436 }
 0xafd   : > { %8315 = vpow2.f32 %v2763_v28  ;;  %v2752_v4 = vsub.f32 %v12838_v33, %v2745_v49  ;;  %v3604_v49 = vsub.f32 %v12795_v40, %v13003_v42 }
 0xafe   : > { %v13036_v29 = vpop.eup %8309 }
 0xaff   : > { %v2765_v46 = vmul.f32 1.442695, %v2752_v4  ;;  %v2773_v48 = vsel %vm633_vm4, %v13036_v29, 0.0 }
 0xb00   : > { %v3582_v34 = vpop.xlane.xlu1 %3581  ;;  %2774 = vadd.xlane.f32.xlu0 %v2773_v48  ;;  %v4440_v25 = vpop.xlane.xlu0 %4439 }
 0xb01   : > { %8317 = vpow2.f32 %v2765_v46  ;;  %v3601_v21 = vsub.f32 %v12851_v32, %v3582_v34  ;;  %v4457_v27 = vsub.f32 %v12856_v39, %v4440_v25  ;;  %v3612_v39 = vmul.f32 1.442695, %v3603_v2 }
 0xb02   : > { %v13042_v8 = vpop.eup %8311  ;;  %v3605_v34 = vsub.f32 %v12807_v26, %v13010_v11  ;;  %v3607_v11 = vsub.f32 %v12831_v24, %v13024_v6 }
 0xb03   : > { %v3608_v33 = vmul.f32 1.442695, %v3601_v21  ;;  %v4465_v12 = vmul.f32 1.442695, %v4457_v27  ;;  %v2776_v17 = vsel %vm633_vm4, %v13042_v8, 0.0  ;;  %v3606_v21 = vsub.f32 %v12819_v10, %v13017_v44 }
 0xb04   : > { %v3585_v62 = vpop.xlane.xlu1 %3584  ;;  %2777 = vadd.xlane.f32.xlu0 %v2776_v17  ;;  %v4443_v28 = vpop.xlane.xlu0 %4442  ;;  %v3620_v17 = vmul.f32 1.442695, %v3607_v11 }
 0xb05   : > { %8319 = vpow2.f32 %v3608_v33  ;;  %v3602_v51 = vsub.f32 %v12863_v1, %v3585_v62  ;;  %v4458_v32 = vsub.f32 %v12867_v53, %v4443_v28  ;;  %v3614_v53 = vmul.f32 1.442695, %v3604_v49 }
 0xb06   : > { %v13050_v45 = vpop.eup %8313  ;;  %8321 = vpow2.f32 %v4465_v12  ;;  %v3618_v26 = vmul.f32 1.442695, %v3606_v21  ;;  %v4456_v62 = vsub.f32 %v12844_v47, %v13033_v5 }
 0xb07   : > { %v3610_v15 = vmul.f32 1.442695, %v3602_v51  ;;  %v4467_v13 = vmul.f32 1.442695, %v4458_v32  ;;  %v2779_v4 = vsel %vm633_vm4, %v13050_v45, 0.0 }
 0xb08   : > { %2780 = vadd.xlane.f32.xlu0 %v2779_v4  ;;  %v4446_v46 = vpop.xlane.xlu0 %4445  ;;  %v4463_v32 = vmul.f32 1.442695, %v4456_v62 }
 0xb09   : > { %8323 = vpow2.f32 %v3610_v15  ;;  %v4459_v48 = vsub.f32 %v12875_v7, %v4446_v46  ;;  %v3616_v7 = vmul.f32 1.442695, %v3605_v34 }
 0xb0a   : > { %v13057_v1 = vpop.eup %8315  ;;  %8325 = vpow2.f32 %v3612_v39 }
 0xb0b   : > { %8327 = vpow2.f32 %v4467_v13  ;;  %v4469_v40 = vmul.f32 1.442695, %v4459_v48  ;;  %v2782_v42 = vsel %vm633_vm4, %v13057_v1, 0.0 }
 0xb0c   : > { %2783 = vadd.xlane.f32.xlu0 %v2782_v42  ;;  %8329 = vpow2.f32 %v3614_v53 }
 0xb0d   : > { %8331 = vpow2.f32 %v4469_v40 }
 0xb0e   : > { %v13063_v25 = vpop.eup %8317  ;;  %8333 = vpow2.f32 %v3616_v7 }
 0xb0f   : > { %v2785_v27 = vsel %vm652_vm5, %v13063_v25, 0.0  ;;  %8335 = vpow2.f32 %v3618_v26 }
 0xb10   : > { %2786 = vadd.xlane.f32.xlu0 %v2785_v27  ;;  %8337 = vpow2.f32 %v3620_v17 }
 0xb11   : > { %8339 = vpow2.f32 %v4463_v32 }
 0xb12   : > { %v13069_v2 = vpop.eup %8319 }
 0xb13   : > { %v3622_v33 = vsel %vm633_vm4, %v13069_v2, 0.0  ;;  %v13075_v12 = vpop.eup %8321 }
 0xb14   : > { %3623 = vadd.xlane.f32.xlu0 %v3622_v33  ;;  %v4480_v24 = vsel %vm633_vm4, %v13075_v12, 0.0 }
 0xb16   : > { %v13077_v10 = vpop.eup %8323 }
 0xb17   : > { %v13079_v44 = vpop.eup %8325  ;;  %v3625_v28 = vsel %vm633_vm4, %v13077_v10, 0.0 }
 0xb18   : > { %v13087_v6 = vpop.eup %8327  ;;  %3626 = vadd.xlane.f32.xlu1 %v3625_v28  ;;  %4481 = vadd.xlane.f32.xlu0 %v4480_v24  ;;  %v3628_v39 = vsel %vm633_vm4, %v13079_v44, 0.0 }
 0xb19   : > { %v13089_v51 = vpop.eup %8329  ;;  %v4483_v47 = vsel %vm633_vm4, %v13087_v6, 0.0 }
 0xb1a   : > { %v13095_v5 = vpop.eup %8331  ;;  %v3631_v49 = vsel %vm633_vm4, %v13089_v51, 0.0 }
 0xb1b   : > { %v4486_v15 = vsel %vm633_vm4, %v13095_v5, 0.0  ;;  %v13101_v13 = vpop.eup %8333 }
 0xb1c   : > { %3629 = vadd.xlane.f32.xlu1 %v3628_v39  ;;  %4484 = vadd.xlane.f32.xlu0 %v4483_v47  ;;  %v13103_v4 = vpop.eup %8335  ;;  %v3634_v46 = vsel %vm633_vm4, %v13101_v13, 0.0 }
 0xb1d   : > { %v3637_v34 = vsel %vm633_vm4, %v13103_v4, 0.0  ;;  %v13110_v40 = vpop.eup %8337 }
 0xb1e   : > { %v3640_v27 = vsel %vm652_vm5, %v13110_v40, 0.0  ;;  %v13115_v26 = vpop.eup %8339 }
 0xb1f   : > { %v4477_v17 = vsel %vm633_vm4, %v13115_v26, 0.0 }
 0xb20   : > { %3632 = vadd.xlane.f32.xlu1 %v3631_v49  ;;  %4487 = vadd.xlane.f32.xlu0 %v4486_v15 }
 0xb24   : > { %3635 = vadd.xlane.f32.xlu1 %v3634_v46 }
 0xb25   : > { %v4449_v48 = vpop.xlane.xlu0 %4448 }
 0xb26   : > { %v4460_v53 = vsub.f32 %v12881_v36, %v4449_v48 }
 0xb28   : > { %v4471_v42 = vmul.f32 1.442695, %v4460_v53  ;;  %3638 = vadd.xlane.f32.xlu1 %v3637_v34 }
 0xb29   : > { %v4452_v21 = vpop.xlane.xlu1 %4451 }
 0xb2a   : > { %8341 = vpow2.f32 %v4471_v42  ;;  %v4461_v7 = vsub.f32 %v12887_v54, %v4452_v21 }
 0xb2c   : > { %v4473_v11 = vmul.f32 1.442695, %v4461_v7  ;;  %3641 = vadd.xlane.f32.xlu1 %v3640_v27 }
 0xb2d   : > { %v4455_v33 = vpop.xlane.xlu0 %4454 }
 0xb2e   : > { %8343 = vpow2.f32 %v4473_v11  ;;  %v4462_v36 = vsub.f32 %v12893_v38, %v4455_v33 }
 0xb30   : > { %v4475_v62 = vmul.f32 1.442695, %v4462_v36  ;;  %4478 = vadd.xlane.f32.xlu1 %v4477_v17 }
 0xb31   : > { %v13120_v28 = vpop.xlane.xlu0 %5291 }
 0xb32   : > { %8345 = vpow2.f32 %v4475_v62 }
 0xb37   : > { %v13122_v54 = vpop.eup %8341 }
 0xb38   : > { %v4489_v24 = vsel %vm633_vm4, %v13122_v54, 0.0 }
 0xb39   : > { %4490 = vadd.xlane.f32.xlu0 %v4489_v24  ;;  %v5295_v32 = vpop.xlane.xlu0 %5294  ;;  %v14553_v24 = vld [vmem:[#allocation5_spill] sm:$0xff] }
 0xb3a   : > { %v5312_v39 = vsub.f32 %v12907_v16, %v5295_v32 }
 0xb3b   : > { %v13127_v47 = vpop.eup %8343 }
 0xb3c   : > { %v5320_v38 = vmul.f32 1.442695, %v5312_v39  ;;  %v4492_v49 = vsel %vm633_vm4, %v13127_v47, 0.0 }
 0xb3d   : > { %4493 = vadd.xlane.f32.xlu0 %v4492_v49  ;;  %v5298_v15 = vpop.xlane.xlu0 %5297  ;;  %v14554_v49 = vld [vmem:[#allocation36_spill] sm:$0xff] }
 0xb3e   : > { %8347 = vpow2.f32 %v5320_v38  ;;  %v5313_v46 = vsub.f32 %v12913_v20, %v5298_v15  ;;  %v14555_v15 = vld [vmem:[#allocation4_spill] sm:$0xff] }
 0xb3f   : > { %v13132_v48 = vpop.eup %8345 }
 0xb40   : > { %v5322_v53 = vmul.f32 1.442695, %v5313_v46  ;;  %v4495_v34 = vsel %vm652_vm5, %v13132_v48, 0.0  ;;  %v13157_v46 = vld [vmem:[#allocation2] sm:$0xff] }
 0xb41   : > { %4496 = vadd.xlane.f32.xlu1 %v4495_v34 }
 0xb42   : > { %8349 = vpow2.f32 %v5322_v53 }
 0xb45   : > { %v5301_v16 = vpop.xlane.xlu1 %5300  ;;  %v1099_v42 = vpop.xlane.xlu0 %1098 }
 0xb46   : > { %v5314_v21 = vsub.f32 %v12923_v55, %v5301_v16  ;;  %8351 = vrcp.f32 %v1099_v42  ;;  %v14557_v16 = vld [vmem:[#allocation39_spill] sm:$0xff] }
 0xb48   : > { %v5324_v7 = vmul.f32 1.442695, %v5314_v21  ;;  %v5311_v21 = vsub.f32 %v12899_v31, %v13120_v28  ;;  %v14560_v28 = vld [vmem:[#allocation46_spill] sm:$0xff] }
 0xb49   : > { %v5304_v27 = vpop.xlane.xlu1 %5303 }
 0xb4a   : > { %8353 = vpow2.f32 %v5324_v7  ;;  %v14558_v7 = vld [vmem:[#allocation43_spill] sm:$0xff] }
 0xb4b   : > { %v13137_v11 = vpop.eup %8347 }
 0xb4c   : > { %v5335_v20 = vsel %vm633_vm4, %v13137_v11, 0.0 }
 0xb4d   : > { %v1102_v33 = vpop.xlane.xlu1 %1101  ;;  %5336 = vadd.xlane.f32.xlu1 %v5335_v20 }
 0xb4e   : > { %8355 = vrcp.f32 %v1102_v33 }
 0xb4f   : > { %v13141_v36 = vpop.eup %8349 }
 0xb50   : > { %v5338_v17 = vsel %vm633_vm4, %v13141_v36, 0.0 }
 0xb51   : > { %v13145_v62 = vpop.xlane.xlu1 %5309  ;;  %5339 = vadd.xlane.f32.xlu1 %v5338_v17  ;;  %v14559_v17 = vld [vmem:[#allocation34_spill] sm:$0xff] }
 0xb53   : > { %v8352_v55 = vpop.eup %8351  ;;  %4514 = vrot.lane.b32.xlu0 %v14553_v24, %s8515_s11 }
 0xb54   : > { %v1119_v32 = vmul.f32 %v8352_v55, %v12920_v18  ;;  %v14556_v18 = vld [vmem:[#allocation31_spill] sm:$0xff]  ;;  %v5318_v55 = vmul.f32 1.442695, %v5311_v21 }
 0xb55   : > { %v1105_v39 = vpop.xlane.xlu1 %1104 }
 0xb56   : > { %7656 = vmatmul.mubr.msk.f32.vlgmr.msra.gmra.mxu0 %vm633_vm4, %v1119_v32  ;;  %8357 = vrcp.f32 %v1105_v39  ;;  %v5315_v32 = vsub.f32 %v12931_v37, %v5304_v27 }
 0xb57   : > { %v13151_v38 = vpop.eup %8353  ;;  %7712 = vmatpush3.msk.msra.mxu0 %vm1153_vm1, %v14554_v49  ;;  %4512 = vrot.lane.b32.xlu0 %v14555_v15, %s8515_s11 }
 0xb58   : > { %7713 = vmatprep.subr.mxu0 %v13157_v46  ;;  %v5341_v53 = vsel %vm633_vm4, %v13151_v38, 0.0  ;;  %7658 = vmatprep.mubr.msk.f32.mxu0 %vm8527_vm2, %v13157_v46  ;;  %v5326_v49 = vmul.f32 1.442695, %v5315_v32 }
 0xb59   : > { %7714 = vmatpush3.msra.mxu0 %v14556_v18  ;;  %v1108_v34 = vpop.xlane.xlu1 %1107  ;;  %5342 = vadd.xlane.f32.xlu1 %v5341_v53 }
 0xb5a   : > { %8359 = vrcp.f32 %v1108_v34  ;;  %7715 = vmatprep.subr.mxu0 %v13157_v46 }
 0xb5b   : > { %7716 = vmatpush3.msra.mxu0 %v14557_v16  ;;  %v8356_v42 = vpop.eup %8355  ;;  %v14562_v16 = vld [vmem:[#allocation10_spill] sm:$0xff] }
 0xb5c   : > { %7717 = vmatprep.subr.mxu0 %v13157_v46  ;;  %v1121_v33 = vmul.f32 %v8356_v42, %v12936_v43  ;;  %v14561_v43 = vld [vmem:[#allocation37_spill] sm:$0xff] }
 0xb5d   : > { %7718 = vmatpush3.msra.mxu0 %v14558_v7  ;;  %v1111_v20 = vpop.xlane.xlu1 %1110 }
 0xb5e   : > { %8361 = vrcp.f32 %v1111_v20  ;;  %7719 = vmatprep.subr.mxu0 %v13157_v46  ;;  %7659 = vmatmul.mubr.msk.f32.gmra.mxu0 %vm633_vm4, %v1121_v33 }
 0xb5f   : > { %7720 = vmatpush3.msra.mxu0 %v14559_v17  ;;  %7661 = vmatprep.mubr.msk.f32.mxu0 %vm8527_vm2, %v13157_v46 }
 0xb60   : > { %7721 = vmatprep.subr.mxu0 %v13157_v46 }
 0xb61   : > { %v1114_v31 = vpop.xlane.xlu1 %1113  ;;  %7722 = vmatpush3.msra.mxu0 %v14560_v28  ;;  %v5307_v28 = vpop.xlane.xlu0 %5306 }
 0xb62   : > { %8363 = vrcp.f32 %v1114_v31  ;;  %7723 = vmatprep.subr.mxu0 %v13157_v46 }
 0xb63   : > { %7724 = vmatpush3.msra.mxu0 %v14561_v43  ;;  %v8358_v39 = vpop.eup %8357  ;;  %8365 = vpow2.f32 %v5318_v55 }
 0xb64   : > { %7781 = vmatprep.subr.mxu0 %v13157_v46  ;;  %v1123_v18 = vmul.f32 %v8358_v39, %v12954_v35 }
 0xb65   : > { %v1117_v53 = vpop.xlane.xlu1 %1116 }
 0xb66   : > { %8367 = vrcp.f32 %v1117_v53  ;;  %7662 = vmatmul.mubr.msk.f32.gmra.mxu0 %vm633_vm4, %v1123_v18 }
 0xb67   : > { %v8360_v37 = vpop.eup %8359  ;;  %8369 = vpow2.f32 %v5326_v49  ;;  %7664 = vmatprep.mubr.msk.f32.mxu0 %vm8527_vm2, %v13157_v46  ;;  %v5316_v49 = vsub.f32 %v12948_v23, %v5307_v28 }
 0xb68   : > { %v1125_v27 = vmul.f32 %v8360_v37, %v12959_v52  ;;  %v14563_v52 = vld [vmem:[#allocation8_spill] sm:$0xff] }
 0xb69   : > { %v1908_v34 = vpop.xlane.xlu1 %1907 }
 0xb6a   : > { %8371 = vrcp.f32 %v1908_v34  ;;  %5379 = vrot.lane.b32.xlu1 %v14562_v16, %s8516_s12  ;;  %7665 = vmatmul.mubr.msk.f32.gmra.mxu0 %vm633_vm4, %v1125_v27  ;;  %v5328_v27 = vmul.f32 1.442695, %v5316_v49 }
 0xb6b   : > { %v8362_v42 = vpop.eup %8361  ;;  %7667 = vmatprep.mubr.msk.f32.mxu0 %vm8527_vm2, %v13157_v46 }
 0xb6c   : > { %v1127_v21 = vmul.f32 %v8362_v42, %v12965_v57  ;;  %v14565_v42 = vld [vmem:[#allocation49_spill] sm:$0xff] }
 0xb6d   : > { %v1911_v35 = vpop.xlane.xlu1 %1910 }
 0xb6e   : > { %8373 = vrcp.f32 %v1911_v35  ;;  %5375 = vrot.lane.b32.xlu1 %v14563_v52, %s8516_s12  ;;  %7668 = vmatmul.mubr.msk.f32.gmra.mxu0 %vm633_vm4, %v1127_v21  ;;  %v14566_v21 = vld [vmem:[#allocation44_spill] sm:$0xff] }
 0xb6f   : > { %v8364_v7 = vpop.eup %8363  ;;  %7670 = vmatprep.mubr.msk.f32.mxu0 %vm8527_vm2, %v13157_v46 }
 0xb70   : > { %v1129_v20 = vmul.f32 %v8364_v7, %v12969_v30  ;;  %v13200_v17 = vpop.eup %8365 }
 0xb71   : > { %v1914_v33 = vpop.xlane.xlu1 %1913  ;;  %v5332_v31 = vsel %vm633_vm4, %v13200_v17, 0.0 }
 0xb72   : > { %8375 = vrcp.f32 %v1914_v33  ;;  %7671 = vmatmul.mubr.msk.f32.gmra.mxu0 %vm633_vm4, %v1129_v20  ;;  %v14567_v20 = vld [vmem:[#allocation47_spill] sm:$0xff] }
 0xb73   : > { %v8368_v57 = vpop.eup %8367  ;;  %7673 = vmatprep.mubr.msk.f32.mxu0 %vm8527_vm2, %v13157_v46 }
 0xb74   : > { %v1131_v55 = vmul.f32 %v8368_v57, %v12974_v56  ;;  %v13208_v30 = vpop.eup %8369 }
 0xb75   : > { %v1917_v32 = vpop.xlane.xlu1 %1916  ;;  %v5344_v53 = vsel %vm633_vm4, %v13208_v30, 0.0 }
 0xb76   : > { %8377 = vrcp.f32 %v1917_v32  ;;  %5333 = vadd.xlane.f32.xlu0 %v5332_v31  ;;  %7674 = vmatmul.mubr.msk.f32.gmra.mxu0 %vm633_vm4, %v1131_v55  ;;  %v14569_v31 = vld [vmem:[#allocation62_spill] sm:$0xff] }
 0xb77   : > { %v8372_v43 = vpop.eup %8371  ;;  %7725 = vmatprep.mubr.msk.f32.mxu0 %vm8527_vm2, %v13157_v46 }
 0xb78   : > { %v1928_v39 = vmul.f32 %v8372_v43, %v12979_v3  ;;  %v14564_v3 = vld [vmem:[#allocation41_spill] sm:$0xff] }
 0xb79   : > { %v1920_v56 = vpop.xlane.xlu1 %1919 }
 0xb7a   : > { %8379 = vrcp.f32 %v1920_v56  ;;  %5345 = vadd.xlane.f32.xlu0 %v5344_v53  ;;  %7726 = vmatmul.mubr.msk.f32.vlgmr.msra.gmra.mxu0 %vm633_vm4, %v1928_v39 }
 0xb7b   : > { %v8374_v18 = vpop.eup %8373  ;;  %7782 = vmatpush3.msk.msra.mxu0 %vm1153_vm1, %v14564_v3  ;;  %7728 = vmatprep.mubr.msk.f32.mxu0 %vm8527_vm2, %v13157_v46 }
 0xb7c   : > { %v1930_v37 = vmul.f32 %v8374_v18, %v12984_v9  ;;  %7783 = vmatprep.subr.mxu0 %v13157_v46  ;;  %v14571_v18 = vld [vmem:[#allocation9_spill] sm:$0xff] }
 0xb7d   : > { %v1923_v34 = vpop.xlane.xlu1 %1922  ;;  %7784 = vmatpush3.msra.mxu0 %v14565_v42 }
 0xb7e   : > { %8381 = vrcp.f32 %v1923_v34  ;;  %7785 = vmatprep.subr.mxu0 %v13157_v46  ;;  %7729 = vmatmul.mubr.msk.f32.gmra.mxu0 %vm633_vm4, %v1930_v37 }
 0xb7f   : > { %v8376_v23 = vpop.eup %8375  ;;  %8383 = vpow2.f32 %v5328_v27  ;;  %7786 = vmatpush3.msra.mxu0 %v14566_v21  ;;  %7731 = vmatprep.mubr.msk.f32.mxu0 %vm8527_vm2, %v13157_v46 }
 0xb80   : > { %v1932_v9 = vmul.f32 %v8376_v23, %v12989_v61  ;;  %7787 = vmatprep.subr.mxu0 %v13157_v46  ;;  %v14568_v61 = vld [vmem:[#allocation65_spill] sm:$0xff]  ;;  %v14572_v23 = vld [vmem:[#allocation7_spill] sm:$0xff] }
 0xb81   : > { %v1926_v35 = vpop.xlane.xlu1 %1925  ;;  %7788 = vmatpush3.msra.mxu0 %v14567_v20  ;;  %v5317_v20 = vsub.f32 %v12943_v50, %v13145_v62  ;;  %v14577_v50 = vld [vmem:[#allocation83_spill] sm:$0xff] }
 0xb82   : > { %8385 = vrcp.f32 %v1926_v35  ;;  %7789 = vmatprep.subr.mxu0 %v13157_v46  ;;  %7732 = vmatmul.mubr.msk.f32.gmra.mxu0 %vm633_vm4, %v1932_v9  ;;  %v14573_v9 = vld [vmem:[#allocation78_spill] sm:$0xff] }
 0xb83   : > { %v8378_v7 = vpop.eup %8377  ;;  %7790 = vmatpush3.msra.mxu0 %v14568_v61  ;;  %7734 = vmatprep.mubr.msk.f32.mxu0 %vm8527_vm2, %v13157_v46 }
 0xb84   : > { %v1934_v33 = vmul.f32 %v8378_v7, %v12994_v63  ;;  %7791 = vmatprep.subr.mxu0 %v13157_v46  ;;  %v14570_v63 = vld [vmem:[#allocation75_spill] sm:$0xff] }
 0xb85   : > { %v2769_v57 = vpop.xlane.xlu1 %2768  ;;  %v2772_v55 = vpop.xlane.xlu0 %2771  ;;  %7792 = vmatpush3.msra.mxu0 %v14569_v31  ;;  %v14574_v7 = vld [vmem:[#allocation71_spill] sm:$0xff] }
 0xb86   : > { %8387 = vrcp.f32 %v2769_v57  ;;  %7793 = vmatprep.subr.mxu0 %v13157_v46  ;;  %7735 = vmatmul.mubr.msk.f32.gmra.mxu0 %vm633_vm4, %v1934_v33  ;;  %v14575_v33 = vld [vmem:[#allocation81_spill] sm:$0xff]  ;;  %v14576_v57 = vld [vmem:[#allocation87_spill] sm:$0xff] }
 0xb87   : > { %v8380_v32 = vpop.eup %8379  ;;  %7794 = vmatpush3.msra.mxu0 %v14570_v63  ;;  %7737 = vmatprep.mubr.msk.f32.mxu0 %vm8527_vm2, %v13157_v46  ;;  %8389 = vrcp.f32 %v2772_v55  ;;  %v14579_v63 = vld [vmem:[#allocation89_spill] sm:$0xff] }
 0xb88   : > { %v1936_v28 = vmul.f32 %v8380_v32, %v13001_v41  ;;  %7851 = vmatprep.subr.mxu0 %v13157_v46  ;;  %v5330_v32 = vmul.f32 1.442695, %v5317_v20 }
 0xb89   : > { %v2775_v43 = vpop.xlane.xlu0 %2774 }
 0xb8a   : > { %7738 = vmatmul.mubr.msk.f32.gmra.mxu0 %vm633_vm4, %v1936_v28  ;;  %8391 = vrcp.f32 %v2775_v43  ;;  %v14578_v28 = vld [vmem:[#allocation90_spill] sm:$0xff] }
 0xb8b   : > { %v8382_v39 = vpop.eup %8381  ;;  %7740 = vmatprep.mubr.msk.f32.mxu0 %vm8527_vm2, %v13157_v46 }
 0xb8c   : > { %v1938_v49 = vmul.f32 %v8382_v39, %v13008_v59  ;;  %v13252_v53 = vpop.eup %8383 }
 0xb8d   : > { %v2778_v56 = vpop.xlane.xlu0 %2777  ;;  %v5347_v59 = vsel %vm633_vm4, %v13252_v53, 0.0 }
 0xb8e   : > { %7741 = vmatmul.mubr.msk.f32.gmra.mxu0 %vm633_vm4, %v1938_v49  ;;  %8393 = vrcp.f32 %v2778_v56 }
 0xb8f   : > { %v8386_v41 = vpop.eup %8385  ;;  %7743 = vmatprep.mubr.msk.f32.mxu0 %vm8527_vm2, %v13157_v46 }
 0xb90   : > { %5377 = vrot.lane.b32.xlu0 %v14571_v18, %s8516_s12  ;;  %v1940_v37 = vmul.f32 %v8386_v41, %v13015_v19 }
 0xb91   : > { %v2781_v27 = vpop.xlane.xlu0 %2780 }
 0xb92   : > { %5348 = vadd.xlane.f32.xlu1 %v5347_v59  ;;  %7744 = vmatmul.mubr.msk.f32.gmra.mxu0 %vm633_vm4, %v1940_v37  ;;  %8395 = vrcp.f32 %v2781_v27  ;;  %v14580_v37 = vld [vmem:[#allocation72_spill] sm:$0xff] }
 0xb93   : > { %v8388_v3 = vpop.eup %8387  ;;  %7795 = vmatprep.mubr.msk.f32.mxu0 %vm8527_vm2, %v13157_v46  ;;  %v14581_v27 = vld [vmem:[#allocation64_spill] sm:$0xff] }
 0xb94   : > { %v2789_v34 = vmul.f32 %v8388_v3, %v13022_v60  ;;  %5373 = vrot.lane.b32.xlu0 %v14572_v23, %s8516_s12  ;;  %v8390_v42 = vpop.eup %8389  ;;  %v5746_v59 = vsub.f32 %v14581_v27, %v14580_v37 }
 0xb95   : > { %v2784_v19 = vpop.xlane.xlu0 %2783  ;;  %v2791_v21 = vmul.f32 %v8390_v42, %v13027_v22  ;;  %v14582_v42 = vld [vmem:[#allocation74_spill] sm:$0xff] }
 0xb96   : > { %7796 = vmatmul.mubr.msk.f32.vlgmr.msra.gmra.mxu0 %vm633_vm4, %v2789_v34  ;;  %8397 = vrcp.f32 %v2784_v19  ;;  %v5753_v19 = vmul.f32 1.442695, %v5746_v59 }
 0xb97   : > { %7852 = vmatpush3.msk.msra.mxu0 %vm1153_vm1, %v14573_v9  ;;  %7798 = vmatprep.mubr.msk.f32.mxu0 %vm8527_vm2, %v13157_v46  ;;  %v8392_v35 = vpop.eup %8391  ;;  %v14583_v9 = vld [vmem:[#allocation67_spill] sm:$0xff] }
 0xb98   : > { %5371 = vrot.lane.b32.xlu0 %v14415_v14, %s8516_s12  ;;  %7853 = vmatprep.subr.mxu0 %v13157_v46  ;;  %v2793_v22 = vmul.f32 %v8392_v35, %v13036_v29 }
 0xb99   : > { %v2787_v60 = vpop.xlane.xlu0 %2786  ;;  %7854 = vmatpush3.msra.mxu0 %v14574_v7 }
 0xb9a   : > { %7855 = vmatprep.subr.mxu0 %v13157_v46  ;;  %7799 = vmatmul.mubr.msk.f32.gmra.mxu0 %vm633_vm4, %v2791_v21  ;;  %8399 = vrcp.f32 %v2787_v60 }
 0xb9b   : > { %7856 = vmatpush3.msra.mxu0 %v14575_v33  ;;  %7801 = vmatprep.mubr.msk.f32.mxu0 %vm8527_vm2, %v13157_v46  ;;  %v8394_v61 = vpop.eup %8393  ;;  %v14584_v33 = vld [vmem:[#allocation79_spill] sm:$0xff] }
 0xb9c   : > { %7857 = vmatprep.subr.mxu0 %v13157_v46  ;;  %v2795_v29 = vmul.f32 %v8394_v61, %v13042_v8 }
 0xb9d   : > { %7858 = vmatpush3.msra.mxu0 %v14576_v57  ;;  %v3624_v55 = vpop.xlane.xlu0 %3623 }
 0xb9e   : > { %7859 = vmatprep.subr.mxu0 %v13157_v46  ;;  %7802 = vmatmul.mubr.msk.f32.gmra.mxu0 %vm633_vm4, %v2793_v22  ;;  %8401 = vrcp.f32 %v3624_v55  ;;  %v14585_v22 = vld [vmem:[#allocation69_spill] sm:$0xff] }
 0xb9f   : > { %7860 = vmatpush3.msra.mxu0 %v14577_v50  ;;  %7804 = vmatprep.mubr.msk.f32.mxu0 %vm8527_vm2, %v13157_v46  ;;  %v8396_v31 = vpop.eup %8395  ;;  %8403 = vpow2.f32 %v5330_v32  ;;  %v5749_v61 = vsub.f32 %v14585_v22, %v14584_v33  ;;  %v14586_v50 = vld [vmem:[#allocation99_spill] sm:$0xff] }
 0xba0   : > { %7861 = vmatprep.subr.mxu0 %v13157_v46  ;;  %v2797_v8 = vmul.f32 %v8396_v31, %v13050_v45 }
 0xba1   : > { %v3627_v62 = vpop.xlane.xlu1 %3626  ;;  %7862 = vmatpush3.msra.mxu0 %v14578_v28  ;;  %v4482_v7 = vpop.xlane.xlu0 %4481  ;;  %v14588_v28 = vld [vmem:[#allocation98_spill] sm:$0xff] }
 0xba2   : > { %7863 = vmatprep.subr.mxu0 %v13157_v46  ;;  %7805 = vmatmul.mubr.msk.f32.gmra.mxu0 %vm633_vm4, %v2795_v29  ;;  %8405 = vrcp.f32 %v3627_v62  ;;  %v14587_v29 = vld [vmem:[#allocation95_spill] sm:$0xff] }
 0xba3   : > { %5369 = vrot.lane.b32.xlu1 %v14553_v24, %s8516_s12  ;;  %7864 = vmatpush3.msra.mxu0 %v14579_v63  ;;  %v8398_v39 = vpop.eup %8397 }
 0xba4   : > { %7807 = vmatprep.mubr.msk.f32.mxu0 %vm8527_vm2, %v13157_v46  ;;  %7921 = vmatprep.subr.mxu0 %v13157_v46  ;;  %v2799_v56 = vmul.f32 %v8398_v39, %v13057_v1  ;;  %v5748_v1 = vsub.f32 %v14583_v9, %v14582_v42 }
 0xba5   : > { %v3630_v43 = vpop.xlane.xlu1 %3629  ;;  %v4485_v62 = vpop.xlane.xlu0 %4484 }
 0xba6   : > { %7808 = vmatmul.mubr.msk.f32.gmra.mxu0 %vm633_vm4, %v2797_v8  ;;  %8407 = vrcp.f32 %v3630_v43 }
 0xba7   : > { %7810 = vmatprep.mubr.msk.f32.mxu0 %vm8527_vm2, %v13157_v46  ;;  %v8400_v41 = vpop.eup %8399 }
 0xba8   : > { %v2801_v45 = vmul.f32 %v8400_v41, %v13063_v25  ;;  %v5757_v25 = vmul.f32 1.442695, %v5748_v1 }
 0xba9   : > { %v3633_v49 = vpop.xlane.xlu1 %3632  ;;  %v4488_v43 = vpop.xlane.xlu0 %4487 }
 0xbaa   : > { %7811 = vmatmul.mubr.msk.f32.gmra.mxu0 %vm633_vm4, %v2799_v56  ;;  %8409 = vrcp.f32 %v3633_v49 }
 0xbab   : > { %7813 = vmatprep.mubr.msk.f32.mxu0 %vm8527_vm2, %v13157_v46  ;;  %v8402_v34 = vpop.eup %8401 }
 0xbac   : > { %v13320_v21 = vpop.eup %8403  ;;  %v3644_v35 = vmul.f32 %v8402_v34, %v13069_v2 }
 0xbad   : > { %v3636_v3 = vpop.xlane.xlu1 %3635  ;;  %v5350_v55 = vsel %vm652_vm5, %v13320_v21, 0.0 }
 0xbae   : > { %7814 = vmatmul.mubr.msk.f32.gmra.mxu0 %vm633_vm4, %v2801_v45  ;;  %8411 = vrcp.f32 %v3636_v3 }
 0xbaf   : > { %7865 = vmatprep.mubr.msk.f32.mxu0 %vm8527_vm2, %v13157_v46  ;;  %v8406_v20 = vpop.eup %8405  ;;  %8413 = vpow2.f32 %v5753_v19 }
 0xbb0   : > { %v3646_v2 = vmul.f32 %v8406_v20, %v13077_v10 }
 0xbb1   : > { %v3639_v60 = vpop.xlane.xlu1 %3638 }
 0xbb2   : > { %7866 = vmatmul.mubr.msk.f32.vlgmr.msra.gmra.mxu0 %vm633_vm4, %v3644_v35  ;;  %8415 = vrcp.f32 %v3639_v60  ;;  %v14590_v35 = vld [vmem:[#allocation66_spill] sm:$0xff] }
 0xbb3   : > { %7922 = vmatpush3.msk.msra.mxu0 %vm1153_vm1, %v10910_v0  ;;  %7868 = vmatprep.mubr.msk.f32.mxu0 %vm8527_vm2, %v13157_v46  ;;  %v8408_v32 = vpop.eup %8407  ;;  %8417 = vpow2.f32 %v5757_v25  ;;  %v5759_v0 = vmul.f32 1.442695, %v5749_v61  ;;  %v14591_v61 = vld [vmem:[#allocation80_spill] sm:$0xff] }
 0xbb4   : > { %7923 = vmatprep.subr.mxu0 %v13157_v46  ;;  %v3648_v10 = vmul.f32 %v8408_v32, %v13079_v44 }
 0xbb5   : > { %v3642_v57 = vpop.xlane.xlu1 %3641  ;;  %7924 = vmatpush3.msra.mxu0 %v14586_v50 }
 0xbb6   : > { %7925 = vmatprep.subr.mxu0 %v13157_v46  ;;  %7869 = vmatmul.mubr.msk.f32.gmra.mxu0 %vm633_vm4, %v3646_v2  ;;  %8419 = vrcp.f32 %v3642_v57  ;;  %v14592_v57 = vld [vmem:[#allocation70_spill] sm:$0xff] }
 0xbb7   : > { %5351 = vadd.xlane.f32.xlu0 %v5350_v55  ;;  %7926 = vmatpush3.msra.mxu0 %v14587_v29  ;;  %v8410_v31 = vpop.eup %8409  ;;  %8421 = vpow2.f32 %v5759_v0  ;;  %v5750_v2 = vsub.f32 %v14592_v57, %v14591_v61  ;;  %v14600_v61 = vld [vmem:[#allocation57_spill] sm:$0xff] }
 0xbb8   : > { %7871 = vmatprep.mubr.msk.f32.mxu0 %vm8527_vm2, %v13157_v46  ;;  %7927 = vmatprep.subr.mxu0 %v13157_v46  ;;  %v3650_v8 = vmul.f32 %v8410_v31, %v13089_v51 }
 0xbb9   : > { %7928 = vmatpush3.msra.mxu0 %v14588_v28  ;;  %v4479_v63 = vpop.xlane.xlu1 %4478  ;;  %v5761_v50 = vmul.f32 1.442695, %v5750_v2 }
 0xbba   : > { %7929 = vmatprep.subr.mxu0 %v13157_v46  ;;  %7872 = vmatmul.mubr.msk.f32.gmra.mxu0 %vm633_vm4, %v3648_v10  ;;  %8423 = vrcp.f32 %v4479_v63 }
 0xbbb   : > { %7930 = vmatpush3.msra.mxu0 %v12658_v58  ;;  %7874 = vmatprep.mubr.msk.f32.mxu0 %vm8527_vm2, %v13157_v46  ;;  %v8412_v44 = vpop.eup %8411  ;;  %8425 = vrcp.f32 %v4482_v7 }
 0xbbc   : > { %7931 = vmatprep.subr.mxu0 %v13157_v46  ;;  %v13353_v39 = vpop.eup %8413  ;;  %v3652_v58 = vmul.f32 %v8412_v44, %v13101_v13  ;;  %8427 = vrcp.f32 %v4485_v62 }
 0xbbd   : > { %v5767_v27 = vsel %vm633_vm4, %v13353_v39, 0.0  ;;  %8429 = vrcp.f32 %v4488_v43  ;;  %v14593_v43 = vld [vmem:[#allocation76_spill] sm:$0xff] }
 0xbbe   : > { %7875 = vmatmul.mubr.msk.f32.gmra.mxu0 %vm633_vm4, %v3650_v8  ;;  %v14594_v8 = vld [vmem:[#allocation68_spill] sm:$0xff] }
 0xbbf   : > { %7877 = vmatprep.mubr.msk.f32.mxu0 %vm8527_vm2, %v13157_v46  ;;  %v8416_v56 = vpop.eup %8415 }
 0xbc0   : > { %v13359_v51 = vpop.eup %8417  ;;  %v3654_v41 = vmul.f32 %v8416_v56, %v13103_v4 }
 0xbc1   : > { %v5773_v4 = vsel %vm633_vm4, %v13359_v51, 0.0 }
 0xbc2   : > { %v4491_v49 = vpop.xlane.xlu0 %4490  ;;  %7878 = vmatmul.mubr.msk.f32.gmra.mxu0 %vm633_vm4, %v3652_v58 }
 0xbc3   : > { %7880 = vmatprep.mubr.msk.f32.mxu0 %vm8527_vm2, %v13157_v46  ;;  %v8420_v59 = vpop.eup %8419  ;;  %8431 = vrcp.f32 %v4491_v49 }
 0xbc4   : > { %v13367_v13 = vpop.eup %8421  ;;  %v3656_v3 = vmul.f32 %v8420_v59, %v13110_v40 }
 0xbc5   : > { %v5776_v42 = vsel %vm633_vm4, %v13367_v13, 0.0 }
 0xbc6   : > { %v4494_v37 = vpop.xlane.xlu0 %4493  ;;  %7881 = vmatmul.mubr.msk.f32.gmra.mxu0 %vm633_vm4, %v3654_v41 }
 0xbc7   : > { %5768 = vadd.xlane.f32.xlu1 %v5767_v27  ;;  %7883 = vmatprep.mubr.msk.f32.mxu0 %vm8527_vm2, %v13157_v46  ;;  %v8424_v34 = vpop.eup %8423  ;;  %8433 = vrcp.f32 %v4494_v37 }
 0xbc8   : > { %v4499_v19 = vmul.f32 %v8424_v34, %v13115_v26  ;;  %v8426_v9 = vpop.eup %8425  ;;  %v14589_v26 = vld [vmem:[#allocation73_spill] sm:$0xff] }
 0xbc9   : > { %v4501_v1 = vmul.f32 %v8426_v9, %v13075_v12  ;;  %v8428_v60 = vpop.eup %8427  ;;  %v5747_v7 = vsub.f32 %v14590_v35, %v14589_v26  ;;  %v14596_v34 = vld [vmem:[#allocation77_spill] sm:$0xff] }
 0xbca   : > { %v4515_v45 = vpop.permute.xlu0 %4514  ;;  %7884 = vmatmul.mubr.msk.f32.gmra.mxu0 %vm633_vm4, %v3656_v3  ;;  %v4497_v20 = vpop.xlane.xlu1 %4496  ;;  %v4503_v25 = vmul.f32 %v8428_v60, %v13087_v6 }
 0xbcb   : > { %5774 = vadd.xlane.f32.xlu1 %v5773_v4  ;;  %7932 = vmatpush3.msra.mxu0 %v4515_v45  ;;  %8435 = vrcp.f32 %v4497_v20  ;;  %v8430_v33 = vpop.eup %8429  ;;  %v5755_v22 = vmul.f32 1.442695, %v5747_v7  ;;  %v14595_v4 = vld [vmem:[#allocation86_spill] sm:$0xff]  ;;  %v14597_v7 = vld [vmem:[#allocation88_spill] sm:$0xff] }
 0xbcc   : > { %7933 = vmatprep.subr.mxu0 %v13157_v46  ;;  %7935 = vmatprep.mubr.msk.f32.mxu0 %vm8527_vm2, %v13157_v46  ;;  %v4505_v12 = vmul.f32 %v8430_v33, %v13095_v5  ;;  %v14598_v20 = vld [vmem:[#allocation82_spill] sm:$0xff] }
 0xbcd   : > { %5367 = vrot.lane.b32.xlu0 %v14555_v15, %s8516_s12  ;;  %8437 = vpow2.f32 %v5755_v22  ;;  %v14599_v22 = vld [vmem:[#allocation92_spill] sm:$0xff] }
 0xbce   : > { %v4513_v40 = vpop.permute.xlu0 %4512  ;;  %8439 = vpow2.f32 %v5761_v50  ;;  %v6183_v57 = vsub.f32 %v14600_v61, %v14599_v22  ;;  %v14601_v50 = vld [vmem:[#allocation93_spill] sm:$0xff] }
 0xbcf   : > { %5777 = vadd.xlane.f32.xlu1 %v5776_v42  ;;  %7934 = vmatpush3.msra.mxu0 %v4513_v40 }
 0xbd0   : > { %7936 = vmatmul.mubr.msk.f32.vlgmr.msra.gmra.mxu0 %vm633_vm4, %v4499_v19  ;;  %7991 = vmatprep.subr.mxu0 %v13157_v46  ;;  %v8432_v32 = vpop.eup %8431  ;;  %v5752_v19 = vsub.f32 %v14596_v34, %v14595_v4 }
 0xbd1   : > { %7938 = vmatprep.mubr.msk.f32.mxu0 %vm8527_vm2, %v13157_v46  ;;  %v4507_v62 = vmul.f32 %v8432_v32, %v13122_v54 }
 0xbd2   : > { %v5765_v42 = vmul.f32 1.442695, %v5752_v19 }
 0xbd4   : > { %7939 = vmatmul.mubr.msk.f32.gmra.mxu0 %vm633_vm4, %v4501_v1  ;;  %v8434_v0 = vpop.eup %8433 }
 0xbd5   : > { %7941 = vmatprep.mubr.msk.f32.mxu0 %vm8527_vm2, %v13157_v46  ;;  %v4509_v29 = vmul.f32 %v8434_v0, %v13127_v47 }
 0xbd6   : > { %v13394_v55 = vpop.xlane.xlu1 %5336 }
 0xbd8   : > { %7942 = vmatmul.mubr.msk.f32.gmra.mxu0 %vm633_vm4, %v4503_v25  ;;  %v8436_v10 = vpop.eup %8435  ;;  %v6181_v25 = vsub.f32 %v14598_v20, %v14597_v7  ;;  %v14603_v20 = vld [vmem:[#allocation91_spill] sm:$0xff] }
 0xbd9   : > { %7944 = vmatprep.mubr.msk.f32.mxu0 %vm8527_vm2, %v13157_v46  ;;  %v4511_v31 = vmul.f32 %v8436_v10, %v13132_v48  ;;  %v5751_v48 = vsub.f32 %v14594_v8, %v14593_v43 }
 0xbda   : > { %v13403_v6 = vpop.xlane.xlu1 %5339  ;;  %v13421_v28 = vpop.eup %8437  ;;  %v6188_v33 = vmul.f32 1.442695, %v6181_v25  ;;  %v14604_v25 = vld [vmem:[#allocation56_spill] sm:$0xff] }
 0xbdb   : > { %v5770_v47 = vsel %vm633_vm4, %v13421_v28, 0.0  ;;  %v13429_v63 = vpop.eup %8439  ;;  %v5763_v58 = vmul.f32 1.442695, %v5751_v48 }
 0xbdc   : > { %7945 = vmatmul.mubr.msk.f32.gmra.mxu0 %vm633_vm4, %v4505_v12  ;;  %v5779_v44 = vsel %vm633_vm4, %v13429_v63, 0.0 }
 0xbdd   : > { %7947 = vmatprep.mubr.msk.f32.mxu0 %vm8527_vm2, %v13157_v46  ;;  %8441 = vpow2.f32 %v5763_v58 }
 0xbde   : > { %8443 = vpow2.f32 %v5765_v42 }
 0xbdf   : > { %8445 = vpow2.f32 %v6188_v33  ;;  %v6182_v33 = vsub.f32 %v14604_v25, %v14603_v20 }
 0xbe0   : > { %5814 = vrot.lane.b32.xlu1 %v14562_v16, %s8520_s16  ;;  %7948 = vmatmul.mubr.msk.f32.gmra.mxu0 %vm633_vm4, %v4507_v62  ;;  %v14602_v62 = vld [vmem:[#allocation84_spill] sm:$0xff] }
 0xbe1   : > { %7950 = vmatprep.mubr.msk.f32.mxu0 %vm8527_vm2, %v13157_v46  ;;  %v6184_v0 = vsub.f32 %v14602_v62, %v14601_v50 }
 0xbe2   : > { %v13411_v5 = vpop.xlane.xlu1 %5342 }
 0xbe4   : > { %5810 = vrot.lane.b32.xlu1 %v14563_v52, %s8520_s16  ;;  %7951 = vmatmul.mubr.msk.f32.gmra.mxu0 %vm633_vm4, %v4509_v29  ;;  %v6192_v29 = vmul.f32 1.442695, %v6183_v57 }
 0xbe5   : > { %7953 = vmatprep.mubr.msk.f32.mxu0 %vm8527_vm2, %v13157_v46 }
 0xbe6   : > { %v5380_v54 = vpop.permute.xlu1 %5379  ;;  %8447 = vpow2.f32 %v6192_v29 }
 0xbe7   : > { %7992 = vmatpush3.msk.msra.mxu0 %vm1153_vm1, %v5380_v54 }
 0xbe8   : > { %7954 = vmatmul.mubr.msk.f32.gmra.mxu0 %vm633_vm4, %v4511_v31  ;;  %7993 = vmatprep.subr.mxu0 %v13157_v46 }
 0xbe9   : > { %8005 = vmatprep.mubr.msk.f32.mxu0 %vm8527_vm2, %v13157_v46 }
 0xbea   : > { %v13437_v41 = vpop.eup %8441  ;;  %v5376_v59 = vpop.permute.xlu1 %5375 }
 0xbeb   : > { %v5782_v27 = vsel %vm633_vm4, %v13437_v41, 0.0  ;;  %v13464_v12 = vpop.eup %8443 }
 0xbec   : > { %5771 = vadd.xlane.f32.xlu0 %v5770_v47  ;;  %v5785_v54 = vsel %vm652_vm5, %v13464_v12, 0.0  ;;  %v6194_v47 = vmul.f32 1.442695, %v6184_v0 }
 0xbee   : > { %8449 = vpow2.f32 %v6194_v47 }
 0xbf0   : > { %5780 = vadd.xlane.f32.xlu0 %v5779_v44 }
 0xbff   : > { %v5334_v49 = vpop.xlane.xlu0 %5333 }
 0xc00   : > { %8451 = vrcp.f32 %v5334_v49 }
 0xc01   : > { %8453 = vrcp.f32 %v13394_v55 }
 0xc02   : > { %8455 = vrcp.f32 %v13403_v6 }
 0xc03   : > { %v13435_v56 = vpop.xlane.xlu0 %5345  ;;  %8457 = vrcp.f32 %v13411_v5 }
 0xc04   : > { %8459 = vrcp.f32 %v13435_v56 }
 0xc06   : > { %5812 = vrot.lane.b32.xlu0 %v14571_v18, %s8520_s16 }
 0xc07   : > { %v5378_v37 = vpop.permute.xlu0 %5377 }
 0xc08   : > { %5783 = vadd.xlane.f32.xlu1 %v5782_v27  ;;  %7994 = vmatpush3.msra.mxu0 %v5378_v37  ;;  %v13475_v37 = vpop.eup %8445 }
 0xc09   : > { %7995 = vmatprep.subr.mxu0 %v13157_v46  ;;  %v13482_v49 = vpop.eup %8447 }
 0xc0a   : > { %5808 = vrot.lane.b32.xlu0 %v14572_v23, %s8520_s16  ;;  %7996 = vmatpush3.msra.mxu0 %v5376_v59  ;;  %v13484_v4 = vpop.eup %8449  ;;  %v6208_v19 = vsel %vm633_vm4, %v13482_v49, 0.0 }
 0xc0b   : > { %7997 = vmatprep.subr.mxu0 %v13157_v46  ;;  %v5374_v3 = vpop.permute.xlu0 %5373  ;;  %v6211_v5 = vsel %vm633_vm4, %v13484_v4, 0.0 }
 0xc0c   : > { %7998 = vmatpush3.msra.mxu0 %v5374_v3  ;;  %v6202_v3 = vsel %vm633_vm4, %v13475_v37, 0.0 }
 0xc0d   : > { %7999 = vmatprep.subr.mxu0 %v13157_v46  ;;  %v8452_v6 = vpop.eup %8451 }
 0xc0e   : > { %5806 = vrot.lane.b32.xlu0 %v14415_v14, %s8520_s16  ;;  %v5354_v42 = vmul.f32 %v8452_v6, %v13200_v17 }
 0xc0f   : > { %v5372_v45 = vpop.permute.xlu0 %5371 }
 0xc10   : > { %8000 = vmatpush3.msra.mxu0 %v5372_v45 }
 0xc11   : > { %8001 = vmatprep.subr.mxu0 %v13157_v46 }
 0xc16   : > { %v1223_v40 = vpop.f32.mrf.mxu0 }
 0xc17   : > { %1258 = vst.msk [vmem:[#allocation3] sm:$0xff] %vm1257_vm15, %v1223_v40 }
 0xc18   : > { %v7657_v9 = vpop.f32.mrf.mxu0 }
 0xc19   : > { %5804 = vrot.lane.b32.xlu1 %v14553_v24, %s8520_s16 }
 0xc1b   : > { %v13456_v1 = vpop.xlane.xlu1 %5348 }
 0xc1c   : > { %8461 = vrcp.f32 %v13456_v1 }
 0xc1e   : > { %v1228_v60 = vpop.f32.mrf.mxu0 }
 0xc1f   : > { %v5370_v26 = vpop.permute.xlu1 %5369  ;;  %1259 = vst.msk [vmem:[#allocation3 + $0x8] sm:$0xff] %vm1257_vm15, %v1228_v60 }
 0xc20   : > { %8002 = vmatpush3.msra.mxu0 %v5370_v26  ;;  %v7660_v35 = vpop.f32.mrf.mxu0  ;;  %v8454_v26 = vpop.eup %8453 }
 0xc21   : > { %8003 = vmatprep.subr.mxu0 %v13157_v46  ;;  %v5356_v56 = vmul.f32 %v8454_v26, %v13137_v11  ;;  %v8456_v7 = vpop.eup %8455  ;;  %v6190_v11 = vmul.f32 1.442695, %v6182_v33 }
 0xc22   : > { %v5358_v57 = vmul.f32 %v8456_v7, %v13141_v36  ;;  %v8458_v1 = vpop.eup %8457 }
 0xc26   : > { %v1233_v2 = vpop.f32.mrf.mxu0 }
 0xc27   : > { %1260 = vst.msk [vmem:[#allocation3 + $0x10] sm:$0xff] %vm1257_vm15, %v1233_v2  ;;  %v14605_v2 = vld [vmem:[#allocation94_spill] sm:$0xff] }
 0xc28   : > { %v7663_v32 = vpop.f32.mrf.mxu0 }
 0xc29   : > { %v14606_v32 = vld [vmem:[#allocation85_spill] sm:$0xff] }
 0xc2a   : > { %v1238_v10 = vpop.f32.mrf.mxu0  ;;  %v6185_v50 = vsub.f32 %v14606_v32, %v14605_v2 }
 0xc2b   : > { %1261 = vst.msk [vmem:[#allocation3 + $0x18] sm:$0xff] %vm1257_vm15, %v1238_v10  ;;  %v5360_v10 = vmul.f32 %v8458_v1, %v13151_v38 }
 0xc2c   : > { %v7666_v31 = vpop.f32.mrf.mxu0 }
 0xc2d   : > { %5786 = vadd.xlane.f32.xlu0 %v5785_v54  ;;  %v8460_v54 = vpop.eup %8459  ;;  %v6196_v31 = vmul.f32 1.442695, %v6185_v50 }
 0xc2e   : > { %v1243_v43 = vpop.f32.mrf.mxu0 }
 0xc2f   : > { %1262 = vst.msk [vmem:[#allocation3 + $0x20] sm:$0xff] %vm1257_vm15, %v1243_v43 }
 0xc30   : > { %v7669_v8 = vpop.f32.mrf.mxu0 }
 0xc31   : > { %v5362_v8 = vmul.f32 %v8460_v54, %v13208_v30 }
 0xc32   : > { %v1248_v48 = vpop.f32.mrf.mxu0 }
 0xc33   : > { %1263 = vst.msk [vmem:[#allocation3 + $0x28] sm:$0xff] %vm1257_vm15, %v1248_v48  ;;  %v8462_v48 = vpop.eup %8461  ;;  %vm5545_vm15 = vcmask 778880  }
 0xc34   : > { %v7672_v44 = vpop.f32.mrf.mxu0 }
 0xc36   : > { %v1253_v58 = vpop.f32.mrf.mxu0 }
 0xc37   : > { %1265 = vst.msk [vmem:[#allocation3 + $0x30] sm:$0x1] %vm1264_vm3, %v1253_v58  ;;  %vm5980_vm3 = vcmask 910080  }
 0xc38   : > { %v7675_v27 = vpop.f32.mrf.mxu0 }
 0xc39   : > { %v5364_v27 = vmul.f32 %v8462_v48, %v13252_v53 }
 0xc3a   : > { %v13478_v59 = vpop.f32.mrf.mxu0 }
 0xc3c   : > { %v7727_v45 = vpop.f32.mrf.mxu0 }
 0xc3d   : > { %6203 = vadd.xlane.f32.xlu1 %v6202_v3 }
 0xc3e   : > { %v13487_v55 = vpop.f32.mrf.mxu0 }
 0xc40   : > { %v5352_v34 = vpop.xlane.xlu0 %5351  ;;  %v7730_v40 = vpop.f32.mrf.mxu0 }
 0xc41   : > { %6209 = vadd.xlane.f32.xlu1 %v6208_v19  ;;  %8463 = vrcp.f32 %v5352_v34 }
 0xc42   : > { %v13495_v9 = vpop.f32.mrf.mxu0  ;;  %8465 = vpow2.f32 %v6190_v11 }
 0xc43   : > { %5802 = vrot.lane.b32.xlu0 %v14555_v15, %s8520_s16  ;;  %8467 = vpow2.f32 %v6196_v31 }
 0xc44   : > { %v5368_v60 = vpop.permute.xlu0 %5367  ;;  %v7733_v35 = vpop.f32.mrf.mxu0 }
 0xc45   : > { %6212 = vadd.xlane.f32.xlu1 %v6211_v5  ;;  %8004 = vmatpush3.msra.mxu0 %v5368_v60  ;;  %v14607_v60 = vld [vmem:[#allocation97_spill] sm:$0xff]  ;;  %v14608_v5 = vld [vmem:[#allocation58_spill] sm:$0xff] }
 0xc46   : > { %8006 = vmatmul.mubr.msk.f32.vlgmr.msra.gmra.mxu0 %vm633_vm4, %v5354_v42  ;;  %8061 = vmatprep.subr.mxu0 %v13157_v46  ;;  %v13504_v17 = vpop.f32.mrf.mxu0  ;;  %v6186_v26 = vsub.f32 %v14608_v5, %v14607_v60 }
 0xc47   : > { %8008 = vmatprep.mubr.msk.f32.mxu0 %vm8527_vm2, %v13157_v46 }
 0xc48   : > { %v7736_v22 = vpop.f32.mrf.mxu0  ;;  %v6198_v20 = vmul.f32 1.442695, %v6186_v26 }
 0xc4a   : > { %8009 = vmatmul.mubr.msk.f32.gmra.mxu0 %vm633_vm4, %v5356_v56  ;;  %v13512_v61 = vpop.f32.mrf.mxu0  ;;  %8469 = vpow2.f32 %v6198_v20 }
 0xc4b   : > { %8011 = vmatprep.mubr.msk.f32.mxu0 %vm8527_vm2, %v13157_v46 }
 0xc4c   : > { %v7739_v62 = vpop.f32.mrf.mxu0 }
 0xc4e   : > { %8012 = vmatmul.mubr.msk.f32.gmra.mxu0 %vm633_vm4, %v5358_v57  ;;  %v13520_v0 = vpop.f32.mrf.mxu0  ;;  %v8464_v3 = vpop.eup %8463 }
 0xc4f   : > { %8014 = vmatprep.mubr.msk.f32.mxu0 %vm8527_vm2, %v13157_v46  ;;  %v5366_v34 = vmul.f32 %v8464_v3, %v13320_v21  ;;  %v13552_v19 = vpop.eup %8465  ;;  %v13595_v3 = vld [vmem:[#allocation2] sm:$0xff] }
 0xc50   : > { %v13522_v29 = vpop.xlane.xlu1 %5768  ;;  %v7742_v36 = vpop.f32.mrf.mxu0  ;;  %v6205_v6 = vsel %vm633_vm4, %v13552_v19, 0.0 }
 0xc51   : > { %v13562_v40 = vpop.eup %8467 }
 0xc52   : > { %8015 = vmatmul.mubr.msk.f32.gmra.mxu0 %vm633_vm4, %v5360_v10  ;;  %v13528_v47 = vpop.f32.mrf.mxu0  ;;  %v6214_v35 = vsel %vm633_vm4, %v13562_v40, 0.0 }
 0xc53   : > { %8017 = vmatprep.mubr.msk.f32.mxu0 %vm8527_vm2, %v13157_v46 }
 0xc54   : > { %v13530_v43 = vpop.xlane.xlu1 %5774  ;;  %v7745_v44 = vpop.f32.mrf.mxu0 }
 0xc56   : > { %6249 = vrot.lane.b32.xlu1 %v14562_v16, %s8526_s23  ;;  %8018 = vmatmul.mubr.msk.f32.gmra.mxu0 %vm633_vm4, %v5362_v8  ;;  %v13538_v38 = vpop.f32.mrf.mxu0 }
 0xc57   : > { %8020 = vmatprep.mubr.msk.f32.mxu0 %vm8527_vm2, %v13157_v46  ;;  %v13584_v10 = vpop.eup %8469 }
 0xc58   : > { %v13540_v58 = vpop.xlane.xlu1 %5777  ;;  %v7797_v45 = vpop.f32.mrf.mxu0  ;;  %v6217_v8 = vsel %vm633_vm4, %v13584_v10, 0.0 }
 0xc5a   : > { %6245 = vrot.lane.b32.xlu1 %v14563_v52, %s8526_s23  ;;  %8021 = vmatmul.mubr.msk.f32.gmra.mxu0 %vm633_vm4, %v5364_v27  ;;  %v13548_v16 = vpop.f32.mrf.mxu0 }
 0xc5b   : > { %8023 = vmatprep.mubr.msk.f32.mxu0 %vm8527_vm2, %v13157_v46 }
 0xc5c   : > { %v5815_v30 = vpop.permute.xlu1 %5814  ;;  %v7800_v53 = vpop.f32.mrf.mxu0 }
 0xc5d   : > { %8062 = vmatpush3.msk.msra.mxu0 %vm1153_vm1, %v5815_v30  ;;  %v14609_v53 = vld [vmem:[#allocation96_spill] sm:$0xff] }
 0xc5e   : > { %8024 = vmatmul.mubr.msk.f32.gmra.mxu0 %vm633_vm4, %v5366_v34  ;;  %8063 = vmatprep.subr.mxu0 %v13157_v46  ;;  %v13558_v52 = vpop.f32.mrf.mxu0 }
 0xc5f   : > { %8075 = vmatprep.mubr.msk.f32.mxu0 %vm8527_vm2, %v13157_v46 }
 0xc60   : > { %v7803_v21 = vpop.f32.mrf.mxu0  ;;  %v5811_v44 = vpop.permute.xlu1 %5810 }
 0xc62   : > { %6206 = vadd.xlane.f32.xlu0 %v6205_v6  ;;  %v13564_v42 = vpop.f32.mrf.mxu0  ;;  %v14610_v6 = vld [vmem:[#allocation59_spill] sm:$0xff] }
 0xc63   : > { %v6187_v21 = vsub.f32 %v14610_v6, %v14609_v53 }
 0xc64   : > { %v7806_v56 = vpop.f32.mrf.mxu0 }
 0xc65   : > { %v6200_v26 = vmul.f32 1.442695, %v6187_v21 }
 0xc66   : > { %6215 = vadd.xlane.f32.xlu0 %v6214_v35  ;;  %v13570_v7 = vpop.f32.mrf.mxu0 }
 0xc67   : > { %8471 = vpow2.f32 %v6200_v26 }
 0xc68   : > { %v7809_v25 = vpop.f32.mrf.mxu0  ;;  %8473 = vrcp.f32 %v13522_v29 }
 0xc6a   : > { %v13572_v33 = vpop.f32.mrf.mxu0 }
 0xc6c   : > { %v7812_v22 = vpop.f32.mrf.mxu0 }
 0xc6e   : > { %v13574_v57 = vpop.f32.mrf.mxu0 }
 0xc70   : > { %v7815_v1 = vpop.f32.mrf.mxu0 }
 0xc72   : > { %v13576_v2 = vpop.f32.mrf.mxu0 }
 0xc74   : > { %v7867_v50 = vpop.f32.mrf.mxu0 }
 0xc75   : > { %v13578_v32 = vpop.xlane.xlu0 %5771 }
 0xc76   : > { %v13580_v11 = vpop.f32.mrf.mxu0  ;;  %8475 = vrcp.f32 %v13578_v32 }
 0xc77   : > { %8477 = vrcp.f32 %v13530_v43 }
 0xc78   : > { %v7870_v54 = vpop.f32.mrf.mxu0  ;;  %8479 = vrcp.f32 %v13540_v58 }
 0xc79   : > { %v13582_v62 = vpop.xlane.xlu0 %5780 }
 0xc7a   : > { %v3776_v31 = vpop.f32.mrf.mxu0  ;;  %8481 = vrcp.f32 %v13582_v62 }
 0xc7c   : > { %6247 = vrot.lane.b32.xlu0 %v14571_v18, %s8526_s23  ;;  %v7873_v48 = vpop.f32.mrf.mxu0 }
 0xc7d   : > { %v5813_v36 = vpop.permute.xlu0 %5812 }
 0xc7e   : > { %6218 = vadd.xlane.f32.xlu1 %v6217_v8  ;;  %8064 = vmatpush3.msra.mxu0 %v5813_v36  ;;  %v13591_v27 = vpop.f32.mrf.mxu0  ;;  %v13621_v8 = vpop.eup %8471 }
 0xc7f   : > { %8065 = vmatprep.subr.mxu0 %v13157_v46 }
 0xc80   : > { %6243 = vrot.lane.b32.xlu0 %v14572_v23, %s8526_s23  ;;  %8066 = vmatpush3.msra.mxu0 %v5811_v44  ;;  %v7876_v45 = vpop.f32.mrf.mxu0 }
 0xc81   : > { %8067 = vmatprep.subr.mxu0 %v13595_v3  ;;  %v5809_v18 = vpop.permute.xlu0 %5808  ;;  %v8474_v45 = vpop.eup %8473 }
 0xc82   : > { %8068 = vmatpush3.msra.mxu0 %v5809_v18  ;;  %v13599_v30 = vpop.f32.mrf.mxu0 }
 0xc83   : > { %8069 = vmatprep.subr.mxu0 %v13595_v3 }
 0xc84   : > { %6241 = vrot.lane.b32.xlu0 %v14415_v14, %s8526_s23  ;;  %v7879_v34 = vpop.f32.mrf.mxu0 }
 0xc85   : > { %v5807_v46 = vpop.permute.xlu0 %5806 }
 0xc86   : > { %8070 = vmatpush3.msra.mxu0 %v5807_v46  ;;  %v13604_v23 = vpop.f32.mrf.mxu0  ;;  %v8476_v46 = vpop.eup %8475 }
 0xc87   : > { %8071 = vmatprep.subr.mxu0 %v13595_v3  ;;  %v8478_v43 = vpop.eup %8477 }
 0xc88   : > { %v7882_v60 = vpop.f32.mrf.mxu0  ;;  %v8480_v58 = vpop.eup %8479 }
 0xc89   : > { %v8482_v32 = vpop.eup %8481 }
 0xc8a   : > { %v13608_v5 = vpop.f32.mrf.mxu0 }
 0xc8c   : > { %v7885_v35 = vpop.f32.mrf.mxu0 }
 0xc8f   : > { %6239 = vrot.lane.b32.xlu1 %v14553_v24, %s8526_s23 }
 0xc90   : > { %v13612_v56 = vpop.f32.mrf.mxu0 }
 0xc91   : > { %v5784_v14 = vpop.xlane.xlu1 %5783 }
 0xc92   : > { %v7937_v20 = vpop.f32.mrf.mxu0  ;;  %8483 = vrcp.f32 %v5784_v14 }
 0xc93   : > { %2099 = vrot.lane.b32.xlu1 %v13487_v55, %s8526_s23 }
 0xc94   : > { %v4626_v25 = vpop.f32.mrf.mxu0 }
 0xc95   : > { %v5805_v22 = vpop.permute.xlu1 %5804 }
 0xc96   : > { %v7940_v1 = vpop.f32.mrf.mxu0  ;;  %8072 = vmatpush3.msra.mxu0 %v5805_v22 }
 0xc97   : > { %2101 = vrot.lane.b32.xlu1 %v13495_v9, %s8526_s23  ;;  %8073 = vmatprep.subr.mxu0 %v13595_v3  ;;  %v6220_v9 = vsel %vm652_vm5, %v13621_v8, 0.0  ;;  %vm2973_vm5 = vcmask 392448  }
 0xc98   : > { %v4631_v50 = vpop.f32.mrf.mxu0 }
 0xc9a   : > { %v7943_v54 = vpop.f32.mrf.mxu0 }
 0xc9b   : > { %2103 = vrot.lane.b32.xlu1 %v13504_v17, %s8526_s23 }
 0xc9c   : > { %v4636_v24 = vpop.f32.mrf.mxu0 }
 0xc9e   : > { %v7946_v36 = vpop.f32.mrf.mxu0 }
 0xc9f   : > { %2954 = vrot.lane.b32.xlu1 %v13548_v16, %s8520_s16  ;;  %v8484_v62 = vpop.eup %8483 }
 0xca0   : > { %v13625_v55 = vpop.f32.mrf.mxu0 }
 0xca2   : > { %v7949_v48 = vpop.f32.mrf.mxu0 }
 0xca3   : > { %6221 = vadd.xlane.f32.xlu0 %v6220_v9  ;;  %2958 = vrot.lane.b32.xlu1 %v13564_v42, %s8520_s16 }
 0xca4   : > { %v13631_v44 = vpop.f32.mrf.mxu0 }
 0xca6   : > { %v7952_v17 = vpop.f32.mrf.mxu0 }
 0xca7   : > { %3811 = vrot.lane.b32.xlu1 %v3776_v31, %s8516_s12  ;;  %v5789_v31 = vmul.f32 %v8474_v45, %v13353_v39  ;;  %v5793_v39 = vmul.f32 %v8478_v43, %v13359_v51 }
 0xca8   : > { %v13634_v18 = vpop.f32.mrf.mxu0 }
 0xcaa   : > { %v7955_v16 = vpop.f32.mrf.mxu0 }
 0xcab   : > { %4664 = vrot.lane.b32.xlu1 %v4626_v25, %s8515_s11 }
 0xcaf   : > { %4668 = vrot.lane.b32.xlu1 %v4636_v24, %s8515_s11 }
 0xcb6   : > { %v5787_v42 = vpop.xlane.xlu0 %5786 }
 0xcb7   : > { %8485 = vrcp.f32 %v5787_v42 }
 0xcb9   : > { %6237 = vrot.lane.b32.xlu0 %v14555_v15, %s8526_s23  ;;  %v5791_v15 = vmul.f32 %v8476_v46, %v13421_v28 }
 0xcba   : > { %v5803_v29 = vpop.permute.xlu0 %5802 }
 0xcbb   : > { %8074 = vmatpush3.msra.mxu0 %v5803_v29 }
 0xcbc   : > { %8076 = vmatmul.mubr.msk.f32.vlgmr.msra.gmra.mxu0 %vm633_vm4, %v5789_v31  ;;  %8131 = vmatprep.subr.mxu0 %v13595_v3 }
 0xcbd   : > { %2956 = vrot.lane.b32.xlu0 %v13558_v52, %s8520_s16  ;;  %8078 = vmatprep.mubr.msk.f32.mxu0 %vm8527_vm2, %v13595_v3  ;;  %v5795_v52 = vmul.f32 %v8480_v58, %v13367_v13 }
 0xcc0   : > { %8079 = vmatmul.mubr.msk.f32.gmra.mxu0 %vm633_vm4, %v5791_v15 }
 0xcc1   : > { %3809 = vrot.lane.b32.xlu0 %v13580_v11, %s8516_s12  ;;  %8081 = vmatprep.mubr.msk.f32.mxu0 %vm8527_vm2, %v13595_v3  ;;  %v5797_v11 = vmul.f32 %v8482_v32, %v13429_v63 }
 0xcc4   : > { %8082 = vmatmul.mubr.msk.f32.gmra.mxu0 %vm633_vm4, %v5793_v39  ;;  %v8486_v34 = vpop.eup %8485 }
 0xcc5   : > { %3813 = vrot.lane.b32.xlu0 %v13591_v27, %s8516_s12  ;;  %8084 = vmatprep.mubr.msk.f32.mxu0 %vm8527_vm2, %v13595_v3  ;;  %v5799_v27 = vmul.f32 %v8484_v62, %v13437_v41  ;;  %v5801_v53 = vmul.f32 %v8486_v34, %v13464_v12 }
 0xcc6   : > { %v13664_v28 = vpop.xlane.xlu1 %6203 }
 0xcc7   : > { %8487 = vrcp.f32 %v13664_v28 }
 0xcc8   : > { %8085 = vmatmul.mubr.msk.f32.gmra.mxu0 %vm633_vm4, %v5795_v52 }
 0xcc9   : > { %4666 = vrot.lane.b32.xlu0 %v4631_v50, %s8515_s11  ;;  %8087 = vmatprep.mubr.msk.f32.mxu0 %vm8527_vm2, %v13595_v3 }
 0xcca   : > { %v13671_v51 = vpop.xlane.xlu1 %6209 }
 0xccc   : > { %8088 = vmatmul.mubr.msk.f32.gmra.mxu0 %vm633_vm4, %v5797_v11 }
 0xccd   : > { %2105 = vrot.lane.b32.xlu0 %v13512_v61, %s8526_s23  ;;  %8090 = vmatprep.mubr.msk.f32.mxu0 %vm8527_vm2, %v13595_v3 }
 0xcce   : > { %v13679_v13 = vpop.xlane.xlu1 %6212 }
 0xcd0   : > { %8091 = vmatmul.mubr.msk.f32.gmra.mxu0 %vm633_vm4, %v5799_v27 }
 0xcd1   : > { %8093 = vmatprep.mubr.msk.f32.mxu0 %vm8527_vm2, %v13595_v3 }
 0xcd2   : > { %v6250_v63 = vpop.permute.xlu1 %6249 }
 0xcd3   : > { %8132 = vmatpush3.msk.msra.mxu0 %vm1153_vm1, %v6250_v63  ;;  %vm2118_vm1 = vcmask 261248  }
 0xcd4   : > { %8094 = vmatmul.mubr.msk.f32.gmra.mxu0 %vm633_vm4, %v5801_v53  ;;  %8133 = vmatprep.subr.mxu0 %v13595_v3 }
 0xcd5   : > { %8145 = vmatprep.mubr.msk.f32.mxu0 %vm8527_vm2, %v13595_v3 }
 0xcd6   : > { %v6246_v21 = vpop.permute.xlu1 %6245 }
 0xceb   : > { %v6207_v61 = vpop.xlane.xlu0 %6206 }
 0xcec   : > { %8489 = vrcp.f32 %v6207_v61 }
 0xced   : > { %8491 = vrcp.f32 %v13671_v51 }
 0xcee   : > { %8493 = vrcp.f32 %v13679_v13 }
 0xcef   : > { %v6216_v41 = vpop.xlane.xlu0 %6215 }
 0xcf0   : > { %8495 = vrcp.f32 %v6216_v41 }
 0xcf3   : > { %v6248_v6 = vpop.permute.xlu0 %6247 }
 0xcf4   : > { %8134 = vmatpush3.msra.mxu0 %v6248_v6 }
 0xcf5   : > { %8135 = vmatprep.subr.mxu0 %v13595_v3 }
 0xcf6   : > { %8136 = vmatpush3.msra.mxu0 %v6246_v21 }
 0xcf7   : > { %8137 = vmatprep.subr.mxu0 %v13595_v3  ;;  %v6244_v12 = vpop.permute.xlu0 %6243 }
 0xcf8   : > { %8138 = vmatpush3.msra.mxu0 %v6244_v12 }
 0xcf9   : > { %8139 = vmatprep.subr.mxu0 %v13595_v3 }
 0xcfb   : > { %v6242_v60 = vpop.permute.xlu0 %6241 }
 0xcfc   : > { %8140 = vmatpush3.msra.mxu0 %v6242_v60 }
 0xcfd   : > { %8141 = vmatprep.subr.mxu0 %v13595_v3 }
 0xd06   : > { %v13695_v26 = vpop.f32.mrf.mxu0 }
 0xd07   : > { %v6219_v35 = vpop.xlane.xlu1 %6218 }
 0xd08   : > { %v8007_v14 = vpop.f32.mrf.mxu0  ;;  %8497 = vrcp.f32 %v6219_v35 }
 0xd0a   : > { %v5481_v20 = vpop.f32.mrf.mxu0 }
 0xd0b   : > { %v6240_v25 = vpop.permute.xlu1 %6239  ;;  %5519 = vrot.lane.b32.xlu1 %v5481_v20, %s8524_s20 }
 0xd0c   : > { %v8010_v22 = vpop.f32.mrf.mxu0  ;;  %8142 = vmatpush3.msra.mxu0 %v6240_v25 }
 0xd0d   : > { %8143 = vmatprep.subr.mxu0 %v13595_v3 }
 0xd0e   : > { %v5486_v1 = vpop.f32.mrf.mxu0 }
 0xd0f   : > { %v2100_v50 = vpop.permute.xlu1 %2099  ;;  %5521 = vrot.lane.b32.xlu0 %v5486_v1, %s8524_s20 }
 0xd10   : > { %2120 = vst.msk [vmem:[#allocation3 + $0x8] sm:$0xff] %vm2118_vm1, %v2100_v50  ;;  %v8013_v54 = vpop.f32.mrf.mxu0 }
 0xd12   : > { %v5491_v24 = vpop.f32.mrf.mxu0 }
 0xd13   : > { %v2102_v36 = vpop.permute.xlu1 %2101  ;;  %2960 = vrot.lane.b32.xlu0 %v13570_v7, %s8520_s16  ;;  %5523 = vrot.lane.b32.xlu1 %v5491_v24, %s8524_s20  ;;  %v6936_v24 = vld [vmem:[%s14254_s6 + $0x78] sm:$0xff] }
 0xd14   : > { %2121 = vst.msk [vmem:[#allocation3 + $0x10] sm:$0xff] %vm2118_vm1, %v2102_v36  ;;  %v8016_v48 = vpop.f32.mrf.mxu0  ;;  %8235 = vmatpush3.msra.mxu1 %v6936_v24 }
 0xd15   : > { %8220 = vmatprep.subr.mxu1 %v13595_v3 }
 0xd16   : > { %v5496_v9 = vpop.f32.mrf.mxu0 }
 0xd17   : > { %v2104_v17 = vpop.permute.xlu1 %2103  ;;  %3815 = vrot.lane.b32.xlu0 %v13599_v30, %s8516_s12  ;;  %2107 = vrot.lane.b32.xlu1 %v13520_v0, %s8526_s23 }
 0xd18   : > { %2122 = vst.msk [vmem:[#allocation3 + $0x18] sm:$0xff] %vm2118_vm1, %v2104_v17  ;;  %v8019_v16 = vpop.f32.mrf.mxu0  ;;  %v6935_v17 = vld [vmem:[%s14254_s6 + $0x70] sm:$0xff] }
 0xd19   : > { %8236 = vmatpush3.msra.mxu1 %v6935_v17  ;;  %v6932_v16 = vld [vmem:[%s14254_s6 + $0x58] sm:$0xff] }
 0xd1a   : > { %v13710_v42 = vpop.f32.mrf.mxu0  ;;  %8221 = vmatprep.subr.mxu1 %v13595_v3 }
 0xd1b   : > { %v2955_v7 = vpop.permute.xlu1 %2954  ;;  %4670 = vrot.lane.b32.xlu0 %v13625_v55, %s8515_s11  ;;  %2962 = vrot.lane.b32.xlu1 %v13572_v33, %s8520_s16  ;;  %v8488_v55 = vpop.eup %8487 }
 0xd1c   : > { %2975 = vst.msk [vmem:[#allocation3 + $0x8] sm:$0xff] %vm2973_vm5, %v2955_v7  ;;  %v8022_v45 = vpop.f32.mrf.mxu0  ;;  %v6224_v29 = vmul.f32 %v8488_v55, %v13475_v37  ;;  %v8490_v15 = vpop.eup %8489  ;;  %v6931_v7 = vld [vmem:[%s14254_s6 + $0x50] sm:$0xff] }
 0xd1d   : > { %v6226_v39 = vmul.f32 %v8490_v15, %v13552_v19  ;;  %v8492_v58 = vpop.eup %8491 }
 0xd1e   : > { %v13717_v30 = vpop.f32.mrf.mxu0  ;;  %v6228_v52 = vmul.f32 %v8492_v58, %v13482_v49  ;;  %v8494_v32 = vpop.eup %8493 }
 0xd1f   : > { %v2959_v31 = vpop.permute.xlu1 %2958  ;;  %3817 = vrot.lane.b32.xlu1 %v13604_v23, %s8516_s12  ;;  %5525 = vrot.lane.b32.xlu0 %v5496_v9, %s8524_s20  ;;  %v6230_v51 = vmul.f32 %v8494_v32, %v13484_v4  ;;  %v8496_v11 = vpop.eup %8495 }
 0xd20   : > { %2977 = vst.msk [vmem:[#allocation3 + $0x18] sm:$0xff] %vm2973_vm5, %v2959_v31  ;;  %v8025_v0 = vpop.f32.mrf.mxu0  ;;  %v6232_v13 = vmul.f32 %v8496_v11, %v13562_v40  ;;  %v8498_v27 = vpop.eup %8497 }
 0xd21   : > { %v6234_v34 = vmul.f32 %v8498_v27, %v13584_v10  ;;  %v6925_v27 = vld [vmem:[%s14254_s6 + $0x20] sm:$0xff] }
 0xd23   : > { %v3812_v23 = vpop.permute.xlu1 %3811 }
 0xd27   : > { %v4665_v37 = vpop.permute.xlu1 %4664 }
 0xd2b   : > { %v4669_v62 = vpop.permute.xlu1 %4668 }
 0xd2c   : > { %v6222_v33 = vpop.xlane.xlu0 %6221 }
 0xd2d   : > { %8499 = vrcp.f32 %v6222_v33  ;;  %v6930_v33 = vld [vmem:[%s14254_s6 + $0x48] sm:$0xff] }
 0xd30   : > { %v6238_v46 = vpop.permute.xlu0 %6237 }
 0xd31   : > { %8144 = vmatpush3.msra.mxu0 %v6238_v46 }
 0xd32   : > { %8146 = vmatmul.mubr.msk.f32.vlgmr.msra.gmra.mxu0 %vm633_vm4, %v6224_v29  ;;  %8166 = vmatprep.subr.mxu0 %v13595_v3  ;;  %v6929_v29 = vld [vmem:[%s14254_s6 + $0x40] sm:$0xff] }
 0xd33   : > { %8148 = vmatprep.mubr.msk.f32.mxu0 %vm8527_vm2, %v13595_v3  ;;  %8167 = vmatpush3.msra.mxu0 %v6936_v24  ;;  %v13933_v24 = vld [vmem:[%s14252_s4 + $0x5] ss:$0 sm:$0xff] }
 0xd34   : > { %v2957_v43 = vpop.permute.xlu0 %2956  ;;  %8168 = vmatprep.subr.mxu0 %v13595_v3 }
 0xd35   : > { %2976 = vst.msk [vmem:[#allocation3 + $0x10] sm:$0xff] %vm2973_vm5, %v2957_v43  ;;  %8169 = vmatpush3.msra.mxu0 %v6935_v17  ;;  %v6928_v43 = vld [vmem:[%s14254_s6 + $0x38] sm:$0xff] }
 0xd36   : > { %8149 = vmatmul.mubr.msk.f32.gmra.mxu0 %vm633_vm4, %v6226_v39  ;;  %3831 = vst.msk [vmem:[#allocation3 + $0x10] sm:$0xff] %vm3828_vm6, %v3812_v23  ;;  %8170 = vmatprep.subr.mxu0 %v13595_v3 }
 0xd37   : > { %8151 = vmatprep.mubr.msk.f32.mxu0 %vm8527_vm2, %v13595_v3 }
 0xd38   : > { %v3810_v28 = vpop.permute.xlu0 %3809 }
 0xd39   : > { %3830 = vst.msk [vmem:[#allocation3 + $0x8] sm:$0xff] %vm3828_vm6, %v3810_v28 }
 0xd3a   : > { %8152 = vmatmul.mubr.msk.f32.gmra.mxu0 %vm633_vm4, %v6228_v52  ;;  %4685 = vst.msk [vmem:[#allocation3 + $0x8] sm:$0xff] %vm4683_vm7, %v4665_v37  ;;  %v8500_v63 = vpop.eup %8499  ;;  %v6926_v52 = vld [vmem:[%s14254_s6 + $0x28] sm:$0xff] }
 0xd3b   : > { %8154 = vmatprep.mubr.msk.f32.mxu0 %vm8527_vm2, %v13595_v3  ;;  %v6236_v40 = vmul.f32 %v8500_v63, %v13621_v8 }
 0xd3c   : > { %v3814_v19 = vpop.permute.xlu0 %3813 }
 0xd3d   : > { %3832 = vst.msk [vmem:[#allocation3 + $0x18] sm:$0xff] %vm3828_vm6, %v3814_v19 }
 0xd3e   : > { %8155 = vmatmul.mubr.msk.f32.gmra.mxu0 %vm633_vm4, %v6230_v51  ;;  %4687 = vst.msk [vmem:[#allocation3 + $0x18] sm:$0xff] %vm4683_vm7, %v4669_v62 }
 0xd3f   : > { %8157 = vmatprep.mubr.msk.f32.mxu0 %vm8527_vm2, %v13595_v3 }
 0xd40   : > { %v4667_v49 = vpop.permute.xlu0 %4666 }
 0xd41   : > { %4686 = vst.msk [vmem:[#allocation3 + $0x10] sm:$0xff] %vm4683_vm7, %v4667_v49 }
 0xd42   : > { %8158 = vmatmul.mubr.msk.f32.gmra.mxu0 %vm633_vm4, %v6232_v13 }
 0xd43   : > { %8160 = vmatprep.mubr.msk.f32.mxu0 %vm8527_vm2, %v13595_v3 }
 0xd44   : > { %v2106_v4 = vpop.permute.xlu0 %2105 }
 0xd45   : > { %2123 = vst.msk [vmem:[#allocation3 + $0x20] sm:$0xff] %vm2118_vm1, %v2106_v4  ;;  %v6924_v4 = vld [vmem:[%s14254_s6 + $0x18] sm:$0xff] }
 0xd46   : > { %8161 = vmatmul.mubr.msk.f32.gmra.mxu0 %vm633_vm4, %v6234_v34 }
 0xd47   : > { %8163 = vmatprep.mubr.msk.f32.mxu0 %vm8527_vm2, %v13595_v3 }
 0xd4a   : > { %8164 = vmatmul.mubr.msk.f32.gmra.mxu0 %vm633_vm4, %v6236_v40  ;;  %vm5973_vm4 = vcmask 917248  }
 0xd4b   : > { %8198 = vmatprep.mubr.msk.f32.mxu0 %vm8527_vm2, %v13595_v3 }
 0xd7c   : > { %v13763_v53 = vpop.f32.mrf.mxu0 }
 0xd7d   : > { %v5520_v61 = vpop.permute.xlu1 %5519 }
 0xd7e   : > { %5540 = vst.msk [vmem:[#allocation3 + $0x8] sm:$0xff] %vm5538_vm8, %v5520_v61  ;;  %v8077_v10 = vpop.f32.mrf.mxu0  ;;  %v6923_v61 = vld [vmem:[%s14254_s6 + $0x10] sm:$0xff] }
 0xd7f   : > { %v6922_v10 = vld [vmem:[%s14254_s6 + $0x8] sm:$0xff] }
 0xd80   : > { %v5916_v41 = vpop.f32.mrf.mxu0 }
 0xd81   : > { %5954 = vrot.lane.b32.xlu1 %v5916_v41, %s8523_s19  ;;  %v5522_v6 = vpop.permute.xlu0 %5521 }
 0xd82   : > { %5541 = vst.msk [vmem:[#allocation3 + $0x10] sm:$0xff] %vm5538_vm8, %v5522_v6  ;;  %v8080_v21 = vpop.f32.mrf.mxu0  ;;  %v6921_v6 = vld [vmem:[%s14254_s6] sm:$0xff] }
 0xd83   : > { %v13911_v21 = vld [vmem:[%s14252_s4 + $0x1] ss:$0 sm:$0xff] }
 0xd84   : > { %v5921_v8 = vpop.f32.mrf.mxu0 }
 0xd85   : > { %v5524_v12 = vpop.permute.xlu1 %5523  ;;  %4672 = vrot.lane.b32.xlu1 %v13631_v44, %s8515_s11  ;;  %5956 = vrot.lane.b32.xlu0 %v5921_v8, %s8523_s19  ;;  %v2961_v60 = vpop.permute.xlu0 %2960  ;;  %v13916_v8 = vld [vmem:[%s14252_s4 + $0x2] ss:$0 sm:$0xff] }
 0xd86   : > { %5542 = vst.msk [vmem:[#allocation3 + $0x18] sm:$0xff] %vm5538_vm8, %v5524_v12  ;;  %v8083_v35 = vpop.f32.mrf.mxu0  ;;  %v6456_v12 = vld [vmem:[#allocation2 + $0x8] sm:$0x1] }
 0xd87   : > { %2978 = vst.msk [vmem:[#allocation3 + $0x20] sm:$0xff] %vm2973_vm5, %v2961_v60  ;;  %v6486_v60 = vmul.f32 %v13595_v3, %v13911_v21  ;;  %v6526_v35 = vmul.f32 %v13595_v3, %v13916_v8 }
 0xd88   : > { %v5926_v14 = vpop.f32.mrf.mxu0 }
 0xd89   : > { %v2108_v20 = vpop.permute.xlu1 %2107  ;;  %2097 = vrot.lane.b32.xlu0 %v13478_v59, %s8526_s23  ;;  %5958 = vrot.lane.b32.xlu1 %v5926_v14, %s8523_s19  ;;  %v3816_v25 = vpop.permute.xlu0 %3815  ;;  %v6527_v14 = vmul.f32 %v13916_v8, %v6456_v12 }
 0xd8a   : > { %2124 = vst.msk [vmem:[#allocation3 + $0x28] sm:$0xff] %vm2118_vm1, %v2108_v20  ;;  %v8086_v44 = vpop.f32.mrf.mxu0  ;;  %v13926_v20 = vld [vmem:[%s14252_s4] ss:$0 sm:$0xff] }
 0xd8b   : > { %3833 = vst.msk [vmem:[#allocation3 + $0x20] sm:$0xff] %vm3828_vm6, %v3816_v25  ;;  %v6458_v25 = vld [vmem:[#allocation2 + $0x18] sm:$0x1]  ;;  %v6500_v44 = vrot.slane %v6486_v60, 1  ;;  %v14008_v60 = vld [vmem:[%s14252_s4 + $0x3] ss:$0 sm:$0xff] }
 0xd8c   : > { %v5931_v22 = vpop.f32.mrf.mxu0 }
 0xd8d   : > { %v2963_v1 = vpop.permute.xlu1 %2962  ;;  %2109 = vrot.lane.b32.xlu1 %v13528_v47, %s8526_s23  ;;  %5960 = vrot.lane.b32.xlu0 %v5931_v22, %s8523_s19  ;;  %v4671_v50 = vpop.permute.xlu0 %4670  ;;  %v6460_v22 = vld [vmem:[#allocation2 + $0x28] sm:$0x1] }
 0xd8e   : > { %2979 = vst.msk [vmem:[#allocation3 + $0x28] sm:$0xff] %vm2973_vm5, %v2963_v1  ;;  %v8089_v59 = vpop.f32.mrf.mxu0  ;;  %v6595_v1 = vld [vmem:[#allocation2 + $0x38] sm:$0x1] }
 0xd8f   : > { %4688 = vst.msk [vmem:[#allocation3 + $0x20] sm:$0xff] %vm4683_vm7, %v4671_v50  ;;  %v6474_v50 = vmul.f32 %v13595_v3, %v13926_v20  ;;  %v6555_v59 = vrot.slane %v6526_v35, 2  ;;  %v13942_v17 = vmul.f32 %v13933_v24, %v6595_v1 }
 0xd90   : > { %v5936_v54 = vpop.f32.mrf.mxu0 }
 0xd91   : > { %v3818_v36 = vpop.permute.xlu1 %3817  ;;  %2952 = vrot.lane.b32.xlu1 %v13538_v38, %s8520_s16  ;;  %5527 = vrot.lane.b32.xlu0 %v13710_v42, %s8524_s20  ;;  %v5526_v47 = vpop.permute.xlu0 %5525 }
 0xd92   : > { %3834 = vst.msk [vmem:[#allocation3 + $0x28] sm:$0xff] %vm3828_vm6, %v3818_v36  ;;  %v8092_v48 = vpop.f32.mrf.mxu0  ;;  %v6736_v36 = vld [vmem:[#allocation2 + $0x48] sm:$0x1] }
 0xd93   : > { %5543 = vst.msk [vmem:[#allocation3 + $0x20] sm:$0xff] %vm5538_vm8, %v5526_v47  ;;  %v6591_v47 = vld [vmem:[#allocation2 + $0x18] sm:$0x1]  ;;  %v13936_v48 = vmul.f32 %v13916_v8, %v6458_v25 }
 0xd94   : > { %v13794_v9 = vpop.f32.mrf.mxu0 }
 0xd95   : > { %2964 = vrot.lane.b32.xlu0 %v13574_v57, %s8520_s16  ;;  %5962 = vrot.lane.b32.xlu1 %v5936_v54, %s8523_s19  ;;  %v6934_v57 = vld [vmem:[%s14254_s6 + $0x68] sm:$0xff]  ;;  %v6556_v54 = vrot.slane %v6527_v14, 2 }
 0xd96   : > { %v8095_v38 = vpop.f32.mrf.mxu0  ;;  %8237 = vmatpush3.msra.mxu1 %v6934_v57  ;;  %8171 = vmatpush3.msra.mxu0 %v6934_v57  ;;  %v6462_v57 = vld [vmem:[#allocation2 + $0x38] sm:$0x1] }
 0xd97   : > { %8222 = vmatprep.subr.mxu1 %v13595_v3  ;;  %8172 = vmatprep.subr.mxu0 %v13595_v3  ;;  %v13939_v38 = vmul.f32 %v13916_v8, %v6460_v22 }
 0xd99   : > { %3807 = vrot.lane.b32.xlu0 %v13576_v2, %s8516_s12  ;;  %3819 = vrot.lane.b32.xlu1 %v13608_v5, %s8516_s12  ;;  %v6933_v2 = vld [vmem:[%s14254_s6 + $0x60] sm:$0xff] }
 0xd9a   : > { %8238 = vmatpush3.msra.mxu1 %v6933_v2  ;;  %8173 = vmatpush3.msra.mxu0 %v6933_v2  ;;  %v6597_v2 = vld [vmem:[#allocation2 + $0x48] sm:$0x1] }
 0xd9b   : > { %8223 = vmatprep.subr.mxu1 %v13595_v3  ;;  %8174 = vmatprep.subr.mxu0 %v13595_v3 }
 0xd9c   : > { %8239 = vmatpush3.msra.mxu1 %v6932_v16  ;;  %8175 = vmatpush3.msra.mxu0 %v6932_v16  ;;  %v6514_v16 = vadd.f32 %v6500_v44, %v6474_v50 }
 0xd9d   : > { %4674 = vrot.lane.b32.xlu0 %v13634_v18, %s8515_s11  ;;  %8224 = vmatprep.subr.mxu1 %v13595_v3 }
 0xd9e   : > { %8176 = vmatprep.subr.mxu0 %v13595_v3  ;;  %8240 = vmatpush3.msra.mxu1 %v6931_v7 }
 0xd9f   : > { %8177 = vmatpush3.msra.mxu0 %v6931_v7  ;;  %8225 = vmatprep.subr.mxu1 %v13595_v3  ;;  %v13955_v7 = vld [vmem:[#allocation2 + $0x20] sm:$0xff] }
 0xda0   : > { %8241 = vmatpush3.msra.mxu1 %v6930_v33  ;;  %8178 = vmatprep.subr.mxu0 %v13595_v3 }
 0xda1   : > { %8226 = vmatprep.subr.mxu1 %v13595_v3  ;;  %8179 = vmatpush3.msra.mxu0 %v6930_v33  ;;  %v13965_v33 = vmul.f32 %v13933_v24, %v6597_v2 }
 0xda2   : > { %8242 = vmatpush3.msra.mxu1 %v6929_v29  ;;  %8180 = vmatprep.subr.mxu0 %v13595_v3 }
 0xda3   : > { %8227 = vmatprep.subr.mxu1 %v13595_v3  ;;  %8181 = vmatpush3.msra.mxu0 %v6929_v29  ;;  %v6599_v29 = vld [vmem:[#allocation2 + $0x58] sm:$0x1] }
 0xda4   : > { %8243 = vmatpush3.msra.mxu1 %v6928_v43  ;;  %8182 = vmatprep.subr.mxu0 %v13595_v3 }
 0xda5   : > { %8228 = vmatprep.subr.mxu1 %v13595_v3  ;;  %8183 = vmatpush3.msra.mxu0 %v6928_v43 }
 0xda6   : > { %8184 = vmatprep.subr.mxu0 %v13595_v3 }
 0xdf2   : > { %v13818_v5 = vpop.f32.mrf.mxu0 }
 0xdf3   : > { %v5955_v18 = vpop.permute.xlu1 %5954 }
 0xdf4   : > { %5975 = vst.msk [vmem:[#allocation3 + $0x8] sm:$0xff] %vm5973_vm4, %v5955_v18  ;;  %v8147_v42 = vpop.f32.mrf.mxu0  ;;  %v6738_v18 = vld [vmem:[#allocation2 + $0x58] sm:$0x1] }
 0xdf5   : > { %v13953_v42 = vmul.f32 %v13933_v24, %v6591_v47 }
 0xdf6   : > { %v6351_v45 = vpop.f32.mrf.mxu0 }
 0xdf7   : > { %v4673_v31 = vpop.permute.xlu1 %4672  ;;  %6389 = vrot.lane.b32.xlu1 %v6351_v45, %s8519_s15  ;;  %v5957_v0 = vpop.permute.xlu0 %5956  ;;  %v6557_v45 = vsel %vm6554_vm13, %v6555_v59, %v6556_v54  ;;  %v6476_v59 = vmul.f32 %v13926_v20, %v13955_v7  ;;  %v14028_v54 = vld [vmem:[%s14252_s4 + $0x4] ss:$0 sm:$0xff] }
 0xdf8   : > { %4689 = vst.msk [vmem:[#allocation3 + $0x28] sm:$0xff] %vm4683_vm7, %v4673_v31  ;;  %v8150_v55 = vpop.f32.mrf.mxu0 }
 0xdf9   : > { %5976 = vst.msk [vmem:[#allocation3 + $0x10] sm:$0xff] %vm5973_vm4, %v5957_v0  ;;  %v13962_v0 = vmul.f32 %v13916_v8, %v6462_v57  ;;  %v6464_v55 = vld [vmem:[#allocation2 + $0x48] sm:$0x1] }
 0xdfa   : > { %v6356_v46 = vpop.f32.mrf.mxu0 }
 0xdfb   : > { %v5959_v15 = vpop.permute.xlu1 %5958  ;;  %4662 = vrot.lane.b32.xlu1 %v13612_v56, %s8515_s11  ;;  %6391 = vrot.lane.b32.xlu0 %v6356_v46, %s8519_s15  ;;  %v2098_v23 = vpop.permute.xlu0 %2097  ;;  %v6927_v56 = vld [vmem:[%s14254_s6 + $0x30] sm:$0xff]  ;;  %v6559_v46 = vrot.slane %v13936_v48, 2  ;;  %v14081_v48 = vmul.f32 %v14028_v54, %v13955_v7 }
 0xdfc   : > { %5977 = vst.msk [vmem:[#allocation3 + $0x18] sm:$0xff] %vm5973_vm4, %v5959_v15  ;;  %v8153_v39 = vpop.f32.mrf.mxu0  ;;  %8244 = vmatpush3.msra.mxu1 %v6927_v56  ;;  %8185 = vmatpush3.msra.mxu0 %v6927_v56  ;;  %v6562_v15 = vrot.slane %v13939_v38, 2  ;;  %v6732_v56 = vld [vmem:[#allocation2 + $0x28] sm:$0x1] }
 0xdfd   : > { %2119 = vst.msk [vmem:[#allocation3] sm:$0xff] %vm2118_vm1, %v2098_v23  ;;  %8229 = vmatprep.subr.mxu1 %v13595_v3  ;;  %8186 = vmatprep.subr.mxu0 %v13595_v3  ;;  %v6703_v23 = vrot.slane %v13942_v17, 2  ;;  %v6740_v39 = vld [vmem:[#allocation2 + $0x68] sm:$0x1]  ;;  %v6739_v17 = vld [vmem:[#allocation2 + $0x60] sm:$0xff]  ;;  %vm6415_vm1 = vcmask 1041280  }
 0xdfe   : > { %v6361_v58 = vpop.f32.mrf.mxu0  ;;  %8245 = vmatpush3.msra.mxu1 %v6926_v52  ;;  %8187 = vmatpush3.msra.mxu0 %v6926_v52  ;;  %v6583_v52 = vadd.f32 %v6557_v45, %v6514_v16  ;;  %v14037_v45 = vld [vmem:[#allocation2 + $0x40] sm:$0xff] }
 0xdff   : > { %v2110_v37 = vpop.permute.xlu1 %2109  ;;  %5529 = vrot.lane.b32.xlu0 %v13717_v30, %s8524_s20  ;;  %6393 = vrot.lane.b32.xlu1 %v6361_v58, %s8519_s15  ;;  %v5961_v28 = vpop.permute.xlu0 %5960  ;;  %v6488_v58 = vmul.f32 %v13911_v21, %v13955_v7 }
 0xe00   : > { %2126 = vst.msk [vmem:[#allocation3 + $0x30] sm:$0x1] %vm2125_vm9, %v2110_v37  ;;  %v8156_v32 = vpop.f32.mrf.mxu0  ;;  %8230 = vmatprep.subr.mxu1 %v13595_v3  ;;  %8188 = vmatprep.subr.mxu0 %v13595_v3  ;;  %v6643_v37 = vrot.slane %v14081_v48, 1 }
 0xe01   : > { %5978 = vst.msk [vmem:[#allocation3 + $0x20] sm:$0xff] %vm5973_vm4, %v5961_v28  ;;  %8246 = vmatpush3.msra.mxu1 %v6925_v27  ;;  %8189 = vmatpush3.msra.mxu0 %v6925_v27  ;;  %v6466_v28 = vld [vmem:[#allocation2 + $0x58] sm:$0x1]  ;;  %v6697_v32 = vrot.slane %v13953_v42, 2  ;;  %v6565_v27 = vrot.slane %v13962_v0, 2  ;;  %v6502_v12 = vrot.slane %v6488_v58, 1  ;;  %v6490_v58 = vmul.f32 %v13911_v21, %v14037_v45 }
 0xe02   : > { %v6366_v19 = vpop.f32.mrf.mxu0  ;;  %8231 = vmatprep.subr.mxu1 %v13595_v3  ;;  %8190 = vmatprep.subr.mxu0 %v13595_v3 }
 0xe03   : > { %v2953_v30 = vpop.permute.xlu1 %2952  ;;  %5517 = vrot.lane.b32.xlu1 %v13695_v26, %s8524_s20  ;;  %6395 = vrot.lane.b32.xlu0 %v6366_v19, %s8519_s15  ;;  %v5528_v51 = vpop.permute.xlu0 %5527  ;;  %v6734_v19 = vld [vmem:[#allocation2 + $0x38] sm:$0x1]  ;;  %v6516_v16 = vadd.f32 %v6502_v12, %v6476_v59 }
 0xe04   : > { %2974 = vst.msk [vmem:[#allocation3] sm:$0xff] %vm2973_vm5, %v2953_v30  ;;  %v8159_v11 = vpop.f32.mrf.mxu0  ;;  %8247 = vmatpush3.msra.mxu1 %v6924_v4  ;;  %8191 = vmatpush3.msra.mxu0 %v6924_v4  ;;  %v6530_v30 = vmul.f32 %v13916_v8, %v13955_v7  ;;  %v6706_v4 = vrot.slane %v13965_v33, 2 }
 0xe05   : > { %5544 = vst.msk [vmem:[#allocation3 + $0x28] sm:$0xff] %vm5538_vm8, %v5528_v51  ;;  %8232 = vmatprep.subr.mxu1 %v13595_v3  ;;  %8192 = vmatprep.subr.mxu0 %v13595_v3  ;;  %v13980_v51 = vmul.f32 %v13916_v8, %v6464_v55  ;;  %v13983_v11 = vmul.f32 %v13933_v24, %v6599_v29 }
 0xe06   : > { %v6371_v62 = vpop.f32.mrf.mxu0  ;;  %8248 = vmatpush3.msra.mxu1 %v6923_v61  ;;  %8193 = vmatpush3.msra.mxu0 %v6923_v61  ;;  %v6561_v44 = vrot.slane %v6530_v30, 2  ;;  %v6534_v30 = vmul.f32 %v13916_v8, %v14037_v45 }
 0xe07   : > { %v5963_v49 = vpop.permute.xlu1 %5962  ;;  %5952 = vrot.lane.b32.xlu1 %v13763_v53, %s8523_s19  ;;  %6397 = vrot.lane.b32.xlu0 %v6371_v62, %s8519_s15  ;;  %v2965_v26 = vpop.permute.xlu0 %2964  ;;  %v6601_v62 = vld [vmem:[#allocation2 + $0x68] sm:$0x1]  ;;  %v6568_v22 = vrot.slane %v13980_v51, 2  ;;  %v6709_v1 = vrot.slane %v13983_v11, 2 }
 0xe08   : > { %5979 = vst.msk [vmem:[#allocation3 + $0x28] sm:$0xff] %vm5973_vm4, %v5963_v49  ;;  %v8162_v13 = vpop.f32.mrf.mxu0  ;;  %8233 = vmatprep.subr.mxu1 %v13595_v3  ;;  %8194 = vmatprep.subr.mxu0 %v13595_v3  ;;  %v6742_v49 = vld [vmem:[#allocation2 + $0x78] sm:$0x1]  ;;  %v14013_v14 = vmul.f32 %v13933_v24, %v6601_v62 }
 0xe09   : > { %2981 = vst.msk [vmem:[#allocation3 + $0x30] sm:$0x1] %vm2980_vm10, %v2965_v26  ;;  %8249 = vmatpush3.msra.mxu1 %v6922_v10  ;;  %8195 = vmatpush3.msra.mxu0 %v6922_v10  ;;  %v13986_v13 = vld [vmem:[#allocation2 + $0x30] sm:$0xff]  ;;  %v14000_v10 = vmul.f32 %v13916_v8, %v6466_v28  ;;  %v6674_v26 = vmul.f32 %v13933_v24, %v14037_v45 }
 0xe0a   : > { %v6376_v34 = vpop.f32.mrf.mxu0  ;;  %8234 = vmatprep.subr.mxu1 %v13595_v3  ;;  %8196 = vmatprep.subr.mxu0 %v13595_v3  ;;  %v13947_v3 = vld [vmem:[%s14252_s4 + $0x8] ss:$0 sm:$0xff]  ;;  %v6532_v35 = vmul.f32 %v13916_v8, %v13986_v13  ;;  %v6477_v38 = vmul.f32 %v13926_v20, %v13986_v13  ;;  %v6630_v59 = vmul.f32 %v14028_v54, %v13986_v13 }
 0xe0b   : > { %v3820_v63 = vpop.permute.xlu1 %3819  ;;  %6387 = vrot.lane.b32.xlu1 %v13818_v5, %s8519_s15  ;;  %5964 = vrot.lane.b32.xlu0 %v13794_v9, %s8523_s19  ;;  %v3808_v40 = vpop.permute.xlu0 %3807  ;;  %v6593_v9 = vld [vmem:[#allocation2 + $0x28] sm:$0x1]  ;;  %v13950_v5 = vmul.f32 %v13947_v3, %v6736_v36  ;;  %v13971_v43 = vmul.f32 %v13947_v3, %v6738_v18  ;;  %v14016_v25 = vmul.f32 %v13947_v3, %v6742_v49  ;;  %v6571_v2 = vrot.slane %v14000_v10, 2 }
 0xe0c   : > { %3836 = vst.msk [vmem:[#allocation3 + $0x30] sm:$0x1] %vm3835_vm11, %v3820_v63  ;;  %v8165_v53 = vpop.f32.mrf.mxu0  ;;  %8250 = vmatpush3.msra.mxu1 %v6921_v6  ;;  %8197 = vmatpush3.msra.mxu0 %v6921_v6  ;;  %v13959_v31 = vmul.f32 %v13933_v24, %v6593_v9  ;;  %v13994_v63 = vmul.f32 %v13947_v3, %v6732_v56  ;;  %v6564_v0 = vrot.slane %v6532_v35, 2 }
 0xe0d   : > { %3829 = vst.msk [vmem:[#allocation3] sm:$0xff] %vm3828_vm6, %v3808_v40  ;;  %v6468_v40 = vld [vmem:[#allocation2 + $0x68] sm:$0x1]  ;;  %v6489_v53 = vmul.f32 %v13911_v21, %v13986_v13  ;;  %v14003_v6 = vmul.f32 %v13947_v3, %v6734_v19  ;;  %v6563_v56 = vsel %vm6554_vm13, %v6561_v44, %v6562_v15  ;;  %v6611_v44 = vmul.f32 %v14008_v60, %v13986_v13 }
 0xe0e   : > { %v14021_v50 = vmul.f32 %v13916_v8, %v6468_v40  ;;  %v6585_v35 = vadd.f32 %v6563_v56, %v6516_v16  ;;  %v6566_v29 = vsel %vm6554_vm13, %v6564_v0, %v6565_v27  ;;  %v6612_v0 = vmul.f32 %v14008_v60, %v14037_v45 }
 0xe0f   : > { %6399 = vrot.lane.b32.xlu0 %v6376_v34, %s8519_s15  ;;  %v4675_v41 = vpop.permute.xlu0 %4674  ;;  %v13991_v34 = vmul.f32 %v13947_v3, %v6740_v39  ;;  %v6503_v57 = vrot.slane %v6489_v53, 1  ;;  %v6603_v39 = vld [vmem:[#allocation2 + $0x78] sm:$0x1]  ;;  %v6631_v56 = vmul.f32 %v14028_v54, %v14037_v45  ;;  %v6633_v10 = vmul.f32 %v14028_v54, %v6739_v17 }
 0xe10   : > { %4691 = vst.msk [vmem:[#allocation3 + $0x30] sm:$0x1] %vm4690_vm12, %v4675_v41  ;;  %v6457_v41 = vld [vmem:[#allocation2 + $0x10] sm:$0xff]  ;;  %v6574_v19 = vrot.slane %v14021_v50, 2  ;;  %v14053_v15 = vmul.f32 %v13933_v24, %v6603_v39  ;;  %v14615_v48 = vrot.slane %v13959_v31, 2 }
 0xe11   : > { %v6487_v47 = vmul.f32 %v13911_v21, %v6457_v41  ;;  %v6528_v9 = vmul.f32 %v13916_v8, %v6457_v41  ;;  %v6609_v18 = vmul.f32 %v14008_v60, %v6457_v41  ;;  %v6628_v28 = vmul.f32 %v14028_v54, %v6457_v41 }
 0xe12   : > { %v6475_v51 = vmul.f32 %v13926_v20, %v6457_v41  ;;  %v6517_v40 = vadd.f32 %v6503_v57, %v6477_v38  ;;  %v14050_v12 = vmul.f32 %v13933_v24, %v6457_v41  ;;  %v6504_v41 = vrot.slane %v6490_v58, 1 }
 0xe13   : > { %v6501_v62 = vrot.slane %v6487_v47, 1  ;;  %v6558_v49 = vrot.slane %v6528_v9, 2  ;;  %v6616_v53 = vadd.f32 %v6609_v18, %v6583_v52  ;;  %v6672_v47 = vmul.f32 %v13933_v24, %v13986_v13  ;;  %v14062_v9 = vld [vmem:[#allocation2 + $0x50] sm:$0xff] }
 0xe14   : > { %v6478_v52 = vmul.f32 %v13926_v20, %v14037_v45  ;;  %v6642_v38 = vrot.slane %v6628_v28, 1  ;;  %v6567_v57 = vrot.slane %v6534_v30, 2  ;;  %v6491_v18 = vmul.f32 %v13911_v21, %v14062_v9 }
 0xe15   : > { %v6515_v16 = vadd.f32 %v6501_v62, %v6475_v51  ;;  %v6560_v39 = vsel %vm6554_vm13, %v6558_v49, %v6559_v46  ;;  %v6586_v27 = vadd.f32 %v6566_v29, %v6517_v40  ;;  %v6536_v58 = vmul.f32 %v13916_v8, %v14062_v9 }
 0xe16   : > { %v6618_v28 = vadd.f32 %v6611_v44, %v6585_v35  ;;  %v6644_v30 = vrot.slane %v6630_v59, 1  ;;  %v6702_v46 = vrot.slane %v6672_v47, 2  ;;  %v6518_v29 = vadd.f32 %v6504_v41, %v6478_v52 }
 0xe17   : > { %v14085_v51 = vmul.f32 %v14008_v60, %v13955_v7  ;;  %v6696_v62 = vrot.slane %v14050_v12, 2  ;;  %v6569_v49 = vsel %vm6554_vm13, %v6567_v57, %v6568_v22  ;;  %v6479_v40 = vmul.f32 %v13926_v20, %v14062_v9  ;;  %v14107_v12 = vld [vmem:[%s14252_s4 + $0x7] ss:$0 sm:$0xff] }
 0xe18   : > { %v6505_v35 = vrot.slane %v6491_v18, 1  ;;  %v14091_v44 = vadd.f32 %v6642_v38, %v6616_v53  ;;  %v6619_v59 = vadd.f32 %v6612_v0, %v6586_v27  ;;  %v6645_v36 = vrot.slane %v6631_v56, 1  ;;  %v14102_v53 = vld [vmem:[%s14252_s4 + $0x6] ss:$0 sm:$0xff] }
 0xe19   : > { %v6570_v61 = vrot.slane %v6536_v58, 2  ;;  %v6584_v55 = vadd.f32 %v6560_v39, %v6515_v16  ;;  %v6658_v47 = vadd.f32 %v6644_v30, %v6618_v28  ;;  %v6705_v52 = vrot.slane %v6674_v26, 2 }
 0xe1a   : > { %v6632_v41 = vmul.f32 %v14028_v54, %v14062_v9  ;;  %v6704_v22 = vsel %vm6554_vm13, %v6702_v46, %v6703_v23  ;;  %v6587_v26 = vadd.f32 %v6569_v49, %v6518_v29  ;;  %v6613_v38 = vmul.f32 %v14008_v60, %v14062_v9 }
 0xe1b   : > { %v6676_v57 = vmul.f32 %v13933_v24, %v14062_v9  ;;  %v6752_v23 = vmul.f32 %v14102_v53, %v14037_v45  ;;  %v6771_v18 = vmul.f32 %v14107_v12, %v14037_v45  ;;  %v6519_v16 = vadd.f32 %v6505_v35, %v6479_v40 }
 0xe1c   : > { %v6492_v39 = vmul.f32 %v13911_v21, %v6739_v17  ;;  %v6813_v27 = vmul.f32 %v13947_v3, %v14037_v45  ;;  %v6659_v0 = vadd.f32 %v6645_v36, %v6619_v59  ;;  %v6572_v56 = vsel %vm6554_vm13, %v6570_v61, %v6571_v2 }
 0xe1d   : > { %v6538_v58 = vmul.f32 %v13916_v8, %v6739_v17  ;;  %v6726_v28 = vadd.f32 %v6704_v22, %v6658_v47  ;;  %v6707_v30 = vsel %vm6554_vm13, %v6705_v52, %v6706_v4  ;;  %v6772_v46 = vmul.f32 %v14107_v12, %v14062_v9 }
 0xe1e   : > { %v6646_v29 = vrot.slane %v6632_v41, 1  ;;  %v6620_v21 = vadd.f32 %v6613_v38, %v6587_v26  ;;  %v6708_v49 = vrot.slane %v6676_v57, 2  ;;  %v6614_v36 = vmul.f32 %v14008_v60, %v6739_v17 }
 0xe1f   : > { %v6588_v45 = vadd.f32 %v6572_v56, %v6519_v16  ;;  %v6480_v61 = vmul.f32 %v13926_v20, %v6739_v17  ;;  %v6506_v8 = vrot.slane %v6492_v39, 1  ;;  %v6727_v40 = vadd.f32 %v6707_v30, %v6659_v0 }
 0xe20   : > { %v6753_v33 = vmul.f32 %v14102_v53, %v14062_v9  ;;  %v6678_v4 = vmul.f32 %v13933_v24, %v6739_v17  ;;  %v6573_v35 = vrot.slane %v6538_v58, 2  ;;  %v6759_v59 = vadd.f32 %v6752_v23, %v6726_v28 }
 0xe21   : > { %v6785_v47 = vrot.slane %v6771_v18, 1  ;;  %v6843_v52 = vrot.slane %v6813_v27, 2  ;;  %v6815_v41 = vmul.f32 %v13947_v3, %v14062_v9  ;;  %v6786_v22 = vrot.slane %v6772_v46, 1  ;;  %v6741_v46 = vld [vmem:[#allocation2 + $0x70] sm:$0xff] }
 0xe22   : > { %v6660_v26 = vadd.f32 %v6646_v29, %v6620_v21  ;;  %v6670_v20 = vmul.f32 %v13933_v24, %v13955_v7  ;;  %v6698_v38 = vsel %vm6554_vm13, %v6696_v62, %v6697_v32  ;;  %v6710_v57 = vsel %vm6554_vm13, %v6708_v49, %v6709_v1 }
 0xe23   : > { %v6621_v16 = vadd.f32 %v6614_v36, %v6588_v45  ;;  %v6647_v23 = vrot.slane %v6633_v10, 1  ;;  %v6520_v18 = vadd.f32 %v6506_v8, %v6480_v61  ;;  %v6760_v0 = vadd.f32 %v6753_v33, %v6727_v40 }
 0xe24   : > { %v6817_v9 = vmul.f32 %v13947_v3, %v6739_v17  ;;  %v6711_v56 = vrot.slane %v6678_v4, 2  ;;  %v6575_v58 = vsel %vm6554_vm13, %v6573_v35, %v6574_v19  ;;  %v6799_v42 = vadd.f32 %v6785_v47, %v6759_v59 }
 0xe25   : > { %v14611_v32 = vrot.slane %v13950_v5, 2  ;;  %v6846_v1 = vrot.slane %v6815_v41, 2  ;;  %v6617_v62 = vadd.f32 %v14085_v51, %v6584_v55  ;;  %v6728_v28 = vadd.f32 %v6710_v57, %v6660_v26 }
 0xe26   : > { %v6754_v30 = vmul.f32 %v14102_v53, %v6739_v17  ;;  %v6773_v50 = vmul.f32 %v14107_v12, %v6739_v17  ;;  %v6661_v19 = vadd.f32 %v6647_v23, %v6621_v16  ;;  %v6589_v29 = vadd.f32 %v6575_v58, %v6520_v18 }
 0xe27   : > { %v6845_v11 = vsel %vm6554_vm13, %v6843_v52, %v14611_v32  ;;  %v6615_v21 = vmul.f32 %v14008_v60, %v6741_v46  ;;  %v6634_v5 = vmul.f32 %v14028_v54, %v6741_v46  ;;  %v6800_v49 = vadd.f32 %v6786_v22, %v6760_v0 }
 0xe28   : > { %v6849_v10 = vrot.slane %v6817_v9, 2  ;;  %v14612_v61 = vrot.slane %v14013_v14, 2  ;;  %v6680_v51 = vmul.f32 %v13933_v24, %v6741_v46  ;;  %v6867_v8 = vadd.f32 %v6845_v11, %v6799_v42 }
 0xe29   : > { %v14613_v17 = vrot.slane %v13971_v43, 2  ;;  %v6819_v60 = vmul.f32 %v13947_v3, %v6741_v46  ;;  %v6699_v54 = vrot.slane %v6670_v20, 2  ;;  %v6761_v40 = vadd.f32 %v6754_v30, %v6728_v28 }
 0xe2a   : > { %v6713_v55 = vsel %vm6554_vm13, %v6711_v56, %v14612_v61  ;;  %v6787_v33 = vrot.slane %v6773_v50, 1  ;;  %v6755_v14 = vmul.f32 %v14102_v53, %v6741_v46  ;;  %v6657_v4 = vadd.f32 %v6643_v37, %v6617_v62 }
 0xe2b   : > { %v6729_v24 = vadd.f32 %v6713_v55, %v6661_v19  ;;  %v6774_v35 = vmul.f32 %v14107_v12, %v6741_v46  ;;  %v6622_v43 = vadd.f32 %v6615_v21, %v6589_v29  ;;  %v6648_v59 = vrot.slane %v6634_v5, 1  ;;  %v6744_v29 = vld [vmem:[#allocation2 + $0x88] sm:$0x1] }
 0xe2c   : > { %v14614_v22 = vrot.slane %v13991_v34, 2  ;;  %v6714_v57 = vrot.slane %v6680_v51, 2  ;;  %v6715_v16 = vrot.slane %v14053_v15, 2  ;;  %v6852_v37 = vrot.slane %v6819_v60, 2 }
 0xe2d   : > { %v6701_v18 = vsel %vm6554_vm13, %v6699_v54, %v14615_v48  ;;  %v6751_v0 = vmul.f32 %v14102_v53, %v13986_v13  ;;  %v6770_v15 = vmul.f32 %v14107_v12, %v13986_v13  ;;  %v6762_v9 = vadd.f32 %v6755_v14, %v6729_v24 }
 0xe2e   : > { %v6851_v26 = vsel %vm6554_vm13, %v6849_v10, %v14614_v22  ;;  %v6725_v34 = vadd.f32 %v6701_v18, %v6657_v4  ;;  %v6788_v56 = vrot.slane %v6774_v35, 1  ;;  %v6750_v58 = vmul.f32 %v14102_v53, %v13955_v7 }
 0xe2f   : > { %v6662_v42 = vadd.f32 %v6648_v59, %v6622_v43  ;;  %v6716_v62 = vsel %vm6554_vm13, %v6714_v57, %v6715_v16  ;;  %v14616_v30 = vrot.slane %v14016_v25, 2  ;;  %v6809_v19 = vmul.f32 %v13947_v3, %v13955_v7  ;;  %v7355_v59 = vld [vmem:[%s14253_s5] ss:$0 sm:$0xff] }
 0xe30   : > { %v6784_v5 = vrot.slane %v6770_v15, 1  ;;  %v6838_v54 = vrot.slane %v13994_v63, 2 }
 0xe31   : > { %v6854_v50 = vsel %vm6554_vm13, %v6852_v37, %v14616_v30 }
 0xe69   : > { %v6390_v2 = vpop.permute.xlu1 %6389 }
 0xe6a   : > { %6410 = vst.msk [vmem:[#allocation3 + $0x8] sm:$0xff] %vm6408_vm14, %v6390_v2  ;;  %v6848_v2 = vsel %vm6554_vm13, %v6846_v1, %v14613_v17  ;;  %v6841_v1 = vrot.slane %v14003_v6, 2  ;;  %v6802_v6 = vadd.f32 %v6788_v56, %v6762_v9  ;;  %v6822_v17 = vmul.f32 %v13947_v3, %v6744_v29  ;;  %v7356_v29 = vld [vmem:[%s14255_s7] ss:$0 sm:$0xff] }
 0xe6b   : > { %v6868_v52 = vadd.f32 %v6848_v2, %v6800_v49  ;;  %v6730_v49 = vadd.f32 %v6716_v62, %v6662_v42 }
 0xe6d   : > { %v4663_v39 = vpop.permute.xlu1 %4662  ;;  %v6392_v27 = vpop.permute.xlu0 %6391 }
 0xe6e   : > { %4684 = vst.msk [vmem:[#allocation3] sm:$0xff] %vm4683_vm7, %v4663_v39  ;;  %v6724_v39 = vadd.f32 %v6698_v38, %v14091_v44  ;;  %v6769_v44 = vmul.f32 %v14107_v12, %v13955_v7  ;;  %v6811_v38 = vmul.f32 %v13947_v3, %v13986_v13  ;;  %v6758_v13 = vadd.f32 %v6751_v0, %v6725_v34 }
 0xe6f   : > { %6411 = vst.msk [vmem:[#allocation3 + $0x10] sm:$0xff] %vm6408_vm14, %v6392_v27  ;;  %v6801_v27 = vadd.f32 %v6787_v33, %v6761_v40 }
 0xe70   : > { %v6757_v46 = vadd.f32 %v6750_v58, %v6724_v39  ;;  %v6783_v61 = vrot.slane %v6769_v44, 1  ;;  %v6840_v55 = vrot.slane %v6811_v38, 2  ;;  %v6798_v40 = vadd.f32 %v6784_v5, %v6758_v13 }
 0xe71   : > { %v6394_v36 = vpop.permute.xlu1 %6393  ;;  %v5530_v45 = vpop.permute.xlu0 %5529  ;;  %v6869_v21 = vadd.f32 %v6851_v26, %v6801_v27 }
 0xe72   : > { %6412 = vst.msk [vmem:[#allocation3 + $0x18] sm:$0xff] %vm6408_vm14, %v6394_v36  ;;  %v14203_v36 = vld [vmem:[#allocation2] sm:$0xff]  ;;  %v6797_v60 = vadd.f32 %v6783_v61, %v6757_v46  ;;  %v6842_v24 = vsel %vm6554_vm13, %v6840_v55, %v6841_v1 }
 0xe73   : > { %5546 = vst.msk [vmem:[#allocation3 + $0x30] sm:$0x1] %vm5545_vm15, %v5530_v45  ;;  %v6756_v25 = vmul.f32 %v14203_v36, %v14102_v53  ;;  %v6775_v45 = vmul.f32 %v14203_v36, %v14107_v12  ;;  %v6837_v53 = vrot.slane %v6809_v19, 2  ;;  %v6870_v12 = vadd.f32 %v6854_v50, %v6802_v6 }
 0xe74   : > { %v6866_v22 = vadd.f32 %v6842_v24, %v6798_v40 }
 0xe75   : > { %v5518_v41 = vpop.permute.xlu1 %5517  ;;  %v6396_v20 = vpop.permute.xlu0 %6395  ;;  %v6763_v33 = vadd.f32 %v6756_v25, %v6730_v49  ;;  %v6789_v14 = vrot.slane %v6775_v45, 1  ;;  %v6839_v63 = vsel %vm6554_vm13, %v6837_v53, %v6838_v54 }
 0xe76   : > { %v6878_v47 = vld [vmem:[#allocation3 + $0xe] sm:$0x7f]  ;;  %5539 = vst.msk [vmem:[#allocation3] sm:$0xff] %vm5538_vm8, %v5518_v41  ;;  %v6865_v41 = vadd.f32 %v6839_v63, %v6797_v60 }
 0xe77   : > { %v6879_v23 = vadd.f32 %v6878_v47, %v6867_v8  ;;  %6413 = vst.msk [vmem:[#allocation3 + $0x20] sm:$0xff] %vm6408_vm14, %v6396_v20  ;;  %v6821_v8 = vmul.f32 %v14203_v36, %v13947_v3  ;;  %v6856_v3 = vrot.slane %v6822_v17, 2  ;;  %v6803_v26 = vadd.f32 %v6789_v14, %v6763_v33 }
 0xe79   : > { %6880 = vst [vmem:[#allocation3 + $0xe] sm:$0x7f] %v6879_v23  ;;  %v6881_v31 = vld [vmem:[#allocation3 + $0x15] sm:$0x7f]  ;;  %v5953_v32 = vpop.permute.xlu1 %5952  ;;  %v6398_v11 = vpop.permute.xlu0 %6397  ;;  %v6855_v35 = vrot.slane %v6821_v8, 2 }
 0xe7a   : > { %v6882_v28 = vadd.f32 %v6881_v31, %v6868_v52  ;;  %5974 = vst.msk [vmem:[#allocation3] sm:$0xff] %vm5973_vm4, %v5953_v32 }
 0xe7b   : > { %6414 = vst.msk [vmem:[#allocation3 + $0x28] sm:$0xff] %vm6408_vm14, %v6398_v11  ;;  %v6857_v23 = vsel %vm6554_vm13, %v6855_v35, %v6856_v3 }
 0xe7c   : > { %6883 = vst [vmem:[#allocation3 + $0x15] sm:$0x7f] %v6882_v28  ;;  %v6871_v27 = vadd.f32 %v6857_v23, %v6803_v26 }
 0xe7d   : > { %v6388_v7 = vpop.permute.xlu1 %6387  ;;  %v5965_v51 = vpop.permute.xlu0 %5964 }
 0xe7e   : > { %v6884_v10 = vld [vmem:[#allocation3 + $0x1c] sm:$0x7f]  ;;  %6409 = vst.msk [vmem:[#allocation3] sm:$0xff] %vm6408_vm14, %v6388_v7 }
 0xe7f   : > { %v6885_v2 = vadd.f32 %v6884_v10, %v6869_v21  ;;  %5981 = vst.msk [vmem:[#allocation3 + $0x30] sm:$0x1] %vm5980_vm3, %v5965_v51 }
 0xe81   : > { %6886 = vst [vmem:[#allocation3 + $0x1c] sm:$0x7f] %v6885_v2  ;;  %v6400_v43 = vpop.permute.xlu0 %6399 }
 0xe82   : > { %v6887_v4 = vld [vmem:[#allocation3 + $0x23] sm:$0x7f]  ;;  %6416 = vst.msk [vmem:[#allocation3 + $0x30] sm:$0x1] %vm6415_vm1, %v6400_v43 }
 0xe83   : > { %v6888_v47 = vadd.f32 %v6887_v4, %v6870_v12  ;;  %v6895_v52 = vld [vmem:[#allocation3 + $0x10] sm:$0xff] }
 0xe84   : > { %v6909_v20 = vadd.f32 %v7355_v59, %v6895_v52 }
 0xe85   : > { %6889 = vst [vmem:[#allocation3 + $0x23] sm:$0x7f] %v6888_v47  ;;  %v6872_v57 = vld [vmem:[#allocation3] sm:$0x7f]  ;;  %v6875_v16 = vld [vmem:[#allocation3 + $0x7] sm:$0x7f] }
 0xe86   : > { %v6873_v37 = vadd.f32 %v6872_v57, %v6865_v41  ;;  %v6876_v48 = vadd.f32 %v6875_v16, %v6866_v22  ;;  %v6916_v18 = vmax.f32 %v6909_v20, 0.0 }
 0xe88   : > { %v6896_v39 = vld [vmem:[#allocation3 + $0x18] sm:$0xff]  ;;  %6874 = vst [vmem:[#allocation3] sm:$0x7f] %v6873_v37  ;;  %6877 = vst [vmem:[#allocation3 + $0x7] sm:$0x7f] %v6876_v48  ;;  %8205 = vmatmul.mubr.f32.vlgmr.msra.gmra.mxu1 %v6916_v18 }
 0xe89   : > { %v6910_v34 = vadd.f32 %v7355_v59, %v6896_v39  ;;  %v6890_v0 = vld [vmem:[#allocation3 + $0x2a] sm:$0x7f]  ;;  %8207 = vmatprep.mubr.msk.f32.mxu1 %vm8527_vm2, %v14203_v36 }
 0xe8a   : > { %v6891_v15 = vadd.f32 %v6890_v0, %v6871_v27 }
 0xe8b   : > { %v6917_v9 = vmax.f32 %v6910_v34, 0.0 }
 0xe8c   : > { %v6897_v56 = vld [vmem:[#allocation3 + $0x20] sm:$0xff]  ;;  %6892 = vst [vmem:[#allocation3 + $0x2a] sm:$0x7f] %v6891_v15 }
 0xe8d   : > { %8208 = vmatmul.mubr.f32.gmra.mxu1 %v6917_v9  ;;  %v6911_v58 = vadd.f32 %v7355_v59, %v6897_v56 }
 0xe8e   : > { %8210 = vmatprep.mubr.msk.f32.mxu1 %vm8527_vm2, %v14203_v36 }
 0xe8f   : > { %v6918_v42 = vmax.f32 %v6911_v58, 0.0  ;;  %v6893_v31 = vld [vmem:[#allocation3] sm:$0xff]  ;;  %v6894_v32 = vld [vmem:[#allocation3 + $0x8] sm:$0xff] }
 0xe90   : > { %v6907_v11 = vadd.f32 %v7355_v59, %v6893_v31  ;;  %v6908_v38 = vadd.f32 %v7355_v59, %v6894_v32 }
 0xe91   : > { %8211 = vmatmul.mubr.f32.gmra.mxu1 %v6918_v42 }
 0xe92   : > { %8213 = vmatprep.mubr.msk.f32.mxu1 %vm8527_vm2, %v14203_v36  ;;  %v6914_v44 = vmax.f32 %v6907_v11, 0.0  ;;  %v6915_v30 = vmax.f32 %v6908_v38, 0.0 }
 0xe93   : > { %v6898_v1 = vld [vmem:[#allocation3 + $0x28] sm:$0xff]  ;;  %v6899_v62 = vld [vmem:[#allocation3 + $0x30] sm:$0x1] }
 0xe94   : > { %8199 = vmatmul.mubr.f32.vlgmr.msra.gmra.mxu0 %v6914_v44  ;;  %v6912_v28 = vadd.f32 %v7355_v59, %v6898_v1  ;;  %v6913_v46 = vadd.f32 %v7355_v59, %v6899_v62 }
 0xe95   : > { %8201 = vmatprep.mubr.msk.f32.mxu0 %vm8527_vm2, %v14203_v36 }
 0xe96   : > { %v6919_v50 = vmax.f32 %v6912_v28, 0.0  ;;  %v6920_v19 = vmax.f32 %v6913_v46, 0.0 }
 0xe98   : > { %8202 = vmatmul.mubr.f32.gmra.mxu0 %v6915_v30  ;;  %8214 = vmatmul.mubr.f32.gmra.mxu1 %v6919_v50 }
 0xe99   : > { %8216 = vmatprep.mubr.msk.f32.mxu1 %vm8527_vm2, %v14203_v36  ;;  %vm7050_vm2 = vcmask 253952  }
 0xe9c   : > { %8217 = vmatmul.mubr.f32.gmra.mxu1 %v6920_v19 }
 0xf48   : > { %v7020_v21 = vpop.f32.mrf.mxu1 }
 0xf49   : > { %v7021_v13 = vadd.f32 %v7356_v29, %v7020_v21 }
 0xf4a   : > { %v8206_v5 = vpop.f32.mrf.mxu1 }
 0xf4b   : > { %7046 = vst.msk [vmem:[%s305_s14 + $0x10] sm:$0xff] %vm333_vm0, %v7021_v13 }
 0xf4d   : > { %v7025_v6 = vpop.f32.mrf.mxu1 }
 0xf4e   : > { %v7026_v49 = vadd.f32 %v7356_v29, %v7025_v6 }
 0xf4f   : > { %v8209_v25 = vpop.f32.mrf.mxu1 }
 0xf50   : > { %7047 = vst.msk [vmem:[%s305_s14 + $0x18] sm:$0xff] %vm333_vm0, %v7026_v49 }
 0xf51   : > { %v7030_v36 = vpop.f32.mrf.mxu1 }
 0xf52   : > { %v7031_v45 = vadd.f32 %v7356_v29, %v7030_v36 }
 0xf53   : > { %v8212_v10 = vpop.f32.mrf.mxu1 }
 0xf54   : > { %7048 = vst.msk [vmem:[%s305_s14 + $0x20] sm:$0xff] %vm333_vm0, %v7031_v45  ;;  %v7010_v61 = vpop.f32.mrf.mxu0 }
 0xf55   : > { %v7011_v55 = vadd.f32 %v7356_v29, %v7010_v61 }
 0xf56   : > { %v8200_v7 = vpop.f32.mrf.mxu0 }
 0xf57   : > { %7044 = vst.msk [vmem:[%s305_s14] sm:$0xff] %vm333_vm0, %v7011_v55 }
 0xf58   : > { %v7015_v51 = vpop.f32.mrf.mxu0  ;;  %v7035_v8 = vpop.f32.mrf.mxu1 }
 0xf59   : > { %v7016_v17 = vadd.f32 %v7356_v29, %v7015_v51  ;;  %v7036_v2 = vadd.f32 %v7356_v29, %v7035_v8 }
 0xf5a   : > { %v8203_v60 = vpop.f32.mrf.mxu0  ;;  %v8215_v53 = vpop.f32.mrf.mxu1 }
 0xf5b   : > { %7045 = vst.msk [vmem:[%s305_s14 + $0x8] sm:$0xff] %vm333_vm0, %v7016_v17  ;;  %7049 = vst.msk [vmem:[%s305_s14 + $0x28] sm:$0xff] %vm333_vm0, %v7036_v2 }
 0xf5c   : > { %v7040_v54 = vpop.f32.mrf.mxu1 }
 0xf5d   : > { %v7041_v12 = vadd.f32 %v7356_v29, %v7040_v54 }
 0xf5e   : > { %v8218_v40 = vpop.f32.mrf.mxu1 }
 0xf5f   : > { %7051 = vst.msk [vmem:[%s305_s14 + $0x30] sm:$0x1] %vm7050_vm2, %v7041_v12 }
 0xf60 PF: > { %s18_s27 = sadd.s32 1, %s8511_s27  }
 0xf61   : > { %p15_p4 = scmp.ge.s32.totalorder %s18_s27, 4  }
 0xf63   :  { %17 = sbr.rel (!%p15_p4) target bundleno = 1 (0x1), region = 96 }

</bundles_post_ra>
